<compile_context>
chip_gen: v7x
topology: tpu7x:2x2x1
jax: 0.10.0
libtpu: 0.0.40
codegen_flags: <defaults>
</compile_context>

<pallas_src>
import functools
import numpy as np
import jax
import jax.numpy as jnp
from jax.experimental import pallas as pl
from jax.experimental.pallas import tpu as pltpu

_EPS = 1e-5


def _round_up(x, m):
    return (x + m - 1) // m * m


# --------------------------- tiled fused matmul kernel ------------------------

def _mm_kernel(*refs, relu, has_res):
    if has_res:
        x_ref, w_ref, s_ref, b_ref, r_ref, o_ref, acc_ref = refs
    else:
        x_ref, w_ref, s_ref, b_ref, o_ref, acc_ref = refs
        r_ref = None
    k = pl.program_id(2)

    @pl.when(k == 0)
    def _():
        acc_ref[...] = jnp.zeros_like(acc_ref)

    acc_ref[...] += jnp.dot(x_ref[...], w_ref[...],
                            preferred_element_type=jnp.float32)

    @pl.when(k == pl.num_programs(2) - 1)
    def _():
        acc = acc_ref[...] * s_ref[...] + b_ref[...]
        if r_ref is not None:
            acc = acc + r_ref[...]
        if relu:
            acc = jnp.maximum(acc, 0.0)
        o_ref[...] = acc.astype(o_ref.dtype)


def fused_matmul(x2d, w2d, scale, bias, relu, residual=None):
    """(M,K)@(K,C) in bf16 on the MXU with fused per-channel scale/bias
    (+ optional residual add + ReLU) epilogue.  Tiled & software pipelined."""
    M, K = x2d.shape
    K2, C = w2d.shape
    assert K == K2
    TM = min(512, _round_up(M, 8))
    TN = min(256, _round_up(C, 128))
    TK = min(512, _round_up(K, 128))
    Mp, Kp, Cp = _round_up(M, TM), _round_up(K, TK), _round_up(C, TN)

    xp = jnp.pad(x2d, ((0, Mp - M), (0, Kp - K))).astype(jnp.bfloat16)
    wp = jnp.pad(w2d, ((0, Kp - K), (0, Cp - C))).astype(jnp.bfloat16)
    sp = jnp.pad(scale.reshape(1, C), ((0, 0), (0, Cp - C))).astype(jnp.float32)
    bp = jnp.pad(bias.reshape(1, C), ((0, 0), (0, Cp - C))).astype(jnp.float32)

    inputs = [xp, wp, sp, bp]
    in_specs = [
        pl.BlockSpec((TM, TK), lambda i, j, k: (i, k)),
        pl.BlockSpec((TK, TN), lambda i, j, k: (k, j)),
        pl.BlockSpec((1, TN), lambda i, j, k: (0, j)),
        pl.BlockSpec((1, TN), lambda i, j, k: (0, j)),
    ]
    has_res = residual is not None
    if has_res:
        rp = jnp.pad(residual, ((0, Mp - M), (0, Cp - C))).astype(jnp.float32)
        inputs.append(rp)
        in_specs.append(pl.BlockSpec((TM, TN), lambda i, j, k: (i, j)))

    out = pl.pallas_call(
        functools.partial(_mm_kernel, relu=relu, has_res=has_res),
        out_shape=jax.ShapeDtypeStruct((Mp, Cp), jnp.float32),
        grid_spec=pltpu.PrefetchScalarGridSpec(
            num_scalar_prefetch=0,
            grid=(Mp // TM, Cp // TN, Kp // TK),
            in_specs=in_specs,
            out_specs=pl.BlockSpec((TM, TN), lambda i, j, k: (i, j)),
            scratch_shapes=[pltpu.VMEM((TM, TN), jnp.float32)],
        ),
        compiler_params=pltpu.CompilerParams(
            dimension_semantics=("parallel", "parallel", "arbitrary")),
    )(*inputs)
    return out[:M, :C]


# --------------------------- direct 3x3 conv kernel ---------------------------

def _conv3x3_kernel(x_ref, w_ref, s_ref, b_ref, o_ref, *, relu, row_shift):
    # x_ref: (Rin, Cin) bf16 flattened padded image (one batch element)
    # w_ref: (9, Cin, Cout) bf16   s/b: (1, Cout) f32   o_ref: (Rout, Cout)
    rout, cout = o_ref.shape
    acc = jnp.zeros((rout, cout), jnp.float32)
    for t in range(9):
        dy, dx = divmod(t, 3)
        sh = dy * row_shift + dx
        acc = acc + jnp.dot(x_ref[sh:sh + rout, :], w_ref[t],
                            preferred_element_type=jnp.float32)
    acc = acc * s_ref[...] + b_ref[...]
    if relu:
        acc = jnp.maximum(acc, 0.0)
    o_ref[...] = acc.astype(o_ref.dtype)


def conv3x3_bn_act(x, W, scale, bias, relu):
    """3x3, stride 1, pad 1 conv + folded BN (+ReLU) as a direct Pallas conv.
    Avoids im2col by flattening the padded image; each of the 9 taps is a
    constant row shift in the flattened space (garbage columns sliced off)."""
    N, H, Wd, Cin = x.shape
    Cout = W.shape[0]
    Wp2 = Wd + 2
    xp = jnp.pad(x, ((0, 0), (1, 1), (1, 1), (0, 0))).astype(jnp.bfloat16)
    Rout = (H + 2) * Wp2
    Rin = _round_up(Rout + 2 * Wp2 + 2, 8)
    xf = xp.reshape(N, Rout, Cin)
    xf = jnp.pad(xf, ((0, 0), (0, Rin - Rout), (0, 0)))
    w9 = jnp.transpose(W, (2, 3, 1, 0)).reshape(9, Cin, Cout).astype(jnp.bfloat16)
    s = scale.reshape(1, Cout).astype(jnp.float32)
    b = bias.reshape(1, Cout).astype(jnp.float32)

    out = pl.pallas_call(
        functools.partial(_conv3x3_kernel, relu=relu, row_shift=Wp2),
        out_shape=jax.ShapeDtypeStruct((N, Rout, Cout), jnp.float32),
        grid_spec=pltpu.PrefetchScalarGridSpec(
            num_scalar_prefetch=0,
            grid=(N,),
            in_specs=[
                pl.BlockSpec((None, Rin, Cin), lambda n: (n, 0, 0)),
                pl.BlockSpec((9, Cin, Cout), lambda n: (0, 0, 0)),
                pl.BlockSpec((1, Cout), lambda n: (0, 0)),
                pl.BlockSpec((1, Cout), lambda n: (0, 0)),
            ],
            out_specs=pl.BlockSpec((None, Rout, Cout), lambda n: (n, 0, 0)),
        ),
        compiler_params=pltpu.CompilerParams(
            dimension_semantics=("parallel",)),
    )(xf, w9, s, b)
    return out.reshape(N, H + 2, Wp2, Cout)[:, :H, :Wd, :]


# --------------------------- elementwise / pool kernels ------------------------

def _max9_kernel(p_ref, o_ref):
    m = p_ref[0]
    for i in range(1, 9):
        m = jnp.maximum(m, p_ref[i])
    o_ref[...] = m


def maxpool_3x3_s2_p1(x):
    N, H, Wd, C = x.shape
    neg = jnp.finfo(jnp.float32).min
    xp = jnp.pad(x, ((0, 0), (1, 1), (1, 1), (0, 0)), constant_values=neg)
    Ho = (H + 2 - 3) // 2 + 1
    Wo = (Wd + 2 - 3) // 2 + 1
    views = []
    for dy in range(3):
        for dx in range(3):
            views.append(xp[:, dy:dy + 2 * (Ho - 1) + 1:2,
                            dx:dx + 2 * (Wo - 1) + 1:2, :])
    M = N * Ho * Wo
    p = jnp.stack(views, axis=0).reshape(9, M, C).astype(jnp.float32)
    TM = min(512, _round_up(M, 8))
    Mp = _round_up(M, TM)
    p = jnp.pad(p, ((0, 0), (0, Mp - M), (0, 0)))
    out = pl.pallas_call(
        _max9_kernel,
        out_shape=jax.ShapeDtypeStruct((Mp, C), jnp.float32),
        grid_spec=pltpu.PrefetchScalarGridSpec(
            num_scalar_prefetch=0,
            grid=(Mp // TM,),
            in_specs=[pl.BlockSpec((9, TM, C), lambda i: (0, i, 0))],
            out_specs=pl.BlockSpec((TM, C), lambda i: (i, 0)),
        ),
        compiler_params=pltpu.CompilerParams(dimension_semantics=("parallel",)),
    )(p)
    return out[:M].reshape(N, Ho, Wo, C)


def _add_relu_kernel(a_ref, b_ref, o_ref):
    o_ref[...] = jnp.maximum(a_ref[...] + b_ref[...], 0.0)


def add_relu(a, b):
    # Only used on the PyTorch-style size-1 broadcast residual path.
    shape = jnp.broadcast_shapes(a.shape, b.shape)
    a2 = jnp.broadcast_to(a, shape).reshape(-1, shape[-1]).astype(jnp.float32)
    b2 = jnp.broadcast_to(b, shape).reshape(-1, shape[-1]).astype(jnp.float32)
    M, C = a2.shape
    TM = min(1024, _round_up(M, 8))
    Mp = _round_up(M, TM)
    a2 = jnp.pad(a2, ((0, Mp - M), (0, 0)))
    b2 = jnp.pad(b2, ((0, Mp - M), (0, 0)))
    out = pl.pallas_call(
        _add_relu_kernel,
        out_shape=jax.ShapeDtypeStruct((Mp, C), jnp.float32),
        grid_spec=pltpu.PrefetchScalarGridSpec(
            num_scalar_prefetch=0,
            grid=(Mp // TM,),
            in_specs=[pl.BlockSpec((TM, C), lambda i: (i, 0)),
                      pl.BlockSpec((TM, C), lambda i: (i, 0))],
            out_specs=pl.BlockSpec((TM, C), lambda i: (i, 0)),
        ),
        compiler_params=pltpu.CompilerParams(dimension_semantics=("parallel",)),
    )(a2, b2)
    return out[:M].reshape(shape)


# --------------------------- conv glue ----------------------------------------

def extract_patches(x, kh, kw, stride, pad):
    # im2col (only used for the Cin=3 7x7 stem conv).
    N, H, Wd, C = x.shape
    xp = jnp.pad(x, ((0, 0), (pad, pad), (pad, pad), (0, 0)))
    Ho = (H + 2 * pad - kh) // stride + 1
    Wo = (Wd + 2 * pad - kw) // stride + 1
    cols = []
    for dy in range(kh):
        for dx in range(kw):
            cols.append(xp[:, dy:dy + stride * (Ho - 1) + 1:stride,
                           dx:dx + stride * (Wo - 1) + 1:stride, :])
    patches = jnp.concatenate(cols, axis=-1)
    return patches.reshape(N * Ho * Wo, kh * kw * C), Ho, Wo


def conv_im2col_bn_act(x, W, stride, pad, scale, bias, relu):
    N, H, _, Cin = x.shape
    Cout, _, kh, kw = W.shape
    patches, Ho, Wo = extract_patches(x, kh, kw, stride, pad)
    w2d = jnp.transpose(W, (2, 3, 1, 0)).reshape(kh * kw * Cin, Cout)
    out2d = fused_matmul(patches, w2d, scale, bias, relu)
    return out2d.reshape(N, Ho, Wo, Cout)


def conv1x1_bn_act(x, W, stride, scale, bias, relu, residual=None):
    if stride > 1:
        x = x[:, ::stride, ::stride, :]
    N, H, Wd, Cin = x.shape
    Cout = W.shape[0]
    x2 = x.reshape(N * H * Wd, Cin)
    w2 = jnp.transpose(W.reshape(Cout, Cin), (1, 0))
    r2 = None if residual is None else residual.reshape(N * H * Wd, Cout)
    out2 = fused_matmul(x2, w2, scale, bias, relu, residual=r2)
    return out2.reshape(N, H, Wd, Cout)


# --------------------------- parameters --------------------------------------

def _conv_w(key, cout, cin, kh, kw):
    return 0.05 * jax.random.normal(key, (cout, cin, kh, kw), jnp.float32)


def _bn_params(key, c):
    k1, k2, k3, k4 = jax.random.split(key, 4)
    gamma = 1.0 + 0.1 * jax.random.normal(k1, (c,), jnp.float32)
    beta = 0.1 * jax.random.normal(k2, (c,), jnp.float32)
    mean = 0.1 * jax.random.normal(k3, (c,), jnp.float32)
    var = 0.5 + jax.random.uniform(k4, (c,), jnp.float32)
    return gamma, beta, mean, var


def _fold_bn(gamma, beta, mean, var, conv_bias=None):
    scale = gamma / jnp.sqrt(var + _EPS)
    b = conv_bias if conv_bias is not None else 0.0
    bias = beta + scale * (b - mean)
    return scale, bias


def init_block(key, cin, filters, is_1x1conv):
    f1, f2, f3 = filters
    keys = jax.random.split(key, 8)
    p = {
        'w1': _conv_w(keys[0], f1, cin, 1, 1),
        'w2': _conv_w(keys[2], f2, f1, 3, 3),
        'w3': _conv_w(keys[4], f3, f2, 1, 1),
    }
    p['s1'], p['b1'] = _fold_bn(*_bn_params(keys[1], f1))
    p['s2'], p['b2'] = _fold_bn(*_bn_params(keys[3], f2))
    p['s3'], p['b3'] = _fold_bn(*_bn_params(keys[5], f3))
    if is_1x1conv:
        p['ws'] = _conv_w(keys[6], f3, cin, 1, 1)
        p['ss'], p['bs'] = _fold_bn(*_bn_params(keys[7], f3))
    return p


def init_resnet(key, in_channels, num_classes=7):
    keys = jax.random.split(key, 12)
    params = {'conv1_w': _conv_w(keys[0], 64, in_channels, 7, 7)}
    conv1_bias = 0.05 * jax.random.normal(keys[1], (64,), jnp.float32)
    params['conv1_s'], params['conv1_b'] = _fold_bn(
        *_bn_params(keys[2], 64), conv_bias=conv1_bias)
    # conv2: Layers[0]=3 blocks, filters (64,64,256), stride 1
    params['conv2'] = [
        init_block(keys[3], 64, (64, 64, 256), True),
        init_block(keys[4], 256, (64, 64, 256), False),
        init_block(keys[5], 256, (64, 64, 256), False),
    ]
    # conv3: Layers[1]=4 blocks, filters (128,128,512), stride 2 per block
    # (exactly as in the reference _make_layers)
    params['conv3'] = [
        init_block(keys[6], 256, (128, 128, 512), True),
        init_block(keys[7], 512, (128, 128, 512), False),
        init_block(keys[8], 512, (128, 128, 512), False),
        init_block(keys[9], 512, (128, 128, 512), False),
    ]
    params['cls_w'] = _conv_w(keys[10], num_classes, 512, 1, 1)
    params['cls_b'] = 0.05 * jax.random.normal(keys[11], (num_classes,),
                                               jnp.float32)
    return params


# --------------------------- forward ------------------------------------------

def block_forward(x, p, stride, is_1x1conv):
    if is_1x1conv:
        sc = conv1x1_bn_act(x, p['ws'], stride, p['ss'], p['bs'], relu=False)
    else:
        sc = x
    y = conv1x1_bn_act(x, p['w1'], stride, p['s1'], p['b1'], relu=True)
    y = conv3x3_bn_act(y, p['w2'], p['s2'], p['b2'], relu=True)
    N, H, Wd, _ = y.shape
    f3 = p['w3'].shape[0]
    if sc.shape == (N, H, Wd, f3):
        # Fuse residual add + ReLU into the 1x1 conv matmul epilogue.
        return conv1x1_bn_act(y, p['w3'], 1, p['s3'], p['b3'], relu=True,
                              residual=sc)
    # PyTorch-style size-1 spatial broadcasting of the residual.
    y = conv1x1_bn_act(y, p['w3'], 1, p['s3'], p['b3'], relu=False)
    return add_relu(y, sc)


def _bilinear_matrix(in_size, out_size):
    # F.upsample(mode='bilinear') == interpolate with align_corners=False
    i = np.arange(out_size, dtype=np.float64)
    src = (i + 0.5) * (in_size / out_size) - 0.5
    src = np.clip(src, 0.0, None)
    i0 = np.minimum(np.floor(src).astype(np.int64), in_size - 1)
    i1 = np.minimum(i0 + 1, in_size - 1)
    lam = src - i0
    B = np.zeros((out_size, in_size), dtype=np.float32)
    B[np.arange(out_size), i0] += (1.0 - lam).astype(np.float32)
    B[np.arange(out_size), i1] += lam.astype(np.float32)
    return B


def bilinear_upsample_to_nchw(x_nhwc, Hin, Win):
    # Separable bilinear upsample: H-pass then W-pass, each as a tiled matmul.
    N, Ho, Wo, C = x_nhwc.shape
    Bh = jnp.asarray(_bilinear_matrix(Ho, Hin), jnp.float32)   # (Hin, Ho)
    Bw = jnp.asarray(_bilinear_matrix(Wo, Win), jnp.float32)   # (Win, Wo)
    # H pass: (N*Wo*C, Ho) @ (Ho, Hin)
    a = jnp.transpose(x_nhwc, (0, 2, 3, 1)).reshape(N * Wo * C, Ho)
    z = fused_matmul(a, Bh.T, jnp.ones((Hin,), jnp.float32),
                     jnp.zeros((Hin,), jnp.float32), relu=False)
    z = z.reshape(N, Wo, C, Hin)
    # W pass: (N*C*Hin, Wo) @ (Wo, Win)
    a2 = jnp.transpose(z, (0, 2, 3, 1)).reshape(N * C * Hin, Wo)
    y = fused_matmul(a2, Bw.T, jnp.ones((Win,), jnp.float32),
                     jnp.zeros((Win,), jnp.float32), relu=False)
    return y.reshape(N, C, Hin, Win)


def resnet_forward(params, x_nchw):
    N, _, Hin, Win = x_nchw.shape
    x = jnp.transpose(x_nchw, (0, 2, 3, 1))  # NCHW -> NHWC
    # conv1: 7x7/s2/p3 + BN + ReLU
    x = conv_im2col_bn_act(x, params['conv1_w'], 2, 3,
                           params['conv1_s'], params['conv1_b'], True)
    # maxpool 3x3/s2/p1
    x = maxpool_3x3_s2_p1(x)
    # conv2 / conv3 residual stages
    for i, bp in enumerate(params['conv2']):
        x = block_forward(x, bp, stride=1, is_1x1conv=(i == 0))
    for i, bp in enumerate(params['conv3']):
        x = block_forward(x, bp, stride=2, is_1x1conv=(i == 0))
    # main_classifier: 1x1 conv with bias (no BN, no ReLU)
    num_classes = params['cls_w'].shape[0]
    x = conv1x1_bn_act(x, params['cls_w'], 1,
                       jnp.ones((num_classes,), jnp.float32),
                       params['cls_b'], relu=False)
    # bilinear upsample to input size (separable, via Pallas matmuls)
    return bilinear_upsample_to_nchw(x, Hin, Win)   # NCHW output


# --------------------------- main ---------------------------------------------

if __name__ == "__main__":
    key = jax.random.PRNGKey(0)
    kp, kx = jax.random.split(key)
    in_channels = 3
    params = init_resnet(kp, in_channels, num_classes=7)
    x = jax.random.normal(kx, (2, in_channels, 16, 16), jnp.float32)
    out = jax.jit(resnet_forward)(params, x)
    out = jax.block_until_ready(out)
    assert out.shape == (2, 7, 16, 16), out.shape
    assert jnp.all(jnp.isfinite(out))
    print("KERNEL_OK")
</pallas_src>

<mosaic_0001>
module attributes {stable_mosaic.version = 11 : i64} {
  func.func @_mm_kernel(%arg0: i32, %arg1: i32, %arg2: i32, %arg3: memref<128x256xbf16, #tpu.memory_space<vmem>>, %arg4: memref<256x128xbf16, #tpu.memory_space<vmem>>, %arg5: memref<1x128xf32, #tpu.memory_space<vmem>>, %arg6: memref<1x128xf32, #tpu.memory_space<vmem>>, %arg7: memref<128x128xf32, #tpu.memory_space<vmem>>, %arg8: memref<128x128xf32, #tpu.memory_space<vmem>>) attributes {dimension_semantics = [#tpu.dimension_semantics<parallel>, #tpu.dimension_semantics<parallel>, #tpu.dimension_semantics<arbitrary>], iteration_bounds = array<i64: 1, 1, 1>, scalar_prefetch = 0 : i64, scratch_operands = 1 : i64, tpu.core_type = #tpu.core_type<tc>, window_params = [{transform_indices = @transform_0, window_bounds = array<i64: 128, 256>}, {transform_indices = @transform_1, window_bounds = array<i64: 256, 128>}, {transform_indices = @transform_2, window_bounds = array<i64: 1, 128>}, {transform_indices = @transform_3, window_bounds = array<i64: 1, 128>}, {transform_indices = @transform_4, window_bounds = array<i64: 128, 128>}]} {
    %c0_i32 = arith.constant 0 : i32
    %0 = arith.cmpi eq, %arg2, %c0_i32 : i32
    %1 = arith.extui %0 : i1 to i32
    %c0_i32_0 = arith.constant 0 : i32
    %2 = arith.cmpi ne, %1, %c0_i32_0 : i32
    scf.if %2 {
      %cst_10 = arith.constant 0.000000e+00 : f32
      %12 = vector.broadcast %cst_10 : f32 to vector<128x128xf32>
      %c0_11 = arith.constant 0 : index
      %c0_12 = arith.constant 0 : index
      %13 = vector.load %arg8[%c0_11, %c0_12] : memref<128x128xf32, #tpu.memory_space<vmem>>, vector<128x128xf32>
      tpu.vector_store %arg8[%c0_11, %c0_12], %12 {strides = array<i32>} : memref<128x128xf32, #tpu.memory_space<vmem>>, vector<128x128xf32>,
    } else {
    }
    %c0 = arith.constant 0 : index
    %c0_1 = arith.constant 0 : index
    %3 = vector.load %arg8[%c0, %c0_1] : memref<128x128xf32, #tpu.memory_space<vmem>>, vector<128x128xf32>
    %c0_2 = arith.constant 0 : index
    %c0_3 = arith.constant 0 : index
    %4 = vector.load %arg3[%c0_2, %c0_3] : memref<128x256xbf16, #tpu.memory_space<vmem>>, vector<128x256xbf16>
    %c0_4 = arith.constant 0 : index
    %c0_5 = arith.constant 0 : index
    %5 = vector.load %arg4[%c0_4, %c0_5] : memref<256x128xbf16, #tpu.memory_space<vmem>>, vector<256x128xbf16>
    %cst = arith.constant dense<0.000000e+00> : vector<128x128xf32>
    %6 = tpu.matmul %4, %5, %cst {dimension_numbers = #tpu.dot_dimension_numbers<[1], [0], [0], [1], [0, 0, 1, 1], [], []>} : vector<128x256xbf16>, vector<256x128xbf16>, vector<128x128xf32> -> vector<128x128xf32>
    %7 = arith.addf %3, %6 : vector<128x128xf32>
    %c0_6 = arith.constant 0 : index
    %c0_7 = arith.constant 0 : index
    %8 = vector.load %arg8[%c0_6, %c0_7] : memref<128x128xf32, #tpu.memory_space<vmem>>, vector<128x128xf32>
    tpu.vector_store %arg8[%c0_6, %c0_7], %7 {strides = array<i32>} : memref<128x128xf32, #tpu.memory_space<vmem>>, vector<128x128xf32>,
    %c0_i32_8 = arith.constant 0 : i32
    %9 = arith.cmpi eq, %arg2, %c0_i32_8 : i32
    %10 = arith.extui %9 : i1 to i32
    %c0_i32_9 = arith.constant 0 : i32
    %11 = arith.cmpi ne, %10, %c0_i32_9 : i32
    scf.if %11 {
      %c0_10 = arith.constant 0 : index
      %c0_11 = arith.constant 0 : index
      %12 = vector.load %arg8[%c0_10, %c0_11] : memref<128x128xf32, #tpu.memory_space<vmem>>, vector<128x128xf32>
      %c0_12 = arith.constant 0 : index
      %c0_13 = arith.constant 0 : index
      %13 = vector.load %arg5[%c0_12, %c0_13] : memref<1x128xf32, #tpu.memory_space<vmem>>, vector<1x128xf32>
      %14 = vector.broadcast %13 : vector<1x128xf32> to vector<128x128xf32>
      %15 = arith.mulf %12, %14 : vector<128x128xf32>
      %c0_14 = arith.constant 0 : index
      %c0_15 = arith.constant 0 : index
      %16 = vector.load %arg6[%c0_14, %c0_15] : memref<1x128xf32, #tpu.memory_space<vmem>>, vector<1x128xf32>
      %17 = vector.broadcast %16 : vector<1x128xf32> to vector<128x128xf32>
      %18 = arith.addf %15, %17 : vector<128x128xf32>
      %cst_16 = arith.constant 0.000000e+00 : f32
      %19 = vector.broadcast %cst_16 : f32 to vector<128x128xf32>
      %20 = arith.maximumf %18, %19 : vector<128x128xf32>
      %c0_17 = arith.constant 0 : index
      %c0_18 = arith.constant 0 : index
      %21 = vector.load %arg7[%c0_17, %c0_18] : memref<128x128xf32, #tpu.memory_space<vmem>>, vector<128x128xf32>
      tpu.vector_store %arg7[%c0_17, %c0_18], %20 {strides = array<i32>} : memref<128x128xf32, #tpu.memory_space<vmem>>, vector<128x128xf32>,
    } else {
    }
    return
  }
  func.func @transform_0(%arg0: i32, %arg1: i32, %arg2: i32) -> (i32, i32) {
    %c0_i32 = arith.constant 0 : i32
    return %arg0, %arg2 : i32, i32
  }
  func.func @transform_1(%arg0: i32, %arg1: i32, %arg2: i32) -> (i32, i32) {
    %c0_i32 = arith.constant 0 : i32
    return %arg2, %arg1 : i32, i32
  }
  func.func @transform_2(%arg0: i32, %arg1: i32, %arg2: i32) -> (i32, i32) {
    %c0_i32 = arith.constant 0 : i32
    %c0_i32_0 = arith.constant 0 : i32
    return %c0_i32, %arg1 : i32, i32
  }
  func.func @transform_3(%arg0: i32, %arg1: i32, %arg2: i32) -> (i32, i32) {
    %c0_i32 = arith.constant 0 : i32
    %c0_i32_0 = arith.constant 0 : i32
    return %c0_i32, %arg1 : i32, i32
  }
  func.func @transform_4(%arg0: i32, %arg1: i32, %arg2: i32) -> (i32, i32) {
    %c0_i32 = arith.constant 0 : i32
    return %arg0, %arg1 : i32, i32
  }
}

module attributes {stable_mosaic.version = 11 : i64} {
  func.func @_max9_kernel(%arg0: i32, %arg1: memref<9x32x64xf32, #tpu.memory_space<vmem>>, %arg2: memref<32x64xf32, #tpu.memory_space<vmem>>) attributes {dimension_semantics = [#tpu.dimension_semantics<parallel>], iteration_bounds = array<i64: 1>, scalar_prefetch = 0 : i64, scratch_operands = 0 : i64, tpu.core_type = #tpu.core_type<tc>, window_params = [{transform_indices = @transform_0, window_bounds = array<i64: 9, 32, 64>}, {transform_indices = @transform_1, window_bounds = array<i64: 32, 64>}]} {
    %c0 = arith.constant 0 : index
    %c0_0 = arith.constant 0 : index
    %c0_1 = arith.constant 0 : index
    %0 = vector.load %arg1[%c0, %c0_0, %c0_1] : memref<9x32x64xf32, #tpu.memory_space<vmem>>, vector<1x32x64xf32>
    %1 = vector.shape_cast %0 : vector<1x32x64xf32> to vector<32x64xf32>
    %c1 = arith.constant 1 : index
    %c0_2 = arith.constant 0 : index
    %c0_3 = arith.constant 0 : index
    %2 = vector.load %arg1[%c1, %c0_2, %c0_3] : memref<9x32x64xf32, #tpu.memory_space<vmem>>, vector<1x32x64xf32>
    %3 = vector.shape_cast %2 : vector<1x32x64xf32> to vector<32x64xf32>
    %4 = arith.maximumf %1, %3 : vector<32x64xf32>
    %c2 = arith.constant 2 : index
    %c0_4 = arith.constant 0 : index
    %c0_5 = arith.constant 0 : index
    %5 = vector.load %arg1[%c2, %c0_4, %c0_5] : memref<9x32x64xf32, #tpu.memory_space<vmem>>, vector<1x32x64xf32>
    %6 = vector.shape_cast %5 : vector<1x32x64xf32> to vector<32x64xf32>
    %7 = arith.maximumf %4, %6 : vector<32x64xf32>
    %c3 = arith.constant 3 : index
    %c0_6 = arith.constant 0 : index
    %c0_7 = arith.constant 0 : index
    %8 = vector.load %arg1[%c3, %c0_6, %c0_7] : memref<9x32x64xf32, #tpu.memory_space<vmem>>, vector<1x32x64xf32>
    %9 = vector.shape_cast %8 : vector<1x32x64xf32> to vector<32x64xf32>
    %10 = arith.maximumf %7, %9 : vector<32x64xf32>
    %c4 = arith.constant 4 : index
    %c0_8 = arith.constant 0 : index
    %c0_9 = arith.constant 0 : index
    %11 = vector.load %arg1[%c4, %c0_8, %c0_9] : memref<9x32x64xf32, #tpu.memory_space<vmem>>, vector<1x32x64xf32>
    %12 = vector.shape_cast %11 : vector<1x32x64xf32> to vector<32x64xf32>
    %13 = arith.maximumf %10, %12 : vector<32x64xf32>
    %c5 = arith.constant 5 : index
    %c0_10 = arith.constant 0 : index
    %c0_11 = arith.constant 0 : index
    %14 = vector.load %arg1[%c5, %c0_10, %c0_11] : memref<9x32x64xf32, #tpu.memory_space<vmem>>, vector<1x32x64xf32>
    %15 = vector.shape_cast %14 : vector<1x32x64xf32> to vector<32x64xf32>
    %16 = arith.maximumf %13, %15 : vector<32x64xf32>
    %c6 = arith.constant 6 : index
    %c0_12 = arith.constant 0 : index
    %c0_13 = arith.constant 0 : index
    %17 = vector.load %arg1[%c6, %c0_12, %c0_13] : memref<9x32x64xf32, #tpu.memory_space<vmem>>, vector<1x32x64xf32>
    %18 = vector.shape_cast %17 : vector<1x32x64xf32> to vector<32x64xf32>
    %19 = arith.maximumf %16, %18 : vector<32x64xf32>
    %c7 = arith.constant 7 : index
    %c0_14 = arith.constant 0 : index
    %c0_15 = arith.constant 0 : index
    %20 = vector.load %arg1[%c7, %c0_14, %c0_15] : memref<9x32x64xf32, #tpu.memory_space<vmem>>, vector<1x32x64xf32>
    %21 = vector.shape_cast %20 : vector<1x32x64xf32> to vector<32x64xf32>
    %22 = arith.maximumf %19, %21 : vector<32x64xf32>
    %c8 = arith.constant 8 : index
    %c0_16 = arith.constant 0 : index
    %c0_17 = arith.constant 0 : index
    %23 = vector.load %arg1[%c8, %c0_16, %c0_17] : memref<9x32x64xf32, #tpu.memory_space<vmem>>, vector<1x32x64xf32>
    %24 = vector.shape_cast %23 : vector<1x32x64xf32> to vector<32x64xf32>
    %25 = arith.maximumf %22, %24 : vector<32x64xf32>
    %c0_18 = arith.constant 0 : index
    %c0_19 = arith.constant 0 : index
    %26 = vector.load %arg2[%c0_18, %c0_19] : memref<32x64xf32, #tpu.memory_space<vmem>>, vector<32x64xf32>
    tpu.vector_store %arg2[%c0_18, %c0_19], %25 {strides = array<i32>} : memref<32x64xf32, #tpu.memory_space<vmem>>, vector<32x64xf32>,
    return
  }
  func.func @transform_0(%arg0: i32) -> (i32, i32, i32) {
    %c0_i32 = arith.constant 0 : i32
    %c0_i32_0 = arith.constant 0 : i32
    %c0_i32_1 = arith.constant 0 : i32
    return %c0_i32, %arg0, %c0_i32_0 : i32, i32, i32
  }
  func.func @transform_1(%arg0: i32) -> (i32, i32) {
    %c0_i32 = arith.constant 0 : i32
    %c0_i32_0 = arith.constant 0 : i32
    return %arg0, %c0_i32 : i32, i32
  }
}

module attributes {stable_mosaic.version = 11 : i64} {
  func.func @_mm_kernel(%arg0: i32, %arg1: i32, %arg2: i32, %arg3: memref<32x128xbf16, #tpu.memory_space<vmem>>, %arg4: memref<128x128xbf16, #tpu.memory_space<vmem>>, %arg5: memref<1x128xf32, #tpu.memory_space<vmem>>, %arg6: memref<1x128xf32, #tpu.memory_space<vmem>>, %arg7: memref<32x128xf32, #tpu.memory_space<vmem>>, %arg8: memref<32x128xf32, #tpu.memory_space<vmem>>) attributes {dimension_semantics = [#tpu.dimension_semantics<parallel>, #tpu.dimension_semantics<parallel>, #tpu.dimension_semantics<arbitrary>], iteration_bounds = array<i64: 1, 1, 1>, scalar_prefetch = 0 : i64, scratch_operands = 1 : i64, tpu.core_type = #tpu.core_type<tc>, window_params = [{transform_indices = @transform_0, window_bounds = array<i64: 32, 128>}, {transform_indices = @transform_1, window_bounds = array<i64: 128, 128>}, {transform_indices = @transform_2, window_bounds = array<i64: 1, 128>}, {transform_indices = @transform_3, window_bounds = array<i64: 1, 128>}, {transform_indices = @transform_4, window_bounds = array<i64: 32, 128>}]} {
    %c0_i32 = arith.constant 0 : i32
    %0 = arith.cmpi eq, %arg2, %c0_i32 : i32
    %1 = arith.extui %0 : i1 to i32
    %c0_i32_0 = arith.constant 0 : i32
    %2 = arith.cmpi ne, %1, %c0_i32_0 : i32
    scf.if %2 {
      %cst_10 = arith.constant 0.000000e+00 : f32
      %12 = vector.broadcast %cst_10 : f32 to vector<32x128xf32>
      %c0_11 = arith.constant 0 : index
      %c0_12 = arith.constant 0 : index
      %13 = vector.load %arg8[%c0_11, %c0_12] : memref<32x128xf32, #tpu.memory_space<vmem>>, vector<32x128xf32>
      tpu.vector_store %arg8[%c0_11, %c0_12], %12 {strides = array<i32>} : memref<32x128xf32, #tpu.memory_space<vmem>>, vector<32x128xf32>,
    } else {
    }
    %c0 = arith.constant 0 : index
    %c0_1 = arith.constant 0 : index
    %3 = vector.load %arg8[%c0, %c0_1] : memref<32x128xf32, #tpu.memory_space<vmem>>, vector<32x128xf32>
    %c0_2 = arith.constant 0 : index
    %c0_3 = arith.constant 0 : index
    %4 = vector.load %arg3[%c0_2, %c0_3] : memref<32x128xbf16, #tpu.memory_space<vmem>>, vector<32x128xbf16>
    %c0_4 = arith.constant 0 : index
    %c0_5 = arith.constant 0 : index
    %5 = vector.load %arg4[%c0_4, %c0_5] : memref<128x128xbf16, #tpu.memory_space<vmem>>, vector<128x128xbf16>
    %cst = arith.constant dense<0.000000e+00> : vector<32x128xf32>
    %6 = tpu.matmul %4, %5, %cst {dimension_numbers = #tpu.dot_dimension_numbers<[1], [0], [0], [1], [0, 0, 1, 1], [], []>} : vector<32x128xbf16>, vector<128x128xbf16>, vector<32x128xf32> -> vector<32x128xf32>
    %7 = arith.addf %3, %6 : vector<32x128xf32>
    %c0_6 = arith.constant 0 : index
    %c0_7 = arith.constant 0 : index
    %8 = vector.load %arg8[%c0_6, %c0_7] : memref<32x128xf32, #tpu.memory_space<vmem>>, vector<32x128xf32>
    tpu.vector_store %arg8[%c0_6, %c0_7], %7 {strides = array<i32>} : memref<32x128xf32, #tpu.memory_space<vmem>>, vector<32x128xf32>,
    %c0_i32_8 = arith.constant 0 : i32
    %9 = arith.cmpi eq, %arg2, %c0_i32_8 : i32
    %10 = arith.extui %9 : i1 to i32
    %c0_i32_9 = arith.constant 0 : i32
    %11 = arith.cmpi ne, %10, %c0_i32_9 : i32
    scf.if %11 {
      %c0_10 = arith.constant 0 : index
      %c0_11 = arith.constant 0 : index
      %12 = vector.load %arg8[%c0_10, %c0_11] : memref<32x128xf32, #tpu.memory_space<vmem>>, vector<32x128xf32>
      %c0_12 = arith.constant 0 : index
      %c0_13 = arith.constant 0 : index
      %13 = vector.load %arg5[%c0_12, %c0_13] : memref<1x128xf32, #tpu.memory_space<vmem>>, vector<1x128xf32>
      %14 = vector.broadcast %13 : vector<1x128xf32> to vector<32x128xf32>
      %15 = arith.mulf %12, %14 : vector<32x128xf32>
      %c0_14 = arith.constant 0 : index
      %c0_15 = arith.constant 0 : index
      %16 = vector.load %arg6[%c0_14, %c0_15] : memref<1x128xf32, #tpu.memory_space<vmem>>, vector<1x128xf32>
      %17 = vector.broadcast %16 : vector<1x128xf32> to vector<32x128xf32>
      %18 = arith.addf %15, %17 : vector<32x128xf32>
      %cst_16 = arith.constant 0.000000e+00 : f32
      %19 = vector.broadcast %cst_16 : f32 to vector<32x128xf32>
      %20 = arith.maximumf %18, %19 : vector<32x128xf32>
      %c0_17 = arith.constant 0 : index
      %c0_18 = arith.constant 0 : index
      %21 = vector.load %arg7[%c0_17, %c0_18] : memref<32x128xf32, #tpu.memory_space<vmem>>, vector<32x128xf32>
      tpu.vector_store %arg7[%c0_17, %c0_18], %20 {strides = array<i32>} : memref<32x128xf32, #tpu.memory_space<vmem>>, vector<32x128xf32>,
    } else {
    }
    return
  }
  func.func @transform_0(%arg0: i32, %arg1: i32, %arg2: i32) -> (i32, i32) {
    %c0_i32 = arith.constant 0 : i32
    return %arg0, %arg2 : i32, i32
  }
  func.func @transform_1(%arg0: i32, %arg1: i32, %arg2: i32) -> (i32, i32) {
    %c0_i32 = arith.constant 0 : i32
    return %arg2, %arg1 : i32, i32
  }
  func.func @transform_2(%arg0: i32, %arg1: i32, %arg2: i32) -> (i32, i32) {
    %c0_i32 = arith.constant 0 : i32
    %c0_i32_0 = arith.constant 0 : i32
    return %c0_i32, %arg1 : i32, i32
  }
  func.func @transform_3(%arg0: i32, %arg1: i32, %arg2: i32) -> (i32, i32) {
    %c0_i32 = arith.constant 0 : i32
    %c0_i32_0 = arith.constant 0 : i32
    return %c0_i32, %arg1 : i32, i32
  }
  func.func @transform_4(%arg0: i32, %arg1: i32, %arg2: i32) -> (i32, i32) {
    %c0_i32 = arith.constant 0 : i32
    return %arg0, %arg1 : i32, i32
  }
}

module attributes {stable_mosaic.version = 11 : i64} {
  func.func @_conv3x3_kernel(%arg0: i32, %arg1: memref<1x56x64xbf16, #tpu.memory_space<vmem>>, %arg2: memref<9x64x64xbf16, #tpu.memory_space<vmem>>, %arg3: memref<1x64xf32, #tpu.memory_space<vmem>>, %arg4: memref<1x64xf32, #tpu.memory_space<vmem>>, %arg5: memref<1x36x64xf32, #tpu.memory_space<vmem>>) attributes {dimension_semantics = [#tpu.dimension_semantics<parallel>], iteration_bounds = array<i64: 2>, scalar_prefetch = 0 : i64, scratch_operands = 0 : i64, tpu.core_type = #tpu.core_type<tc>, window_params = [{transform_indices = @transform_0, window_bounds = array<i64: 1, 56, 64>}, {pipeline_mode = #tpu.pipeline_mode<synchronous>, transform_indices = @transform_1, window_bounds = array<i64: 9, 64, 64>}, {pipeline_mode = #tpu.pipeline_mode<synchronous>, transform_indices = @transform_2, window_bounds = array<i64: 1, 64>}, {pipeline_mode = #tpu.pipeline_mode<synchronous>, transform_indices = @transform_3, window_bounds = array<i64: 1, 64>}, {transform_indices = @transform_4, window_bounds = array<i64: 1, 36, 64>}]} {
    %cst = arith.constant 0.000000e+00 : f32
    %0 = vector.broadcast %cst : f32 to vector<36x64xf32>
    %c0 = arith.constant 0 : index
    %c0_0 = arith.constant 0 : index
    %c0_1 = arith.constant 0 : index
    %1 = vector.load %arg1[%c0, %c0_0, %c0_1] : memref<1x56x64xbf16, #tpu.memory_space<vmem>>, vector<1x36x64xbf16>
    %2 = vector.shape_cast %1 : vector<1x36x64xbf16> to vector<36x64xbf16>
    %c0_2 = arith.constant 0 : index
    %c0_3 = arith.constant 0 : index
    %c0_4 = arith.constant 0 : index
    %3 = vector.load %arg2[%c0_2, %c0_3, %c0_4] : memref<9x64x64xbf16, #tpu.memory_space<vmem>>, vector<1x64x64xbf16>
    %4 = vector.shape_cast %3 : vector<1x64x64xbf16> to vector<64x64xbf16>
    %cst_5 = arith.constant dense<0.000000e+00> : vector<36x64xf32>
    %5 = tpu.matmul %2, %4, %cst_5 {dimension_numbers = #tpu.dot_dimension_numbers<[1], [0], [0], [1], [0, 0, 1, 1], [], []>} : vector<36x64xbf16>, vector<64x64xbf16>, vector<36x64xf32> -> vector<36x64xf32>
    %6 = arith.addf %0, %5 : vector<36x64xf32>
    %c0_6 = arith.constant 0 : index
    %c1 = arith.constant 1 : index
    %c0_7 = arith.constant 0 : index
    %7 = vector.load %arg1[%c0_6, %c1, %c0_7] : memref<1x56x64xbf16, #tpu.memory_space<vmem>>, vector<1x36x64xbf16>
    %8 = vector.shape_cast %7 : vector<1x36x64xbf16> to vector<36x64xbf16>
    %c1_8 = arith.constant 1 : index
    %c0_9 = arith.constant 0 : index
    %c0_10 = arith.constant 0 : index
    %9 = vector.load %arg2[%c1_8, %c0_9, %c0_10] : memref<9x64x64xbf16, #tpu.memory_space<vmem>>, vector<1x64x64xbf16>
    %10 = vector.shape_cast %9 : vector<1x64x64xbf16> to vector<64x64xbf16>
    %cst_11 = arith.constant dense<0.000000e+00> : vector<36x64xf32>
    %11 = tpu.matmul %8, %10, %cst_11 {dimension_numbers = #tpu.dot_dimension_numbers<[1], [0], [0], [1], [0, 0, 1, 1], [], []>} : vector<36x64xbf16>, vector<64x64xbf16>, vector<36x64xf32> -> vector<36x64xf32>
    %12 = arith.addf %6, %11 : vector<36x64xf32>
    %c0_12 = arith.constant 0 : index
    %c2 = arith.constant 2 : index
    %c0_13 = arith.constant 0 : index
    %13 = vector.load %arg1[%c0_12, %c2, %c0_13] : memref<1x56x64xbf16, #tpu.memory_space<vmem>>, vector<1x36x64xbf16>
    %14 = vector.shape_cast %13 : vector<1x36x64xbf16> to vector<36x64xbf16>
    %c2_14 = arith.constant 2 : index
    %c0_15 = arith.constant 0 : index
    %c0_16 = arith.constant 0 : index
    %15 = vector.load %arg2[%c2_14, %c0_15, %c0_16] : memref<9x64x64xbf16, #tpu.memory_space<vmem>>, vector<1x64x64xbf16>
    %16 = vector.shape_cast %15 : vector<1x64x64xbf16> to vector<64x64xbf16>
    %cst_17 = arith.constant dense<0.000000e+00> : vector<36x64xf32>
    %17 = tpu.matmul %14, %16, %cst_17 {dimension_numbers = #tpu.dot_dimension_numbers<[1], [0], [0], [1], [0, 0, 1, 1], [], []>} : vector<36x64xbf16>, vector<64x64xbf16>, vector<36x64xf32> -> vector<36x64xf32>
    %18 = arith.addf %12, %17 : vector<36x64xf32>
    %c0_18 = arith.constant 0 : index
    %c6 = arith.constant 6 : index
    %c0_19 = arith.constant 0 : index
    %19 = vector.load %arg1[%c0_18, %c6, %c0_19] : memref<1x56x64xbf16, #tpu.memory_space<vmem>>, vector<1x36x64xbf16>
    %20 = vector.shape_cast %19 : vector<1x36x64xbf16> to vector<36x64xbf16>
    %c3 = arith.constant 3 : index
    %c0_20 = arith.constant 0 : index
    %c0_21 = arith.constant 0 : index
    %21 = vector.load %arg2[%c3, %c0_20, %c0_21] : memref<9x64x64xbf16, #tpu.memory_space<vmem>>, vector<1x64x64xbf16>
    %22 = vector.shape_cast %21 : vector<1x64x64xbf16> to vector<64x64xbf16>
    %cst_22 = arith.constant dense<0.000000e+00> : vector<36x64xf32>
    %23 = tpu.matmul %20, %22, %cst_22 {dimension_numbers = #tpu.dot_dimension_numbers<[1], [0], [0], [1], [0, 0, 1, 1], [], []>} : vector<36x64xbf16>, vector<64x64xbf16>, vector<36x64xf32> -> vector<36x64xf32>
    %24 = arith.addf %18, %23 : vector<36x64xf32>
    %c0_23 = arith.constant 0 : index
    %c7 = arith.constant 7 : index
    %c0_24 = arith.constant 0 : index
    %25 = vector.load %arg1[%c0_23, %c7, %c0_24] : memref<1x56x64xbf16, #tpu.memory_space<vmem>>, vector<1x36x64xbf16>
    %26 = vector.shape_cast %25 : vector<1x36x64xbf16> to vector<36x64xbf16>
    %c4 = arith.constant 4 : index
    %c0_25 = arith.constant 0 : index
    %c0_26 = arith.constant 0 : index
    %27 = vector.load %arg2[%c4, %c0_25, %c0_26] : memref<9x64x64xbf16, #tpu.memory_space<vmem>>, vector<1x64x64xbf16>
    %28 = vector.shape_cast %27 : vector<1x64x64xbf16> to vector<64x64xbf16>
    %cst_27 = arith.constant dense<0.000000e+00> : vector<36x64xf32>
    %29 = tpu.matmul %26, %28, %cst_27 {dimension_numbers = #tpu.dot_dimension_numbers<[1], [0], [0], [1], [0, 0, 1, 1], [], []>} : vector<36x64xbf16>, vector<64x64xbf16>, vector<36x64xf32> -> vector<36x64xf32>
    %30 = arith.addf %24, %29 : vector<36x64xf32>
    %c0_28 = arith.constant 0 : index
    %c8 = arith.constant 8 : index
    %c0_29 = arith.constant 0 : index
    %31 = vector.load %arg1[%c0_28, %c8, %c0_29] : memref<1x56x64xbf16, #tpu.memory_space<vmem>>, vector<1x36x64xbf16>
    %32 = vector.shape_cast %31 : vector<1x36x64xbf16> to vector<36x64xbf16>
    %c5 = arith.constant 5 : index
    %c0_30 = arith.constant 0 : index
    %c0_31 = arith.constant 0 : index
    %33 = vector.load %arg2[%c5, %c0_30, %c0_31] : memref<9x64x64xbf16, #tpu.memory_space<vmem>>, vector<1x64x64xbf16>
    %34 = vector.shape_cast %33 : vector<1x64x64xbf16> to vector<64x64xbf16>
    %cst_32 = arith.constant dense<0.000000e+00> : vector<36x64xf32>
    %35 = tpu.matmul %32, %34, %cst_32 {dimension_numbers = #tpu.dot_dimension_numbers<[1], [0], [0], [1], [0, 0, 1, 1], [], []>} : vector<36x64xbf16>, vector<64x64xbf16>, vector<36x64xf32> -> vector<36x64xf32>
    %36 = arith.addf %30, %35 : vector<36x64xf32>
    %c0_33 = arith.constant 0 : index
    %c12 = arith.constant 12 : index
    %c0_34 = arith.constant 0 : index
    %37 = vector.load %arg1[%c0_33, %c12, %c0_34] : memref<1x56x64xbf16, #tpu.memory_space<vmem>>, vector<1x36x64xbf16>
    %38 = vector.shape_cast %37 : vector<1x36x64xbf16> to vector<36x64xbf16>
    %c6_35 = arith.constant 6 : index
    %c0_36 = arith.constant 0 : index
    %c0_37 = arith.constant 0 : index
    %39 = vector.load %arg2[%c6_35, %c0_36, %c0_37] : memref<9x64x64xbf16, #tpu.memory_space<vmem>>, vector<1x64x64xbf16>
    %40 = vector.shape_cast %39 : vector<1x64x64xbf16> to vector<64x64xbf16>
    %cst_38 = arith.constant dense<0.000000e+00> : vector<36x64xf32>
    %41 = tpu.matmul %38, %40, %cst_38 {dimension_numbers = #tpu.dot_dimension_numbers<[1], [0], [0], [1], [0, 0, 1, 1], [], []>} : vector<36x64xbf16>, vector<64x64xbf16>, vector<36x64xf32> -> vector<36x64xf32>
    %42 = arith.addf %36, %41 : vector<36x64xf32>
    %c0_39 = arith.constant 0 : index
    %c13 = arith.constant 13 : index
    %c0_40 = arith.constant 0 : index
    %43 = vector.load %arg1[%c0_39, %c13, %c0_40] : memref<1x56x64xbf16, #tpu.memory_space<vmem>>, vector<1x36x64xbf16>
    %44 = vector.shape_cast %43 : vector<1x36x64xbf16> to vector<36x64xbf16>
    %c7_41 = arith.constant 7 : index
    %c0_42 = arith.constant 0 : index
    %c0_43 = arith.constant 0 : index
    %45 = vector.load %arg2[%c7_41, %c0_42, %c0_43] : memref<9x64x64xbf16, #tpu.memory_space<vmem>>, vector<1x64x64xbf16>
    %46 = vector.shape_cast %45 : vector<1x64x64xbf16> to vector<64x64xbf16>
    %cst_44 = arith.constant dense<0.000000e+00> : vector<36x64xf32>
    %47 = tpu.matmul %44, %46, %cst_44 {dimension_numbers = #tpu.dot_dimension_numbers<[1], [0], [0], [1], [0, 0, 1, 1], [], []>} : vector<36x64xbf16>, vector<64x64xbf16>, vector<36x64xf32> -> vector<36x64xf32>
    %48 = arith.addf %42, %47 : vector<36x64xf32>
    %c0_45 = arith.constant 0 : index
    %c14 = arith.constant 14 : index
    %c0_46 = arith.constant 0 : index
    %49 = vector.load %arg1[%c0_45, %c14, %c0_46] : memref<1x56x64xbf16, #tpu.memory_space<vmem>>, vector<1x36x64xbf16>
    %50 = vector.shape_cast %49 : vector<1x36x64xbf16> to vector<36x64xbf16>
    %c8_47 = arith.constant 8 : index
    %c0_48 = arith.constant 0 : index
    %c0_49 = arith.constant 0 : index
    %51 = vector.load %arg2[%c8_47, %c0_48, %c0_49] : memref<9x64x64xbf16, #tpu.memory_space<vmem>>, vector<1x64x64xbf16>
    %52 = vector.shape_cast %51 : vector<1x64x64xbf16> to vector<64x64xbf16>
    %cst_50 = arith.constant dense<0.000000e+00> : vector<36x64xf32>
    %53 = tpu.matmul %50, %52, %cst_50 {dimension_numbers = #tpu.dot_dimension_numbers<[1], [0], [0], [1], [0, 0, 1, 1], [], []>} : vector<36x64xbf16>, vector<64x64xbf16>, vector<36x64xf32> -> vector<36x64xf32>
    %54 = arith.addf %48, %53 : vector<36x64xf32>
    %c0_51 = arith.constant 0 : index
    %c0_52 = arith.constant 0 : index
    %55 = vector.load %arg3[%c0_51, %c0_52] : memref<1x64xf32, #tpu.memory_space<vmem>>, vector<1x64xf32>
    %56 = vector.broadcast %55 : vector<1x64xf32> to vector<36x64xf32>
    %57 = arith.mulf %54, %56 : vector<36x64xf32>
    %c0_53 = arith.constant 0 : index
    %c0_54 = arith.constant 0 : index
    %58 = vector.load %arg4[%c0_53, %c0_54] : memref<1x64xf32, #tpu.memory_space<vmem>>, vector<1x64xf32>
    %59 = vector.broadcast %58 : vector<1x64xf32> to vector<36x64xf32>
    %60 = arith.addf %57, %59 : vector<36x64xf32>
    %cst_55 = arith.constant 0.000000e+00 : f32
    %61 = vector.broadcast %cst_55 : f32 to vector<36x64xf32>
    %62 = arith.maximumf %60, %61 : vector<36x64xf32>
    %c0_56 = arith.constant 0 : index
    %c0_57 = arith.constant 0 : index
    %c0_58 = arith.constant 0 : index
    %63 = vector.load %arg5[%c0_56, %c0_57, %c0_58] : memref<1x36x64xf32, #tpu.memory_space<vmem>>, vector<1x36x64xf32>
    %64 = vector.shape_cast %63 : vector<1x36x64xf32> to vector<36x64xf32>
    %65 = vector.shape_cast %62 : vector<36x64xf32> to vector<1x36x64xf32>
    tpu.vector_store %arg5[%c0_56, %c0_57, %c0_58], %65 {strides = array<i32>} : memref<1x36x64xf32, #tpu.memory_space<vmem>>, vector<1x36x64xf32>,
    return
  }
  func.func @transform_0(%arg0: i32) -> (i32, i32, i32) {
    %c0_i32 = arith.constant 0 : i32
    %c0_i32_0 = arith.constant 0 : i32
    %c0_i32_1 = arith.constant 0 : i32
    return %arg0, %c0_i32, %c0_i32_0 : i32, i32, i32
  }
  func.func @transform_1(%arg0: i32) -> (i32, i32, i32) {
    %c0_i32 = arith.constant 0 : i32
    %c0_i32_0 = arith.constant 0 : i32
    %c0_i32_1 = arith.constant 0 : i32
    %c0_i32_2 = arith.constant 0 : i32
    return %c0_i32, %c0_i32_0, %c0_i32_1 : i32, i32, i32
  }
  func.func @transform_2(%arg0: i32) -> (i32, i32) {
    %c0_i32 = arith.constant 0 : i32
    %c0_i32_0 = arith.constant 0 : i32
    %c0_i32_1 = arith.constant 0 : i32
    return %c0_i32, %c0_i32_0 : i32, i32
  }
  func.func @transform_3(%arg0: i32) -> (i32, i32) {
    %c0_i32 = arith.constant 0 : i32
    %c0_i32_0 = arith.constant 0 : i32
    %c0_i32_1 = arith.constant 0 : i32
    return %c0_i32, %c0_i32_0 : i32, i32
  }
  func.func @transform_4(%arg0: i32) -> (i32, i32, i32) {
    %c0_i32 = arith.constant 0 : i32
    %c0_i32_0 = arith.constant 0 : i32
    %c0_i32_1 = arith.constant 0 : i32
    return %arg0, %c0_i32, %c0_i32_0 : i32, i32, i32
  }
}

module attributes {stable_mosaic.version = 11 : i64} {
  func.func @_mm_kernel(%arg0: i32, %arg1: i32, %arg2: i32, %arg3: memref<32x128xbf16, #tpu.memory_space<vmem>>, %arg4: memref<128x256xbf16, #tpu.memory_space<vmem>>, %arg5: memref<1x256xf32, #tpu.memory_space<vmem>>, %arg6: memref<1x256xf32, #tpu.memory_space<vmem>>, %arg7: memref<32x256xf32, #tpu.memory_space<vmem>>, %arg8: memref<32x256xf32, #tpu.memory_space<vmem>>) attributes {dimension_semantics = [#tpu.dimension_semantics<parallel>, #tpu.dimension_semantics<parallel>, #tpu.dimension_semantics<arbitrary>], iteration_bounds = array<i64: 1, 1, 1>, scalar_prefetch = 0 : i64, scratch_operands = 1 : i64, tpu.core_type = #tpu.core_type<tc>, window_params = [{transform_indices = @transform_0, window_bounds = array<i64: 32, 128>}, {transform_indices = @transform_1, window_bounds = array<i64: 128, 256>}, {transform_indices = @transform_2, window_bounds = array<i64: 1, 256>}, {transform_indices = @transform_3, window_bounds = array<i64: 1, 256>}, {transform_indices = @transform_4, window_bounds = array<i64: 32, 256>}]} {
    %c0_i32 = arith.constant 0 : i32
    %0 = arith.cmpi eq, %arg2, %c0_i32 : i32
    %1 = arith.extui %0 : i1 to i32
    %c0_i32_0 = arith.constant 0 : i32
    %2 = arith.cmpi ne, %1, %c0_i32_0 : i32
    scf.if %2 {
      %cst_10 = arith.constant 0.000000e+00 : f32
      %12 = vector.broadcast %cst_10 : f32 to vector<32x256xf32>
      %c0_11 = arith.constant 0 : index
      %c0_12 = arith.constant 0 : index
      %13 = vector.load %arg8[%c0_11, %c0_12] : memref<32x256xf32, #tpu.memory_space<vmem>>, vector<32x256xf32>
      tpu.vector_store %arg8[%c0_11, %c0_12], %12 {strides = array<i32>} : memref<32x256xf32, #tpu.memory_space<vmem>>, vector<32x256xf32>,
    } else {
    }
    %c0 = arith.constant 0 : index
    %c0_1 = arith.constant 0 : index
    %3 = vector.load %arg8[%c0, %c0_1] : memref<32x256xf32, #tpu.memory_space<vmem>>, vector<32x256xf32>
    %c0_2 = arith.constant 0 : index
    %c0_3 = arith.constant 0 : index
    %4 = vector.load %arg3[%c0_2, %c0_3] : memref<32x128xbf16, #tpu.memory_space<vmem>>, vector<32x128xbf16>
    %c0_4 = arith.constant 0 : index
    %c0_5 = arith.constant 0 : index
    %5 = vector.load %arg4[%c0_4, %c0_5] : memref<128x256xbf16, #tpu.memory_space<vmem>>, vector<128x256xbf16>
    %cst = arith.constant dense<0.000000e+00> : vector<32x256xf32>
    %6 = tpu.matmul %4, %5, %cst {dimension_numbers = #tpu.dot_dimension_numbers<[1], [0], [0], [1], [0, 0, 1, 1], [], []>} : vector<32x128xbf16>, vector<128x256xbf16>, vector<32x256xf32> -> vector<32x256xf32>
    %7 = arith.addf %3, %6 : vector<32x256xf32>
    %c0_6 = arith.constant 0 : index
    %c0_7 = arith.constant 0 : index
    %8 = vector.load %arg8[%c0_6, %c0_7] : memref<32x256xf32, #tpu.memory_space<vmem>>, vector<32x256xf32>
    tpu.vector_store %arg8[%c0_6, %c0_7], %7 {strides = array<i32>} : memref<32x256xf32, #tpu.memory_space<vmem>>, vector<32x256xf32>,
    %c0_i32_8 = arith.constant 0 : i32
    %9 = arith.cmpi eq, %arg2, %c0_i32_8 : i32
    %10 = arith.extui %9 : i1 to i32
    %c0_i32_9 = arith.constant 0 : i32
    %11 = arith.cmpi ne, %10, %c0_i32_9 : i32
    scf.if %11 {
      %c0_10 = arith.constant 0 : index
      %c0_11 = arith.constant 0 : index
      %12 = vector.load %arg8[%c0_10, %c0_11] : memref<32x256xf32, #tpu.memory_space<vmem>>, vector<32x256xf32>
      %c0_12 = arith.constant 0 : index
      %c0_13 = arith.constant 0 : index
      %13 = vector.load %arg5[%c0_12, %c0_13] : memref<1x256xf32, #tpu.memory_space<vmem>>, vector<1x256xf32>
      %14 = vector.broadcast %13 : vector<1x256xf32> to vector<32x256xf32>
      %15 = arith.mulf %12, %14 : vector<32x256xf32>
      %c0_14 = arith.constant 0 : index
      %c0_15 = arith.constant 0 : index
      %16 = vector.load %arg6[%c0_14, %c0_15] : memref<1x256xf32, #tpu.memory_space<vmem>>, vector<1x256xf32>
      %17 = vector.broadcast %16 : vector<1x256xf32> to vector<32x256xf32>
      %18 = arith.addf %15, %17 : vector<32x256xf32>
      %c0_16 = arith.constant 0 : index
      %c0_17 = arith.constant 0 : index
      %19 = vector.load %arg7[%c0_16, %c0_17] : memref<32x256xf32, #tpu.memory_space<vmem>>, vector<32x256xf32>
      tpu.vector_store %arg7[%c0_16, %c0_17], %18 {strides = array<i32>} : memref<32x256xf32, #tpu.memory_space<vmem>>, vector<32x256xf32>,
    } else {
    }
    return
  }
  func.func @transform_0(%arg0: i32, %arg1: i32, %arg2: i32) -> (i32, i32) {
    %c0_i32 = arith.constant 0 : i32
    return %arg0, %arg2 : i32, i32
  }
  func.func @transform_1(%arg0: i32, %arg1: i32, %arg2: i32) -> (i32, i32) {
    %c0_i32 = arith.constant 0 : i32
    return %arg2, %arg1 : i32, i32
  }
  func.func @transform_2(%arg0: i32, %arg1: i32, %arg2: i32) -> (i32, i32) {
    %c0_i32 = arith.constant 0 : i32
    %c0_i32_0 = arith.constant 0 : i32
    return %c0_i32, %arg1 : i32, i32
  }
  func.func @transform_3(%arg0: i32, %arg1: i32, %arg2: i32) -> (i32, i32) {
    %c0_i32 = arith.constant 0 : i32
    %c0_i32_0 = arith.constant 0 : i32
    return %c0_i32, %arg1 : i32, i32
  }
  func.func @transform_4(%arg0: i32, %arg1: i32, %arg2: i32) -> (i32, i32) {
    %c0_i32 = arith.constant 0 : i32
    return %arg0, %arg1 : i32, i32
  }
}

module attributes {stable_mosaic.version = 11 : i64} {
  func.func @_mm_kernel(%arg0: i32, %arg1: i32, %arg2: i32, %arg3: memref<32x128xbf16, #tpu.memory_space<vmem>>, %arg4: memref<128x256xbf16, #tpu.memory_space<vmem>>, %arg5: memref<1x256xf32, #tpu.memory_space<vmem>>, %arg6: memref<1x256xf32, #tpu.memory_space<vmem>>, %arg7: memref<32x256xf32, #tpu.memory_space<vmem>>, %arg8: memref<32x256xf32, #tpu.memory_space<vmem>>, %arg9: memref<32x256xf32, #tpu.memory_space<vmem>>) attributes {dimension_semantics = [#tpu.dimension_semantics<parallel>, #tpu.dimension_semantics<parallel>, #tpu.dimension_semantics<arbitrary>], iteration_bounds = array<i64: 1, 1, 1>, scalar_prefetch = 0 : i64, scratch_operands = 1 : i64, tpu.core_type = #tpu.core_type<tc>, window_params = [{transform_indices = @transform_0, window_bounds = array<i64: 32, 128>}, {transform_indices = @transform_1, window_bounds = array<i64: 128, 256>}, {transform_indices = @transform_2, window_bounds = array<i64: 1, 256>}, {transform_indices = @transform_3, window_bounds = array<i64: 1, 256>}, {transform_indices = @transform_4, window_bounds = array<i64: 32, 256>}, {transform_indices = @transform_5, window_bounds = array<i64: 32, 256>}]} {
    %c0_i32 = arith.constant 0 : i32
    %0 = arith.cmpi eq, %arg2, %c0_i32 : i32
    %1 = arith.extui %0 : i1 to i32
    %c0_i32_0 = arith.constant 0 : i32
    %2 = arith.cmpi ne, %1, %c0_i32_0 : i32
    scf.if %2 {
      %cst_10 = arith.constant 0.000000e+00 : f32
      %12 = vector.broadcast %cst_10 : f32 to vector<32x256xf32>
      %c0_11 = arith.constant 0 : index
      %c0_12 = arith.constant 0 : index
      %13 = vector.load %arg9[%c0_11, %c0_12] : memref<32x256xf32, #tpu.memory_space<vmem>>, vector<32x256xf32>
      tpu.vector_store %arg9[%c0_11, %c0_12], %12 {strides = array<i32>} : memref<32x256xf32, #tpu.memory_space<vmem>>, vector<32x256xf32>,
    } else {
    }
    %c0 = arith.constant 0 : index
    %c0_1 = arith.constant 0 : index
    %3 = vector.load %arg9[%c0, %c0_1] : memref<32x256xf32, #tpu.memory_space<vmem>>, vector<32x256xf32>
    %c0_2 = arith.constant 0 : index
    %c0_3 = arith.constant 0 : index
    %4 = vector.load %arg3[%c0_2, %c0_3] : memref<32x128xbf16, #tpu.memory_space<vmem>>, vector<32x128xbf16>
    %c0_4 = arith.constant 0 : index
    %c0_5 = arith.constant 0 : index
    %5 = vector.load %arg4[%c0_4, %c0_5] : memref<128x256xbf16, #tpu.memory_space<vmem>>, vector<128x256xbf16>
    %cst = arith.constant dense<0.000000e+00> : vector<32x256xf32>
    %6 = tpu.matmul %4, %5, %cst {dimension_numbers = #tpu.dot_dimension_numbers<[1], [0], [0], [1], [0, 0, 1, 1], [], []>} : vector<32x128xbf16>, vector<128x256xbf16>, vector<32x256xf32> -> vector<32x256xf32>
    %7 = arith.addf %3, %6 : vector<32x256xf32>
    %c0_6 = arith.constant 0 : index
    %c0_7 = arith.constant 0 : index
    %8 = vector.load %arg9[%c0_6, %c0_7] : memref<32x256xf32, #tpu.memory_space<vmem>>, vector<32x256xf32>
    tpu.vector_store %arg9[%c0_6, %c0_7], %7 {strides = array<i32>} : memref<32x256xf32, #tpu.memory_space<vmem>>, vector<32x256xf32>,
    %c0_i32_8 = arith.constant 0 : i32
    %9 = arith.cmpi eq, %arg2, %c0_i32_8 : i32
    %10 = arith.extui %9 : i1 to i32
    %c0_i32_9 = arith.constant 0 : i32
    %11 = arith.cmpi ne, %10, %c0_i32_9 : i32
    scf.if %11 {
      %c0_10 = arith.constant 0 : index
      %c0_11 = arith.constant 0 : index
      %12 = vector.load %arg9[%c0_10, %c0_11] : memref<32x256xf32, #tpu.memory_space<vmem>>, vector<32x256xf32>
      %c0_12 = arith.constant 0 : index
      %c0_13 = arith.constant 0 : index
      %13 = vector.load %arg5[%c0_12, %c0_13] : memref<1x256xf32, #tpu.memory_space<vmem>>, vector<1x256xf32>
      %14 = vector.broadcast %13 : vector<1x256xf32> to vector<32x256xf32>
      %15 = arith.mulf %12, %14 : vector<32x256xf32>
      %c0_14 = arith.constant 0 : index
      %c0_15 = arith.constant 0 : index
      %16 = vector.load %arg6[%c0_14, %c0_15] : memref<1x256xf32, #tpu.memory_space<vmem>>, vector<1x256xf32>
      %17 = vector.broadcast %16 : vector<1x256xf32> to vector<32x256xf32>
      %18 = arith.addf %15, %17 : vector<32x256xf32>
      %c0_16 = arith.constant 0 : index
      %c0_17 = arith.constant 0 : index
      %19 = vector.load %arg7[%c0_16, %c0_17] : memref<32x256xf32, #tpu.memory_space<vmem>>, vector<32x256xf32>
      %20 = arith.addf %18, %19 : vector<32x256xf32>
      %cst_18 = arith.constant 0.000000e+00 : f32
      %21 = vector.broadcast %cst_18 : f32 to vector<32x256xf32>
      %22 = arith.maximumf %20, %21 : vector<32x256xf32>
      %c0_19 = arith.constant 0 : index
      %c0_20 = arith.constant 0 : index
      %23 = vector.load %arg8[%c0_19, %c0_20] : memref<32x256xf32, #tpu.memory_space<vmem>>, vector<32x256xf32>
      tpu.vector_store %arg8[%c0_19, %c0_20], %22 {strides = array<i32>} : memref<32x256xf32, #tpu.memory_space<vmem>>, vector<32x256xf32>,
    } else {
    }
    return
  }
  func.func @transform_0(%arg0: i32, %arg1: i32, %arg2: i32) -> (i32, i32) {
    %c0_i32 = arith.constant 0 : i32
    return %arg0, %arg2 : i32, i32
  }
  func.func @transform_1(%arg0: i32, %arg1: i32, %arg2: i32) -> (i32, i32) {
    %c0_i32 = arith.constant 0 : i32
    return %arg2, %arg1 : i32, i32
  }
  func.func @transform_2(%arg0: i32, %arg1: i32, %arg2: i32) -> (i32, i32) {
    %c0_i32 = arith.constant 0 : i32
    %c0_i32_0 = arith.constant 0 : i32
    return %c0_i32, %arg1 : i32, i32
  }
  func.func @transform_3(%arg0: i32, %arg1: i32, %arg2: i32) -> (i32, i32) {
    %c0_i32 = arith.constant 0 : i32
    %c0_i32_0 = arith.constant 0 : i32
    return %c0_i32, %arg1 : i32, i32
  }
  func.func @transform_4(%arg0: i32, %arg1: i32, %arg2: i32) -> (i32, i32) {
    %c0_i32 = arith.constant 0 : i32
    return %arg0, %arg1 : i32, i32
  }
  func.func @transform_5(%arg0: i32, %arg1: i32, %arg2: i32) -> (i32, i32) {
    %c0_i32 = arith.constant 0 : i32
    return %arg0, %arg1 : i32, i32
  }
}

module attributes {stable_mosaic.version = 11 : i64} {
  func.func @_mm_kernel(%arg0: i32, %arg1: i32, %arg2: i32, %arg3: memref<32x256xbf16, #tpu.memory_space<vmem>>, %arg4: memref<256x128xbf16, #tpu.memory_space<vmem>>, %arg5: memref<1x128xf32, #tpu.memory_space<vmem>>, %arg6: memref<1x128xf32, #tpu.memory_space<vmem>>, %arg7: memref<32x128xf32, #tpu.memory_space<vmem>>, %arg8: memref<32x128xf32, #tpu.memory_space<vmem>>) attributes {dimension_semantics = [#tpu.dimension_semantics<parallel>, #tpu.dimension_semantics<parallel>, #tpu.dimension_semantics<arbitrary>], iteration_bounds = array<i64: 1, 1, 1>, scalar_prefetch = 0 : i64, scratch_operands = 1 : i64, tpu.core_type = #tpu.core_type<tc>, window_params = [{transform_indices = @transform_0, window_bounds = array<i64: 32, 256>}, {transform_indices = @transform_1, window_bounds = array<i64: 256, 128>}, {transform_indices = @transform_2, window_bounds = array<i64: 1, 128>}, {transform_indices = @transform_3, window_bounds = array<i64: 1, 128>}, {transform_indices = @transform_4, window_bounds = array<i64: 32, 128>}]} {
    %c0_i32 = arith.constant 0 : i32
    %0 = arith.cmpi eq, %arg2, %c0_i32 : i32
    %1 = arith.extui %0 : i1 to i32
    %c0_i32_0 = arith.constant 0 : i32
    %2 = arith.cmpi ne, %1, %c0_i32_0 : i32
    scf.if %2 {
      %cst_10 = arith.constant 0.000000e+00 : f32
      %12 = vector.broadcast %cst_10 : f32 to vector<32x128xf32>
      %c0_11 = arith.constant 0 : index
      %c0_12 = arith.constant 0 : index
      %13 = vector.load %arg8[%c0_11, %c0_12] : memref<32x128xf32, #tpu.memory_space<vmem>>, vector<32x128xf32>
      tpu.vector_store %arg8[%c0_11, %c0_12], %12 {strides = array<i32>} : memref<32x128xf32, #tpu.memory_space<vmem>>, vector<32x128xf32>,
    } else {
    }
    %c0 = arith.constant 0 : index
    %c0_1 = arith.constant 0 : index
    %3 = vector.load %arg8[%c0, %c0_1] : memref<32x128xf32, #tpu.memory_space<vmem>>, vector<32x128xf32>
    %c0_2 = arith.constant 0 : index
    %c0_3 = arith.constant 0 : index
    %4 = vector.load %arg3[%c0_2, %c0_3] : memref<32x256xbf16, #tpu.memory_space<vmem>>, vector<32x256xbf16>
    %c0_4 = arith.constant 0 : index
    %c0_5 = arith.constant 0 : index
    %5 = vector.load %arg4[%c0_4, %c0_5] : memref<256x128xbf16, #tpu.memory_space<vmem>>, vector<256x128xbf16>
    %cst = arith.constant dense<0.000000e+00> : vector<32x128xf32>
    %6 = tpu.matmul %4, %5, %cst {dimension_numbers = #tpu.dot_dimension_numbers<[1], [0], [0], [1], [0, 0, 1, 1], [], []>} : vector<32x256xbf16>, vector<256x128xbf16>, vector<32x128xf32> -> vector<32x128xf32>
    %7 = arith.addf %3, %6 : vector<32x128xf32>
    %c0_6 = arith.constant 0 : index
    %c0_7 = arith.constant 0 : index
    %8 = vector.load %arg8[%c0_6, %c0_7] : memref<32x128xf32, #tpu.memory_space<vmem>>, vector<32x128xf32>
    tpu.vector_store %arg8[%c0_6, %c0_7], %7 {strides = array<i32>} : memref<32x128xf32, #tpu.memory_space<vmem>>, vector<32x128xf32>,
    %c0_i32_8 = arith.constant 0 : i32
    %9 = arith.cmpi eq, %arg2, %c0_i32_8 : i32
    %10 = arith.extui %9 : i1 to i32
    %c0_i32_9 = arith.constant 0 : i32
    %11 = arith.cmpi ne, %10, %c0_i32_9 : i32
    scf.if %11 {
      %c0_10 = arith.constant 0 : index
      %c0_11 = arith.constant 0 : index
      %12 = vector.load %arg8[%c0_10, %c0_11] : memref<32x128xf32, #tpu.memory_space<vmem>>, vector<32x128xf32>
      %c0_12 = arith.constant 0 : index
      %c0_13 = arith.constant 0 : index
      %13 = vector.load %arg5[%c0_12, %c0_13] : memref<1x128xf32, #tpu.memory_space<vmem>>, vector<1x128xf32>
      %14 = vector.broadcast %13 : vector<1x128xf32> to vector<32x128xf32>
      %15 = arith.mulf %12, %14 : vector<32x128xf32>
      %c0_14 = arith.constant 0 : index
      %c0_15 = arith.constant 0 : index
      %16 = vector.load %arg6[%c0_14, %c0_15] : memref<1x128xf32, #tpu.memory_space<vmem>>, vector<1x128xf32>
      %17 = vector.broadcast %16 : vector<1x128xf32> to vector<32x128xf32>
      %18 = arith.addf %15, %17 : vector<32x128xf32>
      %cst_16 = arith.constant 0.000000e+00 : f32
      %19 = vector.broadcast %cst_16 : f32 to vector<32x128xf32>
      %20 = arith.maximumf %18, %19 : vector<32x128xf32>
      %c0_17 = arith.constant 0 : index
      %c0_18 = arith.constant 0 : index
      %21 = vector.load %arg7[%c0_17, %c0_18] : memref<32x128xf32, #tpu.memory_space<vmem>>, vector<32x128xf32>
      tpu.vector_store %arg7[%c0_17, %c0_18], %20 {strides = array<i32>} : memref<32x128xf32, #tpu.memory_space<vmem>>, vector<32x128xf32>,
    } else {
    }
    return
  }
  func.func @transform_0(%arg0: i32, %arg1: i32, %arg2: i32) -> (i32, i32) {
    %c0_i32 = arith.constant 0 : i32
    return %arg0, %arg2 : i32, i32
  }
  func.func @transform_1(%arg0: i32, %arg1: i32, %arg2: i32) -> (i32, i32) {
    %c0_i32 = arith.constant 0 : i32
    return %arg2, %arg1 : i32, i32
  }
  func.func @transform_2(%arg0: i32, %arg1: i32, %arg2: i32) -> (i32, i32) {
    %c0_i32 = arith.constant 0 : i32
    %c0_i32_0 = arith.constant 0 : i32
    return %c0_i32, %arg1 : i32, i32
  }
  func.func @transform_3(%arg0: i32, %arg1: i32, %arg2: i32) -> (i32, i32) {
    %c0_i32 = arith.constant 0 : i32
    %c0_i32_0 = arith.constant 0 : i32
    return %c0_i32, %arg1 : i32, i32
  }
  func.func @transform_4(%arg0: i32, %arg1: i32, %arg2: i32) -> (i32, i32) {
    %c0_i32 = arith.constant 0 : i32
    return %arg0, %arg1 : i32, i32
  }
}

module attributes {stable_mosaic.version = 11 : i64} {
  func.func @_mm_kernel(%arg0: i32, %arg1: i32, %arg2: i32, %arg3: memref<8x256xbf16, #tpu.memory_space<vmem>>, %arg4: memref<256x128xbf16, #tpu.memory_space<vmem>>, %arg5: memref<1x128xf32, #tpu.memory_space<vmem>>, %arg6: memref<1x128xf32, #tpu.memory_space<vmem>>, %arg7: memref<8x128xf32, #tpu.memory_space<vmem>>, %arg8: memref<8x128xf32, #tpu.memory_space<vmem>>) attributes {dimension_semantics = [#tpu.dimension_semantics<parallel>, #tpu.dimension_semantics<parallel>, #tpu.dimension_semantics<arbitrary>], iteration_bounds = array<i64: 1, 1, 1>, scalar_prefetch = 0 : i64, scratch_operands = 1 : i64, tpu.core_type = #tpu.core_type<tc>, window_params = [{transform_indices = @transform_0, window_bounds = array<i64: 8, 256>}, {transform_indices = @transform_1, window_bounds = array<i64: 256, 128>}, {transform_indices = @transform_2, window_bounds = array<i64: 1, 128>}, {transform_indices = @transform_3, window_bounds = array<i64: 1, 128>}, {transform_indices = @transform_4, window_bounds = array<i64: 8, 128>}]} {
    %c0_i32 = arith.constant 0 : i32
    %0 = arith.cmpi eq, %arg2, %c0_i32 : i32
    %1 = arith.extui %0 : i1 to i32
    %c0_i32_0 = arith.constant 0 : i32
    %2 = arith.cmpi ne, %1, %c0_i32_0 : i32
    scf.if %2 {
      %cst_10 = arith.constant 0.000000e+00 : f32
      %12 = vector.broadcast %cst_10 : f32 to vector<8x128xf32>
      %c0_11 = arith.constant 0 : index
      %c0_12 = arith.constant 0 : index
      %13 = vector.load %arg8[%c0_11, %c0_12] : memref<8x128xf32, #tpu.memory_space<vmem>>, vector<8x128xf32>
      tpu.vector_store %arg8[%c0_11, %c0_12], %12 {strides = array<i32>} : memref<8x128xf32, #tpu.memory_space<vmem>>, vector<8x128xf32>,
    } else {
    }
    %c0 = arith.constant 0 : index
    %c0_1 = arith.constant 0 : index
    %3 = vector.load %arg8[%c0, %c0_1] : memref<8x128xf32, #tpu.memory_space<vmem>>, vector<8x128xf32>
    %c0_2 = arith.constant 0 : index
    %c0_3 = arith.constant 0 : index
    %4 = vector.load %arg3[%c0_2, %c0_3] : memref<8x256xbf16, #tpu.memory_space<vmem>>, vector<8x256xbf16>
    %c0_4 = arith.constant 0 : index
    %c0_5 = arith.constant 0 : index
    %5 = vector.load %arg4[%c0_4, %c0_5] : memref<256x128xbf16, #tpu.memory_space<vmem>>, vector<256x128xbf16>
    %cst = arith.constant dense<0.000000e+00> : vector<8x128xf32>
    %6 = tpu.matmul %4, %5, %cst {dimension_numbers = #tpu.dot_dimension_numbers<[1], [0], [0], [1], [0, 0, 1, 1], [], []>} : vector<8x256xbf16>, vector<256x128xbf16>, vector<8x128xf32> -> vector<8x128xf32>
    %7 = arith.addf %3, %6 : vector<8x128xf32>
    %c0_6 = arith.constant 0 : index
    %c0_7 = arith.constant 0 : index
    %8 = vector.load %arg8[%c0_6, %c0_7] : memref<8x128xf32, #tpu.memory_space<vmem>>, vector<8x128xf32>
    tpu.vector_store %arg8[%c0_6, %c0_7], %7 {strides = array<i32>} : memref<8x128xf32, #tpu.memory_space<vmem>>, vector<8x128xf32>,
    %c0_i32_8 = arith.constant 0 : i32
    %9 = arith.cmpi eq, %arg2, %c0_i32_8 : i32
    %10 = arith.extui %9 : i1 to i32
    %c0_i32_9 = arith.constant 0 : i32
    %11 = arith.cmpi ne, %10, %c0_i32_9 : i32
    scf.if %11 {
      %c0_10 = arith.constant 0 : index
      %c0_11 = arith.constant 0 : index
      %12 = vector.load %arg8[%c0_10, %c0_11] : memref<8x128xf32, #tpu.memory_space<vmem>>, vector<8x128xf32>
      %c0_12 = arith.constant 0 : index
      %c0_13 = arith.constant 0 : index
      %13 = vector.load %arg5[%c0_12, %c0_13] : memref<1x128xf32, #tpu.memory_space<vmem>>, vector<1x128xf32>
      %14 = vector.broadcast %13 : vector<1x128xf32> to vector<8x128xf32>
      %15 = arith.mulf %12, %14 : vector<8x128xf32>
      %c0_14 = arith.constant 0 : index
      %c0_15 = arith.constant 0 : index
      %16 = vector.load %arg6[%c0_14, %c0_15] : memref<1x128xf32, #tpu.memory_space<vmem>>, vector<1x128xf32>
      %17 = vector.broadcast %16 : vector<1x128xf32> to vector<8x128xf32>
      %18 = arith.addf %15, %17 : vector<8x128xf32>
      %cst_16 = arith.constant 0.000000e+00 : f32
      %19 = vector.broadcast %cst_16 : f32 to vector<8x128xf32>
      %20 = arith.maximumf %18, %19 : vector<8x128xf32>
      %c0_17 = arith.constant 0 : index
      %c0_18 = arith.constant 0 : index
      %21 = vector.load %arg7[%c0_17, %c0_18] : memref<8x128xf32, #tpu.memory_space<vmem>>, vector<8x128xf32>
      tpu.vector_store %arg7[%c0_17, %c0_18], %20 {strides = array<i32>} : memref<8x128xf32, #tpu.memory_space<vmem>>, vector<8x128xf32>,
    } else {
    }
    return
  }
  func.func @transform_0(%arg0: i32, %arg1: i32, %arg2: i32) -> (i32, i32) {
    %c0_i32 = arith.constant 0 : i32
    return %arg0, %arg2 : i32, i32
  }
  func.func @transform_1(%arg0: i32, %arg1: i32, %arg2: i32) -> (i32, i32) {
    %c0_i32 = arith.constant 0 : i32
    return %arg2, %arg1 : i32, i32
  }
  func.func @transform_2(%arg0: i32, %arg1: i32, %arg2: i32) -> (i32, i32) {
    %c0_i32 = arith.constant 0 : i32
    %c0_i32_0 = arith.constant 0 : i32
    return %c0_i32, %arg1 : i32, i32
  }
  func.func @transform_3(%arg0: i32, %arg1: i32, %arg2: i32) -> (i32, i32) {
    %c0_i32 = arith.constant 0 : i32
    %c0_i32_0 = arith.constant 0 : i32
    return %c0_i32, %arg1 : i32, i32
  }
  func.func @transform_4(%arg0: i32, %arg1: i32, %arg2: i32) -> (i32, i32) {
    %c0_i32 = arith.constant 0 : i32
    return %arg0, %arg1 : i32, i32
  }
}

module attributes {stable_mosaic.version = 11 : i64} {
  func.func @_conv3x3_kernel(%arg0: i32, %arg1: memref<1x32x128xbf16, #tpu.memory_space<vmem>>, %arg2: memref<9x128x128xbf16, #tpu.memory_space<vmem>>, %arg3: memref<1x128xf32, #tpu.memory_space<vmem>>, %arg4: memref<1x128xf32, #tpu.memory_space<vmem>>, %arg5: memref<1x16x128xf32, #tpu.memory_space<vmem>>) attributes {dimension_semantics = [#tpu.dimension_semantics<parallel>], iteration_bounds = array<i64: 2>, scalar_prefetch = 0 : i64, scratch_operands = 0 : i64, tpu.core_type = #tpu.core_type<tc>, window_params = [{transform_indices = @transform_0, window_bounds = array<i64: 1, 32, 128>}, {pipeline_mode = #tpu.pipeline_mode<synchronous>, transform_indices = @transform_1, window_bounds = array<i64: 9, 128, 128>}, {pipeline_mode = #tpu.pipeline_mode<synchronous>, transform_indices = @transform_2, window_bounds = array<i64: 1, 128>}, {pipeline_mode = #tpu.pipeline_mode<synchronous>, transform_indices = @transform_3, window_bounds = array<i64: 1, 128>}, {transform_indices = @transform_4, window_bounds = array<i64: 1, 16, 128>}]} {
    %cst = arith.constant 0.000000e+00 : f32
    %0 = vector.broadcast %cst : f32 to vector<16x128xf32>
    %c0 = arith.constant 0 : index
    %c0_0 = arith.constant 0 : index
    %c0_1 = arith.constant 0 : index
    %1 = vector.load %arg1[%c0, %c0_0, %c0_1] : memref<1x32x128xbf16, #tpu.memory_space<vmem>>, vector<1x16x128xbf16>
    %2 = vector.shape_cast %1 : vector<1x16x128xbf16> to vector<16x128xbf16>
    %c0_2 = arith.constant 0 : index
    %c0_3 = arith.constant 0 : index
    %c0_4 = arith.constant 0 : index
    %3 = vector.load %arg2[%c0_2, %c0_3, %c0_4] : memref<9x128x128xbf16, #tpu.memory_space<vmem>>, vector<1x128x128xbf16>
    %4 = vector.shape_cast %3 : vector<1x128x128xbf16> to vector<128x128xbf16>
    %cst_5 = arith.constant dense<0.000000e+00> : vector<16x128xf32>
    %5 = tpu.matmul %2, %4, %cst_5 {dimension_numbers = #tpu.dot_dimension_numbers<[1], [0], [0], [1], [0, 0, 1, 1], [], []>} : vector<16x128xbf16>, vector<128x128xbf16>, vector<16x128xf32> -> vector<16x128xf32>
    %6 = arith.addf %0, %5 : vector<16x128xf32>
    %c0_6 = arith.constant 0 : index
    %c1 = arith.constant 1 : index
    %c0_7 = arith.constant 0 : index
    %7 = vector.load %arg1[%c0_6, %c1, %c0_7] : memref<1x32x128xbf16, #tpu.memory_space<vmem>>, vector<1x16x128xbf16>
    %8 = vector.shape_cast %7 : vector<1x16x128xbf16> to vector<16x128xbf16>
    %c1_8 = arith.constant 1 : index
    %c0_9 = arith.constant 0 : index
    %c0_10 = arith.constant 0 : index
    %9 = vector.load %arg2[%c1_8, %c0_9, %c0_10] : memref<9x128x128xbf16, #tpu.memory_space<vmem>>, vector<1x128x128xbf16>
    %10 = vector.shape_cast %9 : vector<1x128x128xbf16> to vector<128x128xbf16>
    %cst_11 = arith.constant dense<0.000000e+00> : vector<16x128xf32>
    %11 = tpu.matmul %8, %10, %cst_11 {dimension_numbers = #tpu.dot_dimension_numbers<[1], [0], [0], [1], [0, 0, 1, 1], [], []>} : vector<16x128xbf16>, vector<128x128xbf16>, vector<16x128xf32> -> vector<16x128xf32>
    %12 = arith.addf %6, %11 : vector<16x128xf32>
    %c0_12 = arith.constant 0 : index
    %c2 = arith.constant 2 : index
    %c0_13 = arith.constant 0 : index
    %13 = vector.load %arg1[%c0_12, %c2, %c0_13] : memref<1x32x128xbf16, #tpu.memory_space<vmem>>, vector<1x16x128xbf16>
    %14 = vector.shape_cast %13 : vector<1x16x128xbf16> to vector<16x128xbf16>
    %c2_14 = arith.constant 2 : index
    %c0_15 = arith.constant 0 : index
    %c0_16 = arith.constant 0 : index
    %15 = vector.load %arg2[%c2_14, %c0_15, %c0_16] : memref<9x128x128xbf16, #tpu.memory_space<vmem>>, vector<1x128x128xbf16>
    %16 = vector.shape_cast %15 : vector<1x128x128xbf16> to vector<128x128xbf16>
    %cst_17 = arith.constant dense<0.000000e+00> : vector<16x128xf32>
    %17 = tpu.matmul %14, %16, %cst_17 {dimension_numbers = #tpu.dot_dimension_numbers<[1], [0], [0], [1], [0, 0, 1, 1], [], []>} : vector<16x128xbf16>, vector<128x128xbf16>, vector<16x128xf32> -> vector<16x128xf32>
    %18 = arith.addf %12, %17 : vector<16x128xf32>
    %c0_18 = arith.constant 0 : index
    %c4 = arith.constant 4 : index
    %c0_19 = arith.constant 0 : index
    %19 = vector.load %arg1[%c0_18, %c4, %c0_19] : memref<1x32x128xbf16, #tpu.memory_space<vmem>>, vector<1x16x128xbf16>
    %20 = vector.shape_cast %19 : vector<1x16x128xbf16> to vector<16x128xbf16>
    %c3 = arith.constant 3 : index
    %c0_20 = arith.constant 0 : index
    %c0_21 = arith.constant 0 : index
    %21 = vector.load %arg2[%c3, %c0_20, %c0_21] : memref<9x128x128xbf16, #tpu.memory_space<vmem>>, vector<1x128x128xbf16>
    %22 = vector.shape_cast %21 : vector<1x128x128xbf16> to vector<128x128xbf16>
    %cst_22 = arith.constant dense<0.000000e+00> : vector<16x128xf32>
    %23 = tpu.matmul %20, %22, %cst_22 {dimension_numbers = #tpu.dot_dimension_numbers<[1], [0], [0], [1], [0, 0, 1, 1], [], []>} : vector<16x128xbf16>, vector<128x128xbf16>, vector<16x128xf32> -> vector<16x128xf32>
    %24 = arith.addf %18, %23 : vector<16x128xf32>
    %c0_23 = arith.constant 0 : index
    %c5 = arith.constant 5 : index
    %c0_24 = arith.constant 0 : index
    %25 = vector.load %arg1[%c0_23, %c5, %c0_24] : memref<1x32x128xbf16, #tpu.memory_space<vmem>>, vector<1x16x128xbf16>
    %26 = vector.shape_cast %25 : vector<1x16x128xbf16> to vector<16x128xbf16>
    %c4_25 = arith.constant 4 : index
    %c0_26 = arith.constant 0 : index
    %c0_27 = arith.constant 0 : index
    %27 = vector.load %arg2[%c4_25, %c0_26, %c0_27] : memref<9x128x128xbf16, #tpu.memory_space<vmem>>, vector<1x128x128xbf16>
    %28 = vector.shape_cast %27 : vector<1x128x128xbf16> to vector<128x128xbf16>
    %cst_28 = arith.constant dense<0.000000e+00> : vector<16x128xf32>
    %29 = tpu.matmul %26, %28, %cst_28 {dimension_numbers = #tpu.dot_dimension_numbers<[1], [0], [0], [1], [0, 0, 1, 1], [], []>} : vector<16x128xbf16>, vector<128x128xbf16>, vector<16x128xf32> -> vector<16x128xf32>
    %30 = arith.addf %24, %29 : vector<16x128xf32>
    %c0_29 = arith.constant 0 : index
    %c6 = arith.constant 6 : index
    %c0_30 = arith.constant 0 : index
    %31 = vector.load %arg1[%c0_29, %c6, %c0_30] : memref<1x32x128xbf16, #tpu.memory_space<vmem>>, vector<1x16x128xbf16>
    %32 = vector.shape_cast %31 : vector<1x16x128xbf16> to vector<16x128xbf16>
    %c5_31 = arith.constant 5 : index
    %c0_32 = arith.constant 0 : index
    %c0_33 = arith.constant 0 : index
    %33 = vector.load %arg2[%c5_31, %c0_32, %c0_33] : memref<9x128x128xbf16, #tpu.memory_space<vmem>>, vector<1x128x128xbf16>
    %34 = vector.shape_cast %33 : vector<1x128x128xbf16> to vector<128x128xbf16>
    %cst_34 = arith.constant dense<0.000000e+00> : vector<16x128xf32>
    %35 = tpu.matmul %32, %34, %cst_34 {dimension_numbers = #tpu.dot_dimension_numbers<[1], [0], [0], [1], [0, 0, 1, 1], [], []>} : vector<16x128xbf16>, vector<128x128xbf16>, vector<16x128xf32> -> vector<16x128xf32>
    %36 = arith.addf %30, %35 : vector<16x128xf32>
    %c0_35 = arith.constant 0 : index
    %c8 = arith.constant 8 : index
    %c0_36 = arith.constant 0 : index
    %37 = vector.load %arg1[%c0_35, %c8, %c0_36] : memref<1x32x128xbf16, #tpu.memory_space<vmem>>, vector<1x16x128xbf16>
    %38 = vector.shape_cast %37 : vector<1x16x128xbf16> to vector<16x128xbf16>
    %c6_37 = arith.constant 6 : index
    %c0_38 = arith.constant 0 : index
    %c0_39 = arith.constant 0 : index
    %39 = vector.load %arg2[%c6_37, %c0_38, %c0_39] : memref<9x128x128xbf16, #tpu.memory_space<vmem>>, vector<1x128x128xbf16>
    %40 = vector.shape_cast %39 : vector<1x128x128xbf16> to vector<128x128xbf16>
    %cst_40 = arith.constant dense<0.000000e+00> : vector<16x128xf32>
    %41 = tpu.matmul %38, %40, %cst_40 {dimension_numbers = #tpu.dot_dimension_numbers<[1], [0], [0], [1], [0, 0, 1, 1], [], []>} : vector<16x128xbf16>, vector<128x128xbf16>, vector<16x128xf32> -> vector<16x128xf32>
    %42 = arith.addf %36, %41 : vector<16x128xf32>
    %c0_41 = arith.constant 0 : index
    %c9 = arith.constant 9 : index
    %c0_42 = arith.constant 0 : index
    %43 = vector.load %arg1[%c0_41, %c9, %c0_42] : memref<1x32x128xbf16, #tpu.memory_space<vmem>>, vector<1x16x128xbf16>
    %44 = vector.shape_cast %43 : vector<1x16x128xbf16> to vector<16x128xbf16>
    %c7 = arith.constant 7 : index
    %c0_43 = arith.constant 0 : index
    %c0_44 = arith.constant 0 : index
    %45 = vector.load %arg2[%c7, %c0_43, %c0_44] : memref<9x128x128xbf16, #tpu.memory_space<vmem>>, vector<1x128x128xbf16>
    %46 = vector.shape_cast %45 : vector<1x128x128xbf16> to vector<128x128xbf16>
    %cst_45 = arith.constant dense<0.000000e+00> : vector<16x128xf32>
    %47 = tpu.matmul %44, %46, %cst_45 {dimension_numbers = #tpu.dot_dimension_numbers<[1], [0], [0], [1], [0, 0, 1, 1], [], []>} : vector<16x128xbf16>, vector<128x128xbf16>, vector<16x128xf32> -> vector<16x128xf32>
    %48 = arith.addf %42, %47 : vector<16x128xf32>
    %c0_46 = arith.constant 0 : index
    %c10 = arith.constant 10 : index
    %c0_47 = arith.constant 0 : index
    %49 = vector.load %arg1[%c0_46, %c10, %c0_47] : memref<1x32x128xbf16, #tpu.memory_space<vmem>>, vector<1x16x128xbf16>
    %50 = vector.shape_cast %49 : vector<1x16x128xbf16> to vector<16x128xbf16>
    %c8_48 = arith.constant 8 : index
    %c0_49 = arith.constant 0 : index
    %c0_50 = arith.constant 0 : index
    %51 = vector.load %arg2[%c8_48, %c0_49, %c0_50] : memref<9x128x128xbf16, #tpu.memory_space<vmem>>, vector<1x128x128xbf16>
    %52 = vector.shape_cast %51 : vector<1x128x128xbf16> to vector<128x128xbf16>
    %cst_51 = arith.constant dense<0.000000e+00> : vector<16x128xf32>
    %53 = tpu.matmul %50, %52, %cst_51 {dimension_numbers = #tpu.dot_dimension_numbers<[1], [0], [0], [1], [0, 0, 1, 1], [], []>} : vector<16x128xbf16>, vector<128x128xbf16>, vector<16x128xf32> -> vector<16x128xf32>
    %54 = arith.addf %48, %53 : vector<16x128xf32>
    %c0_52 = arith.constant 0 : index
    %c0_53 = arith.constant 0 : index
    %55 = vector.load %arg3[%c0_52, %c0_53] : memref<1x128xf32, #tpu.memory_space<vmem>>, vector<1x128xf32>
    %56 = vector.broadcast %55 : vector<1x128xf32> to vector<16x128xf32>
    %57 = arith.mulf %54, %56 : vector<16x128xf32>
    %c0_54 = arith.constant 0 : index
    %c0_55 = arith.constant 0 : index
    %58 = vector.load %arg4[%c0_54, %c0_55] : memref<1x128xf32, #tpu.memory_space<vmem>>, vector<1x128xf32>
    %59 = vector.broadcast %58 : vector<1x128xf32> to vector<16x128xf32>
    %60 = arith.addf %57, %59 : vector<16x128xf32>
    %cst_56 = arith.constant 0.000000e+00 : f32
    %61 = vector.broadcast %cst_56 : f32 to vector<16x128xf32>
    %62 = arith.maximumf %60, %61 : vector<16x128xf32>
    %c0_57 = arith.constant 0 : index
    %c0_58 = arith.constant 0 : index
    %c0_59 = arith.constant 0 : index
    %63 = vector.load %arg5[%c0_57, %c0_58, %c0_59] : memref<1x16x128xf32, #tpu.memory_space<vmem>>, vector<1x16x128xf32>
    %64 = vector.shape_cast %63 : vector<1x16x128xf32> to vector<16x128xf32>
    %65 = vector.shape_cast %62 : vector<16x128xf32> to vector<1x16x128xf32>
    tpu.vector_store %arg5[%c0_57, %c0_58, %c0_59], %65 {strides = array<i32>} : memref<1x16x128xf32, #tpu.memory_space<vmem>>, vector<1x16x128xf32>,
    return
  }
  func.func @transform_0(%arg0: i32) -> (i32, i32, i32) {
    %c0_i32 = arith.constant 0 : i32
    %c0_i32_0 = arith.constant 0 : i32
    %c0_i32_1 = arith.constant 0 : i32
    return %arg0, %c0_i32, %c0_i32_0 : i32, i32, i32
  }
  func.func @transform_1(%arg0: i32) -> (i32, i32, i32) {
    %c0_i32 = arith.constant 0 : i32
    %c0_i32_0 = arith.constant 0 : i32
    %c0_i32_1 = arith.constant 0 : i32
    %c0_i32_2 = arith.constant 0 : i32
    return %c0_i32, %c0_i32_0, %c0_i32_1 : i32, i32, i32
  }
  func.func @transform_2(%arg0: i32) -> (i32, i32) {
    %c0_i32 = arith.constant 0 : i32
    %c0_i32_0 = arith.constant 0 : i32
    %c0_i32_1 = arith.constant 0 : i32
    return %c0_i32, %c0_i32_0 : i32, i32
  }
  func.func @transform_3(%arg0: i32) -> (i32, i32) {
    %c0_i32 = arith.constant 0 : i32
    %c0_i32_0 = arith.constant 0 : i32
    %c0_i32_1 = arith.constant 0 : i32
    return %c0_i32, %c0_i32_0 : i32, i32
  }
  func.func @transform_4(%arg0: i32) -> (i32, i32, i32) {
    %c0_i32 = arith.constant 0 : i32
    %c0_i32_0 = arith.constant 0 : i32
    %c0_i32_1 = arith.constant 0 : i32
    return %arg0, %c0_i32, %c0_i32_0 : i32, i32, i32
  }
}

module attributes {stable_mosaic.version = 11 : i64} {
  func.func @_mm_kernel(%arg0: i32, %arg1: i32, %arg2: i32, %arg3: memref<8x256xbf16, #tpu.memory_space<vmem>>, %arg4: memref<256x256xbf16, #tpu.memory_space<vmem>>, %arg5: memref<1x256xf32, #tpu.memory_space<vmem>>, %arg6: memref<1x256xf32, #tpu.memory_space<vmem>>, %arg7: memref<8x256xf32, #tpu.memory_space<vmem>>, %arg8: memref<8x256xf32, #tpu.memory_space<vmem>>) attributes {dimension_semantics = [#tpu.dimension_semantics<parallel>, #tpu.dimension_semantics<parallel>, #tpu.dimension_semantics<arbitrary>], iteration_bounds = array<i64: 1, 2, 1>, scalar_prefetch = 0 : i64, scratch_operands = 1 : i64, tpu.core_type = #tpu.core_type<tc>, window_params = [{transform_indices = @transform_0, window_bounds = array<i64: 8, 256>}, {transform_indices = @transform_1, window_bounds = array<i64: 256, 256>}, {transform_indices = @transform_2, window_bounds = array<i64: 1, 256>}, {transform_indices = @transform_3, window_bounds = array<i64: 1, 256>}, {transform_indices = @transform_4, window_bounds = array<i64: 8, 256>}]} {
    %c0_i32 = arith.constant 0 : i32
    %0 = arith.cmpi eq, %arg2, %c0_i32 : i32
    %1 = arith.extui %0 : i1 to i32
    %c0_i32_0 = arith.constant 0 : i32
    %2 = arith.cmpi ne, %1, %c0_i32_0 : i32
    scf.if %2 {
      %cst_10 = arith.constant 0.000000e+00 : f32
      %12 = vector.broadcast %cst_10 : f32 to vector<8x256xf32>
      %c0_11 = arith.constant 0 : index
      %c0_12 = arith.constant 0 : index
      %13 = vector.load %arg8[%c0_11, %c0_12] : memref<8x256xf32, #tpu.memory_space<vmem>>, vector<8x256xf32>
      tpu.vector_store %arg8[%c0_11, %c0_12], %12 {strides = array<i32>} : memref<8x256xf32, #tpu.memory_space<vmem>>, vector<8x256xf32>,
    } else {
    }
    %c0 = arith.constant 0 : index
    %c0_1 = arith.constant 0 : index
    %3 = vector.load %arg8[%c0, %c0_1] : memref<8x256xf32, #tpu.memory_space<vmem>>, vector<8x256xf32>
    %c0_2 = arith.constant 0 : index
    %c0_3 = arith.constant 0 : index
    %4 = vector.load %arg3[%c0_2, %c0_3] : memref<8x256xbf16, #tpu.memory_space<vmem>>, vector<8x256xbf16>
    %c0_4 = arith.constant 0 : index
    %c0_5 = arith.constant 0 : index
    %5 = vector.load %arg4[%c0_4, %c0_5] : memref<256x256xbf16, #tpu.memory_space<vmem>>, vector<256x256xbf16>
    %cst = arith.constant dense<0.000000e+00> : vector<8x256xf32>
    %6 = tpu.matmul %4, %5, %cst {dimension_numbers = #tpu.dot_dimension_numbers<[1], [0], [0], [1], [0, 0, 1, 1], [], []>} : vector<8x256xbf16>, vector<256x256xbf16>, vector<8x256xf32> -> vector<8x256xf32>
    %7 = arith.addf %3, %6 : vector<8x256xf32>
    %c0_6 = arith.constant 0 : index
    %c0_7 = arith.constant 0 : index
    %8 = vector.load %arg8[%c0_6, %c0_7] : memref<8x256xf32, #tpu.memory_space<vmem>>, vector<8x256xf32>
    tpu.vector_store %arg8[%c0_6, %c0_7], %7 {strides = array<i32>} : memref<8x256xf32, #tpu.memory_space<vmem>>, vector<8x256xf32>,
    %c0_i32_8 = arith.constant 0 : i32
    %9 = arith.cmpi eq, %arg2, %c0_i32_8 : i32
    %10 = arith.extui %9 : i1 to i32
    %c0_i32_9 = arith.constant 0 : i32
    %11 = arith.cmpi ne, %10, %c0_i32_9 : i32
    scf.if %11 {
      %c0_10 = arith.constant 0 : index
      %c0_11 = arith.constant 0 : index
      %12 = vector.load %arg8[%c0_10, %c0_11] : memref<8x256xf32, #tpu.memory_space<vmem>>, vector<8x256xf32>
      %c0_12 = arith.constant 0 : index
      %c0_13 = arith.constant 0 : index
      %13 = vector.load %arg5[%c0_12, %c0_13] : memref<1x256xf32, #tpu.memory_space<vmem>>, vector<1x256xf32>
      %14 = vector.broadcast %13 : vector<1x256xf32> to vector<8x256xf32>
      %15 = arith.mulf %12, %14 : vector<8x256xf32>
      %c0_14 = arith.constant 0 : index
      %c0_15 = arith.constant 0 : index
      %16 = vector.load %arg6[%c0_14, %c0_15] : memref<1x256xf32, #tpu.memory_space<vmem>>, vector<1x256xf32>
      %17 = vector.broadcast %16 : vector<1x256xf32> to vector<8x256xf32>
      %18 = arith.addf %15, %17 : vector<8x256xf32>
      %c0_16 = arith.constant 0 : index
      %c0_17 = arith.constant 0 : index
      %19 = vector.load %arg7[%c0_16, %c0_17] : memref<8x256xf32, #tpu.memory_space<vmem>>, vector<8x256xf32>
      tpu.vector_store %arg7[%c0_16, %c0_17], %18 {strides = array<i32>} : memref<8x256xf32, #tpu.memory_space<vmem>>, vector<8x256xf32>,
    } else {
    }
    return
  }
  func.func @transform_0(%arg0: i32, %arg1: i32, %arg2: i32) -> (i32, i32) {
    %c0_i32 = arith.constant 0 : i32
    return %arg0, %arg2 : i32, i32
  }
  func.func @transform_1(%arg0: i32, %arg1: i32, %arg2: i32) -> (i32, i32) {
    %c0_i32 = arith.constant 0 : i32
    return %arg2, %arg1 : i32, i32
  }
  func.func @transform_2(%arg0: i32, %arg1: i32, %arg2: i32) -> (i32, i32) {
    %c0_i32 = arith.constant 0 : i32
    %c0_i32_0 = arith.constant 0 : i32
    return %c0_i32, %arg1 : i32, i32
  }
  func.func @transform_3(%arg0: i32, %arg1: i32, %arg2: i32) -> (i32, i32) {
    %c0_i32 = arith.constant 0 : i32
    %c0_i32_0 = arith.constant 0 : i32
    return %c0_i32, %arg1 : i32, i32
  }
  func.func @transform_4(%arg0: i32, %arg1: i32, %arg2: i32) -> (i32, i32) {
    %c0_i32 = arith.constant 0 : i32
    return %arg0, %arg1 : i32, i32
  }
}

module attributes {stable_mosaic.version = 11 : i64} {
  func.func @_mm_kernel(%arg0: i32, %arg1: i32, %arg2: i32, %arg3: memref<8x128xbf16, #tpu.memory_space<vmem>>, %arg4: memref<128x256xbf16, #tpu.memory_space<vmem>>, %arg5: memref<1x256xf32, #tpu.memory_space<vmem>>, %arg6: memref<1x256xf32, #tpu.memory_space<vmem>>, %arg7: memref<8x256xf32, #tpu.memory_space<vmem>>, %arg8: memref<8x256xf32, #tpu.memory_space<vmem>>, %arg9: memref<8x256xf32, #tpu.memory_space<vmem>>) attributes {dimension_semantics = [#tpu.dimension_semantics<parallel>, #tpu.dimension_semantics<parallel>, #tpu.dimension_semantics<arbitrary>], iteration_bounds = array<i64: 1, 2, 1>, scalar_prefetch = 0 : i64, scratch_operands = 1 : i64, tpu.core_type = #tpu.core_type<tc>, window_params = [{transform_indices = @transform_0, window_bounds = array<i64: 8, 128>}, {transform_indices = @transform_1, window_bounds = array<i64: 128, 256>}, {transform_indices = @transform_2, window_bounds = array<i64: 1, 256>}, {transform_indices = @transform_3, window_bounds = array<i64: 1, 256>}, {transform_indices = @transform_4, window_bounds = array<i64: 8, 256>}, {transform_indices = @transform_5, window_bounds = array<i64: 8, 256>}]} {
    %c0_i32 = arith.constant 0 : i32
    %0 = arith.cmpi eq, %arg2, %c0_i32 : i32
    %1 = arith.extui %0 : i1 to i32
    %c0_i32_0 = arith.constant 0 : i32
    %2 = arith.cmpi ne, %1, %c0_i32_0 : i32
    scf.if %2 {
      %cst_10 = arith.constant 0.000000e+00 : f32
      %12 = vector.broadcast %cst_10 : f32 to vector<8x256xf32>
      %c0_11 = arith.constant 0 : index
      %c0_12 = arith.constant 0 : index
      %13 = vector.load %arg9[%c0_11, %c0_12] : memref<8x256xf32, #tpu.memory_space<vmem>>, vector<8x256xf32>
      tpu.vector_store %arg9[%c0_11, %c0_12], %12 {strides = array<i32>} : memref<8x256xf32, #tpu.memory_space<vmem>>, vector<8x256xf32>,
    } else {
    }
    %c0 = arith.constant 0 : index
    %c0_1 = arith.constant 0 : index
    %3 = vector.load %arg9[%c0, %c0_1] : memref<8x256xf32, #tpu.memory_space<vmem>>, vector<8x256xf32>
    %c0_2 = arith.constant 0 : index
    %c0_3 = arith.constant 0 : index
    %4 = vector.load %arg3[%c0_2, %c0_3] : memref<8x128xbf16, #tpu.memory_space<vmem>>, vector<8x128xbf16>
    %c0_4 = arith.constant 0 : index
    %c0_5 = arith.constant 0 : index
    %5 = vector.load %arg4[%c0_4, %c0_5] : memref<128x256xbf16, #tpu.memory_space<vmem>>, vector<128x256xbf16>
    %cst = arith.constant dense<0.000000e+00> : vector<8x256xf32>
    %6 = tpu.matmul %4, %5, %cst {dimension_numbers = #tpu.dot_dimension_numbers<[1], [0], [0], [1], [0, 0, 1, 1], [], []>} : vector<8x128xbf16>, vector<128x256xbf16>, vector<8x256xf32> -> vector<8x256xf32>
    %7 = arith.addf %3, %6 : vector<8x256xf32>
    %c0_6 = arith.constant 0 : index
    %c0_7 = arith.constant 0 : index
    %8 = vector.load %arg9[%c0_6, %c0_7] : memref<8x256xf32, #tpu.memory_space<vmem>>, vector<8x256xf32>
    tpu.vector_store %arg9[%c0_6, %c0_7], %7 {strides = array<i32>} : memref<8x256xf32, #tpu.memory_space<vmem>>, vector<8x256xf32>,
    %c0_i32_8 = arith.constant 0 : i32
    %9 = arith.cmpi eq, %arg2, %c0_i32_8 : i32
    %10 = arith.extui %9 : i1 to i32
    %c0_i32_9 = arith.constant 0 : i32
    %11 = arith.cmpi ne, %10, %c0_i32_9 : i32
    scf.if %11 {
      %c0_10 = arith.constant 0 : index
      %c0_11 = arith.constant 0 : index
      %12 = vector.load %arg9[%c0_10, %c0_11] : memref<8x256xf32, #tpu.memory_space<vmem>>, vector<8x256xf32>
      %c0_12 = arith.constant 0 : index
      %c0_13 = arith.constant 0 : index
      %13 = vector.load %arg5[%c0_12, %c0_13] : memref<1x256xf32, #tpu.memory_space<vmem>>, vector<1x256xf32>
      %14 = vector.broadcast %13 : vector<1x256xf32> to vector<8x256xf32>
      %15 = arith.mulf %12, %14 : vector<8x256xf32>
      %c0_14 = arith.constant 0 : index
      %c0_15 = arith.constant 0 : index
      %16 = vector.load %arg6[%c0_14, %c0_15] : memref<1x256xf32, #tpu.memory_space<vmem>>, vector<1x256xf32>
      %17 = vector.broadcast %16 : vector<1x256xf32> to vector<8x256xf32>
      %18 = arith.addf %15, %17 : vector<8x256xf32>
      %c0_16 = arith.constant 0 : index
      %c0_17 = arith.constant 0 : index
      %19 = vector.load %arg7[%c0_16, %c0_17] : memref<8x256xf32, #tpu.memory_space<vmem>>, vector<8x256xf32>
      %20 = arith.addf %18, %19 : vector<8x256xf32>
      %cst_18 = arith.constant 0.000000e+00 : f32
      %21 = vector.broadcast %cst_18 : f32 to vector<8x256xf32>
      %22 = arith.maximumf %20, %21 : vector<8x256xf32>
      %c0_19 = arith.constant 0 : index
      %c0_20 = arith.constant 0 : index
      %23 = vector.load %arg8[%c0_19, %c0_20] : memref<8x256xf32, #tpu.memory_space<vmem>>, vector<8x256xf32>
      tpu.vector_store %arg8[%c0_19, %c0_20], %22 {strides = array<i32>} : memref<8x256xf32, #tpu.memory_space<vmem>>, vector<8x256xf32>,
    } else {
    }
    return
  }
  func.func @transform_0(%arg0: i32, %arg1: i32, %arg2: i32) -> (i32, i32) {
    %c0_i32 = arith.constant 0 : i32
    return %arg0, %arg2 : i32, i32
  }
  func.func @transform_1(%arg0: i32, %arg1: i32, %arg2: i32) -> (i32, i32) {
    %c0_i32 = arith.constant 0 : i32
    return %arg2, %arg1 : i32, i32
  }
  func.func @transform_2(%arg0: i32, %arg1: i32, %arg2: i32) -> (i32, i32) {
    %c0_i32 = arith.constant 0 : i32
    %c0_i32_0 = arith.constant 0 : i32
    return %c0_i32, %arg1 : i32, i32
  }
  func.func @transform_3(%arg0: i32, %arg1: i32, %arg2: i32) -> (i32, i32) {
    %c0_i32 = arith.constant 0 : i32
    %c0_i32_0 = arith.constant 0 : i32
    return %c0_i32, %arg1 : i32, i32
  }
  func.func @transform_4(%arg0: i32, %arg1: i32, %arg2: i32) -> (i32, i32) {
    %c0_i32 = arith.constant 0 : i32
    return %arg0, %arg1 : i32, i32
  }
  func.func @transform_5(%arg0: i32, %arg1: i32, %arg2: i32) -> (i32, i32) {
    %c0_i32 = arith.constant 0 : i32
    return %arg0, %arg1 : i32, i32
  }
}

module attributes {stable_mosaic.version = 11 : i64} {
  func.func @_mm_kernel(%arg0: i32, %arg1: i32, %arg2: i32, %arg3: memref<8x512xbf16, #tpu.memory_space<vmem>>, %arg4: memref<512x128xbf16, #tpu.memory_space<vmem>>, %arg5: memref<1x128xf32, #tpu.memory_space<vmem>>, %arg6: memref<1x128xf32, #tpu.memory_space<vmem>>, %arg7: memref<8x128xf32, #tpu.memory_space<vmem>>, %arg8: memref<8x128xf32, #tpu.memory_space<vmem>>) attributes {dimension_semantics = [#tpu.dimension_semantics<parallel>, #tpu.dimension_semantics<parallel>, #tpu.dimension_semantics<arbitrary>], iteration_bounds = array<i64: 1, 1, 1>, scalar_prefetch = 0 : i64, scratch_operands = 1 : i64, tpu.core_type = #tpu.core_type<tc>, window_params = [{transform_indices = @transform_0, window_bounds = array<i64: 8, 512>}, {transform_indices = @transform_1, window_bounds = array<i64: 512, 128>}, {transform_indices = @transform_2, window_bounds = array<i64: 1, 128>}, {transform_indices = @transform_3, window_bounds = array<i64: 1, 128>}, {transform_indices = @transform_4, window_bounds = array<i64: 8, 128>}]} {
    %c0_i32 = arith.constant 0 : i32
    %0 = arith.cmpi eq, %arg2, %c0_i32 : i32
    %1 = arith.extui %0 : i1 to i32
    %c0_i32_0 = arith.constant 0 : i32
    %2 = arith.cmpi ne, %1, %c0_i32_0 : i32
    scf.if %2 {
      %cst_10 = arith.constant 0.000000e+00 : f32
      %12 = vector.broadcast %cst_10 : f32 to vector<8x128xf32>
      %c0_11 = arith.constant 0 : index
      %c0_12 = arith.constant 0 : index
      %13 = vector.load %arg8[%c0_11, %c0_12] : memref<8x128xf32, #tpu.memory_space<vmem>>, vector<8x128xf32>
      tpu.vector_store %arg8[%c0_11, %c0_12], %12 {strides = array<i32>} : memref<8x128xf32, #tpu.memory_space<vmem>>, vector<8x128xf32>,
    } else {
    }
    %c0 = arith.constant 0 : index
    %c0_1 = arith.constant 0 : index
    %3 = vector.load %arg8[%c0, %c0_1] : memref<8x128xf32, #tpu.memory_space<vmem>>, vector<8x128xf32>
    %c0_2 = arith.constant 0 : index
    %c0_3 = arith.constant 0 : index
    %4 = vector.load %arg3[%c0_2, %c0_3] : memref<8x512xbf16, #tpu.memory_space<vmem>>, vector<8x512xbf16>
    %c0_4 = arith.constant 0 : index
    %c0_5 = arith.constant 0 : index
    %5 = vector.load %arg4[%c0_4, %c0_5] : memref<512x128xbf16, #tpu.memory_space<vmem>>, vector<512x128xbf16>
    %cst = arith.constant dense<0.000000e+00> : vector<8x128xf32>
    %6 = tpu.matmul %4, %5, %cst {dimension_numbers = #tpu.dot_dimension_numbers<[1], [0], [0], [1], [0, 0, 1, 1], [], []>} : vector<8x512xbf16>, vector<512x128xbf16>, vector<8x128xf32> -> vector<8x128xf32>
    %7 = arith.addf %3, %6 : vector<8x128xf32>
    %c0_6 = arith.constant 0 : index
    %c0_7 = arith.constant 0 : index
    %8 = vector.load %arg8[%c0_6, %c0_7] : memref<8x128xf32, #tpu.memory_space<vmem>>, vector<8x128xf32>
    tpu.vector_store %arg8[%c0_6, %c0_7], %7 {strides = array<i32>} : memref<8x128xf32, #tpu.memory_space<vmem>>, vector<8x128xf32>,
    %c0_i32_8 = arith.constant 0 : i32
    %9 = arith.cmpi eq, %arg2, %c0_i32_8 : i32
    %10 = arith.extui %9 : i1 to i32
    %c0_i32_9 = arith.constant 0 : i32
    %11 = arith.cmpi ne, %10, %c0_i32_9 : i32
    scf.if %11 {
      %c0_10 = arith.constant 0 : index
      %c0_11 = arith.constant 0 : index
      %12 = vector.load %arg8[%c0_10, %c0_11] : memref<8x128xf32, #tpu.memory_space<vmem>>, vector<8x128xf32>
      %c0_12 = arith.constant 0 : index
      %c0_13 = arith.constant 0 : index
      %13 = vector.load %arg5[%c0_12, %c0_13] : memref<1x128xf32, #tpu.memory_space<vmem>>, vector<1x128xf32>
      %14 = vector.broadcast %13 : vector<1x128xf32> to vector<8x128xf32>
      %15 = arith.mulf %12, %14 : vector<8x128xf32>
      %c0_14 = arith.constant 0 : index
      %c0_15 = arith.constant 0 : index
      %16 = vector.load %arg6[%c0_14, %c0_15] : memref<1x128xf32, #tpu.memory_space<vmem>>, vector<1x128xf32>
      %17 = vector.broadcast %16 : vector<1x128xf32> to vector<8x128xf32>
      %18 = arith.addf %15, %17 : vector<8x128xf32>
      %cst_16 = arith.constant 0.000000e+00 : f32
      %19 = vector.broadcast %cst_16 : f32 to vector<8x128xf32>
      %20 = arith.maximumf %18, %19 : vector<8x128xf32>
      %c0_17 = arith.constant 0 : index
      %c0_18 = arith.constant 0 : index
      %21 = vector.load %arg7[%c0_17, %c0_18] : memref<8x128xf32, #tpu.memory_space<vmem>>, vector<8x128xf32>
      tpu.vector_store %arg7[%c0_17, %c0_18], %20 {strides = array<i32>} : memref<8x128xf32, #tpu.memory_space<vmem>>, vector<8x128xf32>,
    } else {
    }
    return
  }
  func.func @transform_0(%arg0: i32, %arg1: i32, %arg2: i32) -> (i32, i32) {
    %c0_i32 = arith.constant 0 : i32
    return %arg0, %arg2 : i32, i32
  }
  func.func @transform_1(%arg0: i32, %arg1: i32, %arg2: i32) -> (i32, i32) {
    %c0_i32 = arith.constant 0 : i32
    return %arg2, %arg1 : i32, i32
  }
  func.func @transform_2(%arg0: i32, %arg1: i32, %arg2: i32) -> (i32, i32) {
    %c0_i32 = arith.constant 0 : i32
    %c0_i32_0 = arith.constant 0 : i32
    return %c0_i32, %arg1 : i32, i32
  }
  func.func @transform_3(%arg0: i32, %arg1: i32, %arg2: i32) -> (i32, i32) {
    %c0_i32 = arith.constant 0 : i32
    %c0_i32_0 = arith.constant 0 : i32
    return %c0_i32, %arg1 : i32, i32
  }
  func.func @transform_4(%arg0: i32, %arg1: i32, %arg2: i32) -> (i32, i32) {
    %c0_i32 = arith.constant 0 : i32
    return %arg0, %arg1 : i32, i32
  }
}

module attributes {stable_mosaic.version = 11 : i64} {
  func.func @_conv3x3_kernel(%arg0: i32, %arg1: memref<1x24x128xbf16, #tpu.memory_space<vmem>>, %arg2: memref<9x128x128xbf16, #tpu.memory_space<vmem>>, %arg3: memref<1x128xf32, #tpu.memory_space<vmem>>, %arg4: memref<1x128xf32, #tpu.memory_space<vmem>>, %arg5: memref<1x9x128xf32, #tpu.memory_space<vmem>>) attributes {dimension_semantics = [#tpu.dimension_semantics<parallel>], iteration_bounds = array<i64: 2>, scalar_prefetch = 0 : i64, scratch_operands = 0 : i64, tpu.core_type = #tpu.core_type<tc>, window_params = [{transform_indices = @transform_0, window_bounds = array<i64: 1, 24, 128>}, {pipeline_mode = #tpu.pipeline_mode<synchronous>, transform_indices = @transform_1, window_bounds = array<i64: 9, 128, 128>}, {pipeline_mode = #tpu.pipeline_mode<synchronous>, transform_indices = @transform_2, window_bounds = array<i64: 1, 128>}, {pipeline_mode = #tpu.pipeline_mode<synchronous>, transform_indices = @transform_3, window_bounds = array<i64: 1, 128>}, {transform_indices = @transform_4, window_bounds = array<i64: 1, 9, 128>}]} {
    %cst = arith.constant 0.000000e+00 : f32
    %0 = vector.broadcast %cst : f32 to vector<9x128xf32>
    %c0 = arith.constant 0 : index
    %c0_0 = arith.constant 0 : index
    %c0_1 = arith.constant 0 : index
    %1 = vector.load %arg1[%c0, %c0_0, %c0_1] : memref<1x24x128xbf16, #tpu.memory_space<vmem>>, vector<1x9x128xbf16>
    %2 = vector.shape_cast %1 : vector<1x9x128xbf16> to vector<9x128xbf16>
    %c0_2 = arith.constant 0 : index
    %c0_3 = arith.constant 0 : index
    %c0_4 = arith.constant 0 : index
    %3 = vector.load %arg2[%c0_2, %c0_3, %c0_4] : memref<9x128x128xbf16, #tpu.memory_space<vmem>>, vector<1x128x128xbf16>
    %4 = vector.shape_cast %3 : vector<1x128x128xbf16> to vector<128x128xbf16>
    %cst_5 = arith.constant dense<0.000000e+00> : vector<9x128xf32>
    %5 = tpu.matmul %2, %4, %cst_5 {dimension_numbers = #tpu.dot_dimension_numbers<[1], [0], [0], [1], [0, 0, 1, 1], [], []>} : vector<9x128xbf16>, vector<128x128xbf16>, vector<9x128xf32> -> vector<9x128xf32>
    %6 = arith.addf %0, %5 : vector<9x128xf32>
    %c0_6 = arith.constant 0 : index
    %c1 = arith.constant 1 : index
    %c0_7 = arith.constant 0 : index
    %7 = vector.load %arg1[%c0_6, %c1, %c0_7] : memref<1x24x128xbf16, #tpu.memory_space<vmem>>, vector<1x9x128xbf16>
    %8 = vector.shape_cast %7 : vector<1x9x128xbf16> to vector<9x128xbf16>
    %c1_8 = arith.constant 1 : index
    %c0_9 = arith.constant 0 : index
    %c0_10 = arith.constant 0 : index
    %9 = vector.load %arg2[%c1_8, %c0_9, %c0_10] : memref<9x128x128xbf16, #tpu.memory_space<vmem>>, vector<1x128x128xbf16>
    %10 = vector.shape_cast %9 : vector<1x128x128xbf16> to vector<128x128xbf16>
    %cst_11 = arith.constant dense<0.000000e+00> : vector<9x128xf32>
    %11 = tpu.matmul %8, %10, %cst_11 {dimension_numbers = #tpu.dot_dimension_numbers<[1], [0], [0], [1], [0, 0, 1, 1], [], []>} : vector<9x128xbf16>, vector<128x128xbf16>, vector<9x128xf32> -> vector<9x128xf32>
    %12 = arith.addf %6, %11 : vector<9x128xf32>
    %c0_12 = arith.constant 0 : index
    %c2 = arith.constant 2 : index
    %c0_13 = arith.constant 0 : index
    %13 = vector.load %arg1[%c0_12, %c2, %c0_13] : memref<1x24x128xbf16, #tpu.memory_space<vmem>>, vector<1x9x128xbf16>
    %14 = vector.shape_cast %13 : vector<1x9x128xbf16> to vector<9x128xbf16>
    %c2_14 = arith.constant 2 : index
    %c0_15 = arith.constant 0 : index
    %c0_16 = arith.constant 0 : index
    %15 = vector.load %arg2[%c2_14, %c0_15, %c0_16] : memref<9x128x128xbf16, #tpu.memory_space<vmem>>, vector<1x128x128xbf16>
    %16 = vector.shape_cast %15 : vector<1x128x128xbf16> to vector<128x128xbf16>
    %cst_17 = arith.constant dense<0.000000e+00> : vector<9x128xf32>
    %17 = tpu.matmul %14, %16, %cst_17 {dimension_numbers = #tpu.dot_dimension_numbers<[1], [0], [0], [1], [0, 0, 1, 1], [], []>} : vector<9x128xbf16>, vector<128x128xbf16>, vector<9x128xf32> -> vector<9x128xf32>
    %18 = arith.addf %12, %17 : vector<9x128xf32>
    %c0_18 = arith.constant 0 : index
    %c3 = arith.constant 3 : index
    %c0_19 = arith.constant 0 : index
    %19 = vector.load %arg1[%c0_18, %c3, %c0_19] : memref<1x24x128xbf16, #tpu.memory_space<vmem>>, vector<1x9x128xbf16>
    %20 = vector.shape_cast %19 : vector<1x9x128xbf16> to vector<9x128xbf16>
    %c3_20 = arith.constant 3 : index
    %c0_21 = arith.constant 0 : index
    %c0_22 = arith.constant 0 : index
    %21 = vector.load %arg2[%c3_20, %c0_21, %c0_22] : memref<9x128x128xbf16, #tpu.memory_space<vmem>>, vector<1x128x128xbf16>
    %22 = vector.shape_cast %21 : vector<1x128x128xbf16> to vector<128x128xbf16>
    %cst_23 = arith.constant dense<0.000000e+00> : vector<9x128xf32>
    %23 = tpu.matmul %20, %22, %cst_23 {dimension_numbers = #tpu.dot_dimension_numbers<[1], [0], [0], [1], [0, 0, 1, 1], [], []>} : vector<9x128xbf16>, vector<128x128xbf16>, vector<9x128xf32> -> vector<9x128xf32>
    %24 = arith.addf %18, %23 : vector<9x128xf32>
    %c0_24 = arith.constant 0 : index
    %c4 = arith.constant 4 : index
    %c0_25 = arith.constant 0 : index
    %25 = vector.load %arg1[%c0_24, %c4, %c0_25] : memref<1x24x128xbf16, #tpu.memory_space<vmem>>, vector<1x9x128xbf16>
    %26 = vector.shape_cast %25 : vector<1x9x128xbf16> to vector<9x128xbf16>
    %c4_26 = arith.constant 4 : index
    %c0_27 = arith.constant 0 : index
    %c0_28 = arith.constant 0 : index
    %27 = vector.load %arg2[%c4_26, %c0_27, %c0_28] : memref<9x128x128xbf16, #tpu.memory_space<vmem>>, vector<1x128x128xbf16>
    %28 = vector.shape_cast %27 : vector<1x128x128xbf16> to vector<128x128xbf16>
    %cst_29 = arith.constant dense<0.000000e+00> : vector<9x128xf32>
    %29 = tpu.matmul %26, %28, %cst_29 {dimension_numbers = #tpu.dot_dimension_numbers<[1], [0], [0], [1], [0, 0, 1, 1], [], []>} : vector<9x128xbf16>, vector<128x128xbf16>, vector<9x128xf32> -> vector<9x128xf32>
    %30 = arith.addf %24, %29 : vector<9x128xf32>
    %c0_30 = arith.constant 0 : index
    %c5 = arith.constant 5 : index
    %c0_31 = arith.constant 0 : index
    %31 = vector.load %arg1[%c0_30, %c5, %c0_31] : memref<1x24x128xbf16, #tpu.memory_space<vmem>>, vector<1x9x128xbf16>
    %32 = vector.shape_cast %31 : vector<1x9x128xbf16> to vector<9x128xbf16>
    %c5_32 = arith.constant 5 : index
    %c0_33 = arith.constant 0 : index
    %c0_34 = arith.constant 0 : index
    %33 = vector.load %arg2[%c5_32, %c0_33, %c0_34] : memref<9x128x128xbf16, #tpu.memory_space<vmem>>, vector<1x128x128xbf16>
    %34 = vector.shape_cast %33 : vector<1x128x128xbf16> to vector<128x128xbf16>
    %cst_35 = arith.constant dense<0.000000e+00> : vector<9x128xf32>
    %35 = tpu.matmul %32, %34, %cst_35 {dimension_numbers = #tpu.dot_dimension_numbers<[1], [0], [0], [1], [0, 0, 1, 1], [], []>} : vector<9x128xbf16>, vector<128x128xbf16>, vector<9x128xf32> -> vector<9x128xf32>
    %36 = arith.addf %30, %35 : vector<9x128xf32>
    %c0_36 = arith.constant 0 : index
    %c6 = arith.constant 6 : index
    %c0_37 = arith.constant 0 : index
    %37 = vector.load %arg1[%c0_36, %c6, %c0_37] : memref<1x24x128xbf16, #tpu.memory_space<vmem>>, vector<1x9x128xbf16>
    %38 = vector.shape_cast %37 : vector<1x9x128xbf16> to vector<9x128xbf16>
    %c6_38 = arith.constant 6 : index
    %c0_39 = arith.constant 0 : index
    %c0_40 = arith.constant 0 : index
    %39 = vector.load %arg2[%c6_38, %c0_39, %c0_40] : memref<9x128x128xbf16, #tpu.memory_space<vmem>>, vector<1x128x128xbf16>
    %40 = vector.shape_cast %39 : vector<1x128x128xbf16> to vector<128x128xbf16>
    %cst_41 = arith.constant dense<0.000000e+00> : vector<9x128xf32>
    %41 = tpu.matmul %38, %40, %cst_41 {dimension_numbers = #tpu.dot_dimension_numbers<[1], [0], [0], [1], [0, 0, 1, 1], [], []>} : vector<9x128xbf16>, vector<128x128xbf16>, vector<9x128xf32> -> vector<9x128xf32>
    %42 = arith.addf %36, %41 : vector<9x128xf32>
    %c0_42 = arith.constant 0 : index
    %c7 = arith.constant 7 : index
    %c0_43 = arith.constant 0 : index
    %43 = vector.load %arg1[%c0_42, %c7, %c0_43] : memref<1x24x128xbf16, #tpu.memory_space<vmem>>, vector<1x9x128xbf16>
    %44 = vector.shape_cast %43 : vector<1x9x128xbf16> to vector<9x128xbf16>
    %c7_44 = arith.constant 7 : index
    %c0_45 = arith.constant 0 : index
    %c0_46 = arith.constant 0 : index
    %45 = vector.load %arg2[%c7_44, %c0_45, %c0_46] : memref<9x128x128xbf16, #tpu.memory_space<vmem>>, vector<1x128x128xbf16>
    %46 = vector.shape_cast %45 : vector<1x128x128xbf16> to vector<128x128xbf16>
    %cst_47 = arith.constant dense<0.000000e+00> : vector<9x128xf32>
    %47 = tpu.matmul %44, %46, %cst_47 {dimension_numbers = #tpu.dot_dimension_numbers<[1], [0], [0], [1], [0, 0, 1, 1], [], []>} : vector<9x128xbf16>, vector<128x128xbf16>, vector<9x128xf32> -> vector<9x128xf32>
    %48 = arith.addf %42, %47 : vector<9x128xf32>
    %c0_48 = arith.constant 0 : index
    %c8 = arith.constant 8 : index
    %c0_49 = arith.constant 0 : index
    %49 = vector.load %arg1[%c0_48, %c8, %c0_49] : memref<1x24x128xbf16, #tpu.memory_space<vmem>>, vector<1x9x128xbf16>
    %50 = vector.shape_cast %49 : vector<1x9x128xbf16> to vector<9x128xbf16>
    %c8_50 = arith.constant 8 : index
    %c0_51 = arith.constant 0 : index
    %c0_52 = arith.constant 0 : index
    %51 = vector.load %arg2[%c8_50, %c0_51, %c0_52] : memref<9x128x128xbf16, #tpu.memory_space<vmem>>, vector<1x128x128xbf16>
    %52 = vector.shape_cast %51 : vector<1x128x128xbf16> to vector<128x128xbf16>
    %cst_53 = arith.constant dense<0.000000e+00> : vector<9x128xf32>
    %53 = tpu.matmul %50, %52, %cst_53 {dimension_numbers = #tpu.dot_dimension_numbers<[1], [0], [0], [1], [0, 0, 1, 1], [], []>} : vector<9x128xbf16>, vector<128x128xbf16>, vector<9x128xf32> -> vector<9x128xf32>
    %54 = arith.addf %48, %53 : vector<9x128xf32>
    %c0_54 = arith.constant 0 : index
    %c0_55 = arith.constant 0 : index
    %55 = vector.load %arg3[%c0_54, %c0_55] : memref<1x128xf32, #tpu.memory_space<vmem>>, vector<1x128xf32>
    %56 = vector.broadcast %55 : vector<1x128xf32> to vector<9x128xf32>
    %57 = arith.mulf %54, %56 : vector<9x128xf32>
    %c0_56 = arith.constant 0 : index
    %c0_57 = arith.constant 0 : index
    %58 = vector.load %arg4[%c0_56, %c0_57] : memref<1x128xf32, #tpu.memory_space<vmem>>, vector<1x128xf32>
    %59 = vector.broadcast %58 : vector<1x128xf32> to vector<9x128xf32>
    %60 = arith.addf %57, %59 : vector<9x128xf32>
    %cst_58 = arith.constant 0.000000e+00 : f32
    %61 = vector.broadcast %cst_58 : f32 to vector<9x128xf32>
    %62 = arith.maximumf %60, %61 : vector<9x128xf32>
    %c0_59 = arith.constant 0 : index
    %c0_60 = arith.constant 0 : index
    %c0_61 = arith.constant 0 : index
    %63 = vector.load %arg5[%c0_59, %c0_60, %c0_61] : memref<1x9x128xf32, #tpu.memory_space<vmem>>, vector<1x9x128xf32>
    %64 = vector.shape_cast %63 : vector<1x9x128xf32> to vector<9x128xf32>
    %65 = vector.shape_cast %62 : vector<9x128xf32> to vector<1x9x128xf32>
    tpu.vector_store %arg5[%c0_59, %c0_60, %c0_61], %65 {strides = array<i32>} : memref<1x9x128xf32, #tpu.memory_space<vmem>>, vector<1x9x128xf32>,
    return
  }
  func.func @transform_0(%arg0: i32) -> (i32, i32, i32) {
    %c0_i32 = arith.constant 0 : i32
    %c0_i32_0 = arith.constant 0 : i32
    %c0_i32_1 = arith.constant 0 : i32
    return %arg0, %c0_i32, %c0_i32_0 : i32, i32, i32
  }
  func.func @transform_1(%arg0: i32) -> (i32, i32, i32) {
    %c0_i32 = arith.constant 0 : i32
    %c0_i32_0 = arith.constant 0 : i32
    %c0_i32_1 = arith.constant 0 : i32
    %c0_i32_2 = arith.constant 0 : i32
    return %c0_i32, %c0_i32_0, %c0_i32_1 : i32, i32, i32
  }
  func.func @transform_2(%arg0: i32) -> (i32, i32) {
    %c0_i32 = arith.constant 0 : i32
    %c0_i32_0 = arith.constant 0 : i32
    %c0_i32_1 = arith.constant 0 : i32
    return %c0_i32, %c0_i32_0 : i32, i32
  }
  func.func @transform_3(%arg0: i32) -> (i32, i32) {
    %c0_i32 = arith.constant 0 : i32
    %c0_i32_0 = arith.constant 0 : i32
    %c0_i32_1 = arith.constant 0 : i32
    return %c0_i32, %c0_i32_0 : i32, i32
  }
  func.func @transform_4(%arg0: i32) -> (i32, i32, i32) {
    %c0_i32 = arith.constant 0 : i32
    %c0_i32_0 = arith.constant 0 : i32
    %c0_i32_1 = arith.constant 0 : i32
    return %arg0, %c0_i32, %c0_i32_0 : i32, i32, i32
  }
}

module attributes {stable_mosaic.version = 11 : i64} {
  func.func @_mm_kernel(%arg0: i32, %arg1: i32, %arg2: i32, %arg3: memref<8x128xbf16, #tpu.memory_space<vmem>>, %arg4: memref<128x256xbf16, #tpu.memory_space<vmem>>, %arg5: memref<1x256xf32, #tpu.memory_space<vmem>>, %arg6: memref<1x256xf32, #tpu.memory_space<vmem>>, %arg7: memref<8x256xf32, #tpu.memory_space<vmem>>, %arg8: memref<8x256xf32, #tpu.memory_space<vmem>>) attributes {dimension_semantics = [#tpu.dimension_semantics<parallel>, #tpu.dimension_semantics<parallel>, #tpu.dimension_semantics<arbitrary>], iteration_bounds = array<i64: 1, 2, 1>, scalar_prefetch = 0 : i64, scratch_operands = 1 : i64, tpu.core_type = #tpu.core_type<tc>, window_params = [{transform_indices = @transform_0, window_bounds = array<i64: 8, 128>}, {transform_indices = @transform_1, window_bounds = array<i64: 128, 256>}, {transform_indices = @transform_2, window_bounds = array<i64: 1, 256>}, {transform_indices = @transform_3, window_bounds = array<i64: 1, 256>}, {transform_indices = @transform_4, window_bounds = array<i64: 8, 256>}]} {
    %c0_i32 = arith.constant 0 : i32
    %0 = arith.cmpi eq, %arg2, %c0_i32 : i32
    %1 = arith.extui %0 : i1 to i32
    %c0_i32_0 = arith.constant 0 : i32
    %2 = arith.cmpi ne, %1, %c0_i32_0 : i32
    scf.if %2 {
      %cst_10 = arith.constant 0.000000e+00 : f32
      %12 = vector.broadcast %cst_10 : f32 to vector<8x256xf32>
      %c0_11 = arith.constant 0 : index
      %c0_12 = arith.constant 0 : index
      %13 = vector.load %arg8[%c0_11, %c0_12] : memref<8x256xf32, #tpu.memory_space<vmem>>, vector<8x256xf32>
      tpu.vector_store %arg8[%c0_11, %c0_12], %12 {strides = array<i32>} : memref<8x256xf32, #tpu.memory_space<vmem>>, vector<8x256xf32>,
    } else {
    }
    %c0 = arith.constant 0 : index
    %c0_1 = arith.constant 0 : index
    %3 = vector.load %arg8[%c0, %c0_1] : memref<8x256xf32, #tpu.memory_space<vmem>>, vector<8x256xf32>
    %c0_2 = arith.constant 0 : index
    %c0_3 = arith.constant 0 : index
    %4 = vector.load %arg3[%c0_2, %c0_3] : memref<8x128xbf16, #tpu.memory_space<vmem>>, vector<8x128xbf16>
    %c0_4 = arith.constant 0 : index
    %c0_5 = arith.constant 0 : index
    %5 = vector.load %arg4[%c0_4, %c0_5] : memref<128x256xbf16, #tpu.memory_space<vmem>>, vector<128x256xbf16>
    %cst = arith.constant dense<0.000000e+00> : vector<8x256xf32>
    %6 = tpu.matmul %4, %5, %cst {dimension_numbers = #tpu.dot_dimension_numbers<[1], [0], [0], [1], [0, 0, 1, 1], [], []>} : vector<8x128xbf16>, vector<128x256xbf16>, vector<8x256xf32> -> vector<8x256xf32>
    %7 = arith.addf %3, %6 : vector<8x256xf32>
    %c0_6 = arith.constant 0 : index
    %c0_7 = arith.constant 0 : index
    %8 = vector.load %arg8[%c0_6, %c0_7] : memref<8x256xf32, #tpu.memory_space<vmem>>, vector<8x256xf32>
    tpu.vector_store %arg8[%c0_6, %c0_7], %7 {strides = array<i32>} : memref<8x256xf32, #tpu.memory_space<vmem>>, vector<8x256xf32>,
    %c0_i32_8 = arith.constant 0 : i32
    %9 = arith.cmpi eq, %arg2, %c0_i32_8 : i32
    %10 = arith.extui %9 : i1 to i32
    %c0_i32_9 = arith.constant 0 : i32
    %11 = arith.cmpi ne, %10, %c0_i32_9 : i32
    scf.if %11 {
      %c0_10 = arith.constant 0 : index
      %c0_11 = arith.constant 0 : index
      %12 = vector.load %arg8[%c0_10, %c0_11] : memref<8x256xf32, #tpu.memory_space<vmem>>, vector<8x256xf32>
      %c0_12 = arith.constant 0 : index
      %c0_13 = arith.constant 0 : index
      %13 = vector.load %arg5[%c0_12, %c0_13] : memref<1x256xf32, #tpu.memory_space<vmem>>, vector<1x256xf32>
      %14 = vector.broadcast %13 : vector<1x256xf32> to vector<8x256xf32>
      %15 = arith.mulf %12, %14 : vector<8x256xf32>
      %c0_14 = arith.constant 0 : index
      %c0_15 = arith.constant 0 : index
      %16 = vector.load %arg6[%c0_14, %c0_15] : memref<1x256xf32, #tpu.memory_space<vmem>>, vector<1x256xf32>
      %17 = vector.broadcast %16 : vector<1x256xf32> to vector<8x256xf32>
      %18 = arith.addf %15, %17 : vector<8x256xf32>
      %c0_16 = arith.constant 0 : index
      %c0_17 = arith.constant 0 : index
      %19 = vector.load %arg7[%c0_16, %c0_17] : memref<8x256xf32, #tpu.memory_space<vmem>>, vector<8x256xf32>
      tpu.vector_store %arg7[%c0_16, %c0_17], %18 {strides = array<i32>} : memref<8x256xf32, #tpu.memory_space<vmem>>, vector<8x256xf32>,
    } else {
    }
    return
  }
  func.func @transform_0(%arg0: i32, %arg1: i32, %arg2: i32) -> (i32, i32) {
    %c0_i32 = arith.constant 0 : i32
    return %arg0, %arg2 : i32, i32
  }
  func.func @transform_1(%arg0: i32, %arg1: i32, %arg2: i32) -> (i32, i32) {
    %c0_i32 = arith.constant 0 : i32
    return %arg2, %arg1 : i32, i32
  }
  func.func @transform_2(%arg0: i32, %arg1: i32, %arg2: i32) -> (i32, i32) {
    %c0_i32 = arith.constant 0 : i32
    %c0_i32_0 = arith.constant 0 : i32
    return %c0_i32, %arg1 : i32, i32
  }
  func.func @transform_3(%arg0: i32, %arg1: i32, %arg2: i32) -> (i32, i32) {
    %c0_i32 = arith.constant 0 : i32
    %c0_i32_0 = arith.constant 0 : i32
    return %c0_i32, %arg1 : i32, i32
  }
  func.func @transform_4(%arg0: i32, %arg1: i32, %arg2: i32) -> (i32, i32) {
    %c0_i32 = arith.constant 0 : i32
    return %arg0, %arg1 : i32, i32
  }
}

module attributes {stable_mosaic.version = 11 : i64} {
  func.func @_add_relu_kernel(%arg0: i32, %arg1: memref<8x512xf32, #tpu.memory_space<vmem>>, %arg2: memref<8x512xf32, #tpu.memory_space<vmem>>, %arg3: memref<8x512xf32, #tpu.memory_space<vmem>>) attributes {dimension_semantics = [#tpu.dimension_semantics<parallel>], iteration_bounds = array<i64: 1>, scalar_prefetch = 0 : i64, scratch_operands = 0 : i64, tpu.core_type = #tpu.core_type<tc>, window_params = [{transform_indices = @transform_0, window_bounds = array<i64: 8, 512>}, {transform_indices = @transform_1, window_bounds = array<i64: 8, 512>}, {transform_indices = @transform_2, window_bounds = array<i64: 8, 512>}]} {
    %c0 = arith.constant 0 : index
    %c0_0 = arith.constant 0 : index
    %0 = vector.load %arg1[%c0, %c0_0] : memref<8x512xf32, #tpu.memory_space<vmem>>, vector<8x512xf32>
    %c0_1 = arith.constant 0 : index
    %c0_2 = arith.constant 0 : index
    %1 = vector.load %arg2[%c0_1, %c0_2] : memref<8x512xf32, #tpu.memory_space<vmem>>, vector<8x512xf32>
    %2 = arith.addf %0, %1 : vector<8x512xf32>
    %cst = arith.constant 0.000000e+00 : f32
    %3 = vector.broadcast %cst : f32 to vector<8x512xf32>
    %4 = arith.maximumf %2, %3 : vector<8x512xf32>
    %c0_3 = arith.constant 0 : index
    %c0_4 = arith.constant 0 : index
    %5 = vector.load %arg3[%c0_3, %c0_4] : memref<8x512xf32, #tpu.memory_space<vmem>>, vector<8x512xf32>
    tpu.vector_store %arg3[%c0_3, %c0_4], %4 {strides = array<i32>} : memref<8x512xf32, #tpu.memory_space<vmem>>, vector<8x512xf32>,
    return
  }
  func.func @transform_0(%arg0: i32) -> (i32, i32) {
    %c0_i32 = arith.constant 0 : i32
    %c0_i32_0 = arith.constant 0 : i32
    return %arg0, %c0_i32 : i32, i32
  }
  func.func @transform_1(%arg0: i32) -> (i32, i32) {
    %c0_i32 = arith.constant 0 : i32
    %c0_i32_0 = arith.constant 0 : i32
    return %arg0, %c0_i32 : i32, i32
  }
  func.func @transform_2(%arg0: i32) -> (i32, i32) {
    %c0_i32 = arith.constant 0 : i32
    %c0_i32_0 = arith.constant 0 : i32
    return %arg0, %c0_i32 : i32, i32
  }
}

module attributes {stable_mosaic.version = 11 : i64} {
  func.func @_mm_kernel(%arg0: i32, %arg1: i32, %arg2: i32, %arg3: memref<8x512xbf16, #tpu.memory_space<vmem>>, %arg4: memref<512x128xbf16, #tpu.memory_space<vmem>>, %arg5: memref<1x128xf32, #tpu.memory_space<vmem>>, %arg6: memref<1x128xf32, #tpu.memory_space<vmem>>, %arg7: memref<8x128xf32, #tpu.memory_space<vmem>>, %arg8: memref<8x128xf32, #tpu.memory_space<vmem>>) attributes {dimension_semantics = [#tpu.dimension_semantics<parallel>, #tpu.dimension_semantics<parallel>, #tpu.dimension_semantics<arbitrary>], iteration_bounds = array<i64: 1, 1, 1>, scalar_prefetch = 0 : i64, scratch_operands = 1 : i64, tpu.core_type = #tpu.core_type<tc>, window_params = [{transform_indices = @transform_0, window_bounds = array<i64: 8, 512>}, {transform_indices = @transform_1, window_bounds = array<i64: 512, 128>}, {transform_indices = @transform_2, window_bounds = array<i64: 1, 128>}, {transform_indices = @transform_3, window_bounds = array<i64: 1, 128>}, {transform_indices = @transform_4, window_bounds = array<i64: 8, 128>}]} {
    %c0_i32 = arith.constant 0 : i32
    %0 = arith.cmpi eq, %arg2, %c0_i32 : i32
    %1 = arith.extui %0 : i1 to i32
    %c0_i32_0 = arith.constant 0 : i32
    %2 = arith.cmpi ne, %1, %c0_i32_0 : i32
    scf.if %2 {
      %cst_10 = arith.constant 0.000000e+00 : f32
      %12 = vector.broadcast %cst_10 : f32 to vector<8x128xf32>
      %c0_11 = arith.constant 0 : index
      %c0_12 = arith.constant 0 : index
      %13 = vector.load %arg8[%c0_11, %c0_12] : memref<8x128xf32, #tpu.memory_space<vmem>>, vector<8x128xf32>
      tpu.vector_store %arg8[%c0_11, %c0_12], %12 {strides = array<i32>} : memref<8x128xf32, #tpu.memory_space<vmem>>, vector<8x128xf32>,
    } else {
    }
    %c0 = arith.constant 0 : index
    %c0_1 = arith.constant 0 : index
    %3 = vector.load %arg8[%c0, %c0_1] : memref<8x128xf32, #tpu.memory_space<vmem>>, vector<8x128xf32>
    %c0_2 = arith.constant 0 : index
    %c0_3 = arith.constant 0 : index
    %4 = vector.load %arg3[%c0_2, %c0_3] : memref<8x512xbf16, #tpu.memory_space<vmem>>, vector<8x512xbf16>
    %c0_4 = arith.constant 0 : index
    %c0_5 = arith.constant 0 : index
    %5 = vector.load %arg4[%c0_4, %c0_5] : memref<512x128xbf16, #tpu.memory_space<vmem>>, vector<512x128xbf16>
    %cst = arith.constant dense<0.000000e+00> : vector<8x128xf32>
    %6 = tpu.matmul %4, %5, %cst {dimension_numbers = #tpu.dot_dimension_numbers<[1], [0], [0], [1], [0, 0, 1, 1], [], []>} : vector<8x512xbf16>, vector<512x128xbf16>, vector<8x128xf32> -> vector<8x128xf32>
    %7 = arith.addf %3, %6 : vector<8x128xf32>
    %c0_6 = arith.constant 0 : index
    %c0_7 = arith.constant 0 : index
    %8 = vector.load %arg8[%c0_6, %c0_7] : memref<8x128xf32, #tpu.memory_space<vmem>>, vector<8x128xf32>
    tpu.vector_store %arg8[%c0_6, %c0_7], %7 {strides = array<i32>} : memref<8x128xf32, #tpu.memory_space<vmem>>, vector<8x128xf32>,
    %c0_i32_8 = arith.constant 0 : i32
    %9 = arith.cmpi eq, %arg2, %c0_i32_8 : i32
    %10 = arith.extui %9 : i1 to i32
    %c0_i32_9 = arith.constant 0 : i32
    %11 = arith.cmpi ne, %10, %c0_i32_9 : i32
    scf.if %11 {
      %c0_10 = arith.constant 0 : index
      %c0_11 = arith.constant 0 : index
      %12 = vector.load %arg8[%c0_10, %c0_11] : memref<8x128xf32, #tpu.memory_space<vmem>>, vector<8x128xf32>
      %c0_12 = arith.constant 0 : index
      %c0_13 = arith.constant 0 : index
      %13 = vector.load %arg5[%c0_12, %c0_13] : memref<1x128xf32, #tpu.memory_space<vmem>>, vector<1x128xf32>
      %14 = vector.broadcast %13 : vector<1x128xf32> to vector<8x128xf32>
      %15 = arith.mulf %12, %14 : vector<8x128xf32>
      %c0_14 = arith.constant 0 : index
      %c0_15 = arith.constant 0 : index
      %16 = vector.load %arg6[%c0_14, %c0_15] : memref<1x128xf32, #tpu.memory_space<vmem>>, vector<1x128xf32>
      %17 = vector.broadcast %16 : vector<1x128xf32> to vector<8x128xf32>
      %18 = arith.addf %15, %17 : vector<8x128xf32>
      %c0_16 = arith.constant 0 : index
      %c0_17 = arith.constant 0 : index
      %19 = vector.load %arg7[%c0_16, %c0_17] : memref<8x128xf32, #tpu.memory_space<vmem>>, vector<8x128xf32>
      tpu.vector_store %arg7[%c0_16, %c0_17], %18 {strides = array<i32>} : memref<8x128xf32, #tpu.memory_space<vmem>>, vector<8x128xf32>,
    } else {
    }
    return
  }
  func.func @transform_0(%arg0: i32, %arg1: i32, %arg2: i32) -> (i32, i32) {
    %c0_i32 = arith.constant 0 : i32
    return %arg0, %arg2 : i32, i32
  }
  func.func @transform_1(%arg0: i32, %arg1: i32, %arg2: i32) -> (i32, i32) {
    %c0_i32 = arith.constant 0 : i32
    return %arg2, %arg1 : i32, i32
  }
  func.func @transform_2(%arg0: i32, %arg1: i32, %arg2: i32) -> (i32, i32) {
    %c0_i32 = arith.constant 0 : i32
    %c0_i32_0 = arith.constant 0 : i32
    return %c0_i32, %arg1 : i32, i32
  }
  func.func @transform_3(%arg0: i32, %arg1: i32, %arg2: i32) -> (i32, i32) {
    %c0_i32 = arith.constant 0 : i32
    %c0_i32_0 = arith.constant 0 : i32
    return %c0_i32, %arg1 : i32, i32
  }
  func.func @transform_4(%arg0: i32, %arg1: i32, %arg2: i32) -> (i32, i32) {
    %c0_i32 = arith.constant 0 : i32
    return %arg0, %arg1 : i32, i32
  }
}

module attributes {stable_mosaic.version = 11 : i64} {
  func.func @_mm_kernel(%arg0: i32, %arg1: i32, %arg2: i32, %arg3: memref<32x128xbf16, #tpu.memory_space<vmem>>, %arg4: memref<128x128xbf16, #tpu.memory_space<vmem>>, %arg5: memref<1x128xf32, #tpu.memory_space<vmem>>, %arg6: memref<1x128xf32, #tpu.memory_space<vmem>>, %arg7: memref<32x128xf32, #tpu.memory_space<vmem>>, %arg8: memref<32x128xf32, #tpu.memory_space<vmem>>) attributes {dimension_semantics = [#tpu.dimension_semantics<parallel>, #tpu.dimension_semantics<parallel>, #tpu.dimension_semantics<arbitrary>], iteration_bounds = array<i64: 1, 1, 1>, scalar_prefetch = 0 : i64, scratch_operands = 1 : i64, tpu.core_type = #tpu.core_type<tc>, window_params = [{transform_indices = @transform_0, window_bounds = array<i64: 32, 128>}, {transform_indices = @transform_1, window_bounds = array<i64: 128, 128>}, {transform_indices = @transform_2, window_bounds = array<i64: 1, 128>}, {transform_indices = @transform_3, window_bounds = array<i64: 1, 128>}, {transform_indices = @transform_4, window_bounds = array<i64: 32, 128>}]} {
    %c0_i32 = arith.constant 0 : i32
    %0 = arith.cmpi eq, %arg2, %c0_i32 : i32
    %1 = arith.extui %0 : i1 to i32
    %c0_i32_0 = arith.constant 0 : i32
    %2 = arith.cmpi ne, %1, %c0_i32_0 : i32
    scf.if %2 {
      %cst_10 = arith.constant 0.000000e+00 : f32
      %12 = vector.broadcast %cst_10 : f32 to vector<32x128xf32>
      %c0_11 = arith.constant 0 : index
      %c0_12 = arith.constant 0 : index
      %13 = vector.load %arg8[%c0_11, %c0_12] : memref<32x128xf32, #tpu.memory_space<vmem>>, vector<32x128xf32>
      tpu.vector_store %arg8[%c0_11, %c0_12], %12 {strides = array<i32>} : memref<32x128xf32, #tpu.memory_space<vmem>>, vector<32x128xf32>,
    } else {
    }
    %c0 = arith.constant 0 : index
    %c0_1 = arith.constant 0 : index
    %3 = vector.load %arg8[%c0, %c0_1] : memref<32x128xf32, #tpu.memory_space<vmem>>, vector<32x128xf32>
    %c0_2 = arith.constant 0 : index
    %c0_3 = arith.constant 0 : index
    %4 = vector.load %arg3[%c0_2, %c0_3] : memref<32x128xbf16, #tpu.memory_space<vmem>>, vector<32x128xbf16>
    %c0_4 = arith.constant 0 : index
    %c0_5 = arith.constant 0 : index
    %5 = vector.load %arg4[%c0_4, %c0_5] : memref<128x128xbf16, #tpu.memory_space<vmem>>, vector<128x128xbf16>
    %cst = arith.constant dense<0.000000e+00> : vector<32x128xf32>
    %6 = tpu.matmul %4, %5, %cst {dimension_numbers = #tpu.dot_dimension_numbers<[1], [0], [0], [1], [0, 0, 1, 1], [], []>} : vector<32x128xbf16>, vector<128x128xbf16>, vector<32x128xf32> -> vector<32x128xf32>
    %7 = arith.addf %3, %6 : vector<32x128xf32>
    %c0_6 = arith.constant 0 : index
    %c0_7 = arith.constant 0 : index
    %8 = vector.load %arg8[%c0_6, %c0_7] : memref<32x128xf32, #tpu.memory_space<vmem>>, vector<32x128xf32>
    tpu.vector_store %arg8[%c0_6, %c0_7], %7 {strides = array<i32>} : memref<32x128xf32, #tpu.memory_space<vmem>>, vector<32x128xf32>,
    %c0_i32_8 = arith.constant 0 : i32
    %9 = arith.cmpi eq, %arg2, %c0_i32_8 : i32
    %10 = arith.extui %9 : i1 to i32
    %c0_i32_9 = arith.constant 0 : i32
    %11 = arith.cmpi ne, %10, %c0_i32_9 : i32
    scf.if %11 {
      %c0_10 = arith.constant 0 : index
      %c0_11 = arith.constant 0 : index
      %12 = vector.load %arg8[%c0_10, %c0_11] : memref<32x128xf32, #tpu.memory_space<vmem>>, vector<32x128xf32>
      %c0_12 = arith.constant 0 : index
      %c0_13 = arith.constant 0 : index
      %13 = vector.load %arg5[%c0_12, %c0_13] : memref<1x128xf32, #tpu.memory_space<vmem>>, vector<1x128xf32>
      %14 = vector.broadcast %13 : vector<1x128xf32> to vector<32x128xf32>
      %15 = arith.mulf %12, %14 : vector<32x128xf32>
      %c0_14 = arith.constant 0 : index
      %c0_15 = arith.constant 0 : index
      %16 = vector.load %arg6[%c0_14, %c0_15] : memref<1x128xf32, #tpu.memory_space<vmem>>, vector<1x128xf32>
      %17 = vector.broadcast %16 : vector<1x128xf32> to vector<32x128xf32>
      %18 = arith.addf %15, %17 : vector<32x128xf32>
      %c0_16 = arith.constant 0 : index
      %c0_17 = arith.constant 0 : index
      %19 = vector.load %arg7[%c0_16, %c0_17] : memref<32x128xf32, #tpu.memory_space<vmem>>, vector<32x128xf32>
      tpu.vector_store %arg7[%c0_16, %c0_17], %18 {strides = array<i32>} : memref<32x128xf32, #tpu.memory_space<vmem>>, vector<32x128xf32>,
    } else {
    }
    return
  }
  func.func @transform_0(%arg0: i32, %arg1: i32, %arg2: i32) -> (i32, i32) {
    %c0_i32 = arith.constant 0 : i32
    return %arg0, %arg2 : i32, i32
  }
  func.func @transform_1(%arg0: i32, %arg1: i32, %arg2: i32) -> (i32, i32) {
    %c0_i32 = arith.constant 0 : i32
    return %arg2, %arg1 : i32, i32
  }
  func.func @transform_2(%arg0: i32, %arg1: i32, %arg2: i32) -> (i32, i32) {
    %c0_i32 = arith.constant 0 : i32
    %c0_i32_0 = arith.constant 0 : i32
    return %c0_i32, %arg1 : i32, i32
  }
  func.func @transform_3(%arg0: i32, %arg1: i32, %arg2: i32) -> (i32, i32) {
    %c0_i32 = arith.constant 0 : i32
    %c0_i32_0 = arith.constant 0 : i32
    return %c0_i32, %arg1 : i32, i32
  }
  func.func @transform_4(%arg0: i32, %arg1: i32, %arg2: i32) -> (i32, i32) {
    %c0_i32 = arith.constant 0 : i32
    return %arg0, %arg1 : i32, i32
  }
}

module attributes {stable_mosaic.version = 11 : i64} {
  func.func @_mm_kernel(%arg0: i32, %arg1: i32, %arg2: i32, %arg3: memref<224x128xbf16, #tpu.memory_space<vmem>>, %arg4: memref<128x128xbf16, #tpu.memory_space<vmem>>, %arg5: memref<1x128xf32, #tpu.memory_space<vmem>>, %arg6: memref<1x128xf32, #tpu.memory_space<vmem>>, %arg7: memref<224x128xf32, #tpu.memory_space<vmem>>, %arg8: memref<224x128xf32, #tpu.memory_space<vmem>>) attributes {dimension_semantics = [#tpu.dimension_semantics<parallel>, #tpu.dimension_semantics<parallel>, #tpu.dimension_semantics<arbitrary>], iteration_bounds = array<i64: 1, 1, 1>, scalar_prefetch = 0 : i64, scratch_operands = 1 : i64, tpu.core_type = #tpu.core_type<tc>, window_params = [{transform_indices = @transform_0, window_bounds = array<i64: 224, 128>}, {transform_indices = @transform_1, window_bounds = array<i64: 128, 128>}, {transform_indices = @transform_2, window_bounds = array<i64: 1, 128>}, {transform_indices = @transform_3, window_bounds = array<i64: 1, 128>}, {transform_indices = @transform_4, window_bounds = array<i64: 224, 128>}]} {
    %c0_i32 = arith.constant 0 : i32
    %0 = arith.cmpi eq, %arg2, %c0_i32 : i32
    %1 = arith.extui %0 : i1 to i32
    %c0_i32_0 = arith.constant 0 : i32
    %2 = arith.cmpi ne, %1, %c0_i32_0 : i32
    scf.if %2 {
      %cst_10 = arith.constant 0.000000e+00 : f32
      %12 = vector.broadcast %cst_10 : f32 to vector<224x128xf32>
      %c0_11 = arith.constant 0 : index
      %c0_12 = arith.constant 0 : index
      %13 = vector.load %arg8[%c0_11, %c0_12] : memref<224x128xf32, #tpu.memory_space<vmem>>, vector<224x128xf32>
      tpu.vector_store %arg8[%c0_11, %c0_12], %12 {strides = array<i32>} : memref<224x128xf32, #tpu.memory_space<vmem>>, vector<224x128xf32>,
    } else {
    }
    %c0 = arith.constant 0 : index
    %c0_1 = arith.constant 0 : index
    %3 = vector.load %arg8[%c0, %c0_1] : memref<224x128xf32, #tpu.memory_space<vmem>>, vector<224x128xf32>
    %c0_2 = arith.constant 0 : index
    %c0_3 = arith.constant 0 : index
    %4 = vector.load %arg3[%c0_2, %c0_3] : memref<224x128xbf16, #tpu.memory_space<vmem>>, vector<224x128xbf16>
    %c0_4 = arith.constant 0 : index
    %c0_5 = arith.constant 0 : index
    %5 = vector.load %arg4[%c0_4, %c0_5] : memref<128x128xbf16, #tpu.memory_space<vmem>>, vector<128x128xbf16>
    %cst = arith.constant dense<0.000000e+00> : vector<224x128xf32>
    %6 = tpu.matmul %4, %5, %cst {dimension_numbers = #tpu.dot_dimension_numbers<[1], [0], [0], [1], [0, 0, 1, 1], [], []>} : vector<224x128xbf16>, vector<128x128xbf16>, vector<224x128xf32> -> vector<224x128xf32>
    %7 = arith.addf %3, %6 : vector<224x128xf32>
    %c0_6 = arith.constant 0 : index
    %c0_7 = arith.constant 0 : index
    %8 = vector.load %arg8[%c0_6, %c0_7] : memref<224x128xf32, #tpu.memory_space<vmem>>, vector<224x128xf32>
    tpu.vector_store %arg8[%c0_6, %c0_7], %7 {strides = array<i32>} : memref<224x128xf32, #tpu.memory_space<vmem>>, vector<224x128xf32>,
    %c0_i32_8 = arith.constant 0 : i32
    %9 = arith.cmpi eq, %arg2, %c0_i32_8 : i32
    %10 = arith.extui %9 : i1 to i32
    %c0_i32_9 = arith.constant 0 : i32
    %11 = arith.cmpi ne, %10, %c0_i32_9 : i32
    scf.if %11 {
      %c0_10 = arith.constant 0 : index
      %c0_11 = arith.constant 0 : index
      %12 = vector.load %arg8[%c0_10, %c0_11] : memref<224x128xf32, #tpu.memory_space<vmem>>, vector<224x128xf32>
      %c0_12 = arith.constant 0 : index
      %c0_13 = arith.constant 0 : index
      %13 = vector.load %arg5[%c0_12, %c0_13] : memref<1x128xf32, #tpu.memory_space<vmem>>, vector<1x128xf32>
      %14 = vector.broadcast %13 : vector<1x128xf32> to vector<224x128xf32>
      %15 = arith.mulf %12, %14 : vector<224x128xf32>
      %c0_14 = arith.constant 0 : index
      %c0_15 = arith.constant 0 : index
      %16 = vector.load %arg6[%c0_14, %c0_15] : memref<1x128xf32, #tpu.memory_space<vmem>>, vector<1x128xf32>
      %17 = vector.broadcast %16 : vector<1x128xf32> to vector<224x128xf32>
      %18 = arith.addf %15, %17 : vector<224x128xf32>
      %c0_16 = arith.constant 0 : index
      %c0_17 = arith.constant 0 : index
      %19 = vector.load %arg7[%c0_16, %c0_17] : memref<224x128xf32, #tpu.memory_space<vmem>>, vector<224x128xf32>
      tpu.vector_store %arg7[%c0_16, %c0_17], %18 {strides = array<i32>} : memref<224x128xf32, #tpu.memory_space<vmem>>, vector<224x128xf32>,
    } else {
    }
    return
  }
  func.func @transform_0(%arg0: i32, %arg1: i32, %arg2: i32) -> (i32, i32) {
    %c0_i32 = arith.constant 0 : i32
    return %arg0, %arg2 : i32, i32
  }
  func.func @transform_1(%arg0: i32, %arg1: i32, %arg2: i32) -> (i32, i32) {
    %c0_i32 = arith.constant 0 : i32
    return %arg2, %arg1 : i32, i32
  }
  func.func @transform_2(%arg0: i32, %arg1: i32, %arg2: i32) -> (i32, i32) {
    %c0_i32 = arith.constant 0 : i32
    %c0_i32_0 = arith.constant 0 : i32
    return %c0_i32, %arg1 : i32, i32
  }
  func.func @transform_3(%arg0: i32, %arg1: i32, %arg2: i32) -> (i32, i32) {
    %c0_i32 = arith.constant 0 : i32
    %c0_i32_0 = arith.constant 0 : i32
    return %c0_i32, %arg1 : i32, i32
  }
  func.func @transform_4(%arg0: i32, %arg1: i32, %arg2: i32) -> (i32, i32) {
    %c0_i32 = arith.constant 0 : i32
    return %arg0, %arg1 : i32, i32
  }
}

</mosaic_0001>

<bundles_post_ra>
// kernel: resnet_forward.31
= control target key start
LH: loop header
LB: loop body
LE: loop exit
PB: predicated region body
PF: predicated region fallthrough
CT: control target
= control target key end

     0   :  { %s873_s1 = inlined_call_operand.vmem [shape: bf16[256,128], index: 1, kind: input, shape index: {}]   ;;  %s874_s0 = inlined_call_operand.vmem [shape: bf16[128,256], index: 0, kind: input, shape index: {}]   ;;  %s875_s2 = inlined_call_operand.vmem [shape: f32[1,128], index: 2, kind: input, shape index: {}]   ;;  %s876_s3 = inlined_call_operand.vmem [shape: f32[1,128], index: 3, kind: input, shape index: {}]   ;;  %s877_s4 = inlined_call_operand.vmem [shape: f32[128,128], index: 4, kind: output, shape index: {}]  }
   0x1   :  { %v622_v0 = vld [vmem:[%s873_s1 + $0x40] sm:$0xff]   ;;  %v624_v2 = vld [vmem:[%s873_s1 + $0x48] sm:$0xff]   ;;  %v626_v4 = vld [vmem:[%s873_s1 + $0x50] sm:$0xff]  }
   0x2   :  { %v623_v1 = vld [vmem:[%s873_s1] sm:$0xff]   ;;  %542 = vmatprep.subr.bf16.mxu0 %v622_v0  ;;  %606 = vmatprep.subr.bf16.mxu1 %v622_v0  ;;  %v625_v3 = vld [vmem:[%s873_s1 + $0x8] sm:$0xff]   ;;  %v627_v5 = vld [vmem:[%s873_s1 + $0x10] sm:$0xff]  }
   0x3   :  { %543 = vmatpush3.bf16.msra.mxu0 %v623_v1  ;;  %614 = vmatpush3.bf16.msra.mxu1 %v623_v1  ;;  %v628_v6 = vld [vmem:[%s873_s1 + $0x58] sm:$0xff]   ;;  %v630_v8 = vld [vmem:[%s873_s1 + $0x60] sm:$0xff]   ;;  %v632_v10 = vld [vmem:[%s873_s1 + $0x68] sm:$0xff]  }
   0x4   :  { %544 = vmatprep.subr.bf16.mxu0 %v624_v2  ;;  %607 = vmatprep.subr.bf16.mxu1 %v624_v2  ;;  %v629_v7 = vld [vmem:[%s873_s1 + $0x18] sm:$0xff]   ;;  %v631_v9 = vld [vmem:[%s873_s1 + $0x20] sm:$0xff]   ;;  %v633_v13 = vld [vmem:[%s873_s1 + $0x28] sm:$0xff]  }
   0x5   :  { %v640_v11 = vld [vmem:[%s874_s0 + $0x4] ss:$8 sps:$4 sm:$0xff]   ;;  %v634_v14 = vld [vmem:[%s873_s1 + $0x70] sm:$0xff]   ;;  %v636_v16 = vld [vmem:[%s873_s1 + $0x78] sm:$0xff]  }
   0x6   :  { %v643_v12 = vld [vmem:[%s874_s0 + $0x44] ss:$8 sps:$4 sm:$0xff]   ;;  %310 = vmatprep.mubr.bf16.mxu0 %v640_v11  ;;  %v635_v15 = vld [vmem:[%s873_s1 + $0x30] sm:$0xff]   ;;  %v637_v17 = vld [vmem:[%s873_s1 + $0x38] sm:$0xff]  }
   0x7   :  { %545 = vmatpush3.bf16.msra.mxu0 %v625_v3  ;;  %615 = vmatpush3.bf16.msra.mxu1 %v625_v3  ;;  %v638_v18 = vld [vmem:[%s874_s0] ss:$8 sps:$4 sm:$0xff]   ;;  %v644_v20 = vld [vmem:[%s874_s0 + $0x14] ss:$8 sps:$4 sm:$0xff]   ;;  %v648_v22 = vld [vmem:[%s874_s0 + $0x10] ss:$8 sps:$4 sm:$0xff]  }
   0x8   :  { %546 = vmatprep.subr.bf16.mxu0 %v626_v4  ;;  %608 = vmatprep.subr.bf16.mxu1 %v626_v4  ;;  %v641_v19 = vld [vmem:[%s874_s0 + $0x40] ss:$8 sps:$4 sm:$0xff]   ;;  %v646_v21 = vld [vmem:[%s874_s0 + $0x54] ss:$8 sps:$4 sm:$0xff]   ;;  %v649_v23 = vld [vmem:[%s874_s0 + $0x50] ss:$8 sps:$4 sm:$0xff]  }
   0x9   :  { %342 = vmatprep.mubr.bf16.mxu1 %v643_v12  ;;  %v650_v24 = vld [vmem:[%s874_s0 + $0x24] ss:$8 sps:$4 sm:$0xff]   ;;  %v654_v26 = vld [vmem:[%s874_s0 + $0x20] ss:$8 sps:$4 sm:$0xff]   ;;  %v656_v28 = vld [vmem:[%s874_s0 + $0x34] ss:$8 sps:$4 sm:$0xff]  }
   0xa   :  { %v652_v25 = vld [vmem:[%s874_s0 + $0x64] ss:$8 sps:$4 sm:$0xff]   ;;  %v655_v27 = vld [vmem:[%s874_s0 + $0x60] ss:$8 sps:$4 sm:$0xff]   ;;  %v658_v29 = vld [vmem:[%s874_s0 + $0x74] ss:$8 sps:$4 sm:$0xff]  }
   0xb   :  { %547 = vmatpush3.bf16.msra.mxu0 %v627_v5  ;;  %616 = vmatpush3.bf16.msra.mxu1 %v627_v5  ;;  %v660_v30 = vld [vmem:[%s874_s0 + $0x30] ss:$8 sps:$4 sm:$0xff]   ;;  %v786_v35 = vld [vmem:[%s875_s2] ss:$0 sm:$0xff] }
   0xc   :  { %548 = vmatprep.subr.bf16.mxu0 %v628_v6  ;;  %609 = vmatprep.subr.bf16.mxu1 %v628_v6  ;;  %v661_v31 = vld [vmem:[%s874_s0 + $0x70] ss:$8 sps:$4 sm:$0xff]   ;;  %v791_v41 = vld [vmem:[%s876_s3] ss:$0 sm:$0xff] }
   0xf   :  { %549 = vmatpush3.bf16.msra.mxu0 %v629_v7  ;;  %617 = vmatpush3.bf16.msra.mxu1 %v629_v7 }
  0x10   :  { %550 = vmatprep.subr.bf16.mxu0 %v630_v8  ;;  %610 = vmatprep.subr.bf16.mxu1 %v630_v8 }
  0x13   :  { %551 = vmatpush3.bf16.msra.mxu0 %v631_v9  ;;  %618 = vmatpush3.bf16.msra.mxu1 %v631_v9 }
  0x14   :  { %552 = vmatprep.subr.bf16.mxu0 %v632_v10  ;;  %611 = vmatprep.subr.bf16.mxu1 %v632_v10 }
  0x17   :  { %553 = vmatpush3.bf16.msra.mxu0 %v633_v13  ;;  %619 = vmatpush3.bf16.msra.mxu1 %v633_v13 }
  0x18   :  { %554 = vmatprep.subr.bf16.mxu0 %v634_v14  ;;  %612 = vmatprep.subr.bf16.mxu1 %v634_v14 }
  0x1b   :  { %555 = vmatpush3.bf16.msra.mxu0 %v635_v15  ;;  %620 = vmatpush3.bf16.msra.mxu1 %v635_v15 }
  0x1c   :  { %556 = vmatprep.subr.bf16.mxu0 %v636_v16  ;;  %613 = vmatprep.subr.bf16.mxu1 %v636_v16 }
  0x1f   :  { %557 = vmatpush3.bf16.msra.mxu0 %v637_v17  ;;  %621 = vmatpush3.bf16.msra.mxu1 %v637_v17 }
  0x22   :  { %311 = vmatmul.mubr.bf16.vlgmr.msra.gmra.mrb[0].mxu0 %v638_v18  ;;  %343 = vmatmul.mubr.bf16.vlgmr.msra.gmra.mrb[0].mxu1 %v641_v19 }
  0x23   :  { %318 = vmatprep.mubr.bf16.mxu0 %v644_v20  ;;  %350 = vmatprep.mubr.bf16.mxu1 %v646_v21 }
  0x2a   :  { %319 = vmatmul.mubr.bf16.gmra.mrb[4].mxu0 %v648_v22  ;;  %351 = vmatmul.mubr.bf16.gmra.mrb[4].mxu1 %v649_v23 }
  0x2b   :  { %326 = vmatprep.mubr.bf16.mxu0 %v650_v24  ;;  %358 = vmatprep.mubr.bf16.mxu1 %v652_v25 }
  0x32   :  { %327 = vmatmul.mubr.bf16.gmra.mrb[8].mxu0 %v654_v26  ;;  %359 = vmatmul.mubr.bf16.gmra.mrb[8].mxu1 %v655_v27 }
  0x33   :  { %334 = vmatprep.mubr.bf16.mxu0 %v656_v28  ;;  %366 = vmatprep.mubr.bf16.mxu1 %v658_v29 }
  0x3a   :  { %335 = vmatmul.mubr.bf16.gmra.mrb[12].mxu0 %v660_v30  ;;  %367 = vmatmul.mubr.bf16.gmra.mrb[12].mxu1 %v661_v31 }
  0xf5   :  { %v558_v32 = vpop.f32.mrb[0].mxu0  ;;  %v582_v33 = vpop.f32.mrb[0].mxu1 }
  0xf6   :  { %v559_v34 = vpop.f32.mrb[1].mxu0  ;;  %v583_v36 = vpop.f32.mrb[1].mxu1 }
  0xf7   :  { %v560_v37 = vadd.f32 %v559_v34, %v558_v32  ;;  %v584_v38 = vadd.f32 %v583_v36, %v582_v33  ;;  %v561_v39 = vpop.f32.mrb[2].mxu0  ;;  %v585_v40 = vpop.f32.mrb[2].mxu1 }
  0xf8   :  { %v562_v42 = vpop.f32.mrb[3].mxu0  ;;  %v586_v43 = vpop.f32.mrb[3].mxu1 }
  0xf9   :  { %v433_v44 = vmul.f32 %v560_v37, %v786_v35  ;;  %v441_v45 = vmul.f32 %v584_v38, %v786_v35  ;;  %v563_v46 = vadd.f32 %v562_v42, %v561_v39  ;;  %v587_v47 = vadd.f32 %v586_v43, %v585_v40 }
  0xfb   :  { %v456_v48 = vadd.f32 %v791_v41, %v433_v44  ;;  %v464_v49 = vadd.f32 %v791_v41, %v441_v45  ;;  %v434_v50 = vmul.f32 %v563_v46, %v786_v35  ;;  %v442_v51 = vmul.f32 %v587_v47, %v786_v35 }
  0xfd   :  { %v472_v52 = vmax.f32 %v456_v48, 0.0  ;;  %v480_v53 = vmax.f32 %v464_v49, 0.0  ;;  %v457_v54 = vadd.f32 %v791_v41, %v434_v50  ;;  %v465_v55 = vadd.f32 %v791_v41, %v442_v51  ;;  %v564_v56 = vpop.f32.mrb[4].mxu0  ;;  %v588_v57 = vpop.f32.mrb[4].mxu1 }
  0xfe   :  { %v565_v58 = vpop.f32.mrb[5].mxu0  ;;  %v589_v59 = vpop.f32.mrb[5].mxu1 }
  0xff   :  { %488 = vst [vmem:[%s877_s4] sm:$0xff] %v472_v52  ;;  %496 = vst [vmem:[%s877_s4 + $0x40] sm:$0xff] %v480_v53  ;;  %v473_v60 = vmax.f32 %v457_v54, 0.0  ;;  %v481_v61 = vmax.f32 %v465_v55, 0.0  ;;  %v566_v62 = vadd.f32 %v565_v58, %v564_v56  ;;  %v590_v63 = vadd.f32 %v589_v59, %v588_v57  ;;  %v567_v0 = vpop.f32.mrb[6].mxu0  ;;  %v591_v1 = vpop.f32.mrb[6].mxu1 }
 0x100   :  { %v568_v2 = vpop.f32.mrb[7].mxu0  ;;  %v592_v3 = vpop.f32.mrb[7].mxu1 }
 0x101   :  { %489 = vst [vmem:[%s877_s4 + $0x8] sm:$0xff] %v473_v60  ;;  %497 = vst [vmem:[%s877_s4 + $0x48] sm:$0xff] %v481_v61  ;;  %v435_v4 = vmul.f32 %v566_v62, %v786_v35  ;;  %v443_v5 = vmul.f32 %v590_v63, %v786_v35  ;;  %v569_v6 = vadd.f32 %v568_v2, %v567_v0 }
 0x102   :  { %v593_v7 = vadd.f32 %v592_v3, %v591_v1 }
 0x103   :  { %v458_v8 = vadd.f32 %v791_v41, %v435_v4  ;;  %v466_v9 = vadd.f32 %v791_v41, %v443_v5  ;;  %v436_v10 = vmul.f32 %v569_v6, %v786_v35 }
 0x104   :  { %v444_v11 = vmul.f32 %v593_v7, %v786_v35 }
 0x105   :  { %v474_v12 = vmax.f32 %v458_v8, 0.0  ;;  %v482_v13 = vmax.f32 %v466_v9, 0.0  ;;  %v459_v14 = vadd.f32 %v791_v41, %v436_v10  ;;  %v570_v16 = vpop.f32.mrb[8].mxu0  ;;  %v594_v17 = vpop.f32.mrb[8].mxu1 }
 0x106   :  { %v467_v15 = vadd.f32 %v791_v41, %v444_v11  ;;  %v571_v18 = vpop.f32.mrb[9].mxu0  ;;  %v595_v19 = vpop.f32.mrb[9].mxu1 }
 0x107   :  { %490 = vst [vmem:[%s877_s4 + $0x10] sm:$0xff] %v474_v12  ;;  %498 = vst [vmem:[%s877_s4 + $0x50] sm:$0xff] %v482_v13  ;;  %v475_v20 = vmax.f32 %v459_v14, 0.0  ;;  %v572_v22 = vadd.f32 %v571_v18, %v570_v16  ;;  %v596_v23 = vadd.f32 %v595_v19, %v594_v17  ;;  %v573_v24 = vpop.f32.mrb[10].mxu0  ;;  %v597_v25 = vpop.f32.mrb[10].mxu1 }
 0x108   :  { %v483_v21 = vmax.f32 %v467_v15, 0.0  ;;  %v574_v26 = vpop.f32.mrb[11].mxu0  ;;  %v598_v27 = vpop.f32.mrb[11].mxu1 }
 0x109   :  { %491 = vst [vmem:[%s877_s4 + $0x18] sm:$0xff] %v475_v20  ;;  %v437_v28 = vmul.f32 %v572_v22, %v786_v35  ;;  %v445_v29 = vmul.f32 %v596_v23, %v786_v35  ;;  %v575_v30 = vadd.f32 %v574_v26, %v573_v24  ;;  %v599_v31 = vadd.f32 %v598_v27, %v597_v25 }
 0x10a   :  { %499 = vst [vmem:[%s877_s4 + $0x58] sm:$0xff] %v483_v21 }
 0x10b   :  { %v460_v32 = vadd.f32 %v791_v41, %v437_v28  ;;  %v468_v33 = vadd.f32 %v791_v41, %v445_v29  ;;  %v438_v34 = vmul.f32 %v575_v30, %v786_v35  ;;  %v446_v36 = vmul.f32 %v599_v31, %v786_v35 }
 0x10d   :  { %v476_v37 = vmax.f32 %v460_v32, 0.0  ;;  %v484_v38 = vmax.f32 %v468_v33, 0.0  ;;  %v461_v39 = vadd.f32 %v791_v41, %v438_v34  ;;  %v469_v40 = vadd.f32 %v791_v41, %v446_v36  ;;  %v576_v42 = vpop.f32.mrb[12].mxu0  ;;  %v600_v43 = vpop.f32.mrb[12].mxu1 }
 0x10e   :  { %v577_v44 = vpop.f32.mrb[13].mxu0  ;;  %v601_v45 = vpop.f32.mrb[13].mxu1 }
 0x10f   :  { %492 = vst [vmem:[%s877_s4 + $0x20] sm:$0xff] %v476_v37  ;;  %500 = vst [vmem:[%s877_s4 + $0x60] sm:$0xff] %v484_v38  ;;  %v477_v46 = vmax.f32 %v461_v39, 0.0  ;;  %v485_v47 = vmax.f32 %v469_v40, 0.0  ;;  %v578_v48 = vadd.f32 %v577_v44, %v576_v42  ;;  %v602_v49 = vadd.f32 %v601_v45, %v600_v43  ;;  %v579_v50 = vpop.f32.mrb[14].mxu0  ;;  %v603_v51 = vpop.f32.mrb[14].mxu1 }
 0x110   :  { %v580_v52 = vpop.f32.mrb[15].mxu0  ;;  %v604_v53 = vpop.f32.mrb[15].mxu1 }
 0x111   :  { %493 = vst [vmem:[%s877_s4 + $0x28] sm:$0xff] %v477_v46  ;;  %501 = vst [vmem:[%s877_s4 + $0x68] sm:$0xff] %v485_v47  ;;  %v439_v54 = vmul.f32 %v578_v48, %v786_v35  ;;  %v447_v55 = vmul.f32 %v602_v49, %v786_v35  ;;  %v581_v56 = vadd.f32 %v580_v52, %v579_v50 }
 0x112   :  { %v605_v57 = vadd.f32 %v604_v53, %v603_v51 }
 0x113   :  { %v462_v58 = vadd.f32 %v791_v41, %v439_v54  ;;  %v470_v59 = vadd.f32 %v791_v41, %v447_v55  ;;  %v440_v60 = vmul.f32 %v581_v56, %v786_v35 }
 0x114   :  { %v448_v61 = vmul.f32 %v605_v57, %v786_v35 }
 0x115   :  { %v478_v62 = vmax.f32 %v462_v58, 0.0  ;;  %v486_v63 = vmax.f32 %v470_v59, 0.0  ;;  %v463_v0 = vadd.f32 %v791_v41, %v440_v60 }
 0x116   :  { %v471_v1 = vadd.f32 %v791_v41, %v448_v61 }
 0x117   :  { %494 = vst [vmem:[%s877_s4 + $0x30] sm:$0xff] %v478_v62  ;;  %502 = vst [vmem:[%s877_s4 + $0x70] sm:$0xff] %v486_v63  ;;  %v479_v2 = vmax.f32 %v463_v0, 0.0 }
 0x118   :  { %v487_v3 = vmax.f32 %v471_v1, 0.0 }
 0x119   :  { %495 = vst [vmem:[%s877_s4 + $0x38] sm:$0xff] %v479_v2 }
 0x11a   :  { %503 = vst [vmem:[%s877_s4 + $0x78] sm:$0xff] %v487_v3 }

// kernel: resnet_forward.32
= control target key start
LH: loop header
LB: loop body
LE: loop exit
PB: predicated region body
PF: predicated region fallthrough
CT: control target
= control target key end

     0   :  { %vm84_vm0 = vcmask 523264   ;;  %s259_s0 = inlined_call_operand.vmem [shape: f32[9,32,64], index: 0, kind: input, shape index: {}]   ;;  %s260_s1 = inlined_call_operand.vmem [shape: f32[32,64], index: 1, kind: output, shape index: {}]  }
   0x1   :  { %v8_v0 = vld [vmem:[%s259_s0] sm:$0xff]  ;;  %v9_v6 = vld [vmem:[%s259_s0 + $0x8] sm:$0xff]  ;;  %v10_v15 = vld [vmem:[%s259_s0 + $0x10] sm:$0xff] }
   0x2   :  { %v93_v1 = vld [vmem:[%s259_s0 + $0x20] sm:$0xff]  ;;  %v94_v7 = vld [vmem:[%s259_s0 + $0x28] sm:$0xff]  ;;  %v95_v16 = vld [vmem:[%s259_s0 + $0x30] sm:$0xff] }
   0x3   :  { %v97_v2 = vld [vmem:[%s259_s0 + $0x40] sm:$0xff]  ;;  %v17_v3 = vmax.f32 %v8_v0, %v93_v1  ;;  %v98_v8 = vld [vmem:[%s259_s0 + $0x48] sm:$0xff]  ;;  %v18_v10 = vmax.f32 %v9_v6, %v94_v7  ;;  %v99_v17 = vld [vmem:[%s259_s0 + $0x50] sm:$0xff]  ;;  %v19_v20 = vmax.f32 %v10_v15, %v95_v16 }
   0x4   :  { %v101_v4 = vld [vmem:[%s259_s0 + $0x60] sm:$0xff]  ;;  %v102_v13 = vld [vmem:[%s259_s0 + $0x68] sm:$0xff]  ;;  %v103_v24 = vld [vmem:[%s259_s0 + $0x70] sm:$0xff] }
   0x5   :  { %v26_v5 = vmax.f32 %v17_v3, %v97_v2  ;;  %v105_v9 = vld [vmem:[%s259_s0 + $0x80] sm:$0xff]  ;;  %v27_v14 = vmax.f32 %v18_v10, %v98_v8  ;;  %v106_v19 = vld [vmem:[%s259_s0 + $0x88] sm:$0xff]  ;;  %v28_v26 = vmax.f32 %v19_v20, %v99_v17  ;;  %v11_v27 = vld [vmem:[%s259_s0 + $0x18] sm:$0xff] }
   0x6   :  { %v109_v12 = vld [vmem:[%s259_s0 + $0xa0] sm:$0xff]  ;;  %v110_v23 = vld [vmem:[%s259_s0 + $0xa8] sm:$0xff]  ;;  %v96_v28 = vld [vmem:[%s259_s0 + $0x38] sm:$0xff] }
   0x7   :  { %v35_v11 = vmax.f32 %v26_v5, %v101_v4  ;;  %v113_v21 = vld [vmem:[%s259_s0 + $0xc0] sm:$0xff]  ;;  %v36_v22 = vmax.f32 %v27_v14, %v102_v13  ;;  %v100_v29 = vld [vmem:[%s259_s0 + $0x58] sm:$0xff]  ;;  %v107_v32 = vld [vmem:[%s259_s0 + $0x90] sm:$0xff]  ;;  %v20_v33 = vmax.f32 %v11_v27, %v96_v28  ;;  %v37_v36 = vmax.f32 %v28_v26, %v103_v24 }
   0x8   :  { %v117_v30 = vld [vmem:[%s259_s0 + $0xe0] sm:$0xff]  ;;  %v114_v35 = vld [vmem:[%s259_s0 + $0xc8] sm:$0xff]  ;;  %v104_v37 = vld [vmem:[%s259_s0 + $0x78] sm:$0xff] }
   0x9   :  { %v44_v18 = vmax.f32 %v35_v11, %v105_v9  ;;  %v45_v31 = vmax.f32 %v36_v22, %v106_v19  ;;  %v121_v38 = vld [vmem:[%s259_s0 + $0x100] sm:$0xff]  ;;  %v111_v40 = vld [vmem:[%s259_s0 + $0xb0] sm:$0xff]  ;;  %v29_v41 = vmax.f32 %v20_v33, %v100_v29  ;;  %v118_v43 = vld [vmem:[%s259_s0 + $0xe8] sm:$0xff]  ;;  %v46_v44 = vmax.f32 %v37_v36, %v107_v32 }
   0xa   :  { %v108_v45 = vld [vmem:[%s259_s0 + $0x98] sm:$0xff]  ;;  %v115_v47 = vld [vmem:[%s259_s0 + $0xd0] sm:$0xff]  ;;  %v122_v50 = vld [vmem:[%s259_s0 + $0x108] sm:$0xff] }
   0xb   :  { %v53_v25 = vmax.f32 %v44_v18, %v109_v12  ;;  %v54_v39 = vmax.f32 %v45_v31, %v110_v23  ;;  %v38_v48 = vmax.f32 %v29_v41, %v104_v37  ;;  %v55_v51 = vmax.f32 %v46_v44, %v111_v40  ;;  %v112_v52 = vld [vmem:[%s259_s0 + $0xb8] sm:$0xff]  ;;  %v119_v54 = vld [vmem:[%s259_s0 + $0xf0] sm:$0xff] }
   0xc   :  { %v116_v57 = vld [vmem:[%s259_s0 + $0xd8] sm:$0xff]  ;;  %v123_v59 = vld [vmem:[%s259_s0 + $0x110] sm:$0xff] }
   0xd   :  { %v62_v34 = vmax.f32 %v53_v25, %v113_v21  ;;  %v63_v46 = vmax.f32 %v54_v39, %v114_v35  ;;  %v47_v55 = vmax.f32 %v38_v48, %v108_v45  ;;  %v64_v56 = vmax.f32 %v55_v51, %v115_v47  ;;  %v120_v62 = vld [vmem:[%s259_s0 + $0xf8] sm:$0xff] }
   0xe   :  { %v124_v1 = vld [vmem:[%s259_s0 + $0x118] sm:$0xff] }
   0xf   :  { %v71_v42 = vmax.f32 %v62_v34, %v117_v30  ;;  %v72_v53 = vmax.f32 %v63_v46, %v118_v43  ;;  %v56_v60 = vmax.f32 %v47_v55, %v112_v52  ;;  %v73_v61 = vmax.f32 %v64_v56, %v119_v54 }
  0x11   :  { %v80_v49 = vmax.f32 %v71_v42, %v121_v38  ;;  %v81_v58 = vmax.f32 %v72_v53, %v122_v50  ;;  %v65_v63 = vmax.f32 %v56_v60, %v116_v57  ;;  %v82_v0 = vmax.f32 %v73_v61, %v123_v59 }
  0x13   :  { %85 = vst.msk [vmem:[%s260_s1] sm:$0xff] %vm84_vm0, %v80_v49  ;;  %86 = vst.msk [vmem:[%s260_s1 + $0x8] sm:$0xff] %vm84_vm0, %v81_v58  ;;  %v74_v2 = vmax.f32 %v65_v63, %v120_v62 }
  0x14   :  { %87 = vst.msk [vmem:[%s260_s1 + $0x10] sm:$0xff] %vm84_vm0, %v82_v0 }
  0x15   :  { %v83_v3 = vmax.f32 %v74_v2, %v124_v1 }
  0x17   :  { %88 = vst.msk [vmem:[%s260_s1 + $0x18] sm:$0xff] %vm84_vm0, %v83_v3 }

// kernel: resnet_forward.34
= control target key start
LH: loop header
LB: loop body
LE: loop exit
PB: predicated region body
PF: predicated region fallthrough
CT: control target
= control target key end

     0   :  { %s333_s1 = inlined_call_operand.vmem [shape: bf16[128,128], index: 1, kind: input, shape index: {}]   ;;  %s334_s0 = inlined_call_operand.vmem [shape: bf16[32,128], index: 0, kind: input, shape index: {}]   ;;  %s335_s2 = inlined_call_operand.vmem [shape: f32[1,128], index: 2, kind: input, shape index: {}]   ;;  %s336_s3 = inlined_call_operand.vmem [shape: f32[1,128], index: 3, kind: input, shape index: {}]   ;;  %s337_s4 = inlined_call_operand.vmem [shape: f32[32,128], index: 4, kind: output, shape index: {}]  }
   0x1   :  { %v250_v0 = vld [vmem:[%s333_s1] sm:$0xff]   ;;  %v251_v1 = vld [vmem:[%s333_s1 + $0x8] sm:$0xff]   ;;  %v252_v2 = vld [vmem:[%s333_s1 + $0x10] sm:$0xff]  }
   0x2   :  { %230 = vmatprep.subr.bf16.mxu0 %v250_v0  ;;  %v253_v3 = vld [vmem:[%s333_s1 + $0x18] sm:$0xff]   ;;  %v258_v4 = vld [vmem:[%s334_s0] sm:$0xff]   ;;  %v255_v6 = vld [vmem:[%s333_s1 + $0x28] sm:$0xff]  }
   0x3   :  { %231 = vmatpush3.bf16.msra.mxu0 %v250_v0  ;;  %246 = vmatprep.mubr.bf16.mxu0 %v258_v4  ;;  %v254_v5 = vld [vmem:[%s333_s1 + $0x20] sm:$0xff]   ;;  %v256_v7 = vld [vmem:[%s333_s1 + $0x30] sm:$0xff]   ;;  %v257_v8 = vld [vmem:[%s333_s1 + $0x38] sm:$0xff]  }
   0x4   :  { %232 = vmatprep.subr.bf16.mxu0 %v251_v1  ;;  %v259_v9 = vld [vmem:[%s334_s0 + $0x8] sm:$0xff]   ;;  %v218_v10 = vld [vmem:[%s335_s2] ss:$0 sm:$0xff] }
   0x5   :  { %v219_v12 = vld [vmem:[%s336_s3] ss:$0 sm:$0xff] }
   0x7   :  { %233 = vmatpush3.bf16.msra.mxu0 %v251_v1 }
   0x8   :  { %234 = vmatprep.subr.bf16.mxu0 %v252_v2 }
   0xb   :  { %235 = vmatpush3.bf16.msra.mxu0 %v252_v2 }
   0xc   :  { %236 = vmatprep.subr.bf16.mxu0 %v253_v3 }
   0xf   :  { %237 = vmatpush3.bf16.msra.mxu0 %v253_v3 }
  0x10   :  { %238 = vmatprep.subr.bf16.mxu0 %v254_v5 }
  0x13   :  { %239 = vmatpush3.bf16.msra.mxu0 %v254_v5 }
  0x14   :  { %240 = vmatprep.subr.bf16.mxu0 %v255_v6 }
  0x17   :  { %241 = vmatpush3.bf16.msra.mxu0 %v255_v6 }
  0x18   :  { %242 = vmatprep.subr.bf16.mxu0 %v256_v7 }
  0x1b   :  { %243 = vmatpush3.bf16.msra.mxu0 %v256_v7 }
  0x1c   :  { %244 = vmatprep.subr.bf16.mxu0 %v257_v8 }
  0x1f   :  { %245 = vmatpush3.bf16.msra.mxu0 %v257_v8 }
  0x22   :  { %247 = vmatmul.mubr.bf16.vlgmr.msra.gmra.mrb[0].mxu0 %v259_v9 }
  0xf5   :  { %v248_v11 = vpop.f32.mrb[0].mxu0 }
  0xf6   :  { %v183_v13 = vmul.f32 %v248_v11, %v218_v10  ;;  %v144_v14 = vpop.f32.mrb[1].mxu0 }
  0xf7   :  { %v181_v15 = vmul.f32 %v218_v10, %v144_v14  ;;  %v249_v16 = vpop.f32.mrb[2].mxu0 }
  0xf8   :  { %v194_v17 = vadd.f32 %v219_v12, %v183_v13  ;;  %v184_v18 = vmul.f32 %v249_v16, %v218_v10  ;;  %v147_v19 = vpop.f32.mrb[3].mxu0 }
  0xf9   :  { %v192_v20 = vadd.f32 %v219_v12, %v181_v15  ;;  %v182_v21 = vmul.f32 %v218_v10, %v147_v19 }
  0xfa   :  { %v198_v22 = vmax.f32 %v194_v17, 0.0  ;;  %v195_v23 = vadd.f32 %v219_v12, %v184_v18 }
  0xfb   :  { %v196_v24 = vmax.f32 %v192_v20, 0.0  ;;  %v193_v25 = vadd.f32 %v219_v12, %v182_v21 }
  0xfc   :  { %202 = vst [vmem:[%s337_s4 + $0x10] sm:$0xff] %v198_v22  ;;  %v199_v26 = vmax.f32 %v195_v23, 0.0 }
  0xfd   :  { %200 = vst [vmem:[%s337_s4] sm:$0xff] %v196_v24  ;;  %v197_v27 = vmax.f32 %v193_v25, 0.0 }
  0xfe   :  { %203 = vst [vmem:[%s337_s4 + $0x18] sm:$0xff] %v199_v26 }
  0xff   :  { %201 = vst [vmem:[%s337_s4 + $0x8] sm:$0xff] %v197_v27 }

// kernel: resnet_forward.35
= control target key start
LH: loop header
LB: loop body
LE: loop exit
PB: predicated region body
PF: predicated region fallthrough
CT: control target
= control target key end

     0   :  { %s1989_s15 = smov 0   ;;  %s2393_s0 = inlined_call_operand.vmem [shape: bf16[2,56,64], index: 0, kind: input, shape index: {}]   ;;  %s2394_s1 = inlined_call_operand.vmem [shape: bf16[9,64,64], index: 1, kind: input, shape index: {}]   ;;  %s2395_s2 = inlined_call_operand.vmem [shape: f32[1,64], index: 2, kind: input, shape index: {}]   ;;  %s2396_s3 = inlined_call_operand.vmem [shape: f32[1,64], index: 3, kind: input, shape index: {}]   ;;  %s2397_s4 = inlined_call_operand.vmem [shape: f32[2,36,64], index: 4, kind: output, shape index: {}]  }
   0x1 LB: > { %s1392_s16 = sadd.s32 4294967295, %s1960_s15   ;;  %p1396_p0 = scmp.ge.s32.totalorder %s1960_s15, 1  ;;  %s1960_s15 = sphi %s1989_s15, %s14_s15  }
   0x2   : > { %p162_p1 = scmp.lt.s32.totalorder %s1960_s15, 3 }
   0x4   : > { %p163_p2 = pnand %p1396_p0, %p162_p1 }
   0x5   : > { %v1900_v0 = vld [vmem:[%s2394_s1 + $0x20] sm:$0xff] (!%p163_p2)   ;;  %v1962_v1 = vmov (!%p163_p2), 0.0   ;;  %v1902_v3 = vld [vmem:[%s2394_s1 + $0x28] sm:$0xff] (!%p163_p2)   ;;  %vm1963_vm0 = vmmov (!%p163_p2), 0   ;;  %p188_p3 = scmp.lt.s32.totalorder (!%p163_p2), %s1392_s16, 1  ;;  %v1904_v5 = vld [vmem:[%s2394_s1 + $0x30] sm:$0xff] (!%p163_p2)  }
   0x6   : > { %166 = sbr.rel (%p163_p2) target bundleno = 354 (0x162), region = 36  ;;  %1611 = vmatprep.subr.bf16.mxu1 (!%p163_p2), %v1962_v1  ;;  %1691 = vmatprep.subr.bf16.mxu0 (!%p163_p2), %v1962_v1  ;;  %v2005_v2 = vld [vmem:[%s2394_s1 + $0x80] sm:$0xff] (!%p163_p2)   ;;  %v2017_v4 = vld [vmem:[%s2394_s1 + $0x88] sm:$0xff] (!%p163_p2)   ;;  %v2033_v6 = vld [vmem:[%s2394_s1 + $0x90] sm:$0xff] (!%p163_p2)   ;;  %vm235_vm1 = vsmask.f32 (!%p163_p2), 7424 }
   0x7   : > { %1612 = vmatpush3.bf16.msra.mxu1 (!%p163_p2), %v1900_v0  ;;  %1619 = vmatprep.mubr.msk.bf16.mxu1 (!%p163_p2), %vm1963_vm0, %v1962_v1  ;;  %v1906_v7 = vld [vmem:[%s2394_s1 + $0x38] sm:$0xff] (!%p163_p2)   ;;  %vm283_vm2 = vcmask (!%p163_p2), 523264   ;;  %vm695_vm3 = vsmask.f32 (!%p163_p2), 4352  ;;  %v1914_v28 = vld [vmem:[%s2394_s1] sm:$0xff] (!%p163_p2)   ;;  %v1919_v45 = vld [vmem:[%s2394_s1 + $0x8] sm:$0xff] (!%p163_p2)  }
   0x8   : > { %1692 = vmatpush3.bf16.msra.mxu0 (!%p163_p2), %v2005_v2  ;;  %1613 = vmatprep.subr.bf16.mxu1 (!%p163_p2), %v1962_v1  ;;  %v2047_v8 = vld [vmem:[%s2394_s1 + $0x98] sm:$0xff] (!%p163_p2)   ;;  %v1913_v41 = vld [vmem:[%s2394_s1 + $0xa0] sm:$0xff] (!%p163_p2)   ;;  %v1915_v47 = vld [vmem:[%s2394_s1 + $0xa8] sm:$0xff] (!%p163_p2)   ;;  %vm582_vm4 = vcmask (!%p163_p2), 1044480   ;;  %vm939_vm5 = vcmask (!%p163_p2), 1045504   ;;  %vm452_vm6 = vcmask (!%p163_p2), 1046528  }
   0x9   : > { %1693 = vmatprep.subr.bf16.mxu0 (!%p163_p2), %v1962_v1  ;;  %1699 = vmatprep.mubr.msk.bf16.mxu0 (!%p163_p2), %vm1963_vm0, %v1962_v1  ;;  %v1921_v55 = vld [vmem:[%s2394_s1 + $0x10] sm:$0xff] (!%p163_p2)   ;;  %v1923_v61 = vld [vmem:[%s2394_s1 + $0x18] sm:$0xff] (!%p163_p2)   ;;  %vm1069_vm7 = vsmask.f32 (!%p163_p2), 5376  ;;  %vm1335_vm8 = vcmask (!%p163_p2), 519168  }
   0xa   : > { %v1918_v56 = vld [vmem:[%s2394_s1 + $0xb0] sm:$0xff] (!%p163_p2)   ;;  %v1920_v63 = vld [vmem:[%s2394_s1 + $0xb8] sm:$0xff] (!%p163_p2)  }
   0xb   : > { %1614 = vmatpush3.bf16.msra.mxu1 (!%p163_p2), %v1902_v3 }
   0xc   : > { %1694 = vmatpush3.bf16.msra.mxu0 (!%p163_p2), %v2017_v4  ;;  %1615 = vmatprep.subr.bf16.mxu1 (!%p163_p2), %v1962_v1 }
   0xd   : > { %s2399_s16 = smov (!%p188_p3, %s1392_s16), 1  ;;  %1695 = vmatprep.subr.bf16.mxu0 %v1962_v1 }
   0xe   : > { %s1888_s27 = smul.u32 28, %s2399_s16 }
   0xf   : > { %1616 = vmatpush3.bf16.msra.mxu1 %v1904_v5  ;;  %v1922_v5 = vld [vmem:[%s2394_s1 + $0xc0] sm:$0xff]   ;;  %s1889_s24 = smul.u32 40, %s2399_s16 }
  0x10   : > { %s2042_s8 = scalar_lea.vmem %s2393_s0, %s1888_s27  ;;  %1696 = vmatpush3.bf16.msra.mxu0 %v2033_v6  ;;  %1617 = vmatprep.subr.bf16.mxu1 %v1962_v1 }
  0x11   : > { %v199_v9 = vld [vmem:[%s2042_s8] sm:$0xf]  ;;  %v2051_v10 = vld [vmem:[%s2042_s8 + $0x4] sm:$0xf]  ;;  %v2057_v12 = vld [vmem:[%s2042_s8 + $0x8] sm:$0xff]   ;;  %1697 = vmatprep.subr.bf16.mxu0 %v1962_v1  ;;  %s2379_s29 = scalar_lea.vmem %s2397_s4, %s1889_s24 }
  0x12   : > { %v2054_v11 = vcombine.low %v199_v9, %v2051_v10  ;;  %v552_v13 = vld [vmem:[%s2042_s8] sm:$0x8]  ;;  %v2063_v14 = vld [vmem:[%s2042_s8 + $0x4] sm:$0xf]  ;;  %v2066_v15 = vld [vmem:[%s2042_s8 + $0x8] sm:$0xf] }
  0x13   : > { %v2069_v16 = vld [vmem:[%s2042_s8 + $0xc] sm:$0xf]  ;;  %v244_v19 = vshll.u32 %v2057_v12, 16  ;;  %v2076_v20 = vcombine.low %v552_v13, %v2063_v14  ;;  %1618 = vmatpush3.bf16.msra.mxu1 %v1906_v7  ;;  %v248_v29 = vshrl.u32 %v2057_v12, 16  ;;  %v2094_v33 = vld [vmem:[%s2042_s8 + $0x10] sm:$0xf]  ;;  %v1483_v3 = vcombine.low %v2063_v14, %v2066_v15 }
  0x14   : > { %v237_v17 = vshrl.u32 %v2054_v11, 16  ;;  %v239_v18 = vshll.u32 %v2054_v11, 16  ;;  %v2080_v21 = vcombine.low %v2066_v15, %v2069_v16  ;;  %1698 = vmatpush3.bf16.msra.mxu0 %v2047_v8  ;;  %1631 = vmatprep.subr.bf16.mxu1 %v1962_v1  ;;  %v2097_v36 = vld [vmem:[%s2042_s8 + $0x10] ss:$0 sps:$4 sm:$0x77]   ;;  %v1924_v7 = vld [vmem:[%s2394_s1 + $0xc8] sm:$0xff]   ;;  %v2179_v13 = vcombine.low %v2069_v16, %v2094_v33 }
  0x15   : > { %v246_v23 = vrot.slane %v244_v19, 1  ;;  %v697_v24 = vshrl.u32 %v2076_v20, 16  ;;  %v700_v25 = vshll.u32 %v2076_v20, 16  ;;  %1711 = vmatprep.subr.bf16.mxu0 %v1962_v1  ;;  %v2101_v39 = vld [vmem:[%s2042_s8 + $0x14] sm:$0x3]  ;;  %v252_v42 = vshll.u32 %v2097_v36, 16 }
  0x16   : > { %v241_v22 = vrot.slane %v239_v18, 1  ;;  %v705_v26 = vshrl.u32 %v2080_v21, 16  ;;  %v708_v27 = vshll.u32 %v2080_v21, 16  ;;  %v1467_v43 = vcombine.low %v2094_v33, %v2101_v39  ;;  %v1926_v9 = vld [vmem:[%s2394_s1 + $0x40] sm:$0xff]   ;;  %v1927_v14 = vld [vmem:[%s2394_s1 + $0xd0] sm:$0xff]  }
  0x17   : > { %v699_v31 = vrot.slane %v697_v24, 3  ;;  %v702_v32 = vrot.slane %v700_v25, 4  ;;  %v250_v44 = vor.u32 %v248_v29, %v246_v23  ;;  %v254_v48 = vrot.slane %v252_v42, 1  ;;  %v922_v16 = vld [vmem:[%s2042_s8 + $0x4] sm:$0xc]  ;;  %v1933_v19 = vld [vmem:[%s2394_s1 + $0x50] sm:$0xff]  }
  0x18   : > { %v242_v30 = vor.u32 %v241_v22, %v237_v17  ;;  %v707_v34 = vrot.slane %v705_v26, 3  ;;  %v710_v35 = vrot.slane %v708_v27, 4  ;;  %v714_v49 = vshrl.u32 %v1467_v43, 16  ;;  %v1929_v17 = vld [vmem:[%s2394_s1 + $0x48] sm:$0xff]   ;;  %v557_v18 = vld [vmem:[%s2042_s8 + $0x14] sm:$0x1] }
  0x19   : > { %v703_v38 = vor.u32 %v702_v32, %v699_v31  ;;  %v717_v50 = vshll.u32 %v1467_v43, 16  ;;  %v255_v53 = vsel %vm235_vm1, %v250_v44, %v254_v48  ;;  %v256_v58 = vshrl.u32 %v2097_v36, 16  ;;  %v1935_v24 = vld [vmem:[%s2394_s1 + $0x58] sm:$0xff]   ;;  %v439_v25 = vld [vmem:[%s2042_s8] sm:$0xe]  ;;  %v2265_v43 = vld [vmem:[%s2042_s8 + $0xc] sm:$0xff]  }
  0x1a   : > { %v247_v37 = vsel %vm235_vm1, %v242_v30, %v246_v23  ;;  %v711_v40 = vor.u32 %v710_v35, %v707_v34  ;;  %v716_v51 = vrot.slane %v714_v49, 3  ;;  %v583_v59 = vrot.slane %v2076_v20, 3  ;;  %v1931_v27 = vld [vmem:[%s2042_s8 + $0x10] ss:$0 sps:$4 sm:$0x33]   ;;  %v1934_v31 = vld [vmem:[%s2394_s1 + $0xe0] sm:$0xff]  }
  0x1b   : > { %1620 = vmatmul.mubr.msk.bf16.vlgmr.msra.gmra.mrb[0].mxu1 %vm283_vm2, %v247_v37  ;;  %v719_v52 = vrot.slane %v717_v50, 4  ;;  %v584_v60 = vrot.slane %v2080_v21, 3  ;;  %v258_v0 = vor.u32 %v256_v58, %v254_v48  ;;  %v1451_v20 = vcombine.low %v2094_v33, %v557_v18  ;;  %v1938_v32 = vld [vmem:[%s2042_s8 + $0x14] ss:$0 sps:$4 sm:$0xff]   ;;  %v1936_v34 = vld [vmem:[%s2394_s1 + $0xe8] sm:$0xff]   ;;  %v1947_v58 = vld [vmem:[%s2394_s1 + $0x78] sm:$0xff]  }
  0x1c   : > { %1632 = vmatpush3.bf16.msra.mxu1 %v1914_v28  ;;  %1623 = vmatprep.mubr.msk.bf16.mxu1 %vm1963_vm0, %v1962_v1  ;;  %v712_v46 = vsel %vm695_vm3, %v703_v38, %v711_v40  ;;  %v1485_v21 = vcombine.low %v2101_v39, %v2101_v39  ;;  %v1501_v22 = vcombine.low %v922_v16, %v2066_v15  ;;  %v941_v15 = vrot.slane %v2179_v13, 2  ;;  %v1039_v38 = vld [vmem:[%s2042_s8 + $0x4] sm:$0xc]  ;;  %v2256_v39 = vld [vmem:[%s2042_s8 + $0x8] sm:$0xf] }
  0x1d   : > { %1633 = vmatprep.subr.bf16.mxu1 %v1962_v1  ;;  %1700 = vmatmul.mubr.msk.bf16.vlgmr.msra.gmra.mrb[0].mxu0 %vm283_vm2, %v712_v46  ;;  %v2125_v54 = vor.u32 %v719_v52, %v716_v51  ;;  %v2149_v62 = vsel %vm582_vm4, %v583_v59, %v584_v60  ;;  %v2213_v23 = vrot.slane %v1451_v20, 3  ;;  %v1433_v29 = vcombine.low %v439_v25, %v2051_v10  ;;  %v1942_v46 = vld [vmem:[%s2394_s1 + $0xf8] sm:$0xff]   ;;  %v1945_v51 = vld [vmem:[%s2394_s1 + $0x70] sm:$0xff]  }
  0x1e   : > { %1712 = vmatpush3.bf16.msra.mxu0 %v1913_v41  ;;  %1703 = vmatprep.mubr.msk.bf16.mxu0 %vm1963_vm0, %v1962_v1  ;;  %v940_v28 = vrot.slane %v1501_v22, 2  ;;  %v454_v10 = vrot.slane %v2057_v12, 1  ;;  %v943_v35 = vrot.slane %v1938_v32, 2  ;;  %v1940_v41 = vld [vmem:[%s2394_s1 + $0xf0] sm:$0xff]   ;;  %v1518_v42 = vcombine.low %v1039_v38, %v2256_v39 }
  0x1f   : > { %1713 = vmatprep.subr.bf16.mxu0 %v1962_v1  ;;  %v721_v57 = vsel %vm695_vm3, %v711_v40, %v2125_v54  ;;  %v2224_v26 = vsel %vm582_vm4, %v584_v60, %v2213_v23  ;;  %v453_v33 = vrot.slane %v1433_v29, 1  ;;  %v456_v44 = vrot.slane %v2097_v36, 1 }
  0x20   : > { %1634 = vmatpush3.bf16.msra.mxu1 %v1919_v45  ;;  %v942_v30 = vsel %vm939_vm5, %v940_v28, %v941_v15  ;;  %v944_v40 = vsel %vm939_vm5, %v941_v15, %v943_v35  ;;  %v1941_v45 = vld [vmem:[%s2394_s1 + $0x68] sm:$0xff]   ;;  %v1071_v36 = vshrl.u32 %v1518_v42, 16  ;;  %v1079_v48 = vshrl.u32 %v2265_v43, 16 }
  0x21   : > { %1635 = vmatprep.subr.bf16.mxu1 %v1962_v1  ;;  %v455_v37 = vsel %vm452_vm6, %v453_v33, %v454_v10  ;;  %v1082_v49 = vshll.u32 %v2265_v43, 16  ;;  %v457_v50 = vsel %vm452_vm6, %v454_v10, %v456_v44  ;;  %v1204_v16 = vrot.slane %v2265_v43, 3 }
  0x22   : > { %1714 = vmatpush3.bf16.msra.mxu0 %v1915_v47  ;;  %v1074_v47 = vshll.u32 %v1518_v42, 16  ;;  %v1073_v52 = vrot.slane %v1071_v36, 2 }
  0x23   : > { %1624 = vmatmul.mubr.msk.bf16.gmra.mrb[4].mxu1 %vm283_vm2, %v255_v53  ;;  %1715 = vmatprep.subr.bf16.mxu0 %v1962_v1 }
  0x24   : > { %1627 = vmatprep.mubr.msk.bf16.mxu1 %vm1963_vm0, %v1962_v1  ;;  %1636 = vmatpush3.bf16.msra.mxu1 %v1921_v55  ;;  %v1076_v53 = vrot.slane %v1074_v47, 3  ;;  %v1081_v55 = vrot.slane %v1079_v48, 2 }
  0x25   : > { %1704 = vmatmul.mubr.msk.bf16.gmra.mrb[4].mxu0 %vm283_vm2, %v721_v57  ;;  %1637 = vmatprep.subr.bf16.mxu1 %v1962_v1  ;;  %v2291_v57 = vld [vmem:[%s2042_s8 + $0x14] sm:$0x1f]  }
  0x26   : > { %1716 = vmatpush3.bf16.msra.mxu0 %v1918_v56  ;;  %1719 = vmatprep.mubr.msk.bf16.mxu0 %vm1963_vm0, %v1962_v1  ;;  %v1084_v56 = vrot.slane %v1082_v49, 3  ;;  %v1077_v59 = vor.u32 %v1076_v53, %v1073_v52 }
  0x27   : > { %1717 = vmatprep.subr.bf16.mxu0 %v1962_v1 }
  0x28   : > { %1638 = vmatpush3.bf16.msra.mxu1 %v1923_v61  ;;  %v1085_v60 = vor.u32 %v1084_v56, %v1081_v55  ;;  %v1088_v61 = vshrl.u32 %v2291_v57, 16 }
  0x29   : > { %1651 = vmatprep.subr.bf16.mxu1 %v1962_v1 }
  0x2a   : > { %1718 = vmatpush3.bf16.msra.mxu0 %v1920_v63  ;;  %v1091_v63 = vshll.u32 %v2291_v57, 16 }
  0x2b   : > { %1628 = vmatmul.mubr.msk.bf16.gmra.mrb[8].mxu1 %vm283_vm2, %v258_v0  ;;  %1731 = vmatprep.subr.bf16.mxu0 %v1962_v1  ;;  %v1086_v0 = vsel %vm1069_vm7, %v1077_v59, %v1085_v60 }
  0x2c   : > { %1639 = vmatprep.mubr.msk.bf16.mxu1 %vm1963_vm0, %v1962_v1 }
  0x2d   : > { %1720 = vmatmul.mubr.msk.bf16.vlgmr.msra.gmra.mrb[0].mxu0 %vm283_vm2, %v1483_v3  ;;  %v1946_v3 = vld [vmem:[%s2394_s1 + $0x100] sm:$0xff]  }
  0x2e   : > { %1732 = vmatpush3.bf16.msra.mxu0 %v1922_v5  ;;  %1723 = vmatprep.mubr.msk.bf16.mxu0 %vm1963_vm0, %v1962_v1  ;;  %v1090_v5 = vrot.slane %v1088_v61, 2 }
  0x2f   : > { %1733 = vmatprep.subr.bf16.mxu0 %v1962_v1 }
  0x32   : > { %1734 = vmatpush3.bf16.msra.mxu0 %v1924_v7  ;;  %v1093_v7 = vrot.slane %v1091_v63, 3 }
  0x33   : > { %1640 = vmatmul.mubr.msk.bf16.vlgmr.msra.gmra.mrb[0].mxu1 %vm283_vm2, %v2054_v11  ;;  %1735 = vmatprep.subr.bf16.mxu0 %v1962_v1  ;;  %v1930_v11 = vld [vmem:[%s2394_s1 + $0xd8] sm:$0xff]  }
  0x34   : > { %1652 = vmatpush3.bf16.msra.mxu1 %v1926_v9  ;;  %1643 = vmatprep.mubr.msk.bf16.mxu1 %vm1963_vm0, %v1962_v1  ;;  %v1948_v9 = vld [vmem:[%s2394_s1 + $0x108] sm:$0xff]  }
  0x35   : > { %1653 = vmatprep.subr.bf16.mxu1 %v1962_v1  ;;  %1724 = vmatmul.mubr.msk.bf16.gmra.mrb[4].mxu0 %vm283_vm2, %v2179_v13  ;;  %v1094_v13 = vor.u32 %v1093_v7, %v1090_v5 }
  0x36   : > { %1736 = vmatpush3.bf16.msra.mxu0 %v1927_v14  ;;  %1727 = vmatprep.mubr.msk.bf16.mxu0 %vm1963_vm0, %v1962_v1 }
  0x37   : > { %1737 = vmatprep.subr.bf16.mxu0 %v1962_v1  ;;  %v1095_v14 = vsel %vm1069_vm7, %v1085_v60, %v1094_v13 }
  0x38   : > { %1654 = vmatpush3.bf16.msra.mxu1 %v1929_v17  ;;  %v1950_v17 = vld [vmem:[%s2394_s1 + $0x110] sm:$0xff]  }
  0x39   : > { %1655 = vmatprep.subr.bf16.mxu1 %v1962_v1 }
  0x3a   : > { %1738 = vmatpush3.bf16.msra.mxu0 %v1930_v11 }
  0x3b   : > { %1644 = vmatmul.mubr.msk.bf16.gmra.mrb[4].mxu1 %vm283_vm2, %v2057_v12  ;;  %1751 = vmatprep.subr.bf16.mxu0 %v1962_v1  ;;  %v1939_v12 = vld [vmem:[%s2394_s1 + $0x60] sm:$0xff]  }
  0x3c   : > { %1647 = vmatprep.mubr.msk.bf16.mxu1 %vm1963_vm0, %v1962_v1  ;;  %1656 = vmatpush3.bf16.msra.mxu1 %v1933_v19 }
  0x3d   : > { %1728 = vmatmul.mubr.msk.bf16.gmra.mrb[8].mxu0 %vm283_vm2, %v1485_v21  ;;  %1657 = vmatprep.subr.bf16.mxu1 %v1962_v1 }
  0x3e   : > { %1739 = vmatprep.mubr.msk.bf16.mxu0 %vm1963_vm0, %v1962_v1 }
  0x40   : > { %1658 = vmatpush3.bf16.msra.mxu1 %v1935_v24 }
  0x41   : > { %1671 = vmatprep.subr.bf16.mxu1 %v1962_v1 }
  0x43   : > { %1648 = vmatmul.mubr.msk.bf16.gmra.mrb[8].mxu1 %vm283_vm2, %v1931_v27  ;;  %v1544_v27 = vld [vmem:[%s2395_s2] ss:$0 sm:$0xff] }
  0x44   : > { %1659 = vmatprep.mubr.msk.bf16.mxu1 %vm1963_vm0, %v1962_v1 }
  0x45   : > { %1740 = vmatmul.mubr.msk.bf16.vlgmr.msra.gmra.mrb[0].mxu0 %vm283_vm2, %v942_v30 }
  0x46   : > { %1752 = vmatpush3.bf16.msra.mxu0 %v1934_v31  ;;  %1743 = vmatprep.mubr.msk.bf16.mxu0 %vm1963_vm0, %v1962_v1 }
  0x47   : > { %1753 = vmatprep.subr.bf16.mxu0 %v1962_v1 }
  0x4a   : > { %1754 = vmatpush3.bf16.msra.mxu0 %v1936_v34 }
  0x4b   : > { %1660 = vmatmul.mubr.msk.bf16.vlgmr.msra.gmra.mrb[0].mxu1 %vm283_vm2, %v455_v37  ;;  %1755 = vmatprep.subr.bf16.mxu0 %v1962_v1 }
  0x4c   : > { %1672 = vmatpush3.bf16.msra.mxu1 %v1939_v12  ;;  %1663 = vmatprep.mubr.msk.bf16.mxu1 %vm1963_vm0, %v1962_v1 }
  0x4d   : > { %1673 = vmatprep.subr.bf16.mxu1 %v1962_v1  ;;  %1744 = vmatmul.mubr.msk.bf16.gmra.mrb[4].mxu0 %vm283_vm2, %v944_v40 }
  0x4e   : > { %1756 = vmatpush3.bf16.msra.mxu0 %v1940_v41  ;;  %1747 = vmatprep.mubr.msk.bf16.mxu0 %vm1963_vm0, %v1962_v1 }
  0x4f   : > { %1757 = vmatprep.subr.bf16.mxu0 %v1962_v1 }
  0x50   : > { %1674 = vmatpush3.bf16.msra.mxu1 %v1941_v45 }
  0x51   : > { %1675 = vmatprep.subr.bf16.mxu1 %v1962_v1 }
  0x52   : > { %1758 = vmatpush3.bf16.msra.mxu0 %v1942_v46 }
  0x53   : > { %1664 = vmatmul.mubr.msk.bf16.gmra.mrb[4].mxu1 %vm283_vm2, %v457_v50  ;;  %1771 = vmatprep.subr.bf16.mxu0 %v1962_v1 }
  0x54   : > { %1667 = vmatprep.mubr.msk.bf16.mxu1 %vm1963_vm0, %v1962_v1  ;;  %1676 = vmatpush3.bf16.msra.mxu1 %v1945_v51 }
  0x55   : > { %1748 = vmatmul.mubr.msk.bf16.gmra.mrb[8].mxu0 %vm283_vm2, %v943_v35  ;;  %1677 = vmatprep.subr.bf16.mxu1 %v1962_v1 }
  0x56   : > { %1759 = vmatprep.mubr.msk.bf16.mxu0 %vm1963_vm0, %v1962_v1 }
  0x58   : > { %1678 = vmatpush3.bf16.msra.mxu1 %v1947_v58 }
  0x59   : > { %1791 = vmatprep.subr.bf16.mxu1 %v1962_v1 }
  0x5b   : > { %1668 = vmatmul.mubr.msk.bf16.gmra.mrb[8].mxu1 %vm283_vm2, %v456_v44 }
  0x5c   : > { %1679 = vmatprep.mubr.msk.bf16.mxu1 %vm1963_vm0, %v1962_v1 }
  0x5d   : > { %1760 = vmatmul.mubr.msk.bf16.vlgmr.msra.gmra.mrb[0].mxu0 %vm283_vm2, %v1086_v0 }
  0x5e   : > { %1772 = vmatpush3.bf16.msra.mxu0 %v1946_v3  ;;  %1763 = vmatprep.mubr.msk.bf16.mxu0 %vm1963_vm0, %v1962_v1 }
  0x5f   : > { %1773 = vmatprep.subr.bf16.mxu0 %v1962_v1 }
  0x62   : > { %1774 = vmatpush3.bf16.msra.mxu0 %v1948_v9 }
  0x63   : > { %1680 = vmatmul.mubr.msk.bf16.vlgmr.msra.gmra.mrb[0].mxu1 %vm283_vm2, %v2149_v62  ;;  %1775 = vmatprep.subr.bf16.mxu0 %v1962_v1  ;;  %v1952_v62 = vld [vmem:[%s2394_s1 + $0x118] sm:$0xff]  }
  0x64   : > { %1795 = vmatpush3.bf16.msra.mxu1 %v2005_v2  ;;  %1683 = vmatprep.mubr.msk.bf16.mxu1 %vm1963_vm0, %v1962_v1  ;;  %v1190_v2 = vld [vmem:[%s2042_s8 + $0x4] sm:$0x8] }
  0x65   : > { %1792 = vmatprep.subr.bf16.mxu1 %v1962_v1  ;;  %1764 = vmatmul.mubr.msk.bf16.gmra.mrb[4].mxu0 %vm283_vm2, %v1095_v14  ;;  %v1536_v11 = vcombine.low %v1190_v2, %v2256_v39 }
  0x66   : > { %1776 = vmatpush3.bf16.msra.mxu0 %v1950_v17  ;;  %1767 = vmatprep.mubr.msk.bf16.mxu0 %vm1963_vm0, %v1962_v1 }
  0x67   : > { %1777 = vmatprep.subr.bf16.mxu0 %v1962_v1 }
  0x68   : > { %1796 = vmatpush3.bf16.msra.mxu1 %v2017_v4  ;;  %v1203_v4 = vrot.slane %v1536_v11, 3 }
  0x69   : > { %1793 = vmatprep.subr.bf16.mxu1 %v1962_v1 }
  0x6a   : > { %1778 = vmatpush3.bf16.msra.mxu0 %v1952_v62  ;;  %v1205_v18 = vsel %vm582_vm4, %v1203_v4, %v1204_v16 }
  0x6b   : > { %1684 = vmatmul.mubr.msk.bf16.gmra.mrb[4].mxu1 %vm283_vm2, %v2224_v26 }
  0x6c   : > { %1687 = vmatprep.mubr.msk.bf16.mxu1 %vm1963_vm0, %v1962_v1  ;;  %1797 = vmatpush3.bf16.msra.mxu1 %v2033_v6  ;;  %v1206_v6 = vrot.slane %v2291_v57, 3 }
  0x6d   : > { %1794 = vmatprep.subr.bf16.mxu1 %v1962_v1  ;;  %1768 = vmatmul.mubr.msk.bf16.gmra.mrb[8].mxu0 %vm283_vm2, %v1094_v13 }
  0x6e   : > { %1779 = vmatprep.mubr.msk.bf16.mxu0 %vm1963_vm0, %v1962_v1  ;;  %v1207_v19 = vsel %vm582_vm4, %v1204_v16, %v1206_v6 }
  0x70   : > { %1798 = vmatpush3.bf16.msra.mxu1 %v2047_v8 }
  0x73   : > { %1688 = vmatmul.mubr.msk.bf16.gmra.mrb[8].mxu1 %vm283_vm2, %v2213_v23 }
  0x74   : > { %1707 = vmatprep.mubr.msk.bf16.mxu1 %vm1963_vm0, %v1962_v1 }
  0x75   : > { %1780 = vmatmul.mubr.msk.bf16.vlgmr.msra.gmra.mrb[0].mxu0 %vm283_vm2, %v1205_v18 }
  0x76   : > { %1783 = vmatprep.mubr.msk.bf16.mxu0 %vm1963_vm0, %v1962_v1 }
  0x7d   : > { %1784 = vmatmul.mubr.msk.bf16.gmra.mrb[4].mxu0 %vm283_vm2, %v1207_v19 }
  0x7e   : > { %1787 = vmatprep.mubr.msk.bf16.mxu0 %vm1963_vm0, %v1962_v1  ;;  %v1545_v1 = vld [vmem:[%s2396_s3] ss:$0 sm:$0xff] }
  0x7f   : > { %1708 = vmatmul.mubr.msk.bf16.vlgmr.msra.gmra.mrb[8].mxu1 %vm283_vm2, %v2125_v54 }
  0x85   : > { %1788 = vmatmul.mubr.msk.bf16.gmra.mrb[8].mxu0 %vm283_vm2, %v1206_v6 }
 0x136   : > { %v655_v8 = vpop.f32.mrb[0].mxu1 }
 0x137   : > { %v1681_v20 = vpop.f32.mrb[1].mxu1 }
 0x138   : > { %v658_v21 = vpop.f32.mrb[2].mxu1 }
 0x139   : > { %v1682_v22 = vpop.f32.mrb[3].mxu1 }
 0x13e   : > { %v663_v23 = vpop.f32.mrb[4].mxu1 }
 0x13f   : > { %v1685_v24 = vpop.f32.mrb[5].mxu1 }
 0x140   : > { %v666_v25 = vpop.f32.mrb[6].mxu1 }
 0x141   : > { %v1686_v26 = vpop.f32.mrb[7].mxu1 }
 0x148   : > { %v1275_v15 = vpop.f32.mrb[0].mxu0 }
 0x149   : > { %v1799_v28 = vadd.f32 %v1275_v15, %v655_v8  ;;  %v1781_v54 = vpop.f32.mrb[1].mxu0 }
 0x14a   : > { %v1278_v29 = vpop.f32.mrb[2].mxu0 }
 0x14b   : > { %v1309_v30 = vmul.f32 %v1799_v28, %v1544_v27  ;;  %v1800_v31 = vadd.f32 %v1278_v29, %v658_v21  ;;  %v1782_v32 = vpop.f32.mrb[3].mxu0 }
 0x14d   : > { %v1321_v33 = vadd.f32 %v1545_v1, %v1309_v30  ;;  %v1310_v10 = vmul.f32 %v1800_v31, %v1544_v27 }
 0x14f   : > { %v1326_v34 = vmax.f32 %v1321_v33, 0.0  ;;  %v1322_v35 = vadd.f32 %v1545_v1, %v1310_v10 }
 0x150   : > { %v1283_v37 = vpop.f32.mrb[4].mxu0 }
 0x151   : > { %1331 = vst.msk [vmem:[%s2379_s29] sm:$0xff] %vm283_vm2, %v1326_v34  ;;  %v1327_v12 = vmax.f32 %v1322_v35, 0.0  ;;  %v1801_v38 = vadd.f32 %v1283_v37, %v663_v23  ;;  %v1785_v39 = vpop.f32.mrb[5].mxu0 }
 0x152   : > { %v805_v40 = vpop.f32.mrb[8].mxu1  ;;  %v1286_v41 = vpop.f32.mrb[6].mxu0 }
 0x153   : > { %v1709_v42 = vpop.f32.mrb[9].mxu1  ;;  %1332 = vst.msk [vmem:[%s2379_s29 + $0x8] sm:$0xff] %vm283_vm2, %v1327_v12  ;;  %v1311_v43 = vmul.f32 %v1801_v38, %v1544_v27  ;;  %v1802_v44 = vadd.f32 %v1286_v41, %v666_v25  ;;  %v1786_v45 = vpop.f32.mrb[7].mxu0 }
 0x154   : > { %v808_v46 = vpop.f32.mrb[10].mxu1 }
 0x155   : > { %v1710_v36 = vpop.f32.mrb[11].mxu1  ;;  %v1323_v47 = vadd.f32 %v1545_v1, %v1311_v43  ;;  %v1312_v48 = vmul.f32 %v1802_v44, %v1544_v27 }
 0x157   : > { %v1328_v49 = vmax.f32 %v1323_v47, 0.0  ;;  %v1324_v50 = vadd.f32 %v1545_v1, %v1312_v48 }
 0x158   : > { %v1291_v51 = vpop.f32.mrb[8].mxu0 }
 0x159   : > { %1333 = vst.msk [vmem:[%s2379_s29 + $0x10] sm:$0xff] %vm283_vm2, %v1328_v49  ;;  %v1329_v52 = vmax.f32 %v1324_v50, 0.0  ;;  %v1803_v53 = vadd.f32 %v1291_v51, %v805_v40  ;;  %v1789_v55 = vpop.f32.mrb[9].mxu0 }
 0x15a   : > { %v1294_v56 = vpop.f32.mrb[10].mxu0 }
 0x15b   : > { %1334 = vst.msk [vmem:[%s2379_s29 + $0x18] sm:$0xff] %vm283_vm2, %v1329_v52  ;;  %v1313_v57 = vmul.f32 %v1803_v53, %v1544_v27  ;;  %v1790_v58 = vpop.f32.mrb[11].mxu0 }
 0x15d   : > { %v1325_v59 = vadd.f32 %v1545_v1, %v1313_v57 }
 0x15f   : > { %v1330_v60 = vmax.f32 %v1325_v59, 0.0 }
 0x161   : > { %1336 = vst.msk [vmem:[%s2379_s29 + $0x20] sm:$0xf] %vm1335_vm8, %v1330_v60 }
 0x162 PF: > { %s14_s15 = sadd.s32 1, %s1960_s15  }
 0x163   : > { %p11_p4 = scmp.ge.s32.totalorder %s14_s15, 4  }
 0x165   :  { %13 = sbr.rel (!%p11_p4) target bundleno = 1 (0x1), region = 74 }

// kernel: resnet_forward.33
= control target key start
LH: loop header
LB: loop body
LE: loop exit
PB: predicated region body
PF: predicated region fallthrough
CT: control target
= control target key end

     0   :  { %v343_v1 = vmov 0   ;;  %v232_v19 = vlaneseq  ;;  %s453_s1 = inlined_call_operand.vmem [shape: bf16[128,256], index: 1, kind: input, shape index: {}]   ;;  %s454_s0 = inlined_call_operand.vmem [shape: bf16[32,128], index: 0, kind: input, shape index: {}]   ;;  %s455_s2 = inlined_call_operand.vmem [shape: f32[1,256], index: 2, kind: input, shape index: {}]   ;;  %s456_s3 = inlined_call_operand.vmem [shape: f32[1,256], index: 3, kind: input, shape index: {}]   ;;  %s457_s4 = inlined_call_operand.vmem [shape: f32[32,256], index: 4, kind: output, shape index: {}]  }
   0x1   :  { %v317_v0 = vld [vmem:[%s453_s1 + $0x4] ss:$8 sps:$4 sm:$0xff]   ;;  %182 = vmatprep.mubr.bf16.mxu0 %v343_v1  ;;  %192 = vmatprep.mubr.bf16.mxu1 %v343_v1  ;;  %v319_v2 = vld [vmem:[%s453_s1] ss:$8 sps:$4 sm:$0xff]   ;;  %v320_v3 = vld [vmem:[%s453_s1 + $0x14] ss:$8 sps:$4 sm:$0xff]  }
   0x2   :  { %150 = vmatprep.subr.bf16.mxu0 %v317_v0  ;;  %300 = vmatprep.subr.bf16.mxu1 %v317_v0  ;;  %v322_v4 = vld [vmem:[%s453_s1 + $0x10] ss:$8 sps:$4 sm:$0xff]   ;;  %v323_v5 = vld [vmem:[%s453_s1 + $0x24] ss:$8 sps:$4 sm:$0xff]   ;;  %v325_v6 = vld [vmem:[%s453_s1 + $0x20] ss:$8 sps:$4 sm:$0xff]  }
   0x3   :  { %151 = vmatpush1.bf16.msra.mxu0 %v319_v2  ;;  %308 = vmatpush1.bf16.msra.mxu1 %v319_v2  ;;  %v326_v7 = vld [vmem:[%s453_s1 + $0x34] ss:$8 sps:$4 sm:$0xff]   ;;  %v328_v8 = vld [vmem:[%s453_s1 + $0x30] ss:$8 sps:$4 sm:$0xff]   ;;  %v329_v9 = vld [vmem:[%s453_s1 + $0x44] ss:$8 sps:$4 sm:$0xff]  }
   0x4   :  { %152 = vmatprep.subr.bf16.mxu0 %v320_v3  ;;  %301 = vmatprep.subr.bf16.mxu1 %v320_v3  ;;  %v331_v10 = vld [vmem:[%s453_s1 + $0x40] ss:$8 sps:$4 sm:$0xff]   ;;  %v332_v11 = vld [vmem:[%s453_s1 + $0x54] ss:$8 sps:$4 sm:$0xff]   ;;  %v334_v12 = vld [vmem:[%s453_s1 + $0x50] ss:$8 sps:$4 sm:$0xff]  }
   0x5   :  { %v335_v13 = vld [vmem:[%s453_s1 + $0x64] ss:$8 sps:$4 sm:$0xff]   ;;  %v337_v14 = vld [vmem:[%s453_s1 + $0x60] ss:$8 sps:$4 sm:$0xff]   ;;  %v338_v15 = vld [vmem:[%s453_s1 + $0x74] ss:$8 sps:$4 sm:$0xff]  }
   0x6   :  { %v340_v16 = vld [vmem:[%s453_s1 + $0x70] ss:$8 sps:$4 sm:$0xff]   ;;  %v341_v17 = vld [vmem:[%s454_s0] sm:$0xff]   ;;  %v342_v18 = vld [vmem:[%s454_s0 + $0x8] sm:$0xff]   ;;  %v233_v20 = vshrl.u32 %v232_v19, 7 }
   0x7   :  { %153 = vmatpush1.bf16.msra.mxu0 %v322_v4  ;;  %309 = vmatpush1.bf16.msra.mxu1 %v322_v4  ;;  %v230_v22 = vld [vmem:[%s455_s2] sm:$0x3] }
   0x8   :  { %154 = vmatprep.subr.bf16.mxu0 %v323_v5  ;;  %302 = vmatprep.subr.bf16.mxu1 %v323_v5  ;;  %v234_v21 = vsub.s32 0, %v233_v20  ;;  %v238_v23 = vsub.s32 1, %v233_v20  ;;  %v250_v24 = vld [vmem:[%s456_s3] sm:$0x3] }
   0xa   :  { %v235_v25 = vrot.slane %v230_v22, %v234_v21  ;;  %v239_v26 = vrot.slane %v230_v22, %v238_v23  ;;  %v255_v27 = vrot.slane %v250_v24, %v234_v21  ;;  %v259_v30 = vrot.slane %v250_v24, %v238_v23 }
   0xb   :  { %155 = vmatpush1.bf16.msra.mxu0 %v325_v6  ;;  %310 = vmatpush1.bf16.msra.mxu1 %v325_v6 }
   0xc   :  { %156 = vmatprep.subr.bf16.mxu0 %v326_v7  ;;  %303 = vmatprep.subr.bf16.mxu1 %v326_v7 }
   0xf   :  { %157 = vmatpush1.bf16.msra.mxu0 %v328_v8  ;;  %311 = vmatpush1.bf16.msra.mxu1 %v328_v8 }
  0x10   :  { %158 = vmatprep.subr.bf16.mxu0 %v329_v9  ;;  %304 = vmatprep.subr.bf16.mxu1 %v329_v9 }
  0x13   :  { %159 = vmatpush1.bf16.msra.mxu0 %v331_v10  ;;  %312 = vmatpush1.bf16.msra.mxu1 %v331_v10 }
  0x14   :  { %160 = vmatprep.subr.bf16.mxu0 %v332_v11  ;;  %305 = vmatprep.subr.bf16.mxu1 %v332_v11 }
  0x17   :  { %161 = vmatpush1.bf16.msra.mxu0 %v334_v12  ;;  %313 = vmatpush1.bf16.msra.mxu1 %v334_v12 }
  0x18   :  { %162 = vmatprep.subr.bf16.mxu0 %v335_v13  ;;  %306 = vmatprep.subr.bf16.mxu1 %v335_v13 }
  0x1b   :  { %163 = vmatpush1.bf16.msra.mxu0 %v337_v14  ;;  %314 = vmatpush1.bf16.msra.mxu1 %v337_v14 }
  0x1c   :  { %164 = vmatprep.subr.bf16.mxu0 %v338_v15  ;;  %307 = vmatprep.subr.bf16.mxu1 %v338_v15 }
  0x1f   :  { %165 = vmatpush1.bf16.msra.mxu0 %v340_v16  ;;  %315 = vmatpush1.bf16.msra.mxu1 %v340_v16 }
  0x22   :  { %183 = vmatmul.mubr.bf16.vlgmr.msra.gmra.mrb[0].mxu0 %v341_v17  ;;  %193 = vmatmul.mubr.bf16.vlgmr.msra.gmra.mrb[0].mxu1 %v342_v18 }
  0xf5   :  { %v184_v28 = vpop.f32.mrb[0].mxu0  ;;  %v194_v29 = vpop.f32.mrb[0].mxu1 }
  0xf6   :  { %v242_v31 = vmul.f32 %v235_v25, %v184_v28  ;;  %v246_v32 = vmul.f32 %v235_v25, %v194_v29  ;;  %v186_v33 = vpop.f32.mrb[1].mxu0  ;;  %v196_v34 = vpop.f32.mrb[1].mxu1 }
  0xf7   :  { %v243_v35 = vmul.f32 %v239_v26, %v186_v33  ;;  %v247_v36 = vmul.f32 %v239_v26, %v196_v34  ;;  %v188_v37 = vpop.f32.mrb[2].mxu0  ;;  %v198_v38 = vpop.f32.mrb[2].mxu1 }
  0xf8   :  { %v262_v39 = vadd.f32 %v255_v27, %v242_v31  ;;  %v266_v40 = vadd.f32 %v255_v27, %v246_v32  ;;  %v244_v41 = vmul.f32 %v235_v25, %v188_v37  ;;  %v248_v42 = vmul.f32 %v235_v25, %v198_v38  ;;  %v190_v43 = vpop.f32.mrb[3].mxu0  ;;  %v200_v44 = vpop.f32.mrb[3].mxu1 }
  0xf9   :  { %v263_v45 = vadd.f32 %v259_v30, %v243_v35  ;;  %v267_v46 = vadd.f32 %v259_v30, %v247_v36  ;;  %v245_v47 = vmul.f32 %v239_v26, %v190_v43  ;;  %v249_v48 = vmul.f32 %v239_v26, %v200_v44 }
  0xfa   :  { %270 = vst [vmem:[%s457_s4] sm:$0xff] %v262_v39  ;;  %274 = vst [vmem:[%s457_s4 + $0x20] sm:$0xff] %v266_v40  ;;  %v264_v49 = vadd.f32 %v255_v27, %v244_v41  ;;  %v268_v50 = vadd.f32 %v255_v27, %v248_v42 }
  0xfb   :  { %271 = vst [vmem:[%s457_s4 + $0x8] sm:$0xff] %v263_v45  ;;  %275 = vst [vmem:[%s457_s4 + $0x28] sm:$0xff] %v267_v46  ;;  %v265_v51 = vadd.f32 %v259_v30, %v245_v47  ;;  %v269_v52 = vadd.f32 %v259_v30, %v249_v48 }
  0xfc   :  { %272 = vst [vmem:[%s457_s4 + $0x10] sm:$0xff] %v264_v49  ;;  %276 = vst [vmem:[%s457_s4 + $0x30] sm:$0xff] %v268_v50 }
  0xfd   :  { %273 = vst [vmem:[%s457_s4 + $0x18] sm:$0xff] %v265_v51  ;;  %277 = vst [vmem:[%s457_s4 + $0x38] sm:$0xff] %v269_v52 }

// kernel: resnet_forward.36
= control target key start
LH: loop header
LB: loop body
LE: loop exit
PB: predicated region body
PF: predicated region fallthrough
CT: control target
= control target key end

     0   :  { %v370_v1 = vmov 0   ;;  %v235_v19 = vlaneseq  ;;  %s509_s1 = inlined_call_operand.vmem [shape: bf16[128,256], index: 1, kind: input, shape index: {}]   ;;  %s510_s0 = inlined_call_operand.vmem [shape: bf16[32,128], index: 0, kind: input, shape index: {}]   ;;  %s511_s2 = inlined_call_operand.vmem [shape: f32[1,256], index: 2, kind: input, shape index: {}]   ;;  %s512_s3 = inlined_call_operand.vmem [shape: f32[1,256], index: 3, kind: input, shape index: {}]   ;;  %s513_s4 = inlined_call_operand.vmem [shape: f32[32,256], index: 4, kind: input, shape index: {}]   ;;  %s514_s5 = inlined_call_operand.vmem [shape: f32[32,256], index: 5, kind: output, shape index: {}]  }
   0x1   :  { %v344_v0 = vld [vmem:[%s509_s1 + $0x4] ss:$8 sps:$4 sm:$0xff]   ;;  %185 = vmatprep.mubr.bf16.mxu0 %v370_v1  ;;  %195 = vmatprep.mubr.bf16.mxu1 %v370_v1  ;;  %v346_v2 = vld [vmem:[%s509_s1] ss:$8 sps:$4 sm:$0xff]   ;;  %v347_v3 = vld [vmem:[%s509_s1 + $0x14] ss:$8 sps:$4 sm:$0xff]  }
   0x2   :  { %153 = vmatprep.subr.bf16.mxu0 %v344_v0  ;;  %327 = vmatprep.subr.bf16.mxu1 %v344_v0  ;;  %v349_v4 = vld [vmem:[%s509_s1 + $0x10] ss:$8 sps:$4 sm:$0xff]   ;;  %v350_v5 = vld [vmem:[%s509_s1 + $0x24] ss:$8 sps:$4 sm:$0xff]   ;;  %v352_v6 = vld [vmem:[%s509_s1 + $0x20] ss:$8 sps:$4 sm:$0xff]  }
   0x3   :  { %154 = vmatpush1.bf16.msra.mxu0 %v346_v2  ;;  %335 = vmatpush1.bf16.msra.mxu1 %v346_v2  ;;  %v353_v7 = vld [vmem:[%s509_s1 + $0x34] ss:$8 sps:$4 sm:$0xff]   ;;  %v355_v8 = vld [vmem:[%s509_s1 + $0x30] ss:$8 sps:$4 sm:$0xff]   ;;  %v356_v9 = vld [vmem:[%s509_s1 + $0x44] ss:$8 sps:$4 sm:$0xff]  }
   0x4   :  { %155 = vmatprep.subr.bf16.mxu0 %v347_v3  ;;  %328 = vmatprep.subr.bf16.mxu1 %v347_v3  ;;  %v358_v10 = vld [vmem:[%s509_s1 + $0x40] ss:$8 sps:$4 sm:$0xff]   ;;  %v359_v11 = vld [vmem:[%s509_s1 + $0x54] ss:$8 sps:$4 sm:$0xff]   ;;  %v361_v12 = vld [vmem:[%s509_s1 + $0x50] ss:$8 sps:$4 sm:$0xff]  }
   0x5   :  { %v362_v13 = vld [vmem:[%s509_s1 + $0x64] ss:$8 sps:$4 sm:$0xff]   ;;  %v364_v14 = vld [vmem:[%s509_s1 + $0x60] ss:$8 sps:$4 sm:$0xff]   ;;  %v365_v15 = vld [vmem:[%s509_s1 + $0x74] ss:$8 sps:$4 sm:$0xff]  }
   0x6   :  { %v367_v16 = vld [vmem:[%s509_s1 + $0x70] ss:$8 sps:$4 sm:$0xff]   ;;  %v368_v17 = vld [vmem:[%s510_s0] sm:$0xff]   ;;  %v369_v18 = vld [vmem:[%s510_s0 + $0x8] sm:$0xff]   ;;  %v236_v20 = vshrl.u32 %v235_v19, 7 }
   0x7   :  { %156 = vmatpush1.bf16.msra.mxu0 %v349_v4  ;;  %336 = vmatpush1.bf16.msra.mxu1 %v349_v4  ;;  %v233_v22 = vld [vmem:[%s511_s2] sm:$0x3]  ;;  %v274_v43 = vld [vmem:[%s513_s4 + $0x8] sm:$0xff]  ;;  %v275_v51 = vld [vmem:[%s513_s4 + $0x10] sm:$0xff] }
   0x8   :  { %157 = vmatprep.subr.bf16.mxu0 %v350_v5  ;;  %329 = vmatprep.subr.bf16.mxu1 %v350_v5  ;;  %v237_v21 = vsub.s32 0, %v236_v20  ;;  %v241_v23 = vsub.s32 1, %v236_v20  ;;  %v253_v24 = vld [vmem:[%s512_s3] sm:$0x3]  ;;  %v278_v44 = vld [vmem:[%s513_s4 + $0x28] sm:$0xff]  ;;  %v279_v52 = vld [vmem:[%s513_s4 + $0x30] sm:$0xff] }
   0x9   :  { %v273_v35 = vld [vmem:[%s513_s4] sm:$0xff]  ;;  %v276_v59 = vld [vmem:[%s513_s4 + $0x18] sm:$0xff] }
   0xa   :  { %v238_v25 = vrot.slane %v233_v22, %v237_v21  ;;  %v242_v26 = vrot.slane %v233_v22, %v241_v23  ;;  %v258_v27 = vrot.slane %v253_v24, %v237_v21  ;;  %v262_v30 = vrot.slane %v253_v24, %v241_v23  ;;  %v277_v36 = vld [vmem:[%s513_s4 + $0x20] sm:$0xff]  ;;  %v280_v60 = vld [vmem:[%s513_s4 + $0x38] sm:$0xff] }
   0xb   :  { %158 = vmatpush1.bf16.msra.mxu0 %v352_v6  ;;  %337 = vmatpush1.bf16.msra.mxu1 %v352_v6 }
   0xc   :  { %159 = vmatprep.subr.bf16.mxu0 %v353_v7  ;;  %330 = vmatprep.subr.bf16.mxu1 %v353_v7 }
   0xf   :  { %160 = vmatpush1.bf16.msra.mxu0 %v355_v8  ;;  %338 = vmatpush1.bf16.msra.mxu1 %v355_v8 }
  0x10   :  { %161 = vmatprep.subr.bf16.mxu0 %v356_v9  ;;  %331 = vmatprep.subr.bf16.mxu1 %v356_v9 }
  0x13   :  { %162 = vmatpush1.bf16.msra.mxu0 %v358_v10  ;;  %339 = vmatpush1.bf16.msra.mxu1 %v358_v10 }
  0x14   :  { %163 = vmatprep.subr.bf16.mxu0 %v359_v11  ;;  %332 = vmatprep.subr.bf16.mxu1 %v359_v11 }
  0x17   :  { %164 = vmatpush1.bf16.msra.mxu0 %v361_v12  ;;  %340 = vmatpush1.bf16.msra.mxu1 %v361_v12 }
  0x18   :  { %165 = vmatprep.subr.bf16.mxu0 %v362_v13  ;;  %333 = vmatprep.subr.bf16.mxu1 %v362_v13 }
  0x1b   :  { %166 = vmatpush1.bf16.msra.mxu0 %v364_v14  ;;  %341 = vmatpush1.bf16.msra.mxu1 %v364_v14 }
  0x1c   :  { %167 = vmatprep.subr.bf16.mxu0 %v365_v15  ;;  %334 = vmatprep.subr.bf16.mxu1 %v365_v15 }
  0x1f   :  { %168 = vmatpush1.bf16.msra.mxu0 %v367_v16  ;;  %342 = vmatpush1.bf16.msra.mxu1 %v367_v16 }
  0x22   :  { %186 = vmatmul.mubr.bf16.vlgmr.msra.gmra.mrb[0].mxu0 %v368_v17  ;;  %196 = vmatmul.mubr.bf16.vlgmr.msra.gmra.mrb[0].mxu1 %v369_v18 }
  0xf5   :  { %v187_v28 = vpop.f32.mrb[0].mxu0  ;;  %v197_v29 = vpop.f32.mrb[0].mxu1 }
  0xf6   :  { %v245_v31 = vmul.f32 %v238_v25, %v187_v28  ;;  %v249_v32 = vmul.f32 %v238_v25, %v197_v29  ;;  %v189_v33 = vpop.f32.mrb[1].mxu0  ;;  %v199_v34 = vpop.f32.mrb[1].mxu1 }
  0xf7   :  { %v246_v37 = vmul.f32 %v242_v26, %v189_v33  ;;  %v250_v38 = vmul.f32 %v242_v26, %v199_v34  ;;  %v191_v39 = vpop.f32.mrb[2].mxu0  ;;  %v201_v40 = vpop.f32.mrb[2].mxu1 }
  0xf8   :  { %v265_v41 = vadd.f32 %v258_v27, %v245_v31  ;;  %v269_v42 = vadd.f32 %v258_v27, %v249_v32  ;;  %v247_v45 = vmul.f32 %v238_v25, %v191_v39  ;;  %v251_v46 = vmul.f32 %v238_v25, %v201_v40  ;;  %v193_v47 = vpop.f32.mrb[3].mxu0  ;;  %v203_v48 = vpop.f32.mrb[3].mxu1 }
  0xf9   :  { %v266_v49 = vadd.f32 %v262_v30, %v246_v37  ;;  %v270_v50 = vadd.f32 %v262_v30, %v250_v38  ;;  %v248_v53 = vmul.f32 %v242_v26, %v193_v47  ;;  %v252_v54 = vmul.f32 %v242_v26, %v203_v48 }
  0xfa   :  { %v281_v55 = vadd.f32 %v273_v35, %v265_v41  ;;  %v285_v56 = vadd.f32 %v277_v36, %v269_v42  ;;  %v267_v57 = vadd.f32 %v258_v27, %v247_v45  ;;  %v271_v58 = vadd.f32 %v258_v27, %v251_v46 }
  0xfb   :  { %v282_v61 = vadd.f32 %v274_v43, %v266_v49  ;;  %v286_v62 = vadd.f32 %v278_v44, %v270_v50  ;;  %v268_v63 = vadd.f32 %v262_v30, %v248_v53  ;;  %v272_v0 = vadd.f32 %v262_v30, %v252_v54 }
  0xfc   :  { %v289_v1 = vmax.f32 %v281_v55, 0.0  ;;  %v293_v2 = vmax.f32 %v285_v56, 0.0  ;;  %v283_v3 = vadd.f32 %v275_v51, %v267_v57  ;;  %v287_v4 = vadd.f32 %v279_v52, %v271_v58 }
  0xfd   :  { %v290_v5 = vmax.f32 %v282_v61, 0.0  ;;  %v294_v6 = vmax.f32 %v286_v62, 0.0  ;;  %v284_v7 = vadd.f32 %v276_v59, %v268_v63  ;;  %v288_v8 = vadd.f32 %v280_v60, %v272_v0 }
  0xfe   :  { %297 = vst [vmem:[%s514_s5] sm:$0xff] %v289_v1  ;;  %301 = vst [vmem:[%s514_s5 + $0x20] sm:$0xff] %v293_v2  ;;  %v291_v9 = vmax.f32 %v283_v3, 0.0  ;;  %v295_v10 = vmax.f32 %v287_v4, 0.0 }
  0xff   :  { %298 = vst [vmem:[%s514_s5 + $0x8] sm:$0xff] %v290_v5  ;;  %302 = vst [vmem:[%s514_s5 + $0x28] sm:$0xff] %v294_v6  ;;  %v292_v11 = vmax.f32 %v284_v7, 0.0  ;;  %v296_v12 = vmax.f32 %v288_v8, 0.0 }
 0x100   :  { %299 = vst [vmem:[%s514_s5 + $0x10] sm:$0xff] %v291_v9  ;;  %303 = vst [vmem:[%s514_s5 + $0x30] sm:$0xff] %v295_v10 }
 0x101   :  { %300 = vst [vmem:[%s514_s5 + $0x18] sm:$0xff] %v292_v11  ;;  %304 = vst [vmem:[%s514_s5 + $0x38] sm:$0xff] %v296_v12 }

// kernel: resnet_forward.37
= control target key start
LH: loop header
LB: loop body
LE: loop exit
PB: predicated region body
PF: predicated region fallthrough
CT: control target
= control target key end

     0   :  { %s471_s1 = inlined_call_operand.vmem [shape: bf16[256,128], index: 1, kind: input, shape index: {}]   ;;  %s472_s0 = inlined_call_operand.vmem [shape: bf16[32,256], index: 0, kind: input, shape index: {}]   ;;  %s473_s2 = inlined_call_operand.vmem [shape: f32[1,128], index: 2, kind: input, shape index: {}]   ;;  %s474_s3 = inlined_call_operand.vmem [shape: f32[1,128], index: 3, kind: input, shape index: {}]   ;;  %s475_s4 = inlined_call_operand.vmem [shape: f32[32,128], index: 4, kind: output, shape index: {}]  }
   0x1   :  { %v346_v0 = vld [vmem:[%s471_s1 + $0x40] sm:$0xff]   ;;  %v348_v2 = vld [vmem:[%s471_s1 + $0x48] sm:$0xff]   ;;  %v350_v4 = vld [vmem:[%s471_s1 + $0x50] sm:$0xff]  }
   0x2   :  { %v347_v1 = vld [vmem:[%s471_s1] sm:$0xff]   ;;  %302 = vmatprep.subr.bf16.mxu0 %v346_v0  ;;  %330 = vmatprep.subr.bf16.mxu1 %v346_v0  ;;  %v349_v3 = vld [vmem:[%s471_s1 + $0x8] sm:$0xff]   ;;  %v351_v5 = vld [vmem:[%s471_s1 + $0x10] sm:$0xff]  }
   0x3   :  { %303 = vmatpush3.bf16.msra.mxu0 %v347_v1  ;;  %338 = vmatpush3.bf16.msra.mxu1 %v347_v1  ;;  %v352_v6 = vld [vmem:[%s471_s1 + $0x58] sm:$0xff]   ;;  %v354_v8 = vld [vmem:[%s471_s1 + $0x60] sm:$0xff]   ;;  %v356_v10 = vld [vmem:[%s471_s1 + $0x68] sm:$0xff]  }
   0x4   :  { %304 = vmatprep.subr.bf16.mxu0 %v348_v2  ;;  %331 = vmatprep.subr.bf16.mxu1 %v348_v2  ;;  %v353_v7 = vld [vmem:[%s471_s1 + $0x18] sm:$0xff]   ;;  %v355_v9 = vld [vmem:[%s471_s1 + $0x20] sm:$0xff]   ;;  %v357_v13 = vld [vmem:[%s471_s1 + $0x28] sm:$0xff]  }
   0x5   :  { %v364_v11 = vld [vmem:[%s472_s0 + $0x4] ss:$8 sps:$4 sm:$0xff]   ;;  %v367_v12 = vld [vmem:[%s472_s0 + $0x14] ss:$8 sps:$4 sm:$0xff]   ;;  %v362_v18 = vld [vmem:[%s472_s0] ss:$8 sps:$4 sm:$0xff]  }
   0x6   :  { %v358_v14 = vld [vmem:[%s471_s1 + $0x70] sm:$0xff]   ;;  %214 = vmatprep.mubr.bf16.mxu0 %v364_v11  ;;  %222 = vmatprep.mubr.bf16.mxu1 %v367_v12  ;;  %v360_v16 = vld [vmem:[%s471_s1 + $0x78] sm:$0xff]   ;;  %v300_v23 = vld [vmem:[%s473_s2] ss:$0 sm:$0xff] }
   0x7   :  { %305 = vmatpush3.bf16.msra.mxu0 %v349_v3  ;;  %339 = vmatpush3.bf16.msra.mxu1 %v349_v3  ;;  %v359_v15 = vld [vmem:[%s471_s1 + $0x30] sm:$0xff]   ;;  %v361_v17 = vld [vmem:[%s471_s1 + $0x38] sm:$0xff]   ;;  %v301_v29 = vld [vmem:[%s474_s3] ss:$0 sm:$0xff] }
   0x8   :  { %306 = vmatprep.subr.bf16.mxu0 %v350_v4  ;;  %332 = vmatprep.subr.bf16.mxu1 %v350_v4  ;;  %v365_v19 = vld [vmem:[%s472_s0 + $0x10] ss:$8 sps:$4 sm:$0xff]  }
   0xb   :  { %307 = vmatpush3.bf16.msra.mxu0 %v351_v5  ;;  %340 = vmatpush3.bf16.msra.mxu1 %v351_v5 }
   0xc   :  { %308 = vmatprep.subr.bf16.mxu0 %v352_v6  ;;  %333 = vmatprep.subr.bf16.mxu1 %v352_v6 }
   0xf   :  { %309 = vmatpush3.bf16.msra.mxu0 %v353_v7  ;;  %341 = vmatpush3.bf16.msra.mxu1 %v353_v7 }
  0x10   :  { %310 = vmatprep.subr.bf16.mxu0 %v354_v8  ;;  %334 = vmatprep.subr.bf16.mxu1 %v354_v8 }
  0x13   :  { %311 = vmatpush3.bf16.msra.mxu0 %v355_v9  ;;  %342 = vmatpush3.bf16.msra.mxu1 %v355_v9 }
  0x14   :  { %312 = vmatprep.subr.bf16.mxu0 %v356_v10  ;;  %335 = vmatprep.subr.bf16.mxu1 %v356_v10 }
  0x17   :  { %313 = vmatpush3.bf16.msra.mxu0 %v357_v13  ;;  %343 = vmatpush3.bf16.msra.mxu1 %v357_v13 }
  0x18   :  { %314 = vmatprep.subr.bf16.mxu0 %v358_v14  ;;  %336 = vmatprep.subr.bf16.mxu1 %v358_v14 }
  0x1b   :  { %315 = vmatpush3.bf16.msra.mxu0 %v359_v15  ;;  %344 = vmatpush3.bf16.msra.mxu1 %v359_v15 }
  0x1c   :  { %316 = vmatprep.subr.bf16.mxu0 %v360_v16  ;;  %337 = vmatprep.subr.bf16.mxu1 %v360_v16 }
  0x1f   :  { %317 = vmatpush3.bf16.msra.mxu0 %v361_v17  ;;  %345 = vmatpush3.bf16.msra.mxu1 %v361_v17 }
  0x22   :  { %215 = vmatmul.mubr.bf16.vlgmr.msra.gmra.mrb[0].mxu0 %v362_v18  ;;  %223 = vmatmul.mubr.bf16.vlgmr.msra.gmra.mrb[0].mxu1 %v365_v19 }
  0xf5   :  { %v318_v20 = vpop.f32.mrb[0].mxu0  ;;  %v324_v21 = vpop.f32.mrb[0].mxu1 }
  0xf6   :  { %v319_v22 = vpop.f32.mrb[1].mxu0  ;;  %v325_v24 = vpop.f32.mrb[1].mxu1 }
  0xf7   :  { %v320_v25 = vadd.f32 %v319_v22, %v318_v20  ;;  %v326_v26 = vadd.f32 %v325_v24, %v324_v21  ;;  %v321_v27 = vpop.f32.mrb[2].mxu0  ;;  %v327_v28 = vpop.f32.mrb[2].mxu1 }
  0xf8   :  { %v322_v30 = vpop.f32.mrb[3].mxu0  ;;  %v328_v31 = vpop.f32.mrb[3].mxu1 }
  0xf9   :  { %v253_v32 = vmul.f32 %v320_v25, %v300_v23  ;;  %v255_v33 = vmul.f32 %v326_v26, %v300_v23  ;;  %v323_v34 = vadd.f32 %v322_v30, %v321_v27  ;;  %v329_v35 = vadd.f32 %v328_v31, %v327_v28 }
  0xfb   :  { %v264_v36 = vadd.f32 %v301_v29, %v253_v32  ;;  %v266_v37 = vadd.f32 %v301_v29, %v255_v33  ;;  %v254_v38 = vmul.f32 %v323_v34, %v300_v23  ;;  %v256_v39 = vmul.f32 %v329_v35, %v300_v23 }
  0xfd   :  { %v268_v40 = vmax.f32 %v264_v36, 0.0  ;;  %v270_v41 = vmax.f32 %v266_v37, 0.0  ;;  %v265_v42 = vadd.f32 %v301_v29, %v254_v38  ;;  %v267_v43 = vadd.f32 %v301_v29, %v256_v39 }
  0xff   :  { %272 = vst [vmem:[%s475_s4] sm:$0xff] %v268_v40  ;;  %274 = vst [vmem:[%s475_s4 + $0x10] sm:$0xff] %v270_v41  ;;  %v269_v44 = vmax.f32 %v265_v42, 0.0  ;;  %v271_v45 = vmax.f32 %v267_v43, 0.0 }
 0x101   :  { %273 = vst [vmem:[%s475_s4 + $0x8] sm:$0xff] %v269_v44  ;;  %275 = vst [vmem:[%s475_s4 + $0x18] sm:$0xff] %v271_v45 }

// kernel: resnet_forward.44
= control target key start
LH: loop header
LB: loop body
LE: loop exit
PB: predicated region body
PF: predicated region fallthrough
CT: control target
= control target key end

     0   :  { %s373_s1 = inlined_call_operand.vmem [shape: bf16[256,128], index: 1, kind: input, shape index: {}]   ;;  %s374_s0 = inlined_call_operand.vmem [shape: bf16[8,256], index: 0, kind: input, shape index: {}]   ;;  %s375_s2 = inlined_call_operand.vmem [shape: f32[1,128], index: 2, kind: input, shape index: {}]   ;;  %s376_s3 = inlined_call_operand.vmem [shape: f32[1,128], index: 3, kind: input, shape index: {}]   ;;  %s377_s4 = inlined_call_operand.vmem [shape: f32[8,128], index: 4, kind: output, shape index: {}]  }
   0x1   :  { %v270_v0 = vld [vmem:[%s373_s1 + $0x40] sm:$0xff]   ;;  %v272_v2 = vld [vmem:[%s373_s1 + $0x48] sm:$0xff]   ;;  %v274_v4 = vld [vmem:[%s373_s1 + $0x50] sm:$0xff]  }
   0x2   :  { %v271_v1 = vld [vmem:[%s373_s1] sm:$0xff]   ;;  %248 = vmatprep.subr.bf16.mxu0 %v270_v0  ;;  %v273_v3 = vld [vmem:[%s373_s1 + $0x8] sm:$0xff]   ;;  %v275_v5 = vld [vmem:[%s373_s1 + $0x10] sm:$0xff]  }
   0x3   :  { %249 = vmatpush3.bf16.msra.mxu0 %v271_v1  ;;  %v276_v6 = vld [vmem:[%s373_s1 + $0x58] sm:$0xff]   ;;  %v278_v8 = vld [vmem:[%s373_s1 + $0x60] sm:$0xff]   ;;  %v280_v10 = vld [vmem:[%s373_s1 + $0x68] sm:$0xff]  }
   0x4   :  { %250 = vmatprep.subr.bf16.mxu0 %v272_v2  ;;  %v277_v7 = vld [vmem:[%s373_s1 + $0x18] sm:$0xff]   ;;  %v279_v9 = vld [vmem:[%s373_s1 + $0x20] sm:$0xff]   ;;  %v281_v13 = vld [vmem:[%s373_s1 + $0x28] sm:$0xff]  }
   0x5   :  { %v24_v11 = vld [vmem:[%s374_s0] sm:$0xff]  ;;  %v282_v14 = vld [vmem:[%s373_s1 + $0x70] sm:$0xff]   ;;  %v284_v16 = vld [vmem:[%s373_s1 + $0x78] sm:$0xff]  }
   0x6   :  { %v229_v12 = vcombine.high %v24_v11, %v24_v11  ;;  %v283_v15 = vld [vmem:[%s373_s1 + $0x30] sm:$0xff]   ;;  %v285_v17 = vld [vmem:[%s373_s1 + $0x38] sm:$0xff]   ;;  %v228_v18 = vcombine.low %v24_v11, %v24_v11  ;;  %v246_v21 = vld [vmem:[%s375_s2] ss:$0 sm:$0xff] }
   0x7   :  { %251 = vmatpush3.bf16.msra.mxu0 %v273_v3  ;;  %v247_v24 = vld [vmem:[%s376_s3] ss:$0 sm:$0xff] }
   0x8   :  { %252 = vmatprep.subr.bf16.mxu0 %v274_v4  ;;  %192 = vmatprep.mubr.bf16.mxu0 %v229_v12 }
   0xb   :  { %253 = vmatpush3.bf16.msra.mxu0 %v275_v5 }
   0xc   :  { %254 = vmatprep.subr.bf16.mxu0 %v276_v6 }
   0xf   :  { %255 = vmatpush3.bf16.msra.mxu0 %v277_v7 }
  0x10   :  { %256 = vmatprep.subr.bf16.mxu0 %v278_v8 }
  0x13   :  { %257 = vmatpush3.bf16.msra.mxu0 %v279_v9 }
  0x14   :  { %258 = vmatprep.subr.bf16.mxu0 %v280_v10 }
  0x17   :  { %259 = vmatpush3.bf16.msra.mxu0 %v281_v13 }
  0x18   :  { %260 = vmatprep.subr.bf16.mxu0 %v282_v14 }
  0x1b   :  { %261 = vmatpush3.bf16.msra.mxu0 %v283_v15 }
  0x1c   :  { %262 = vmatprep.subr.bf16.mxu0 %v284_v16 }
  0x1f   :  { %263 = vmatpush3.bf16.msra.mxu0 %v285_v17 }
  0x22   :  { %193 = vmatmul.mubr.bf16.vlgmr.msra.gmra.mrb[0].mxu0 %v228_v18 }
  0xf5   :  { %v264_v19 = vpop.f32.mrb[0].mxu0 }
  0xf6   :  { %v265_v20 = vpop.f32.mrb[1].mxu0 }
  0xf7   :  { %v266_v22 = vadd.f32 %v265_v20, %v264_v19  ;;  %v267_v23 = vpop.f32.mrb[2].mxu0 }
  0xf8   :  { %v268_v25 = vpop.f32.mrb[3].mxu0 }
  0xf9   :  { %v213_v26 = vmul.f32 %v266_v22, %v246_v21 }
  0xfb   :  { %v221_v27 = vadd.f32 %v247_v24, %v213_v26 }
  0xfd   :  { %v222_v28 = vmax.f32 %v221_v27, 0.0 }
  0xff   :  { %223 = vst [vmem:[%s377_s4] sm:$0xff] %v222_v28 }

// kernel: resnet_forward.43
= control target key start
LH: loop header
LB: loop body
LE: loop exit
PB: predicated region body
PF: predicated region fallthrough
CT: control target
= control target key end

     0   :  { %s1094_s15 = smov 0   ;;  %s1096_s16 = smov 0   ;;  %s1276_s0 = inlined_call_operand.vmem [shape: bf16[8,256], index: 0, kind: input, shape index: {}]   ;;  %s1277_s1 = inlined_call_operand.vmem [shape: bf16[256,512], index: 1, kind: input, shape index: {}]   ;;  %s1278_s2 = inlined_call_operand.vmem [shape: f32[1,512], index: 2, kind: input, shape index: {}]   ;;  %s1279_s3 = inlined_call_operand.vmem [shape: f32[1,512], index: 3, kind: input, shape index: {}]   ;;  %s1280_s4 = inlined_call_operand.vmem [shape: f32[8,512], index: 4, kind: output, shape index: {}]  }
   0x1   :  { %s1098_s17 = smov 0   ;;  %s1100_s18 = smov 0  }
   0x2   :  { %s1102_s19 = smov 0  }
   0x3 LB: > { %s29_s20 = sadd.s32 1, %s1063_s18  ;;  %p77_p1 = scmp.ne.s32.totalorder %s1055_s16, %s1051_s15  ;;  %s1067_s19 = sphi %s1102_s19, %s14_s19   ;;  %s1063_s18 = sphi %s1100_s18, %s1284_s18   ;;  %s1059_s17 = sphi %s1098_s17, %s1283_s17   ;;  %s1055_s16 = sphi %s1096_s16, %s1282_s16   ;;  %s1051_s15 = sphi %s1094_s15, %s1281_s15  }
   0x4   : > { %p31_p0 = scmp.ge.s32.totalorder %s29_s20, 2  ;;  %p78_p2 = scmp.eq.s32.totalorder %s1067_s19, 0 }
   0x5   : > { %s70_s22 = sadd.s32 1, %s1055_s16  ;;  %p892_p5 = scmp.ge.s32.totalorder %s1067_s19, 2 }
   0x6   : > { %s1286_s20 = smov (%p31_p0, %s29_s20), 0  ;;  %p79_p3 = por %p78_p2, %p77_p1 }
   0x7   : > { %s66_s21 = ssub.s32 %s1063_s18, %s1286_s20  ;;  %196 = sbr.rel (%p892_p5) target bundleno = 34 (0x22), region = 20 }
   0x8   : > { %p68_p4 = scmp.eq.s32.totalorder %s66_s21, 0 }
   0xa   : > { %s1129_s23 = scalar_select %p68_p4, %s1055_s16, %s70_s22  }
   0xe   : > { %199 = sbr.rel (!%p79_p3) target bundleno = 34 (0x22), region = 24  ;;  %s201_s24 = sand.u32 (%p79_p3), 1, %s1055_s16  }
   0xf   : > { %s938_s25 = sshll.u32 (%p79_p3), %s1063_s18, 3  ;;  %s893_s26 = sshll.u32 (%p79_p3), %s201_s24, 8 }
  0x10   : > { %s1137_s29 = scalar_lea.vmem (%p79_p3), %s1277_s1, %s938_s25  ;;  %s1142_s30 = scalar_lea.vmem (%p79_p3), [#allocation3], %s893_s26 }
  0x11   : > { %v299_v0 = vld [vmem:[%s1137_s29] sm:$0xff] (%p79_p3)  ;;  %v301_v1 = vld [vmem:[%s1137_s29 + $0x10] sm:$0xff] (%p79_p3) }
  0x12   : > { %v303_v2 = vld [vmem:[%s1137_s29 + $0x20] sm:$0xff] (%p79_p3)  ;;  %300 = vst [vmem:[%s1142_s30] sm:$0xff] (%p79_p3), %v299_v0  ;;  %302 = vst [vmem:[%s1142_s30 + $0x8] sm:$0xff] (%p79_p3), %v301_v1  ;;  %v305_v3 = vld [vmem:[%s1137_s29 + $0x30] sm:$0xff] (%p79_p3) }
  0x13   : > { %304 = vst [vmem:[%s1142_s30 + $0x10] sm:$0xff] (%p79_p3), %v303_v2  ;;  %v307_v4 = vld [vmem:[%s1137_s29 + $0x40] sm:$0xff] (%p79_p3)  ;;  %v309_v5 = vld [vmem:[%s1137_s29 + $0x50] sm:$0xff] (%p79_p3)  ;;  %306 = vst [vmem:[%s1142_s30 + $0x18] sm:$0xff] (%p79_p3), %v305_v3 }
  0x14   : > { %308 = vst [vmem:[%s1142_s30 + $0x20] sm:$0xff] (%p79_p3), %v307_v4  ;;  %310 = vst [vmem:[%s1142_s30 + $0x28] sm:$0xff] (%p79_p3), %v309_v5  ;;  %v311_v6 = vld [vmem:[%s1137_s29 + $0x60] sm:$0xff] (%p79_p3)  ;;  %v313_v7 = vld [vmem:[%s1137_s29 + $0x70] sm:$0xff] (%p79_p3) }
  0x15   : > { %v315_v8 = vld [vmem:[%s1137_s29 + $0x80] sm:$0xff]  ;;  %312 = vst [vmem:[%s1142_s30 + $0x30] sm:$0xff] %v311_v6  ;;  %314 = vst [vmem:[%s1142_s30 + $0x38] sm:$0xff] %v313_v7  ;;  %v317_v9 = vld [vmem:[%s1137_s29 + $0x90] sm:$0xff] }
  0x16   : > { %316 = vst [vmem:[%s1142_s30 + $0x40] sm:$0xff] %v315_v8  ;;  %v319_v10 = vld [vmem:[%s1137_s29 + $0xa0] sm:$0xff]  ;;  %v321_v11 = vld [vmem:[%s1137_s29 + $0xb0] sm:$0xff]  ;;  %318 = vst [vmem:[%s1142_s30 + $0x48] sm:$0xff] %v317_v9 }
  0x17   : > { %320 = vst [vmem:[%s1142_s30 + $0x50] sm:$0xff] %v319_v10  ;;  %322 = vst [vmem:[%s1142_s30 + $0x58] sm:$0xff] %v321_v11  ;;  %v323_v12 = vld [vmem:[%s1137_s29 + $0xc0] sm:$0xff]  ;;  %v325_v13 = vld [vmem:[%s1137_s29 + $0xd0] sm:$0xff] }
  0x18   : > { %v327_v14 = vld [vmem:[%s1137_s29 + $0xe0] sm:$0xff]  ;;  %324 = vst [vmem:[%s1142_s30 + $0x60] sm:$0xff] %v323_v12  ;;  %326 = vst [vmem:[%s1142_s30 + $0x68] sm:$0xff] %v325_v13  ;;  %v329_v15 = vld [vmem:[%s1137_s29 + $0xf0] sm:$0xff] }
  0x19   : > { %328 = vst [vmem:[%s1142_s30 + $0x70] sm:$0xff] %v327_v14  ;;  %v331_v16 = vld [vmem:[%s1137_s29 + $0x100] sm:$0xff]  ;;  %v333_v17 = vld [vmem:[%s1137_s29 + $0x110] sm:$0xff]  ;;  %330 = vst [vmem:[%s1142_s30 + $0x78] sm:$0xff] %v329_v15 }
  0x1a   : > { %332 = vst [vmem:[%s1142_s30 + $0x80] sm:$0xff] %v331_v16  ;;  %334 = vst [vmem:[%s1142_s30 + $0x88] sm:$0xff] %v333_v17  ;;  %v335_v18 = vld [vmem:[%s1137_s29 + $0x120] sm:$0xff]  ;;  %v337_v19 = vld [vmem:[%s1137_s29 + $0x130] sm:$0xff] }
  0x1b   : > { %v339_v20 = vld [vmem:[%s1137_s29 + $0x140] sm:$0xff]  ;;  %336 = vst [vmem:[%s1142_s30 + $0x90] sm:$0xff] %v335_v18  ;;  %338 = vst [vmem:[%s1142_s30 + $0x98] sm:$0xff] %v337_v19  ;;  %v341_v21 = vld [vmem:[%s1137_s29 + $0x150] sm:$0xff] }
  0x1c   : > { %340 = vst [vmem:[%s1142_s30 + $0xa0] sm:$0xff] %v339_v20  ;;  %v343_v22 = vld [vmem:[%s1137_s29 + $0x160] sm:$0xff]  ;;  %v345_v23 = vld [vmem:[%s1137_s29 + $0x170] sm:$0xff]  ;;  %342 = vst [vmem:[%s1142_s30 + $0xa8] sm:$0xff] %v341_v21 }
  0x1d   : > { %344 = vst [vmem:[%s1142_s30 + $0xb0] sm:$0xff] %v343_v22  ;;  %346 = vst [vmem:[%s1142_s30 + $0xb8] sm:$0xff] %v345_v23  ;;  %v347_v24 = vld [vmem:[%s1137_s29 + $0x180] sm:$0xff]  ;;  %v349_v25 = vld [vmem:[%s1137_s29 + $0x190] sm:$0xff] }
  0x1e   : > { %v351_v26 = vld [vmem:[%s1137_s29 + $0x1a0] sm:$0xff]  ;;  %348 = vst [vmem:[%s1142_s30 + $0xc0] sm:$0xff] %v347_v24  ;;  %350 = vst [vmem:[%s1142_s30 + $0xc8] sm:$0xff] %v349_v25  ;;  %v353_v27 = vld [vmem:[%s1137_s29 + $0x1b0] sm:$0xff] }
  0x1f   : > { %352 = vst [vmem:[%s1142_s30 + $0xd0] sm:$0xff] %v351_v26  ;;  %v355_v28 = vld [vmem:[%s1137_s29 + $0x1c0] sm:$0xff]  ;;  %v357_v29 = vld [vmem:[%s1137_s29 + $0x1d0] sm:$0xff]  ;;  %354 = vst [vmem:[%s1142_s30 + $0xd8] sm:$0xff] %v353_v27 }
  0x20   : > { %356 = vst [vmem:[%s1142_s30 + $0xe0] sm:$0xff] %v355_v28  ;;  %358 = vst [vmem:[%s1142_s30 + $0xe8] sm:$0xff] %v357_v29  ;;  %v359_v30 = vld [vmem:[%s1137_s29 + $0x1e0] sm:$0xff]  ;;  %v361_v31 = vld [vmem:[%s1137_s29 + $0x1f0] sm:$0xff] }
  0x21   : > { %360 = vst [vmem:[%s1142_s30 + $0xf0] sm:$0xff] %v359_v30  ;;  %362 = vst [vmem:[%s1142_s30 + $0xf8] sm:$0xff] %v361_v31 }
  0x22 PF: > { %p896_p6 = scmp.ge.s32.totalorder %s1067_s19, 1  ;;  %p383_p7 = scmp.lt.s32.totalorder %s1067_s19, 3 }
  0x24   : > { %p384_p8 = pnand %p896_p6, %p383_p7 }
  0x25   : > { %s390_s5 = sand.u32 (!%p384_p8), 1, %s1051_s15   ;;  %v1211_v32 = vld [vmem:[%s1276_s0] sm:$0xff] (!%p384_p8)  ;;  %s898_s10 = sshll.u32 (!%p384_p8), %s1059_s17, 1  ;;  %v728_v3 = vlaneseq (!%p384_p8) }
  0x26   : > { %387 = sbr.rel (%p384_p8) target bundleno = 323 (0x143), region = 70  ;;  %s897_s8 = sshll.u32 (!%p384_p8), %s390_s5, 8  ;;  %v903_v33 = vcombine.high (!%p384_p8), %v1211_v32, %v1211_v32  ;;  %v902_v2 = vcombine.low (!%p384_p8), %v1211_v32, %v1211_v32 }
  0x27   : > { %s1215_s9 = scalar_lea.vmem (!%p384_p8), [#allocation3], %s897_s8  ;;  %p449_p9 = scmp.lt.s32.totalorder (!%p384_p8), %s898_s10, 3  ;;  %v729_v4 = vshrl.u32 (!%p384_p8), %v728_v3, 7 }
  0x28   : > { %v979_v34 = vld [vmem:[%s1215_s9 + $0x4] ss:$8 sps:$4 sm:$0xff] (!%p384_p8)   ;;  %708 = vmatprep.mubr.bf16.mxu0 (!%p384_p8), %v903_v33  ;;  %v981_v35 = vld [vmem:[%s1215_s9] ss:$8 sps:$4 sm:$0xff] (!%p384_p8)   ;;  %v982_v36 = vld [vmem:[%s1215_s9 + $0x14] ss:$8 sps:$4 sm:$0xff] (!%p384_p8)  }
  0x29   : > { %676 = vmatprep.subr.bf16.mxu0 (!%p384_p8), %v979_v34  ;;  %v984_v37 = vld [vmem:[%s1215_s9 + $0x10] ss:$8 sps:$4 sm:$0xff] (!%p384_p8)   ;;  %v985_v38 = vld [vmem:[%s1215_s9 + $0x24] ss:$8 sps:$4 sm:$0xff] (!%p384_p8)   ;;  %v987_v39 = vld [vmem:[%s1215_s9 + $0x20] ss:$8 sps:$4 sm:$0xff] (!%p384_p8)  }
  0x2a   : > { %677 = vmatpush1.bf16.msra.mxu0 (!%p384_p8), %v981_v35  ;;  %v988_v40 = vld [vmem:[%s1215_s9 + $0x34] ss:$8 sps:$4 sm:$0xff] (!%p384_p8)   ;;  %v990_v41 = vld [vmem:[%s1215_s9 + $0x30] ss:$8 sps:$4 sm:$0xff] (!%p384_p8)   ;;  %v991_v42 = vld [vmem:[%s1215_s9 + $0x44] ss:$8 sps:$4 sm:$0xff] (!%p384_p8)  }
  0x2b   : > { %678 = vmatprep.subr.bf16.mxu0 (!%p384_p8), %v982_v36  ;;  %v993_v43 = vld [vmem:[%s1215_s9 + $0x40] ss:$8 sps:$4 sm:$0xff] (!%p384_p8)   ;;  %v994_v44 = vld [vmem:[%s1215_s9 + $0x54] ss:$8 sps:$4 sm:$0xff] (!%p384_p8)   ;;  %v996_v45 = vld [vmem:[%s1215_s9 + $0x50] ss:$8 sps:$4 sm:$0xff] (!%p384_p8)  }
  0x2c   : > { %v997_v46 = vld [vmem:[%s1215_s9 + $0x64] ss:$8 sps:$4 sm:$0xff] (!%p384_p8)   ;;  %v999_v47 = vld [vmem:[%s1215_s9 + $0x60] ss:$8 sps:$4 sm:$0xff] (!%p384_p8)   ;;  %v1000_v48 = vld [vmem:[%s1215_s9 + $0x74] ss:$8 sps:$4 sm:$0xff] (!%p384_p8)  }
  0x2d   : > { %v1002_v49 = vld [vmem:[%s1215_s9 + $0x70] ss:$8 sps:$4 sm:$0xff]   ;;  %v1003_v50 = vld [vmem:[%s1215_s9 + $0x84] ss:$8 sps:$4 sm:$0xff]   ;;  %v1005_v51 = vld [vmem:[%s1215_s9 + $0x80] ss:$8 sps:$4 sm:$0xff]  }
  0x2e   : > { %679 = vmatpush1.bf16.msra.mxu0 %v984_v37  ;;  %v1006_v52 = vld [vmem:[%s1215_s9 + $0x94] ss:$8 sps:$4 sm:$0xff]   ;;  %v1008_v53 = vld [vmem:[%s1215_s9 + $0x90] ss:$8 sps:$4 sm:$0xff]   ;;  %v1009_v54 = vld [vmem:[%s1215_s9 + $0xa4] ss:$8 sps:$4 sm:$0xff]  }
  0x2f   : > { %680 = vmatprep.subr.bf16.mxu0 %v985_v38  ;;  %v1011_v55 = vld [vmem:[%s1215_s9 + $0xa0] ss:$8 sps:$4 sm:$0xff]   ;;  %v1012_v56 = vld [vmem:[%s1215_s9 + $0xb4] ss:$8 sps:$4 sm:$0xff]   ;;  %v1014_v57 = vld [vmem:[%s1215_s9 + $0xb0] ss:$8 sps:$4 sm:$0xff]  }
  0x30   : > { %v1015_v58 = vld [vmem:[%s1215_s9 + $0xc4] ss:$8 sps:$4 sm:$0xff]   ;;  %v1017_v59 = vld [vmem:[%s1215_s9 + $0xc0] ss:$8 sps:$4 sm:$0xff]   ;;  %v1018_v60 = vld [vmem:[%s1215_s9 + $0xd4] ss:$8 sps:$4 sm:$0xff]  }
  0x31   : > { %v1020_v61 = vld [vmem:[%s1215_s9 + $0xd0] ss:$8 sps:$4 sm:$0xff]   ;;  %v1021_v62 = vld [vmem:[%s1215_s9 + $0xe4] ss:$8 sps:$4 sm:$0xff]   ;;  %v1023_v63 = vld [vmem:[%s1215_s9 + $0xe0] ss:$8 sps:$4 sm:$0xff]  }
  0x32   : > { %681 = vmatpush1.bf16.msra.mxu0 %v987_v39  ;;  %v1024_v0 = vld [vmem:[%s1215_s9 + $0xf4] ss:$8 sps:$4 sm:$0xff]   ;;  %v1026_v1 = vld [vmem:[%s1215_s9 + $0xf0] ss:$8 sps:$4 sm:$0xff]   ;;  %s1288_s10 = smov (!%p449_p9, %s898_s10), 3  ;;  %v730_v5 = vsub.s32 0, %v729_v4 }
  0x33   : > { %682 = vmatprep.subr.bf16.mxu0 %v988_v40  ;;  %s451_s13 = scalar_lea.vmem %s1278_s2, %s1288_s10  ;;  %s456_s21 = scalar_lea.vmem %s1279_s3, %s1288_s10  ;;  %v734_v7 = vsub.s32 1, %v729_v4 }
  0x34   : > { %v726_v6 = vld [vmem:[%s451_s13] sm:$0x3]  ;;  %s901_s22 = sshll.u32 %s1288_s10, 3 }
  0x35   : > { %v740_v8 = vld [vmem:[%s456_s21] sm:$0x3]  ;;  %v731_v9 = vrot.slane %v726_v6, %v730_v5  ;;  %v735_v10 = vrot.slane %v726_v6, %v734_v7  ;;  %s466_s25 = scalar_lea.vmem %s1280_s4, %s901_s22 }
  0x36   : > { %683 = vmatpush1.bf16.msra.mxu0 %v990_v41  ;;  %v745_v11 = vrot.slane %v740_v8, %v730_v5  ;;  %v749_v13 = vrot.slane %v740_v8, %v734_v7 }
  0x37   : > { %684 = vmatprep.subr.bf16.mxu0 %v991_v42 }
  0x3a   : > { %685 = vmatpush1.bf16.msra.mxu0 %v993_v43 }
  0x3b   : > { %686 = vmatprep.subr.bf16.mxu0 %v994_v44 }
  0x3e   : > { %687 = vmatpush1.bf16.msra.mxu0 %v996_v45 }
  0x3f   : > { %688 = vmatprep.subr.bf16.mxu0 %v997_v46 }
  0x42   : > { %689 = vmatpush1.bf16.msra.mxu0 %v999_v47 }
  0x43   : > { %690 = vmatprep.subr.bf16.mxu0 %v1000_v48 }
  0x46   : > { %691 = vmatpush1.bf16.msra.mxu0 %v1002_v49 }
  0x47   : > { %692 = vmatprep.subr.bf16.mxu0 %v1003_v50 }
  0x4a   : > { %693 = vmatpush1.bf16.msra.mxu0 %v1005_v51 }
  0x4b   : > { %694 = vmatprep.subr.bf16.mxu0 %v1006_v52 }
  0x4e   : > { %695 = vmatpush1.bf16.msra.mxu0 %v1008_v53 }
  0x4f   : > { %696 = vmatprep.subr.bf16.mxu0 %v1009_v54 }
  0x52   : > { %697 = vmatpush1.bf16.msra.mxu0 %v1011_v55 }
  0x53   : > { %698 = vmatprep.subr.bf16.mxu0 %v1012_v56 }
  0x56   : > { %699 = vmatpush1.bf16.msra.mxu0 %v1014_v57 }
  0x57   : > { %700 = vmatprep.subr.bf16.mxu0 %v1015_v58 }
  0x5a   : > { %701 = vmatpush1.bf16.msra.mxu0 %v1017_v59 }
  0x5b   : > { %702 = vmatprep.subr.bf16.mxu0 %v1018_v60 }
  0x5e   : > { %703 = vmatpush1.bf16.msra.mxu0 %v1020_v61 }
  0x5f   : > { %704 = vmatprep.subr.bf16.mxu0 %v1021_v62 }
  0x62   : > { %705 = vmatpush1.bf16.msra.mxu0 %v1023_v63 }
  0x63   : > { %706 = vmatprep.subr.bf16.mxu0 %v1024_v0 }
  0x66   : > { %707 = vmatpush1.bf16.msra.mxu0 %v1026_v1 }
  0x69   : > { %709 = vmatmul.mubr.bf16.vlgmr.msra.gmra.mrb[0].mxu0 %v902_v2 }
 0x13c   : > { %v710_v12 = vpop.f32.mrb[0].mxu0 }
 0x13d   : > { %v738_v14 = vmul.f32 %v731_v9, %v710_v12  ;;  %v712_v15 = vpop.f32.mrb[1].mxu0 }
 0x13e   : > { %v739_v16 = vmul.f32 %v735_v10, %v712_v15  ;;  %v714_v17 = vpop.f32.mrb[2].mxu0 }
 0x13f   : > { %v752_v18 = vadd.f32 %v745_v11, %v738_v14  ;;  %v715_v19 = vpop.f32.mrb[3].mxu0 }
 0x140   : > { %v753_v20 = vadd.f32 %v749_v13, %v739_v16 }
 0x141   : > { %754 = vst [vmem:[%s466_s25] sm:$0xff] %v752_v18 }
 0x142   : > { %755 = vst [vmem:[%s466_s25 + $0x8] sm:$0xff] %v753_v20 }
 0x143 PF: > { %s14_s19 = sadd.s32 1, %s1067_s19   ;;  %s1281_s15 = smov %s1055_s16 }
 0x144   : > { %p11_p10 = scmp.ge.s32.totalorder %s14_s19, 4   ;;  %s1282_s16 = smov %s1129_s23 }
 0x145   : > { %s1283_s17 = smov %s1063_s18  ;;  %s1284_s18 = smov %s1286_s20 }
 0x146   :  { %13 = sbr.rel (!%p11_p10) target bundleno = 3 (0x3), region = 126 }

// kernel: resnet_forward.45
= control target key start
LH: loop header
LB: loop body
LE: loop exit
PB: predicated region body
PF: predicated region fallthrough
CT: control target
= control target key end

     0   :  { %s2005_s15 = smov 0   ;;  %s2405_s0 = inlined_call_operand.vmem [shape: bf16[2,32,128], index: 0, kind: input, shape index: {}]   ;;  %s2406_s1 = inlined_call_operand.vmem [shape: bf16[9,128,128], index: 1, kind: input, shape index: {}]   ;;  %s2407_s2 = inlined_call_operand.vmem [shape: f32[1,128], index: 2, kind: input, shape index: {}]   ;;  %s2408_s3 = inlined_call_operand.vmem [shape: f32[1,128], index: 3, kind: input, shape index: {}]   ;;  %s2409_s4 = inlined_call_operand.vmem [shape: f32[2,16,128], index: 4, kind: output, shape index: {}]  }
   0x1 LB: > { %s1360_s16 = sadd.s32 4294967295, %s1976_s15   ;;  %p1364_p0 = scmp.ge.s32.totalorder %s1976_s15, 1  ;;  %s1976_s15 = sphi %s2005_s15, %s14_s15  }
   0x2   : > { %p162_p1 = scmp.lt.s32.totalorder %s1976_s15, 3 }
   0x4   : > { %p163_p2 = pnand %p1364_p0, %p162_p1 }
   0x5   : > { %v1887_v0 = vld [vmem:[%s2406_s1 + $0x40] sm:$0xff] (!%p163_p2)   ;;  %v1978_v1 = vmov (!%p163_p2), 0.0   ;;  %v1889_v3 = vld [vmem:[%s2406_s1 + $0x48] sm:$0xff] (!%p163_p2)   ;;  %vm1979_vm0 = vmmov (!%p163_p2), 0   ;;  %p188_p3 = scmp.lt.s32.totalorder (!%p163_p2), %s1360_s16, 1  ;;  %v1891_v5 = vld [vmem:[%s2406_s1 + $0x50] sm:$0xff] (!%p163_p2)  }
   0x6   : > { %166 = sbr.rel (%p163_p2) target bundleno = 390 (0x186), region = 36  ;;  %1667 = vmatprep.subr.bf16.mxu1 (!%p163_p2), %v1978_v1  ;;  %1747 = vmatprep.subr.bf16.mxu0 (!%p163_p2), %v1978_v1  ;;  %v1888_v2 = vld [vmem:[%s2406_s1 + $0x100] sm:$0xff] (!%p163_p2)   ;;  %v1890_v4 = vld [vmem:[%s2406_s1 + $0x108] sm:$0xff] (!%p163_p2)   ;;  %v1892_v6 = vld [vmem:[%s2406_s1 + $0x110] sm:$0xff] (!%p163_p2)   ;;  %vm243_vm1 = vsmask.f32 (!%p163_p2), 7424 }
   0x7   : > { %1668 = vmatpush3.bf16.msra.mxu1 (!%p163_p2), %v1887_v0  ;;  %1683 = vmatprep.mubr.msk.bf16.mxu1 (!%p163_p2), %vm1979_vm0, %v1978_v1  ;;  %v1893_v7 = vld [vmem:[%s2406_s1 + $0x58] sm:$0xff] (!%p163_p2)   ;;  %v1895_v9 = vld [vmem:[%s2406_s1 + $0x60] sm:$0xff] (!%p163_p2)   ;;  %v1897_v13 = vld [vmem:[%s2406_s1 + $0x68] sm:$0xff] (!%p163_p2)   ;;  %vm695_vm2 = vsmask.f32 (!%p163_p2), 5376  ;;  %vm457_vm3 = vcmask (!%p163_p2), 1046528  }
   0x8   : > { %1748 = vmatpush3.bf16.msra.mxu0 (!%p163_p2), %v1888_v2  ;;  %1669 = vmatprep.subr.bf16.mxu1 (!%p163_p2), %v1978_v1  ;;  %v1894_v8 = vld [vmem:[%s2406_s1 + $0x118] sm:$0xff] (!%p163_p2)   ;;  %v1896_v10 = vld [vmem:[%s2406_s1 + $0x120] sm:$0xff] (!%p163_p2)   ;;  %v1898_v17 = vld [vmem:[%s2406_s1 + $0x128] sm:$0xff] (!%p163_p2)   ;;  %vm826_vm4 = vcmask (!%p163_p2), 1044480   ;;  %vm578_vm5 = vcmask (!%p163_p2), 1045504  }
   0x9   : > { %1749 = vmatprep.subr.bf16.mxu0 (!%p163_p2), %v1978_v1  ;;  %1763 = vmatprep.mubr.msk.bf16.mxu0 (!%p163_p2), %vm1979_vm0, %v1978_v1  ;;  %v1899_v20 = vld [vmem:[%s2406_s1 + $0x70] sm:$0xff] (!%p163_p2)   ;;  %v1901_v32 = vld [vmem:[%s2406_s1 + $0x78] sm:$0xff] (!%p163_p2)   ;;  %v1905_v41 = vld [vmem:[%s2406_s1] sm:$0xff] (!%p163_p2)  }
   0xa   : > { %v1900_v23 = vld [vmem:[%s2406_s1 + $0x130] sm:$0xff] (!%p163_p2)   ;;  %v1902_v35 = vld [vmem:[%s2406_s1 + $0x138] sm:$0xff] (!%p163_p2)   ;;  %v1908_v43 = vld [vmem:[%s2406_s1 + $0x140] sm:$0xff] (!%p163_p2)  }
   0xb   : > { %1670 = vmatpush3.bf16.msra.mxu1 (!%p163_p2), %v1889_v3  ;;  %v1909_v44 = vld [vmem:[%s2406_s1 + $0x8] sm:$0xff] (!%p163_p2)   ;;  %v1911_v46 = vld [vmem:[%s2406_s1 + $0x10] sm:$0xff] (!%p163_p2)   ;;  %v1913_v48 = vld [vmem:[%s2406_s1 + $0x18] sm:$0xff] (!%p163_p2)  }
   0xc   : > { %1750 = vmatpush3.bf16.msra.mxu0 (!%p163_p2), %v1890_v4  ;;  %1671 = vmatprep.subr.bf16.mxu1 (!%p163_p2), %v1978_v1  ;;  %v1910_v45 = vld [vmem:[%s2406_s1 + $0x148] sm:$0xff] (!%p163_p2)   ;;  %v1912_v47 = vld [vmem:[%s2406_s1 + $0x150] sm:$0xff] (!%p163_p2)   ;;  %v1914_v49 = vld [vmem:[%s2406_s1 + $0x158] sm:$0xff] (!%p163_p2)  }
   0xd   : > { %s2411_s16 = smov (!%p188_p3, %s1360_s16), 1  ;;  %1751 = vmatprep.subr.bf16.mxu0 %v1978_v1  ;;  %v1915_v50 = vld [vmem:[%s2406_s1 + $0x20] sm:$0xff]   ;;  %v1917_v52 = vld [vmem:[%s2406_s1 + $0x28] sm:$0xff]   ;;  %v1919_v56 = vld [vmem:[%s2406_s1 + $0x30] sm:$0xff]  }
   0xe   : > { %s1584_s5 = sshll.u32 %s2411_s16, 4  ;;  %v1916_v51 = vld [vmem:[%s2406_s1 + $0x160] sm:$0xff]   ;;  %v1918_v53 = vld [vmem:[%s2406_s1 + $0x168] sm:$0xff]   ;;  %v1920_v60 = vld [vmem:[%s2406_s1 + $0x170] sm:$0xff]  }
   0xf   : > { %1672 = vmatpush3.bf16.msra.mxu1 %v1891_v5  ;;  %s2057_s10 = scalar_lea.vmem %s2405_s0, %s1584_s5  ;;  %v1921_v0 = vld [vmem:[%s2406_s1 + $0x38] sm:$0xff]   ;;  %s197_s9 = scalar_lea.vmem %s2409_s4, %s1584_s5 }
  0x10   : > { %1752 = vmatpush3.bf16.msra.mxu0 %v1892_v6  ;;  %1673 = vmatprep.subr.bf16.mxu1 %v1978_v1  ;;  %v199_v11 = vld [vmem:[%s2057_s10] sm:$0xf]  ;;  %v2069_v12 = vld [vmem:[%s2057_s10 + $0x4] sm:$0xf]  ;;  %v2176_v59 = vld [vmem:[%s2057_s10 + $0x8] sm:$0xf] }
  0x11   : > { %1753 = vmatprep.subr.bf16.mxu0 %v1978_v1  ;;  %v2075_v14 = vcombine.low %v199_v11, %v2069_v12  ;;  %v2078_v15 = vld [vmem:[%s2057_s10 + $0x8] ss:$0 sps:$4 sm:$0x11]   ;;  %v553_v16 = vld [vmem:[%s2057_s10] sm:$0xc]  ;;  %v1520_v62 = vcombine.low %v2069_v12, %v2176_v59  ;;  %v1922_v4 = vld [vmem:[%s2406_s1 + $0x178] sm:$0xff]  }
  0x12   : > { %v2087_v19 = vcombine.low %v553_v16, %v2069_v12  ;;  %v2095_v22 = vld [vmem:[%s2057_s10 + $0x8] ss:$0 sps:$4 sm:$0x77]   ;;  %v252_v25 = vshll.u32 %v2078_v15, 16  ;;  %v805_v54 = vld [vmem:[%s2057_s10] sm:$0x8] }
  0x13   : > { %1674 = vmatpush3.bf16.msra.mxu1 %v1893_v7  ;;  %v247_v18 = vshll.u32 %v2075_v14, 16  ;;  %v245_v21 = vshrl.u32 %v2075_v14, 16  ;;  %v705_v28 = vshrl.u32 %v2095_v22, 16  ;;  %v708_v29 = vshll.u32 %v2095_v22, 16  ;;  %v436_v55 = vld [vmem:[%s2057_s10] sm:$0xe] }
  0x14   : > { %1754 = vmatpush3.bf16.msra.mxu0 %v1894_v8  ;;  %1675 = vmatprep.subr.bf16.mxu1 %v1978_v1  ;;  %v697_v26 = vshrl.u32 %v2087_v19, 16  ;;  %v700_v27 = vshll.u32 %v2087_v19, 16  ;;  %v254_v37 = vrot.slane %v252_v25, 1  ;;  %v1419_v57 = vcombine.low %v436_v55, %v2069_v12  ;;  %v1923_v6 = vld [vmem:[%s2406_s1 + $0x80] sm:$0xff]   ;;  %v1928_v11 = vld [vmem:[%s2406_s1 + $0x90] sm:$0xff]  }
  0x15   : > { %1755 = vmatprep.subr.bf16.mxu0 %v1978_v1  ;;  %v249_v24 = vrot.slane %v247_v18, 1  ;;  %v707_v33 = vrot.slane %v705_v28, 2  ;;  %v710_v34 = vrot.slane %v708_v29, 3  ;;  %v459_v58 = vrot.slane %v2078_v15, 1  ;;  %v1925_v8 = vld [vmem:[%s2406_s1 + $0x180] sm:$0xff]   ;;  %v1954_v55 = vld [vmem:[%s2406_s1 + $0xf0] sm:$0xff]  }
  0x16   : > { %v699_v30 = vrot.slane %v697_v26, 2  ;;  %v702_v31 = vrot.slane %v700_v27, 3  ;;  %v1495_v61 = vcombine.low %v805_v54, %v2069_v12  ;;  %v458_v63 = vrot.slane %v1419_v57, 1  ;;  %v1958_v15 = vld [vmem:[%s2057_s10 + $0x8] ss:$0 sps:$4 sm:$0x33]  }
  0x17   : > { %1676 = vmatpush3.bf16.msra.mxu1 %v1895_v9  ;;  %v250_v36 = vor.u32 %v249_v24, %v245_v21  ;;  %v711_v39 = vor.u32 %v710_v34, %v707_v33  ;;  %v828_v2 = vrot.slane %v2095_v22, 3  ;;  %v1926_v9 = vld [vmem:[%s2406_s1 + $0x88] sm:$0xff]   ;;  %v1035_v16 = vld [vmem:[%s2057_s10 + $0x4] sm:$0xf]  ;;  %v580_v18 = vrot.slane %v1958_v15, 2  ;;  %v1931_v22 = vld [vmem:[%s2406_s1 + $0x198] sm:$0xff]  }
  0x18   : > { %1756 = vmatpush3.bf16.msra.mxu0 %v1896_v10  ;;  %1677 = vmatprep.subr.bf16.mxu1 %v1978_v1  ;;  %v703_v38 = vor.u32 %v702_v31, %v699_v30  ;;  %v2191_v3 = vsel %vm457_vm3, %v458_v63, %v459_v58  ;;  %v827_v5 = vrot.slane %v1495_v61, 3  ;;  %v1927_v10 = vld [vmem:[%s2406_s1 + $0x188] sm:$0xff]   ;;  %v1932_v29 = vld [vmem:[%s2406_s1 + $0xa0] sm:$0xff]   ;;  %v1946_v12 = vld [vmem:[%s2406_s1 + $0xd0] sm:$0xff]  }
  0x19   : > { %1757 = vmatprep.subr.bf16.mxu0 %v1978_v1  ;;  %v255_v40 = vsel %vm243_vm1, %v250_v36, %v254_v37  ;;  %v1960_v21 = vld [vmem:[%s2057_s10 + $0xc] ss:$0 sps:$4 sm:$0x11]   ;;  %v1933_v31 = vld [vmem:[%s2406_s1 + $0x1a0] sm:$0xff]   ;;  %v1956_v57 = vld [vmem:[%s2406_s1 + $0xf8] sm:$0xff]  }
  0x1a   : > { %v712_v42 = vsel %vm695_vm2, %v703_v38, %v711_v39  ;;  %v829_v7 = vsel %vm826_vm4, %v827_v5, %v828_v2  ;;  %v1071_v26 = vshll.u32 %v1960_v21, 16  ;;  %v1167_v33 = vld [vmem:[%s2057_s10 + $0x4] sm:$0xe]  ;;  %v1934_v36 = vld [vmem:[%s2406_s1 + $0xa8] sm:$0xff]   ;;  %v1957_v58 = vld [vmem:[%s2406_s1 + $0x1f8] sm:$0xff]  }
  0x1b   : > { %1678 = vmatpush3.bf16.msra.mxu1 %v1897_v13  ;;  %v579_v13 = vrot.slane %v2087_v19, 2  ;;  %v1930_v19 = vld [vmem:[%s2406_s1 + $0x98] sm:$0xff]   ;;  %v1935_v37 = vld [vmem:[%s2406_s1 + $0x1a8] sm:$0xff]   ;;  %v1961_v59 = vld [vmem:[%s2406_s1 + $0x200] sm:$0xff]  }
  0x1c   : > { %1758 = vmatpush3.bf16.msra.mxu0 %v1898_v17  ;;  %1679 = vmatprep.subr.bf16.mxu1 %v1978_v1  ;;  %v1036_v17 = vld [vmem:[%s2057_s10 + $0x8] sm:$0xf]  ;;  %v1073_v28 = vrot.slane %v1071_v26, 1  ;;  %v1963_v61 = vld [vmem:[%s2406_s1 + $0x210] sm:$0xff]   ;;  %v1965_v63 = vld [vmem:[%s2406_s1 + $0x220] sm:$0xff]  }
  0x1d   : > { %1759 = vmatprep.subr.bf16.mxu0 %v1978_v1  ;;  %v1571_v34 = vcombine.low %v1167_v33, %v1036_v17  ;;  %v1953_v54 = vld [vmem:[%s2406_s1 + $0x1e8] sm:$0xff]   ;;  %v1967_v2 = vld [vmem:[%s2406_s1 + $0x230] sm:$0xff]  }
  0x1f   : > { %1680 = vmatpush3.bf16.msra.mxu1 %v1899_v20  ;;  %v1545_v20 = vcombine.low %v1035_v16, %v1036_v17  ;;  %v1188_v38 = vrot.slane %v1571_v34, 1 }
  0x20   : > { %1760 = vmatpush3.bf16.msra.mxu0 %v1900_v23  ;;  %1681 = vmatprep.subr.bf16.mxu1 %v1978_v1  ;;  %v2239_v23 = vsel %vm578_vm5, %v579_v13, %v580_v18  ;;  %v1581_v13 = vld [vmem:[%s2408_s3] ss:$0 sm:$0xff] }
  0x21   : > { %1761 = vmatprep.subr.bf16.mxu0 %v1978_v1  ;;  %v1064_v24 = vshrl.u32 %v1545_v20, 16  ;;  %v1066_v25 = vshll.u32 %v1545_v20, 16 }
  0x23   : > { %1682 = vmatpush3.bf16.msra.mxu1 %v1901_v32  ;;  %v1068_v27 = vrot.slane %v1066_v25, 1 }
  0x24   : > { %1762 = vmatpush3.bf16.msra.mxu0 %v1902_v35  ;;  %1687 = vmatprep.subr.bf16.mxu1 %v1978_v1  ;;  %v1189_v35 = vrot.slane %v1960_v21, 1 }
  0x25   : > { %1767 = vmatprep.subr.bf16.mxu0 %v1978_v1  ;;  %v1069_v30 = vor.u32 %v1068_v27, %v1064_v24 }
  0x26   : > { %1684 = vmatmul.mubr.bf16.vlgmr.msra.gmra.mrb[0].mxu1 %v255_v40  ;;  %v2264_v39 = vsel %vm457_vm3, %v1188_v38, %v1189_v35  ;;  %v1936_v40 = vld [vmem:[%s2406_s1 + $0xb0] sm:$0xff]  }
  0x27   : > { %1688 = vmatpush3.bf16.msra.mxu1 %v1905_v41  ;;  %1764 = vmatmul.mubr.bf16.vlgmr.msra.gmra.mrb[0].mxu0 %v712_v42  ;;  %v2252_v32 = vsel %vm243_vm1, %v1069_v30, %v1073_v28  ;;  %v1937_v41 = vld [vmem:[%s2406_s1 + $0x1b0] sm:$0xff]   ;;  %v1938_v42 = vld [vmem:[%s2406_s1 + $0xb8] sm:$0xff]  }
  0x28   : > { %1768 = vmatpush3.bf16.msra.mxu0 %v1908_v43  ;;  %1689 = vmatprep.subr.bf16.mxu1 %v1978_v1  ;;  %v1939_v43 = vld [vmem:[%s2406_s1 + $0x1b8] sm:$0xff]  }
  0x29   : > { %1769 = vmatprep.subr.bf16.mxu0 %v1978_v1  ;;  %1703 = vmatprep.mubr.msk.bf16.mxu1 %vm1979_vm0, %v1978_v1 }
  0x2a   : > { %1783 = vmatprep.mubr.msk.bf16.mxu0 %vm1979_vm0, %v1978_v1 }
  0x2b   : > { %1690 = vmatpush3.bf16.msra.mxu1 %v1909_v44  ;;  %v1941_v44 = vld [vmem:[%s2406_s1 + $0xc0] sm:$0xff]  }
  0x2c   : > { %1770 = vmatpush3.bf16.msra.mxu0 %v1910_v45  ;;  %1691 = vmatprep.subr.bf16.mxu1 %v1978_v1  ;;  %v1943_v45 = vld [vmem:[%s2406_s1 + $0x1c0] sm:$0xff]  }
  0x2d   : > { %1771 = vmatprep.subr.bf16.mxu0 %v1978_v1 }
  0x2f   : > { %1692 = vmatpush3.bf16.msra.mxu1 %v1911_v46  ;;  %v1944_v46 = vld [vmem:[%s2406_s1 + $0xc8] sm:$0xff]  }
  0x30   : > { %1772 = vmatpush3.bf16.msra.mxu0 %v1912_v47  ;;  %1693 = vmatprep.subr.bf16.mxu1 %v1978_v1  ;;  %v1945_v47 = vld [vmem:[%s2406_s1 + $0x1c8] sm:$0xff]  }
  0x31   : > { %1773 = vmatprep.subr.bf16.mxu0 %v1978_v1 }
  0x33   : > { %1694 = vmatpush3.bf16.msra.mxu1 %v1913_v48  ;;  %v1947_v48 = vld [vmem:[%s2406_s1 + $0x1d0] sm:$0xff]  }
  0x34   : > { %1774 = vmatpush3.bf16.msra.mxu0 %v1914_v49  ;;  %1695 = vmatprep.subr.bf16.mxu1 %v1978_v1  ;;  %v1948_v49 = vld [vmem:[%s2406_s1 + $0xd8] sm:$0xff]  }
  0x35   : > { %1775 = vmatprep.subr.bf16.mxu0 %v1978_v1 }
  0x37   : > { %1696 = vmatpush3.bf16.msra.mxu1 %v1915_v50  ;;  %v1949_v50 = vld [vmem:[%s2406_s1 + $0x1d8] sm:$0xff]  }
  0x38   : > { %1776 = vmatpush3.bf16.msra.mxu0 %v1916_v51  ;;  %1697 = vmatprep.subr.bf16.mxu1 %v1978_v1  ;;  %v1950_v51 = vld [vmem:[%s2406_s1 + $0xe0] sm:$0xff]  }
  0x39   : > { %1777 = vmatprep.subr.bf16.mxu0 %v1978_v1 }
  0x3b   : > { %1698 = vmatpush3.bf16.msra.mxu1 %v1917_v52  ;;  %v1951_v52 = vld [vmem:[%s2406_s1 + $0x1e0] sm:$0xff]  }
  0x3c   : > { %1778 = vmatpush3.bf16.msra.mxu0 %v1918_v53  ;;  %1699 = vmatprep.subr.bf16.mxu1 %v1978_v1  ;;  %v1952_v53 = vld [vmem:[%s2406_s1 + $0xe8] sm:$0xff]  }
  0x3d   : > { %1779 = vmatprep.subr.bf16.mxu0 %v1978_v1 }
  0x3f   : > { %1700 = vmatpush3.bf16.msra.mxu1 %v1919_v56  ;;  %v1955_v56 = vld [vmem:[%s2406_s1 + $0x1f0] sm:$0xff]  }
  0x40   : > { %1780 = vmatpush3.bf16.msra.mxu0 %v1920_v60  ;;  %1701 = vmatprep.subr.bf16.mxu1 %v1978_v1  ;;  %v1962_v60 = vld [vmem:[%s2406_s1 + $0x208] sm:$0xff]  }
  0x41   : > { %1781 = vmatprep.subr.bf16.mxu0 %v1978_v1 }
  0x43   : > { %1702 = vmatpush3.bf16.msra.mxu1 %v1921_v0  ;;  %v1966_v0 = vld [vmem:[%s2406_s1 + $0x228] sm:$0xff]  }
  0x44   : > { %1782 = vmatpush3.bf16.msra.mxu0 %v1922_v4  ;;  %1707 = vmatprep.subr.bf16.mxu1 %v1978_v1 }
  0x45   : > { %1787 = vmatprep.subr.bf16.mxu0 %v1978_v1 }
  0x46   : > { %1704 = vmatmul.mubr.bf16.vlgmr.msra.gmra.mrb[0].mxu1 %v2075_v14  ;;  %v1929_v14 = vld [vmem:[%s2406_s1 + $0x190] sm:$0xff]  }
  0x47   : > { %1708 = vmatpush3.bf16.msra.mxu1 %v1923_v6  ;;  %1784 = vmatmul.mubr.bf16.vlgmr.msra.gmra.mrb[0].mxu0 %v829_v7 }
  0x48   : > { %1788 = vmatpush3.bf16.msra.mxu0 %v1925_v8  ;;  %1709 = vmatprep.subr.bf16.mxu1 %v1978_v1 }
  0x49   : > { %1789 = vmatprep.subr.bf16.mxu0 %v1978_v1  ;;  %1723 = vmatprep.mubr.msk.bf16.mxu1 %vm1979_vm0, %v1978_v1 }
  0x4a   : > { %1803 = vmatprep.mubr.msk.bf16.mxu0 %vm1979_vm0, %v1978_v1 }
  0x4b   : > { %1710 = vmatpush3.bf16.msra.mxu1 %v1926_v9  ;;  %v1580_v9 = vld [vmem:[%s2407_s2] ss:$0 sm:$0xff] }
  0x4c   : > { %1790 = vmatpush3.bf16.msra.mxu0 %v1927_v10  ;;  %1711 = vmatprep.subr.bf16.mxu1 %v1978_v1 }
  0x4d   : > { %1791 = vmatprep.subr.bf16.mxu0 %v1978_v1 }
  0x4f   : > { %1712 = vmatpush3.bf16.msra.mxu1 %v1928_v11 }
  0x50   : > { %1792 = vmatpush3.bf16.msra.mxu0 %v1929_v14  ;;  %1713 = vmatprep.subr.bf16.mxu1 %v1978_v1 }
  0x51   : > { %1793 = vmatprep.subr.bf16.mxu0 %v1978_v1 }
  0x53   : > { %1714 = vmatpush3.bf16.msra.mxu1 %v1930_v19 }
  0x54   : > { %1794 = vmatpush3.bf16.msra.mxu0 %v1931_v22  ;;  %1715 = vmatprep.subr.bf16.mxu1 %v1978_v1 }
  0x55   : > { %1795 = vmatprep.subr.bf16.mxu0 %v1978_v1 }
  0x57   : > { %1716 = vmatpush3.bf16.msra.mxu1 %v1932_v29 }
  0x58   : > { %1796 = vmatpush3.bf16.msra.mxu0 %v1933_v31  ;;  %1717 = vmatprep.subr.bf16.mxu1 %v1978_v1 }
  0x59   : > { %1797 = vmatprep.subr.bf16.mxu0 %v1978_v1 }
  0x5b   : > { %1718 = vmatpush3.bf16.msra.mxu1 %v1934_v36 }
  0x5c   : > { %1798 = vmatpush3.bf16.msra.mxu0 %v1935_v37  ;;  %1719 = vmatprep.subr.bf16.mxu1 %v1978_v1 }
  0x5d   : > { %1799 = vmatprep.subr.bf16.mxu0 %v1978_v1 }
  0x5f   : > { %1720 = vmatpush3.bf16.msra.mxu1 %v1936_v40 }
  0x60   : > { %1800 = vmatpush3.bf16.msra.mxu0 %v1937_v41  ;;  %1721 = vmatprep.subr.bf16.mxu1 %v1978_v1 }
  0x61   : > { %1801 = vmatprep.subr.bf16.mxu0 %v1978_v1 }
  0x63   : > { %1722 = vmatpush3.bf16.msra.mxu1 %v1938_v42 }
  0x64   : > { %1802 = vmatpush3.bf16.msra.mxu0 %v1939_v43  ;;  %1727 = vmatprep.subr.bf16.mxu1 %v1978_v1 }
  0x65   : > { %1807 = vmatprep.subr.bf16.mxu0 %v1978_v1 }
  0x66   : > { %1724 = vmatmul.mubr.bf16.vlgmr.msra.gmra.mrb[0].mxu1 %v2191_v3  ;;  %v1968_v3 = vld [vmem:[%s2406_s1 + $0x238] sm:$0xff]  }
  0x67   : > { %1728 = vmatpush3.bf16.msra.mxu1 %v1941_v44  ;;  %1804 = vmatmul.mubr.bf16.vlgmr.msra.gmra.mrb[0].mxu0 %v1520_v62  ;;  %v1964_v62 = vld [vmem:[%s2406_s1 + $0x218] sm:$0xff]  }
  0x68   : > { %1808 = vmatpush3.bf16.msra.mxu0 %v1943_v45  ;;  %1729 = vmatprep.subr.bf16.mxu1 %v1978_v1 }
  0x69   : > { %1809 = vmatprep.subr.bf16.mxu0 %v1978_v1  ;;  %1743 = vmatprep.mubr.msk.bf16.mxu1 %vm1979_vm0, %v1978_v1 }
  0x6a   : > { %1823 = vmatprep.mubr.msk.bf16.mxu0 %vm1979_vm0, %v1978_v1 }
  0x6b   : > { %1730 = vmatpush3.bf16.msra.mxu1 %v1944_v46 }
  0x6c   : > { %1810 = vmatpush3.bf16.msra.mxu0 %v1945_v47  ;;  %1731 = vmatprep.subr.bf16.mxu1 %v1978_v1 }
  0x6d   : > { %1811 = vmatprep.subr.bf16.mxu0 %v1978_v1 }
  0x6f   : > { %1732 = vmatpush3.bf16.msra.mxu1 %v1946_v12 }
  0x70   : > { %1812 = vmatpush3.bf16.msra.mxu0 %v1947_v48  ;;  %1733 = vmatprep.subr.bf16.mxu1 %v1978_v1 }
  0x71   : > { %1813 = vmatprep.subr.bf16.mxu0 %v1978_v1 }
  0x73   : > { %1734 = vmatpush3.bf16.msra.mxu1 %v1948_v49 }
  0x74   : > { %1814 = vmatpush3.bf16.msra.mxu0 %v1949_v50  ;;  %1735 = vmatprep.subr.bf16.mxu1 %v1978_v1 }
  0x75   : > { %1815 = vmatprep.subr.bf16.mxu0 %v1978_v1 }
  0x77   : > { %1736 = vmatpush3.bf16.msra.mxu1 %v1950_v51 }
  0x78   : > { %1816 = vmatpush3.bf16.msra.mxu0 %v1951_v52  ;;  %1737 = vmatprep.subr.bf16.mxu1 %v1978_v1 }
  0x79   : > { %1817 = vmatprep.subr.bf16.mxu0 %v1978_v1 }
  0x7b   : > { %1738 = vmatpush3.bf16.msra.mxu1 %v1952_v53 }
  0x7c   : > { %1818 = vmatpush3.bf16.msra.mxu0 %v1953_v54  ;;  %1739 = vmatprep.subr.bf16.mxu1 %v1978_v1 }
  0x7d   : > { %1819 = vmatprep.subr.bf16.mxu0 %v1978_v1 }
  0x7f   : > { %1740 = vmatpush3.bf16.msra.mxu1 %v1954_v55 }
  0x80   : > { %1820 = vmatpush3.bf16.msra.mxu0 %v1955_v56  ;;  %1741 = vmatprep.subr.bf16.mxu1 %v1978_v1 }
  0x81   : > { %1821 = vmatprep.subr.bf16.mxu0 %v1978_v1 }
  0x83   : > { %1742 = vmatpush3.bf16.msra.mxu1 %v1956_v57 }
  0x84   : > { %1822 = vmatpush3.bf16.msra.mxu0 %v1957_v58 }
  0x85   : > { %1827 = vmatprep.subr.bf16.mxu0 %v1978_v1 }
  0x86   : > { %1744 = vmatmul.mubr.bf16.vlgmr.msra.gmra.mrb[0].mxu1 %v2239_v23 }
  0x87   : > { %1824 = vmatmul.mubr.bf16.vlgmr.msra.gmra.mrb[0].mxu0 %v2252_v32 }
  0x88   : > { %1828 = vmatpush3.bf16.msra.mxu0 %v1961_v59  ;;  %1843 = vmatprep.mubr.msk.bf16.mxu0 %vm1979_vm0, %v1978_v1 }
  0x89   : > { %1829 = vmatprep.subr.bf16.mxu0 %v1978_v1 }
  0x8c   : > { %1830 = vmatpush3.bf16.msra.mxu0 %v1962_v60 }
  0x8d   : > { %1831 = vmatprep.subr.bf16.mxu0 %v1978_v1 }
  0x90   : > { %1832 = vmatpush3.bf16.msra.mxu0 %v1963_v61 }
  0x91   : > { %1833 = vmatprep.subr.bf16.mxu0 %v1978_v1 }
  0x94   : > { %1834 = vmatpush3.bf16.msra.mxu0 %v1964_v62 }
  0x95   : > { %1835 = vmatprep.subr.bf16.mxu0 %v1978_v1 }
  0x98   : > { %1836 = vmatpush3.bf16.msra.mxu0 %v1965_v63 }
  0x99   : > { %1837 = vmatprep.subr.bf16.mxu0 %v1978_v1 }
  0x9c   : > { %1838 = vmatpush3.bf16.msra.mxu0 %v1966_v0 }
  0x9d   : > { %1839 = vmatprep.subr.bf16.mxu0 %v1978_v1 }
  0xa0   : > { %1840 = vmatpush3.bf16.msra.mxu0 %v1967_v2 }
  0xa1   : > { %1841 = vmatprep.subr.bf16.mxu0 %v1978_v1 }
  0xa4   : > { %1842 = vmatpush3.bf16.msra.mxu0 %v1968_v3 }
  0xa7   : > { %1844 = vmatmul.mubr.bf16.vlgmr.msra.gmra.mrb[0].mxu0 %v2264_v39 }
 0x159   : > { %v665_v4 = vpop.f32.mrb[0].mxu1 }
 0x15a   : > { %v1745_v5 = vpop.f32.mrb[1].mxu1 }
 0x15b   : > { %v668_v6 = vpop.f32.mrb[2].mxu1 }
 0x15c   : > { %v1746_v7 = vpop.f32.mrb[3].mxu1 }
 0x17a   : > { %v1274_v8 = vpop.f32.mrb[0].mxu0 }
 0x17b   : > { %v1847_v10 = vadd.f32 %v1274_v8, %v665_v4  ;;  %v1845_v11 = vpop.f32.mrb[1].mxu0 }
 0x17c   : > { %v1277_v1 = vpop.f32.mrb[2].mxu0 }
 0x17d   : > { %v1290_v14 = vmul.f32 %v1847_v10, %v1580_v9  ;;  %v1848_v15 = vadd.f32 %v1277_v1, %v668_v6  ;;  %v1846_v16 = vpop.f32.mrb[3].mxu0 }
 0x17f   : > { %v1299_v17 = vadd.f32 %v1581_v13, %v1290_v14  ;;  %v1291_v18 = vmul.f32 %v1848_v15, %v1580_v9 }
 0x181   : > { %v1301_v20 = vmax.f32 %v1299_v17, 0.0  ;;  %v1300_v21 = vadd.f32 %v1581_v13, %v1291_v18 }
 0x183   : > { %1303 = vst [vmem:[%s197_s9] sm:$0xff] %v1301_v20  ;;  %v1302_v19 = vmax.f32 %v1300_v21, 0.0 }
 0x185   : > { %1304 = vst [vmem:[%s197_s9 + $0x8] sm:$0xff] %v1302_v19 }
 0x186 PF: > { %s14_s15 = sadd.s32 1, %s1976_s15  }
 0x187   : > { %p11_p4 = scmp.ge.s32.totalorder %s14_s15, 4  }
 0x189   :  { %13 = sbr.rel (!%p11_p4) target bundleno = 1 (0x1), region = 74 }

// kernel: resnet_forward.46
= control target key start
LH: loop header
LB: loop body
LE: loop exit
PB: predicated region body
PF: predicated region fallthrough
CT: control target
= control target key end

     0   :  { %s969_s18 = smov 0   ;;  %s971_s19 = smov 0   ;;  %s1064_s0 = inlined_call_operand.vmem [shape: bf16[8,128], index: 0, kind: input, shape index: {}]   ;;  %s1065_s1 = inlined_call_operand.vmem [shape: bf16[128,512], index: 1, kind: input, shape index: {}]   ;;  %s1066_s2 = inlined_call_operand.vmem [shape: f32[1,512], index: 2, kind: input, shape index: {}]   ;;  %s1067_s3 = inlined_call_operand.vmem [shape: f32[1,512], index: 3, kind: input, shape index: {}]   ;;  %s1068_s4 = inlined_call_operand.vmem [shape: f32[8,512], index: 4, kind: input, shape index: {}]   ;;  %s1069_s5 = inlined_call_operand.vmem [shape: f32[8,512], index: 5, kind: output, shape index: {}]  }
   0x1   :  { %s973_s20 = smov 0   ;;  %s975_s21 = smov 0  }
   0x2   :  { %s977_s22 = smov 0  }
   0x3 LB: > { %s30_s23 = sadd.s32 1, %s932_s21  ;;  %p78_p1 = scmp.ne.s32.totalorder %s924_s19, %s920_s18  ;;  %s936_s22 = sphi %s977_s22, %s15_s22   ;;  %s932_s21 = sphi %s975_s21, %s1073_s21   ;;  %s928_s20 = sphi %s973_s20, %s1072_s20   ;;  %s924_s19 = sphi %s971_s19, %s1071_s19   ;;  %s920_s18 = sphi %s969_s18, %s1070_s18  }
   0x4   : > { %p32_p0 = scmp.ge.s32.totalorder %s30_s23, 2  ;;  %p79_p2 = scmp.eq.s32.totalorder %s936_s22, 0 }
   0x5   : > { %s71_s25 = sadd.s32 1, %s924_s19  ;;  %p802_p5 = scmp.ge.s32.totalorder %s936_s22, 2 }
   0x6   : > { %s1075_s23 = smov (%p32_p0, %s30_s23), 0  ;;  %p80_p3 = por %p79_p2, %p78_p1 }
   0x7   : > { %s67_s24 = ssub.s32 %s932_s21, %s1075_s23  ;;  %222 = sbr.rel (%p802_p5) target bundleno = 26 (0x1a), region = 20 }
   0x8   : > { %p69_p4 = scmp.eq.s32.totalorder %s67_s24, 0 }
   0xa   : > { %s1004_s26 = scalar_select %p69_p4, %s924_s19, %s71_s25  }
   0xe   : > { %225 = sbr.rel (!%p80_p3) target bundleno = 26 (0x1a), region = 24  ;;  %s227_s27 = sand.u32 (%p80_p3), 1, %s924_s19  }
   0xf   : > { %s832_s28 = sshll.u32 (%p80_p3), %s932_s21, 3  ;;  %s803_s29 = sshll.u32 (%p80_p3), %s227_s27, 7 }
  0x10   : > { %s1012_s7 = scalar_lea.vmem (%p80_p3), %s1065_s1, %s832_s28  ;;  %s229_s8 = scalar_lea.vmem (%p80_p3), [#allocation3], %s803_s29 }
  0x11   : > { %v293_v0 = vld [vmem:[%s1012_s7] sm:$0xff] (%p80_p3)  ;;  %v295_v1 = vld [vmem:[%s1012_s7 + $0x10] sm:$0xff] (%p80_p3) }
  0x12   : > { %v297_v2 = vld [vmem:[%s1012_s7 + $0x20] sm:$0xff] (%p80_p3)  ;;  %294 = vst [vmem:[%s229_s8] sm:$0xff] (%p80_p3), %v293_v0  ;;  %296 = vst [vmem:[%s229_s8 + $0x8] sm:$0xff] (%p80_p3), %v295_v1  ;;  %v299_v3 = vld [vmem:[%s1012_s7 + $0x30] sm:$0xff] (%p80_p3) }
  0x13   : > { %298 = vst [vmem:[%s229_s8 + $0x10] sm:$0xff] (%p80_p3), %v297_v2  ;;  %v301_v4 = vld [vmem:[%s1012_s7 + $0x40] sm:$0xff] (%p80_p3)  ;;  %v303_v5 = vld [vmem:[%s1012_s7 + $0x50] sm:$0xff] (%p80_p3)  ;;  %300 = vst [vmem:[%s229_s8 + $0x18] sm:$0xff] (%p80_p3), %v299_v3 }
  0x14   : > { %302 = vst [vmem:[%s229_s8 + $0x20] sm:$0xff] (%p80_p3), %v301_v4  ;;  %304 = vst [vmem:[%s229_s8 + $0x28] sm:$0xff] (%p80_p3), %v303_v5  ;;  %v305_v6 = vld [vmem:[%s1012_s7 + $0x60] sm:$0xff] (%p80_p3)  ;;  %v307_v7 = vld [vmem:[%s1012_s7 + $0x70] sm:$0xff] (%p80_p3) }
  0x15   : > { %v309_v8 = vld [vmem:[%s1012_s7 + $0x80] sm:$0xff]  ;;  %306 = vst [vmem:[%s229_s8 + $0x30] sm:$0xff] %v305_v6  ;;  %308 = vst [vmem:[%s229_s8 + $0x38] sm:$0xff] %v307_v7  ;;  %v311_v9 = vld [vmem:[%s1012_s7 + $0x90] sm:$0xff] }
  0x16   : > { %310 = vst [vmem:[%s229_s8 + $0x40] sm:$0xff] %v309_v8  ;;  %v313_v10 = vld [vmem:[%s1012_s7 + $0xa0] sm:$0xff]  ;;  %v315_v11 = vld [vmem:[%s1012_s7 + $0xb0] sm:$0xff]  ;;  %312 = vst [vmem:[%s229_s8 + $0x48] sm:$0xff] %v311_v9 }
  0x17   : > { %314 = vst [vmem:[%s229_s8 + $0x50] sm:$0xff] %v313_v10  ;;  %316 = vst [vmem:[%s229_s8 + $0x58] sm:$0xff] %v315_v11  ;;  %v317_v12 = vld [vmem:[%s1012_s7 + $0xc0] sm:$0xff]  ;;  %v319_v13 = vld [vmem:[%s1012_s7 + $0xd0] sm:$0xff] }
  0x18   : > { %v321_v14 = vld [vmem:[%s1012_s7 + $0xe0] sm:$0xff]  ;;  %318 = vst [vmem:[%s229_s8 + $0x60] sm:$0xff] %v317_v12  ;;  %320 = vst [vmem:[%s229_s8 + $0x68] sm:$0xff] %v319_v13  ;;  %v323_v15 = vld [vmem:[%s1012_s7 + $0xf0] sm:$0xff] }
  0x19   : > { %322 = vst [vmem:[%s229_s8 + $0x70] sm:$0xff] %v321_v14  ;;  %324 = vst [vmem:[%s229_s8 + $0x78] sm:$0xff] %v323_v15 }
  0x1a PF: > { %p806_p6 = scmp.ge.s32.totalorder %s936_s22, 1  ;;  %p358_p7 = scmp.lt.s32.totalorder %s936_s22, 3 }
  0x1c   : > { %p359_p8 = pnand %p806_p6, %p358_p7 }
  0x1d   : > { %s365_s9 = sand.u32 (!%p359_p8), 1, %s920_s18   ;;  %v938_v16 = vmov (!%p359_p8), 0   ;;  %v468_v33 = vld [vmem:[%s1064_s0] sm:$0xf] (!%p359_p8)  ;;  %s808_s14 = sshll.u32 (!%p359_p8), %s928_s20, 1  ;;  %v617_v34 = vlaneseq (!%p359_p8) }
  0x1e   : > { %362 = sbr.rel (%p359_p8) target bundleno = 287 (0x11f), region = 74  ;;  %s807_s10 = sshll.u32 (!%p359_p8), %s365_s9, 7  ;;  %597 = vmatprep.mubr.bf16.mxu0 (!%p359_p8), %v938_v16 }
  0x1f   : > { %s367_s11 = scalar_lea.vmem (!%p359_p8), [#allocation3], %s807_s10  ;;  %p430_p9 = scmp.lt.s32.totalorder (!%p359_p8), %s808_s14, 3  ;;  %v618_v35 = vshrl.u32 (!%p359_p8), %v617_v34, 7 }
  0x20   : > { %v874_v17 = vld [vmem:[%s367_s11 + $0x4] ss:$8 sps:$4 sm:$0xff] (!%p359_p8)   ;;  %v876_v18 = vld [vmem:[%s367_s11] ss:$8 sps:$4 sm:$0xff] (!%p359_p8)   ;;  %v877_v19 = vld [vmem:[%s367_s11 + $0x14] ss:$8 sps:$4 sm:$0xff] (!%p359_p8)  }
  0x21   : > { %565 = vmatprep.subr.bf16.mxu0 (!%p359_p8), %v874_v17  ;;  %v879_v20 = vld [vmem:[%s367_s11 + $0x10] ss:$8 sps:$4 sm:$0xff] (!%p359_p8)   ;;  %v880_v21 = vld [vmem:[%s367_s11 + $0x24] ss:$8 sps:$4 sm:$0xff] (!%p359_p8)   ;;  %v882_v22 = vld [vmem:[%s367_s11 + $0x20] ss:$8 sps:$4 sm:$0xff] (!%p359_p8)  }
  0x22   : > { %566 = vmatpush1.bf16.msra.mxu0 (!%p359_p8), %v876_v18  ;;  %v883_v23 = vld [vmem:[%s367_s11 + $0x34] ss:$8 sps:$4 sm:$0xff] (!%p359_p8)   ;;  %v885_v24 = vld [vmem:[%s367_s11 + $0x30] ss:$8 sps:$4 sm:$0xff] (!%p359_p8)   ;;  %v886_v25 = vld [vmem:[%s367_s11 + $0x44] ss:$8 sps:$4 sm:$0xff] (!%p359_p8)  }
  0x23   : > { %567 = vmatprep.subr.bf16.mxu0 (!%p359_p8), %v877_v19  ;;  %v888_v26 = vld [vmem:[%s367_s11 + $0x40] ss:$8 sps:$4 sm:$0xff] (!%p359_p8)   ;;  %v889_v27 = vld [vmem:[%s367_s11 + $0x54] ss:$8 sps:$4 sm:$0xff] (!%p359_p8)   ;;  %v891_v28 = vld [vmem:[%s367_s11 + $0x50] ss:$8 sps:$4 sm:$0xff] (!%p359_p8)  }
  0x24   : > { %v892_v29 = vld [vmem:[%s367_s11 + $0x64] ss:$8 sps:$4 sm:$0xff] (!%p359_p8)   ;;  %v894_v30 = vld [vmem:[%s367_s11 + $0x60] ss:$8 sps:$4 sm:$0xff] (!%p359_p8)   ;;  %v895_v31 = vld [vmem:[%s367_s11 + $0x74] ss:$8 sps:$4 sm:$0xff] (!%p359_p8)  }
  0x25   : > { %v897_v32 = vld [vmem:[%s367_s11 + $0x70] ss:$8 sps:$4 sm:$0xff]   ;;  %s1077_s14 = smov (!%p430_p9, %s808_s14), 3  ;;  %v619_v36 = vsub.s32 0, %v618_v35  ;;  %v623_v38 = vsub.s32 1, %v618_v35 }
  0x26   : > { %568 = vmatpush1.bf16.msra.mxu0 %v879_v20  ;;  %s432_s17 = scalar_lea.vmem %s1066_s2, %s1077_s14  ;;  %s437_s25 = scalar_lea.vmem %s1067_s3, %s1077_s14 }
  0x27   : > { %569 = vmatprep.subr.bf16.mxu0 %v880_v21  ;;  %v615_v37 = vld [vmem:[%s432_s17] sm:$0x3]  ;;  %s811_s27 = sshll.u32 %s1077_s14, 3 }
  0x28   : > { %v629_v39 = vld [vmem:[%s437_s25] sm:$0x3]  ;;  %v620_v40 = vrot.slane %v615_v37, %v619_v36  ;;  %v624_v41 = vrot.slane %v615_v37, %v623_v38  ;;  %s447_s29 = scalar_lea.vmem %s1068_s4, %s811_s27  ;;  %s457_s7 = scalar_lea.vmem %s1069_s5, %s811_s27 }
  0x29   : > { %v634_v42 = vrot.slane %v629_v39, %v619_v36  ;;  %v638_v44 = vrot.slane %v629_v39, %v623_v38  ;;  %v643_v47 = vld [vmem:[%s447_s29] sm:$0xff]  ;;  %v644_v51 = vld [vmem:[%s447_s29 + $0x8] sm:$0xff] }
  0x2a   : > { %570 = vmatpush1.bf16.msra.mxu0 %v882_v22 }
  0x2b   : > { %571 = vmatprep.subr.bf16.mxu0 %v883_v23 }
  0x2e   : > { %572 = vmatpush1.bf16.msra.mxu0 %v885_v24 }
  0x2f   : > { %573 = vmatprep.subr.bf16.mxu0 %v886_v25 }
  0x32   : > { %574 = vmatpush1.bf16.msra.mxu0 %v888_v26 }
  0x33   : > { %575 = vmatprep.subr.bf16.mxu0 %v889_v27 }
  0x36   : > { %576 = vmatpush1.bf16.msra.mxu0 %v891_v28 }
  0x37   : > { %577 = vmatprep.subr.bf16.mxu0 %v892_v29 }
  0x3a   : > { %578 = vmatpush1.bf16.msra.mxu0 %v894_v30 }
  0x3b   : > { %579 = vmatprep.subr.bf16.mxu0 %v895_v31 }
  0x3e   : > { %580 = vmatpush1.bf16.msra.mxu0 %v897_v32 }
  0x41   : > { %598 = vmatmul.mubr.bf16.vlgmr.msra.gmra.mrb[0].mxu0 %v468_v33 }
 0x114   : > { %v599_v43 = vpop.f32.mrb[0].mxu0 }
 0x115   : > { %v627_v45 = vmul.f32 %v620_v40, %v599_v43  ;;  %v601_v46 = vpop.f32.mrb[1].mxu0 }
 0x116   : > { %v628_v48 = vmul.f32 %v624_v41, %v601_v46  ;;  %v603_v49 = vpop.f32.mrb[2].mxu0 }
 0x117   : > { %v641_v50 = vadd.f32 %v634_v42, %v627_v45  ;;  %v604_v52 = vpop.f32.mrb[3].mxu0 }
 0x118   : > { %v642_v53 = vadd.f32 %v638_v44, %v628_v48 }
 0x119   : > { %v645_v54 = vadd.f32 %v643_v47, %v641_v50 }
 0x11a   : > { %v646_v55 = vadd.f32 %v644_v51, %v642_v53 }
 0x11b   : > { %v647_v56 = vmax.f32 %v645_v54, 0.0 }
 0x11c   : > { %v648_v57 = vmax.f32 %v646_v55, 0.0 }
 0x11d   : > { %649 = vst [vmem:[%s457_s7] sm:$0xff] %v647_v56 }
 0x11e   : > { %650 = vst [vmem:[%s457_s7 + $0x8] sm:$0xff] %v648_v57 }
 0x11f PF: > { %s15_s22 = sadd.s32 1, %s936_s22   ;;  %s1070_s18 = smov %s924_s19 }
 0x120   : > { %p12_p10 = scmp.ge.s32.totalorder %s15_s22, 4   ;;  %s1071_s19 = smov %s1004_s26 }
 0x121   : > { %s1072_s20 = smov %s932_s21  ;;  %s1073_s21 = smov %s1075_s23 }
 0x122   :  { %14 = sbr.rel (!%p12_p10) target bundleno = 3 (0x3), region = 133 }

// kernel: resnet_forward.47
= control target key start
LH: loop header
LB: loop body
LE: loop exit
PB: predicated region body
PF: predicated region fallthrough
CT: control target
= control target key end

     0   :  { %s658_s1 = inlined_call_operand.vmem [shape: bf16[512,128], index: 1, kind: input, shape index: {}]   ;;  %s659_s0 = inlined_call_operand.vmem [shape: bf16[8,512], index: 0, kind: input, shape index: {}]   ;;  %s660_s2 = inlined_call_operand.vmem [shape: f32[1,128], index: 2, kind: input, shape index: {}]   ;;  %s661_s3 = inlined_call_operand.vmem [shape: f32[1,128], index: 3, kind: input, shape index: {}]   ;;  %s662_s4 = inlined_call_operand.vmem [shape: f32[8,128], index: 4, kind: output, shape index: {}]  }
   0x1   :  { %v486_v0 = vld [vmem:[%s658_s1 + $0x40] sm:$0xff]   ;;  %v490_v4 = vld [vmem:[%s658_s1 + $0x48] sm:$0xff]   ;;  %v494_v8 = vld [vmem:[%s658_s1 + $0x50] sm:$0xff]  }
   0x2   :  { %v487_v1 = vld [vmem:[%s658_s1 + $0xc0] sm:$0xff]   ;;  %442 = vmatprep.subr.bf16.mxu0 %v486_v0  ;;  %v491_v5 = vld [vmem:[%s658_s1 + $0xc8] sm:$0xff]   ;;  %v495_v9 = vld [vmem:[%s658_s1 + $0xd0] sm:$0xff]  }
   0x3   :  { %v488_v2 = vld [vmem:[%s658_s1] sm:$0xff]   ;;  %464 = vmatprep.subr.bf16.mxu1 %v487_v1  ;;  %v492_v6 = vld [vmem:[%s658_s1 + $0x8] sm:$0xff]   ;;  %v496_v10 = vld [vmem:[%s658_s1 + $0x10] sm:$0xff]  }
   0x4   :  { %v489_v3 = vld [vmem:[%s658_s1 + $0x80] sm:$0xff]   ;;  %443 = vmatpush3.bf16.msra.mxu0 %v488_v2  ;;  %v493_v7 = vld [vmem:[%s658_s1 + $0x88] sm:$0xff]   ;;  %v497_v11 = vld [vmem:[%s658_s1 + $0x90] sm:$0xff]  }
   0x5   :  { %465 = vmatpush3.bf16.msra.mxu1 %v489_v3  ;;  %444 = vmatprep.subr.bf16.mxu0 %v490_v4  ;;  %v498_v12 = vld [vmem:[%s658_s1 + $0x58] sm:$0xff]   ;;  %v502_v16 = vld [vmem:[%s658_s1 + $0x60] sm:$0xff]   ;;  %v506_v20 = vld [vmem:[%s658_s1 + $0x68] sm:$0xff]  }
   0x6   :  { %466 = vmatprep.subr.bf16.mxu1 %v491_v5  ;;  %v499_v13 = vld [vmem:[%s658_s1 + $0xd8] sm:$0xff]   ;;  %v503_v17 = vld [vmem:[%s658_s1 + $0xe0] sm:$0xff]   ;;  %v507_v21 = vld [vmem:[%s658_s1 + $0xe8] sm:$0xff]  }
   0x7   :  { %v500_v14 = vld [vmem:[%s658_s1 + $0x18] sm:$0xff]   ;;  %v504_v18 = vld [vmem:[%s658_s1 + $0x20] sm:$0xff]   ;;  %v508_v22 = vld [vmem:[%s658_s1 + $0x28] sm:$0xff]  }
   0x8   :  { %445 = vmatpush3.bf16.msra.mxu0 %v492_v6  ;;  %v501_v15 = vld [vmem:[%s658_s1 + $0x98] sm:$0xff]   ;;  %v505_v19 = vld [vmem:[%s658_s1 + $0xa0] sm:$0xff]   ;;  %v509_v23 = vld [vmem:[%s658_s1 + $0xa8] sm:$0xff]  }
   0x9   :  { %467 = vmatpush3.bf16.msra.mxu1 %v493_v7  ;;  %446 = vmatprep.subr.bf16.mxu0 %v494_v8  ;;  %v510_v24 = vld [vmem:[%s658_s1 + $0x70] sm:$0xff]   ;;  %v514_v28 = vld [vmem:[%s658_s1 + $0x78] sm:$0xff]   ;;  %v24_v32 = vld [vmem:[%s659_s0] sm:$0xff] }
   0xa   :  { %468 = vmatprep.subr.bf16.mxu1 %v495_v9  ;;  %v511_v25 = vld [vmem:[%s658_s1 + $0xf0] sm:$0xff]   ;;  %v515_v29 = vld [vmem:[%s658_s1 + $0xf8] sm:$0xff]   ;;  %v25_v33 = vld [vmem:[%s659_s0 + $0x8] sm:$0xff]  ;;  %v404_v34 = vcombine.low %v24_v32, %v24_v32  ;;  %v405_v35 = vcombine.high %v24_v32, %v24_v32 }
   0xb   :  { %v512_v26 = vld [vmem:[%s658_s1 + $0x30] sm:$0xff]   ;;  %v516_v30 = vld [vmem:[%s658_s1 + $0x38] sm:$0xff]   ;;  %v406_v36 = vcombine.low %v25_v33, %v25_v33  ;;  %v407_v37 = vcombine.high %v25_v33, %v25_v33  ;;  %v440_v46 = vld [vmem:[%s660_s2] ss:$0 sm:$0xff] }
   0xc   :  { %447 = vmatpush3.bf16.msra.mxu0 %v496_v10  ;;  %v513_v27 = vld [vmem:[%s658_s1 + $0xb0] sm:$0xff]   ;;  %v517_v31 = vld [vmem:[%s658_s1 + $0xb8] sm:$0xff]   ;;  %328 = vmatprep.mubr.bf16.mxu0 %v405_v35  ;;  %v441_v50 = vld [vmem:[%s661_s3] ss:$0 sm:$0xff] }
   0xd   :  { %469 = vmatpush3.bf16.msra.mxu1 %v497_v11  ;;  %448 = vmatprep.subr.bf16.mxu0 %v498_v12 }
   0xe   :  { %470 = vmatprep.subr.bf16.mxu1 %v499_v13  ;;  %368 = vmatprep.mubr.bf16.mxu1 %v407_v37 }
  0x10   :  { %449 = vmatpush3.bf16.msra.mxu0 %v500_v14 }
  0x11   :  { %471 = vmatpush3.bf16.msra.mxu1 %v501_v15  ;;  %450 = vmatprep.subr.bf16.mxu0 %v502_v16 }
  0x12   :  { %472 = vmatprep.subr.bf16.mxu1 %v503_v17 }
  0x14   :  { %451 = vmatpush3.bf16.msra.mxu0 %v504_v18 }
  0x15   :  { %473 = vmatpush3.bf16.msra.mxu1 %v505_v19  ;;  %452 = vmatprep.subr.bf16.mxu0 %v506_v20 }
  0x16   :  { %474 = vmatprep.subr.bf16.mxu1 %v507_v21 }
  0x18   :  { %453 = vmatpush3.bf16.msra.mxu0 %v508_v22 }
  0x19   :  { %475 = vmatpush3.bf16.msra.mxu1 %v509_v23  ;;  %454 = vmatprep.subr.bf16.mxu0 %v510_v24 }
  0x1a   :  { %476 = vmatprep.subr.bf16.mxu1 %v511_v25 }
  0x1c   :  { %455 = vmatpush3.bf16.msra.mxu0 %v512_v26 }
  0x1d   :  { %477 = vmatpush3.bf16.msra.mxu1 %v513_v27  ;;  %456 = vmatprep.subr.bf16.mxu0 %v514_v28 }
  0x1e   :  { %478 = vmatprep.subr.bf16.mxu1 %v515_v29 }
  0x20   :  { %457 = vmatpush3.bf16.msra.mxu0 %v516_v30 }
  0x21   :  { %479 = vmatpush3.bf16.msra.mxu1 %v517_v31 }
  0x23   :  { %329 = vmatmul.mubr.bf16.vlgmr.msra.gmra.mrb[0].mxu0 %v404_v34 }
  0x24   :  { %369 = vmatmul.mubr.bf16.vlgmr.msra.gmra.mrb[0].mxu1 %v406_v36 }
  0xf6   :  { %v458_v38 = vpop.f32.mrb[0].mxu0 }
  0xf7   :  { %v480_v39 = vpop.f32.mrb[0].mxu1  ;;  %v459_v40 = vpop.f32.mrb[1].mxu0 }
  0xf8   :  { %v481_v41 = vpop.f32.mrb[1].mxu1  ;;  %v460_v42 = vadd.f32 %v459_v40, %v458_v38  ;;  %v461_v44 = vpop.f32.mrb[2].mxu0 }
  0xf9   :  { %v482_v43 = vadd.f32 %v481_v41, %v480_v39  ;;  %v483_v45 = vpop.f32.mrb[2].mxu1  ;;  %v462_v47 = vpop.f32.mrb[3].mxu0 }
  0xfa   :  { %v484_v48 = vpop.f32.mrb[3].mxu1 }
  0xfb   :  { %v371_v49 = vadd.f32 %v482_v43, %v460_v42 }
  0xfd   :  { %v389_v51 = vmul.f32 %v440_v46, %v371_v49 }
  0xff   :  { %v397_v52 = vadd.f32 %v441_v50, %v389_v51 }
 0x101   :  { %v398_v53 = vmax.f32 %v397_v52, 0.0 }
 0x103   :  { %399 = vst [vmem:[%s662_s4] sm:$0xff] %v398_v53 }

// kernel: resnet_forward.48
= control target key start
LH: loop header
LB: loop body
LE: loop exit
PB: predicated region body
PF: predicated region fallthrough
CT: control target
= control target key end

     0   :  { %s1953_s15 = smov 0   ;;  %s2298_s0 = inlined_call_operand.vmem [shape: bf16[2,24,128], index: 0, kind: input, shape index: {}]   ;;  %s2299_s1 = inlined_call_operand.vmem [shape: bf16[9,128,128], index: 1, kind: input, shape index: {}]   ;;  %s2300_s2 = inlined_call_operand.vmem [shape: f32[1,128], index: 2, kind: input, shape index: {}]   ;;  %s2301_s3 = inlined_call_operand.vmem [shape: f32[1,128], index: 3, kind: input, shape index: {}]   ;;  %s2302_s4 = inlined_call_operand.vmem [shape: f32[2,9,128], index: 4, kind: output, shape index: {}]  }
   0x1 LB: > { %s1321_s16 = sadd.s32 4294967295, %s1924_s15   ;;  %p1325_p0 = scmp.ge.s32.totalorder %s1924_s15, 1  ;;  %s1924_s15 = sphi %s1953_s15, %s14_s15  }
   0x2   : > { %p162_p1 = scmp.lt.s32.totalorder %s1924_s15, 3 }
   0x4   : > { %p163_p2 = pnand %p1325_p0, %p162_p1 }
   0x5   : > { %v1841_v0 = vld [vmem:[%s2299_s1 + $0x40] sm:$0xff] (!%p163_p2)   ;;  %v1926_v1 = vmov (!%p163_p2), 0.0   ;;  %v1843_v3 = vld [vmem:[%s2299_s1 + $0x48] sm:$0xff] (!%p163_p2)   ;;  %vm1927_vm0 = vmmov (!%p163_p2), 0   ;;  %p188_p3 = scmp.lt.s32.totalorder (!%p163_p2), %s1321_s16, 1  ;;  %v1845_v5 = vld [vmem:[%s2299_s1 + $0x50] sm:$0xff] (!%p163_p2)  }
   0x6   : > { %166 = sbr.rel (%p163_p2) target bundleno = 390 (0x186), region = 36  ;;  %1620 = vmatprep.subr.bf16.mxu1 (!%p163_p2), %v1926_v1  ;;  %1700 = vmatprep.subr.bf16.mxu0 (!%p163_p2), %v1926_v1  ;;  %v1842_v2 = vld [vmem:[%s2299_s1 + $0x100] sm:$0xff] (!%p163_p2)   ;;  %v1844_v4 = vld [vmem:[%s2299_s1 + $0x108] sm:$0xff] (!%p163_p2)   ;;  %v1846_v6 = vld [vmem:[%s2299_s1 + $0x110] sm:$0xff] (!%p163_p2)  }
   0x7   : > { %1621 = vmatpush3.bf16.msra.mxu1 (!%p163_p2), %v1841_v0  ;;  %1636 = vmatprep.mubr.msk.bf16.mxu1 (!%p163_p2), %vm1927_vm0, %v1926_v1  ;;  %v1847_v7 = vld [vmem:[%s2299_s1 + $0x58] sm:$0xff] (!%p163_p2)   ;;  %v1849_v9 = vld [vmem:[%s2299_s1 + $0x60] sm:$0xff] (!%p163_p2)   ;;  %v1851_v12 = vld [vmem:[%s2299_s1 + $0x68] sm:$0xff] (!%p163_p2)  }
   0x8   : > { %1701 = vmatpush3.bf16.msra.mxu0 (!%p163_p2), %v1842_v2  ;;  %1622 = vmatprep.subr.bf16.mxu1 (!%p163_p2), %v1926_v1  ;;  %v1848_v8 = vld [vmem:[%s2299_s1 + $0x118] sm:$0xff] (!%p163_p2)   ;;  %v1850_v10 = vld [vmem:[%s2299_s1 + $0x120] sm:$0xff] (!%p163_p2)   ;;  %v1852_v13 = vld [vmem:[%s2299_s1 + $0x128] sm:$0xff] (!%p163_p2)  }
   0x9   : > { %1702 = vmatprep.subr.bf16.mxu0 (!%p163_p2), %v1926_v1  ;;  %1716 = vmatprep.mubr.msk.bf16.mxu0 (!%p163_p2), %vm1927_vm0, %v1926_v1  ;;  %v1853_v15 = vld [vmem:[%s2299_s1 + $0x70] sm:$0xff] (!%p163_p2)   ;;  %v1855_v17 = vld [vmem:[%s2299_s1 + $0x78] sm:$0xff] (!%p163_p2)   ;;  %v1858_v23 = vld [vmem:[%s2299_s1] sm:$0xff] (!%p163_p2)  }
   0xa   : > { %v1854_v16 = vld [vmem:[%s2299_s1 + $0x130] sm:$0xff] (!%p163_p2)   ;;  %v1856_v21 = vld [vmem:[%s2299_s1 + $0x138] sm:$0xff] (!%p163_p2)   ;;  %v1860_v25 = vld [vmem:[%s2299_s1 + $0x140] sm:$0xff] (!%p163_p2)  }
   0xb   : > { %1623 = vmatpush3.bf16.msra.mxu1 (!%p163_p2), %v1843_v3  ;;  %v1861_v26 = vld [vmem:[%s2299_s1 + $0x8] sm:$0xff] (!%p163_p2)   ;;  %v1863_v28 = vld [vmem:[%s2299_s1 + $0x10] sm:$0xff] (!%p163_p2)   ;;  %v1865_v30 = vld [vmem:[%s2299_s1 + $0x18] sm:$0xff] (!%p163_p2)  }
   0xc   : > { %1703 = vmatpush3.bf16.msra.mxu0 (!%p163_p2), %v1844_v4  ;;  %1624 = vmatprep.subr.bf16.mxu1 (!%p163_p2), %v1926_v1  ;;  %v1862_v27 = vld [vmem:[%s2299_s1 + $0x148] sm:$0xff] (!%p163_p2)   ;;  %v1864_v29 = vld [vmem:[%s2299_s1 + $0x150] sm:$0xff] (!%p163_p2)   ;;  %v1866_v31 = vld [vmem:[%s2299_s1 + $0x158] sm:$0xff] (!%p163_p2)  }
   0xd   : > { %s2304_s16 = smov (!%p188_p3, %s1321_s16), 1  ;;  %1704 = vmatprep.subr.bf16.mxu0 %v1926_v1  ;;  %v1867_v32 = vld [vmem:[%s2299_s1 + $0x20] sm:$0xff]   ;;  %v1869_v34 = vld [vmem:[%s2299_s1 + $0x28] sm:$0xff]   ;;  %v1871_v36 = vld [vmem:[%s2299_s1 + $0x30] sm:$0xff]  }
   0xe   : > { %s1830_s5 = smul.u32 12, %s2304_s16  ;;  %v1868_v33 = vld [vmem:[%s2299_s1 + $0x160] sm:$0xff]   ;;  %v1870_v35 = vld [vmem:[%s2299_s1 + $0x168] sm:$0xff]   ;;  %v1872_v39 = vld [vmem:[%s2299_s1 + $0x170] sm:$0xff]   ;;  %s1538_s30 = sshll.u32 %s2304_s16, 4 }
   0xf   : > { %1625 = vmatpush3.bf16.msra.mxu1 %v1845_v5  ;;  %v1873_v41 = vld [vmem:[%s2299_s1 + $0x38] sm:$0xff]   ;;  %v1875_v44 = vld [vmem:[%s2299_s1 + $0x80] sm:$0xff]   ;;  %v1877_v47 = vld [vmem:[%s2299_s1 + $0x88] sm:$0xff]   ;;  %s197_s6 = scalar_lea.vmem %s2302_s4, %s1538_s30 }
  0x10   : > { %1705 = vmatpush3.bf16.msra.mxu0 %v1846_v6  ;;  %1626 = vmatprep.subr.bf16.mxu1 %v1926_v1  ;;  %s2006_s12 = scalar_lea.vmem %s2298_s0, %s1830_s5  ;;  %v1874_v43 = vld [vmem:[%s2299_s1 + $0x178] sm:$0xff]   ;;  %v1876_v46 = vld [vmem:[%s2299_s1 + $0x180] sm:$0xff]   ;;  %v1878_v48 = vld [vmem:[%s2299_s1 + $0x188] sm:$0xff]  }
  0x11   : > { %1706 = vmatprep.subr.bf16.mxu0 %v1926_v1  ;;  %v2014_v11 = vld [vmem:[%s2006_s12] sm:$0x1f]   ;;  %v1879_v49 = vld [vmem:[%s2299_s1 + $0x90] sm:$0xff]   ;;  %v1881_v51 = vld [vmem:[%s2299_s1 + $0x98] sm:$0xff]  }
  0x12   : > { %v242_v14 = vshll.u32 %v2014_v11, 16  ;;  %v240_v18 = vshrl.u32 %v2014_v11, 16  ;;  %v1859_v20 = vld [vmem:[%s2006_s12] sm:$0x7c]   ;;  %v1880_v50 = vld [vmem:[%s2299_s1 + $0x190] sm:$0xff]   ;;  %v1882_v52 = vld [vmem:[%s2299_s1 + $0x198] sm:$0xff]  }
  0x13   : > { %1627 = vmatpush3.bf16.msra.mxu1 %v1847_v7  ;;  %v684_v24 = vrot.slane %v1859_v20, 2  ;;  %v795_v37 = vshrl.u32 %v1859_v20, 16  ;;  %v798_v38 = vshll.u32 %v1859_v20, 16  ;;  %v1883_v53 = vld [vmem:[%s2299_s1 + $0xa0] sm:$0xff]   ;;  %v1885_v55 = vld [vmem:[%s2299_s1 + $0xa8] sm:$0xff]   ;;  %v1887_v57 = vld [vmem:[%s2299_s1 + $0xb0] sm:$0xff]  }
  0x14   : > { %1707 = vmatpush3.bf16.msra.mxu0 %v1848_v8  ;;  %1628 = vmatprep.subr.bf16.mxu1 %v1926_v1  ;;  %v244_v19 = vrot.slane %v242_v14, 1  ;;  %v1884_v54 = vld [vmem:[%s2299_s1 + $0x1a0] sm:$0xff]   ;;  %v1886_v56 = vld [vmem:[%s2299_s1 + $0x1a8] sm:$0xff]   ;;  %v1888_v58 = vld [vmem:[%s2299_s1 + $0x1b0] sm:$0xff]  }
  0x15   : > { %1708 = vmatprep.subr.bf16.mxu0 %v1926_v1  ;;  %v797_v40 = vrot.slane %v795_v37, 2  ;;  %v800_v42 = vrot.slane %v798_v38, 3  ;;  %v1891_v59 = vld [vmem:[%s2006_s12] sm:$0x3e]   ;;  %v1889_v60 = vld [vmem:[%s2299_s1 + $0xb8] sm:$0xff]   ;;  %v1895_v4 = vld [vmem:[%s2299_s1 + $0xc8] sm:$0xff]  }
  0x16   : > { %v245_v22 = vor.u32 %v244_v19, %v240_v18  ;;  %v1893_v61 = vld [vmem:[%s2006_s12] sm:$0xf8]   ;;  %v1890_v62 = vld [vmem:[%s2299_s1 + $0x1b8] sm:$0xff]   ;;  %v450_v63 = vrot.slane %v1891_v59, 1  ;;  %v1896_v5 = vld [vmem:[%s2299_s1 + $0x1c8] sm:$0xff]   ;;  %v561_v14 = vshrl.u32 %v1891_v59, 16 }
  0x17   : > { %1629 = vmatpush3.bf16.msra.mxu1 %v1849_v9  ;;  %v801_v45 = vor.u32 %v800_v42, %v797_v40  ;;  %v1892_v0 = vld [vmem:[%s2299_s1 + $0xc0] sm:$0xff]   ;;  %v918_v2 = vrot.slane %v1893_v61, 3  ;;  %v1897_v6 = vld [vmem:[%s2299_s1 + $0xd0] sm:$0xff]   ;;  %v1899_v8 = vld [vmem:[%s2299_s1 + $0xd8] sm:$0xff]   ;;  %v1032_v18 = vshll.u32 %v1893_v61, 16 }
  0x18   : > { %1709 = vmatpush3.bf16.msra.mxu0 %v1850_v10  ;;  %1630 = vmatprep.subr.bf16.mxu1 %v1926_v1  ;;  %v1894_v3 = vld [vmem:[%s2299_s1 + $0x1c0] sm:$0xff]   ;;  %v1898_v7 = vld [vmem:[%s2299_s1 + $0x1d0] sm:$0xff]   ;;  %v1900_v9 = vld [vmem:[%s2299_s1 + $0x1d8] sm:$0xff]   ;;  %v563_v20 = vrot.slane %v561_v14, 1 }
  0x19   : > { %1710 = vmatprep.subr.bf16.mxu0 %v1926_v1  ;;  %v1901_v10 = vld [vmem:[%s2299_s1 + $0xe0] sm:$0xff]   ;;  %v1906_v19 = vld [vmem:[%s2299_s1 + $0x1f0] sm:$0xff]  }
  0x1a   : > { %v1534_v42 = vld [vmem:[%s2300_s2] ss:$0 sm:$0xff] }
  0x1b   : > { %1631 = vmatpush3.bf16.msra.mxu1 %v1851_v12  ;;  %v1903_v12 = vld [vmem:[%s2299_s1 + $0xe8] sm:$0xff]  }
  0x1c   : > { %1711 = vmatpush3.bf16.msra.mxu0 %v1852_v13  ;;  %1632 = vmatprep.subr.bf16.mxu1 %v1926_v1  ;;  %v1904_v13 = vld [vmem:[%s2299_s1 + $0x1e8] sm:$0xff]  }
  0x1d   : > { %1712 = vmatprep.subr.bf16.mxu0 %v1926_v1 }
  0x1f   : > { %1633 = vmatpush3.bf16.msra.mxu1 %v1853_v15  ;;  %v564_v15 = vshll.u32 %v1891_v59, 16 }
  0x20   : > { %1713 = vmatpush3.bf16.msra.mxu0 %v1854_v16  ;;  %1634 = vmatprep.subr.bf16.mxu1 %v1926_v1  ;;  %v1905_v16 = vld [vmem:[%s2299_s1 + $0xf0] sm:$0xff]  }
  0x21   : > { %1714 = vmatprep.subr.bf16.mxu0 %v1926_v1 }
  0x23   : > { %1635 = vmatpush3.bf16.msra.mxu1 %v1855_v17  ;;  %v1029_v17 = vshrl.u32 %v1893_v61, 16 }
  0x24   : > { %1715 = vmatpush3.bf16.msra.mxu0 %v1856_v21  ;;  %1640 = vmatprep.subr.bf16.mxu1 %v1926_v1  ;;  %v566_v21 = vrot.slane %v564_v15, 2 }
  0x25   : > { %1720 = vmatprep.subr.bf16.mxu0 %v1926_v1 }
  0x26   : > { %1637 = vmatmul.mubr.bf16.vlgmr.msra.gmra.mrb[0].mxu1 %v245_v22  ;;  %v1907_v22 = vld [vmem:[%s2299_s1 + $0xf8] sm:$0xff]  }
  0x27   : > { %1641 = vmatpush3.bf16.msra.mxu1 %v1858_v23  ;;  %1717 = vmatmul.mubr.bf16.vlgmr.msra.gmra.mrb[0].mxu0 %v684_v24  ;;  %v1031_v23 = vrot.slane %v1029_v17, 3  ;;  %v1034_v24 = vrot.slane %v1032_v18, 4 }
  0x28   : > { %1721 = vmatpush3.bf16.msra.mxu0 %v1860_v25  ;;  %1642 = vmatprep.subr.bf16.mxu1 %v1926_v1  ;;  %v1908_v25 = vld [vmem:[%s2299_s1 + $0x1f8] sm:$0xff]  }
  0x29   : > { %1722 = vmatprep.subr.bf16.mxu0 %v1926_v1  ;;  %1656 = vmatprep.mubr.msk.bf16.mxu1 %vm1927_vm0, %v1926_v1 }
  0x2a   : > { %1736 = vmatprep.mubr.msk.bf16.mxu0 %vm1927_vm0, %v1926_v1 }
  0x2b   : > { %1643 = vmatpush3.bf16.msra.mxu1 %v1861_v26  ;;  %v567_v26 = vor.u32 %v566_v21, %v563_v20 }
  0x2c   : > { %1723 = vmatpush3.bf16.msra.mxu0 %v1862_v27  ;;  %1644 = vmatprep.subr.bf16.mxu1 %v1926_v1  ;;  %v1035_v27 = vor.u32 %v1034_v24, %v1031_v23 }
  0x2d   : > { %1724 = vmatprep.subr.bf16.mxu0 %v1926_v1 }
  0x2f   : > { %1645 = vmatpush3.bf16.msra.mxu1 %v1863_v28  ;;  %v1909_v28 = vld [vmem:[%s2299_s1 + $0x200] sm:$0xff]  }
  0x30   : > { %1725 = vmatpush3.bf16.msra.mxu0 %v1864_v29  ;;  %1646 = vmatprep.subr.bf16.mxu1 %v1926_v1  ;;  %v1910_v29 = vld [vmem:[%s2299_s1 + $0x208] sm:$0xff]  }
  0x31   : > { %1726 = vmatprep.subr.bf16.mxu0 %v1926_v1 }
  0x33   : > { %1647 = vmatpush3.bf16.msra.mxu1 %v1865_v30  ;;  %v1911_v30 = vld [vmem:[%s2299_s1 + $0x210] sm:$0xff]  }
  0x34   : > { %1727 = vmatpush3.bf16.msra.mxu0 %v1866_v31  ;;  %1648 = vmatprep.subr.bf16.mxu1 %v1926_v1  ;;  %v1912_v31 = vld [vmem:[%s2299_s1 + $0x218] sm:$0xff]  }
  0x35   : > { %1728 = vmatprep.subr.bf16.mxu0 %v1926_v1 }
  0x37   : > { %1649 = vmatpush3.bf16.msra.mxu1 %v1867_v32  ;;  %v1913_v32 = vld [vmem:[%s2299_s1 + $0x220] sm:$0xff]  }
  0x38   : > { %1729 = vmatpush3.bf16.msra.mxu0 %v1868_v33  ;;  %1650 = vmatprep.subr.bf16.mxu1 %v1926_v1  ;;  %v1914_v33 = vld [vmem:[%s2299_s1 + $0x228] sm:$0xff]  }
  0x39   : > { %1730 = vmatprep.subr.bf16.mxu0 %v1926_v1 }
  0x3b   : > { %1651 = vmatpush3.bf16.msra.mxu1 %v1869_v34  ;;  %v1915_v34 = vld [vmem:[%s2299_s1 + $0x230] sm:$0xff]  }
  0x3c   : > { %1731 = vmatpush3.bf16.msra.mxu0 %v1870_v35  ;;  %1652 = vmatprep.subr.bf16.mxu1 %v1926_v1  ;;  %v1916_v35 = vld [vmem:[%s2299_s1 + $0x238] sm:$0xff]  }
  0x3d   : > { %1732 = vmatprep.subr.bf16.mxu0 %v1926_v1 }
  0x3f   : > { %1653 = vmatpush3.bf16.msra.mxu1 %v1871_v36  ;;  %v1917_v36 = vld [vmem:[%s2006_s12 + $0x4] sm:$0x1f]  }
  0x40   : > { %1733 = vmatpush3.bf16.msra.mxu0 %v1872_v39  ;;  %1654 = vmatprep.subr.bf16.mxu1 %v1926_v1 }
  0x41   : > { %1734 = vmatprep.subr.bf16.mxu0 %v1926_v1 }
  0x43   : > { %1655 = vmatpush3.bf16.msra.mxu1 %v1873_v41 }
  0x44   : > { %1735 = vmatpush3.bf16.msra.mxu0 %v1874_v43  ;;  %1660 = vmatprep.subr.bf16.mxu1 %v1926_v1 }
  0x45   : > { %1740 = vmatprep.subr.bf16.mxu0 %v1926_v1 }
  0x46   : > { %1657 = vmatmul.mubr.bf16.vlgmr.msra.gmra.mrb[0].mxu1 %v2014_v11  ;;  %v1902_v11 = vld [vmem:[%s2299_s1 + $0x1e0] sm:$0xff]  }
  0x47   : > { %1661 = vmatpush3.bf16.msra.mxu1 %v1875_v44  ;;  %1737 = vmatmul.mubr.bf16.vlgmr.msra.gmra.mrb[0].mxu0 %v801_v45  ;;  %v1535_v45 = vld [vmem:[%s2301_s3] ss:$0 sm:$0xff] }
  0x48   : > { %1741 = vmatpush3.bf16.msra.mxu0 %v1876_v46  ;;  %1662 = vmatprep.subr.bf16.mxu1 %v1926_v1 }
  0x49   : > { %1742 = vmatprep.subr.bf16.mxu0 %v1926_v1  ;;  %1676 = vmatprep.mubr.msk.bf16.mxu1 %vm1927_vm0, %v1926_v1 }
  0x4a   : > { %1756 = vmatprep.mubr.msk.bf16.mxu0 %vm1927_vm0, %v1926_v1 }
  0x4b   : > { %1663 = vmatpush3.bf16.msra.mxu1 %v1877_v47 }
  0x4c   : > { %1743 = vmatpush3.bf16.msra.mxu0 %v1878_v48  ;;  %1664 = vmatprep.subr.bf16.mxu1 %v1926_v1 }
  0x4d   : > { %1744 = vmatprep.subr.bf16.mxu0 %v1926_v1 }
  0x4f   : > { %1665 = vmatpush3.bf16.msra.mxu1 %v1879_v49 }
  0x50   : > { %1745 = vmatpush3.bf16.msra.mxu0 %v1880_v50  ;;  %1666 = vmatprep.subr.bf16.mxu1 %v1926_v1 }
  0x51   : > { %1746 = vmatprep.subr.bf16.mxu0 %v1926_v1 }
  0x53   : > { %1667 = vmatpush3.bf16.msra.mxu1 %v1881_v51 }
  0x54   : > { %1747 = vmatpush3.bf16.msra.mxu0 %v1882_v52  ;;  %1668 = vmatprep.subr.bf16.mxu1 %v1926_v1 }
  0x55   : > { %1748 = vmatprep.subr.bf16.mxu0 %v1926_v1 }
  0x57   : > { %1669 = vmatpush3.bf16.msra.mxu1 %v1883_v53 }
  0x58   : > { %1749 = vmatpush3.bf16.msra.mxu0 %v1884_v54  ;;  %1670 = vmatprep.subr.bf16.mxu1 %v1926_v1 }
  0x59   : > { %1750 = vmatprep.subr.bf16.mxu0 %v1926_v1 }
  0x5b   : > { %1671 = vmatpush3.bf16.msra.mxu1 %v1885_v55 }
  0x5c   : > { %1751 = vmatpush3.bf16.msra.mxu0 %v1886_v56  ;;  %1672 = vmatprep.subr.bf16.mxu1 %v1926_v1 }
  0x5d   : > { %1752 = vmatprep.subr.bf16.mxu0 %v1926_v1 }
  0x5f   : > { %1673 = vmatpush3.bf16.msra.mxu1 %v1887_v57 }
  0x60   : > { %1753 = vmatpush3.bf16.msra.mxu0 %v1888_v58  ;;  %1674 = vmatprep.subr.bf16.mxu1 %v1926_v1 }
  0x61   : > { %1754 = vmatprep.subr.bf16.mxu0 %v1926_v1 }
  0x63   : > { %1675 = vmatpush3.bf16.msra.mxu1 %v1889_v60 }
  0x64   : > { %1755 = vmatpush3.bf16.msra.mxu0 %v1890_v62  ;;  %1680 = vmatprep.subr.bf16.mxu1 %v1926_v1 }
  0x65   : > { %1760 = vmatprep.subr.bf16.mxu0 %v1926_v1 }
  0x66   : > { %1677 = vmatmul.mubr.bf16.vlgmr.msra.gmra.mrb[0].mxu1 %v450_v63 }
  0x67   : > { %1681 = vmatpush3.bf16.msra.mxu1 %v1892_v0  ;;  %1757 = vmatmul.mubr.bf16.vlgmr.msra.gmra.mrb[0].mxu0 %v918_v2 }
  0x68   : > { %1761 = vmatpush3.bf16.msra.mxu0 %v1894_v3  ;;  %1682 = vmatprep.subr.bf16.mxu1 %v1926_v1 }
  0x69   : > { %1762 = vmatprep.subr.bf16.mxu0 %v1926_v1  ;;  %1696 = vmatprep.mubr.msk.bf16.mxu1 %vm1927_vm0, %v1926_v1 }
  0x6a   : > { %1776 = vmatprep.mubr.msk.bf16.mxu0 %vm1927_vm0, %v1926_v1 }
  0x6b   : > { %1683 = vmatpush3.bf16.msra.mxu1 %v1895_v4 }
  0x6c   : > { %1763 = vmatpush3.bf16.msra.mxu0 %v1896_v5  ;;  %1684 = vmatprep.subr.bf16.mxu1 %v1926_v1 }
  0x6d   : > { %1764 = vmatprep.subr.bf16.mxu0 %v1926_v1 }
  0x6f   : > { %1685 = vmatpush3.bf16.msra.mxu1 %v1897_v6 }
  0x70   : > { %1765 = vmatpush3.bf16.msra.mxu0 %v1898_v7  ;;  %1686 = vmatprep.subr.bf16.mxu1 %v1926_v1 }
  0x71   : > { %1766 = vmatprep.subr.bf16.mxu0 %v1926_v1 }
  0x73   : > { %1687 = vmatpush3.bf16.msra.mxu1 %v1899_v8 }
  0x74   : > { %1767 = vmatpush3.bf16.msra.mxu0 %v1900_v9  ;;  %1688 = vmatprep.subr.bf16.mxu1 %v1926_v1 }
  0x75   : > { %1768 = vmatprep.subr.bf16.mxu0 %v1926_v1 }
  0x77   : > { %1689 = vmatpush3.bf16.msra.mxu1 %v1901_v10 }
  0x78   : > { %1769 = vmatpush3.bf16.msra.mxu0 %v1902_v11  ;;  %1690 = vmatprep.subr.bf16.mxu1 %v1926_v1 }
  0x79   : > { %1770 = vmatprep.subr.bf16.mxu0 %v1926_v1 }
  0x7b   : > { %1691 = vmatpush3.bf16.msra.mxu1 %v1903_v12 }
  0x7c   : > { %1771 = vmatpush3.bf16.msra.mxu0 %v1904_v13  ;;  %1692 = vmatprep.subr.bf16.mxu1 %v1926_v1 }
  0x7d   : > { %1772 = vmatprep.subr.bf16.mxu0 %v1926_v1 }
  0x7f   : > { %1693 = vmatpush3.bf16.msra.mxu1 %v1905_v16 }
  0x80   : > { %1773 = vmatpush3.bf16.msra.mxu0 %v1906_v19  ;;  %1694 = vmatprep.subr.bf16.mxu1 %v1926_v1 }
  0x81   : > { %1774 = vmatprep.subr.bf16.mxu0 %v1926_v1 }
  0x83   : > { %1695 = vmatpush3.bf16.msra.mxu1 %v1907_v22 }
  0x84   : > { %1775 = vmatpush3.bf16.msra.mxu0 %v1908_v25 }
  0x85   : > { %1780 = vmatprep.subr.bf16.mxu0 %v1926_v1 }
  0x86   : > { %1697 = vmatmul.mubr.bf16.vlgmr.msra.gmra.mrb[0].mxu1 %v567_v26 }
  0x87   : > { %1777 = vmatmul.mubr.bf16.vlgmr.msra.gmra.mrb[0].mxu0 %v1035_v27 }
  0x88   : > { %1781 = vmatpush3.bf16.msra.mxu0 %v1909_v28  ;;  %1796 = vmatprep.mubr.msk.bf16.mxu0 %vm1927_vm0, %v1926_v1 }
  0x89   : > { %1782 = vmatprep.subr.bf16.mxu0 %v1926_v1 }
  0x8c   : > { %1783 = vmatpush3.bf16.msra.mxu0 %v1910_v29 }
  0x8d   : > { %1784 = vmatprep.subr.bf16.mxu0 %v1926_v1 }
  0x90   : > { %1785 = vmatpush3.bf16.msra.mxu0 %v1911_v30 }
  0x91   : > { %1786 = vmatprep.subr.bf16.mxu0 %v1926_v1 }
  0x94   : > { %1787 = vmatpush3.bf16.msra.mxu0 %v1912_v31 }
  0x95   : > { %1788 = vmatprep.subr.bf16.mxu0 %v1926_v1 }
  0x98   : > { %1789 = vmatpush3.bf16.msra.mxu0 %v1913_v32 }
  0x99   : > { %1790 = vmatprep.subr.bf16.mxu0 %v1926_v1 }
  0x9c   : > { %1791 = vmatpush3.bf16.msra.mxu0 %v1914_v33 }
  0x9d   : > { %1792 = vmatprep.subr.bf16.mxu0 %v1926_v1 }
  0xa0   : > { %1793 = vmatpush3.bf16.msra.mxu0 %v1915_v34 }
  0xa1   : > { %1794 = vmatprep.subr.bf16.mxu0 %v1926_v1 }
  0xa4   : > { %1795 = vmatpush3.bf16.msra.mxu0 %v1916_v35 }
  0xa7   : > { %1797 = vmatmul.mubr.bf16.vlgmr.msra.gmra.mrb[0].mxu0 %v1917_v36 }
 0x159   : > { %v651_v37 = vpop.f32.mrb[0].mxu1 }
 0x15a   : > { %v1698_v38 = vpop.f32.mrb[1].mxu1 }
 0x15b   : > { %v654_v39 = vpop.f32.mrb[2].mxu1 }
 0x15c   : > { %v1699_v40 = vpop.f32.mrb[3].mxu1 }
 0x17a   : > { %v1235_v41 = vpop.f32.mrb[0].mxu0 }
 0x17b   : > { %v1800_v43 = vadd.f32 %v1235_v41, %v651_v37  ;;  %v1798_v44 = vpop.f32.mrb[1].mxu0 }
 0x17c   : > { %v1238_v46 = vpop.f32.mrb[2].mxu0 }
 0x17d   : > { %v1251_v1 = vmul.f32 %v1800_v43, %v1534_v42  ;;  %v1801_v47 = vadd.f32 %v1238_v46, %v654_v39  ;;  %v1799_v48 = vpop.f32.mrb[3].mxu0 }
 0x17f   : > { %v1260_v49 = vadd.f32 %v1535_v45, %v1251_v1  ;;  %v1252_v50 = vmul.f32 %v1801_v47, %v1534_v42 }
 0x181   : > { %v1262_v51 = vmax.f32 %v1260_v49, 0.0  ;;  %v1261_v52 = vadd.f32 %v1535_v45, %v1252_v50 }
 0x183   : > { %1264 = vst [vmem:[%s197_s6] sm:$0xff] %v1262_v51  ;;  %v1263_v53 = vmax.f32 %v1261_v52, 0.0 }
 0x185   : > { %1265 = vst [vmem:[%s197_s6 + $0x8] sm:$0x1] %v1263_v53 }
 0x186 PF: > { %s14_s15 = sadd.s32 1, %s1924_s15  }
 0x187   : > { %p11_p4 = scmp.ge.s32.totalorder %s14_s15, 4  }
 0x189   :  { %13 = sbr.rel (!%p11_p4) target bundleno = 1 (0x1), region = 74 }

// kernel: resnet_forward.50
= control target key start
LH: loop header
LB: loop body
LE: loop exit
PB: predicated region body
PF: predicated region fallthrough
CT: control target
= control target key end

     0   :  { %s86_s0 = inlined_call_operand.vmem [shape: f32[8,512], index: 0, kind: input, shape index: {}]   ;;  %s87_s1 = inlined_call_operand.vmem [shape: f32[8,512], index: 1, kind: input, shape index: {}]   ;;  %s88_s2 = inlined_call_operand.vmem [shape: f32[8,512], index: 2, kind: output, shape index: {}]  }
   0x1   :  { %v11_v0 = vld [vmem:[%s86_s0] sm:$0xff]  ;;  %v12_v2 = vld [vmem:[%s86_s0 + $0x8] sm:$0xff]  ;;  %v13_v5 = vld [vmem:[%s86_s0 + $0x10] sm:$0xff] }
   0x2   :  { %v15_v1 = vld [vmem:[%s87_s1] sm:$0xff]  ;;  %v16_v4 = vld [vmem:[%s87_s1 + $0x8] sm:$0xff]  ;;  %v17_v6 = vld [vmem:[%s87_s1 + $0x10] sm:$0xff] }
   0x3   :  { %v19_v3 = vadd.f32 %v15_v1, %v11_v0  ;;  %v20_v7 = vadd.f32 %v16_v4, %v12_v2  ;;  %v21_v8 = vadd.f32 %v17_v6, %v13_v5  ;;  %v14_v9 = vld [vmem:[%s86_s0 + $0x18] sm:$0xff] }
   0x4   :  { %v18_v10 = vld [vmem:[%s87_s1 + $0x18] sm:$0xff] }
   0x5   :  { %v23_v11 = vmax.f32 %v19_v3, 0.0  ;;  %v22_v12 = vadd.f32 %v18_v10, %v14_v9  ;;  %v24_v13 = vmax.f32 %v20_v7, 0.0  ;;  %v25_v14 = vmax.f32 %v21_v8, 0.0 }
   0x7   :  { %27 = vst [vmem:[%s88_s2] sm:$0xff] %v23_v11  ;;  %v26_v15 = vmax.f32 %v22_v12, 0.0  ;;  %28 = vst [vmem:[%s88_s2 + $0x8] sm:$0xff] %v24_v13 }
   0x8   :  { %29 = vst [vmem:[%s88_s2 + $0x10] sm:$0xff] %v25_v14 }
   0x9   :  { %30 = vst [vmem:[%s88_s2 + $0x18] sm:$0xff] %v26_v15 }

// kernel: resnet_forward.49
= control target key start
LH: loop header
LB: loop body
LE: loop exit
PB: predicated region body
PF: predicated region fallthrough
CT: control target
= control target key end

     0   :  { %s875_s15 = smov 0   ;;  %s877_s16 = smov 0   ;;  %s967_s0 = inlined_call_operand.vmem [shape: bf16[8,128], index: 0, kind: input, shape index: {}]   ;;  %s968_s1 = inlined_call_operand.vmem [shape: bf16[128,512], index: 1, kind: input, shape index: {}]   ;;  %s969_s2 = inlined_call_operand.vmem [shape: f32[1,512], index: 2, kind: input, shape index: {}]   ;;  %s970_s3 = inlined_call_operand.vmem [shape: f32[1,512], index: 3, kind: input, shape index: {}]   ;;  %s971_s4 = inlined_call_operand.vmem [shape: f32[8,512], index: 4, kind: output, shape index: {}]  }
   0x1   :  { %s879_s17 = smov 0   ;;  %s881_s18 = smov 0  }
   0x2   :  { %s883_s19 = smov 0  }
   0x3 LB: > { %s29_s20 = sadd.s32 1, %s843_s18  ;;  %p77_p1 = scmp.ne.s32.totalorder %s835_s16, %s831_s15  ;;  %s847_s19 = sphi %s883_s19, %s14_s19   ;;  %s843_s18 = sphi %s881_s18, %s975_s18   ;;  %s839_s17 = sphi %s879_s17, %s974_s17   ;;  %s835_s16 = sphi %s877_s16, %s973_s16   ;;  %s831_s15 = sphi %s875_s15, %s972_s15  }
   0x4   : > { %p31_p0 = scmp.ge.s32.totalorder %s29_s20, 2  ;;  %p78_p2 = scmp.eq.s32.totalorder %s847_s19, 0 }
   0x5   : > { %s70_s22 = sadd.s32 1, %s835_s16  ;;  %p715_p5 = scmp.ge.s32.totalorder %s847_s19, 2 }
   0x6   : > { %s977_s20 = smov (%p31_p0, %s29_s20), 0  ;;  %p79_p3 = por %p78_p2, %p77_p1 }
   0x7   : > { %s66_s21 = ssub.s32 %s843_s18, %s977_s20  ;;  %193 = sbr.rel (%p715_p5) target bundleno = 26 (0x1a), region = 20 }
   0x8   : > { %p68_p4 = scmp.eq.s32.totalorder %s66_s21, 0 }
   0xa   : > { %s910_s23 = scalar_select %p68_p4, %s835_s16, %s70_s22  }
   0xe   : > { %196 = sbr.rel (!%p79_p3) target bundleno = 26 (0x1a), region = 24  ;;  %s198_s24 = sand.u32 (%p79_p3), 1, %s835_s16  }
   0xf   : > { %s743_s25 = sshll.u32 (%p79_p3), %s843_s18, 3  ;;  %s716_s26 = sshll.u32 (%p79_p3), %s198_s24, 7 }
  0x10   : > { %s918_s29 = scalar_lea.vmem (%p79_p3), %s968_s1, %s743_s25  ;;  %s200_s30 = scalar_lea.vmem (%p79_p3), [#allocation3], %s716_s26 }
  0x11   : > { %v264_v0 = vld [vmem:[%s918_s29] sm:$0xff] (%p79_p3)  ;;  %v266_v1 = vld [vmem:[%s918_s29 + $0x10] sm:$0xff] (%p79_p3) }
  0x12   : > { %v268_v2 = vld [vmem:[%s918_s29 + $0x20] sm:$0xff] (%p79_p3)  ;;  %265 = vst [vmem:[%s200_s30] sm:$0xff] (%p79_p3), %v264_v0  ;;  %267 = vst [vmem:[%s200_s30 + $0x8] sm:$0xff] (%p79_p3), %v266_v1  ;;  %v270_v3 = vld [vmem:[%s918_s29 + $0x30] sm:$0xff] (%p79_p3) }
  0x13   : > { %269 = vst [vmem:[%s200_s30 + $0x10] sm:$0xff] (%p79_p3), %v268_v2  ;;  %v272_v4 = vld [vmem:[%s918_s29 + $0x40] sm:$0xff] (%p79_p3)  ;;  %v274_v5 = vld [vmem:[%s918_s29 + $0x50] sm:$0xff] (%p79_p3)  ;;  %271 = vst [vmem:[%s200_s30 + $0x18] sm:$0xff] (%p79_p3), %v270_v3 }
  0x14   : > { %273 = vst [vmem:[%s200_s30 + $0x20] sm:$0xff] (%p79_p3), %v272_v4  ;;  %275 = vst [vmem:[%s200_s30 + $0x28] sm:$0xff] (%p79_p3), %v274_v5  ;;  %v276_v6 = vld [vmem:[%s918_s29 + $0x60] sm:$0xff] (%p79_p3)  ;;  %v278_v7 = vld [vmem:[%s918_s29 + $0x70] sm:$0xff] (%p79_p3) }
  0x15   : > { %v280_v8 = vld [vmem:[%s918_s29 + $0x80] sm:$0xff]  ;;  %277 = vst [vmem:[%s200_s30 + $0x30] sm:$0xff] %v276_v6  ;;  %279 = vst [vmem:[%s200_s30 + $0x38] sm:$0xff] %v278_v7  ;;  %v282_v9 = vld [vmem:[%s918_s29 + $0x90] sm:$0xff] }
  0x16   : > { %281 = vst [vmem:[%s200_s30 + $0x40] sm:$0xff] %v280_v8  ;;  %v284_v10 = vld [vmem:[%s918_s29 + $0xa0] sm:$0xff]  ;;  %v286_v11 = vld [vmem:[%s918_s29 + $0xb0] sm:$0xff]  ;;  %283 = vst [vmem:[%s200_s30 + $0x48] sm:$0xff] %v282_v9 }
  0x17   : > { %285 = vst [vmem:[%s200_s30 + $0x50] sm:$0xff] %v284_v10  ;;  %287 = vst [vmem:[%s200_s30 + $0x58] sm:$0xff] %v286_v11  ;;  %v288_v12 = vld [vmem:[%s918_s29 + $0xc0] sm:$0xff]  ;;  %v290_v13 = vld [vmem:[%s918_s29 + $0xd0] sm:$0xff] }
  0x18   : > { %v292_v14 = vld [vmem:[%s918_s29 + $0xe0] sm:$0xff]  ;;  %289 = vst [vmem:[%s200_s30 + $0x60] sm:$0xff] %v288_v12  ;;  %291 = vst [vmem:[%s200_s30 + $0x68] sm:$0xff] %v290_v13  ;;  %v294_v15 = vld [vmem:[%s918_s29 + $0xf0] sm:$0xff] }
  0x19   : > { %293 = vst [vmem:[%s200_s30 + $0x70] sm:$0xff] %v292_v14  ;;  %295 = vst [vmem:[%s200_s30 + $0x78] sm:$0xff] %v294_v15 }
  0x1a PF: > { %p719_p6 = scmp.ge.s32.totalorder %s847_s19, 1  ;;  %p316_p7 = scmp.lt.s32.totalorder %s847_s19, 3 }
  0x1c   : > { %p317_p8 = pnand %p719_p6, %p316_p7 }
  0x1d   : > { %s323_s5 = sand.u32 (!%p317_p8), 1, %s831_s15   ;;  %v849_v16 = vmov (!%p317_p8), 0   ;;  %v405_v33 = vld [vmem:[%s967_s0] sm:$0xf] (!%p317_p8)  ;;  %s721_s10 = sshll.u32 (!%p317_p8), %s839_s17, 1  ;;  %v554_v34 = vlaneseq (!%p317_p8) }
  0x1e   : > { %320 = sbr.rel (%p317_p8) target bundleno = 283 (0x11b), region = 70  ;;  %s720_s6 = sshll.u32 (!%p317_p8), %s323_s5, 7  ;;  %534 = vmatprep.mubr.bf16.mxu0 (!%p317_p8), %v849_v16 }
  0x1f   : > { %s325_s7 = scalar_lea.vmem (!%p317_p8), [#allocation3], %s720_s6  ;;  %p377_p9 = scmp.lt.s32.totalorder (!%p317_p8), %s721_s10, 3  ;;  %v555_v35 = vshrl.u32 (!%p317_p8), %v554_v34, 7 }
  0x20   : > { %v785_v17 = vld [vmem:[%s325_s7 + $0x4] ss:$8 sps:$4 sm:$0xff] (!%p317_p8)   ;;  %v787_v18 = vld [vmem:[%s325_s7] ss:$8 sps:$4 sm:$0xff] (!%p317_p8)   ;;  %v788_v19 = vld [vmem:[%s325_s7 + $0x14] ss:$8 sps:$4 sm:$0xff] (!%p317_p8)  }
  0x21   : > { %502 = vmatprep.subr.bf16.mxu0 (!%p317_p8), %v785_v17  ;;  %v790_v20 = vld [vmem:[%s325_s7 + $0x10] ss:$8 sps:$4 sm:$0xff] (!%p317_p8)   ;;  %v791_v21 = vld [vmem:[%s325_s7 + $0x24] ss:$8 sps:$4 sm:$0xff] (!%p317_p8)   ;;  %v793_v22 = vld [vmem:[%s325_s7 + $0x20] ss:$8 sps:$4 sm:$0xff] (!%p317_p8)  }
  0x22   : > { %503 = vmatpush1.bf16.msra.mxu0 (!%p317_p8), %v787_v18  ;;  %v794_v23 = vld [vmem:[%s325_s7 + $0x34] ss:$8 sps:$4 sm:$0xff] (!%p317_p8)   ;;  %v796_v24 = vld [vmem:[%s325_s7 + $0x30] ss:$8 sps:$4 sm:$0xff] (!%p317_p8)   ;;  %v797_v25 = vld [vmem:[%s325_s7 + $0x44] ss:$8 sps:$4 sm:$0xff] (!%p317_p8)  }
  0x23   : > { %504 = vmatprep.subr.bf16.mxu0 (!%p317_p8), %v788_v19  ;;  %v799_v26 = vld [vmem:[%s325_s7 + $0x40] ss:$8 sps:$4 sm:$0xff] (!%p317_p8)   ;;  %v800_v27 = vld [vmem:[%s325_s7 + $0x54] ss:$8 sps:$4 sm:$0xff] (!%p317_p8)   ;;  %v802_v28 = vld [vmem:[%s325_s7 + $0x50] ss:$8 sps:$4 sm:$0xff] (!%p317_p8)  }
  0x24   : > { %v803_v29 = vld [vmem:[%s325_s7 + $0x64] ss:$8 sps:$4 sm:$0xff] (!%p317_p8)   ;;  %v805_v30 = vld [vmem:[%s325_s7 + $0x60] ss:$8 sps:$4 sm:$0xff] (!%p317_p8)   ;;  %v806_v31 = vld [vmem:[%s325_s7 + $0x74] ss:$8 sps:$4 sm:$0xff] (!%p317_p8)  }
  0x25   : > { %v808_v32 = vld [vmem:[%s325_s7 + $0x70] ss:$8 sps:$4 sm:$0xff]   ;;  %s979_s10 = smov (!%p377_p9, %s721_s10), 3  ;;  %v556_v36 = vsub.s32 0, %v555_v35  ;;  %v560_v38 = vsub.s32 1, %v555_v35 }
  0x26   : > { %505 = vmatpush1.bf16.msra.mxu0 %v790_v20  ;;  %s379_s13 = scalar_lea.vmem %s969_s2, %s979_s10  ;;  %s384_s21 = scalar_lea.vmem %s970_s3, %s979_s10 }
  0x27   : > { %506 = vmatprep.subr.bf16.mxu0 %v791_v21  ;;  %v552_v37 = vld [vmem:[%s379_s13] sm:$0x3]  ;;  %s724_s22 = sshll.u32 %s979_s10, 3 }
  0x28   : > { %v566_v39 = vld [vmem:[%s384_s21] sm:$0x3]  ;;  %v557_v40 = vrot.slane %v552_v37, %v556_v36  ;;  %v561_v41 = vrot.slane %v552_v37, %v560_v38  ;;  %s394_s25 = scalar_lea.vmem %s971_s4, %s724_s22 }
  0x29   : > { %v571_v42 = vrot.slane %v566_v39, %v556_v36  ;;  %v575_v44 = vrot.slane %v566_v39, %v560_v38 }
  0x2a   : > { %507 = vmatpush1.bf16.msra.mxu0 %v793_v22 }
  0x2b   : > { %508 = vmatprep.subr.bf16.mxu0 %v794_v23 }
  0x2e   : > { %509 = vmatpush1.bf16.msra.mxu0 %v796_v24 }
  0x2f   : > { %510 = vmatprep.subr.bf16.mxu0 %v797_v25 }
  0x32   : > { %511 = vmatpush1.bf16.msra.mxu0 %v799_v26 }
  0x33   : > { %512 = vmatprep.subr.bf16.mxu0 %v800_v27 }
  0x36   : > { %513 = vmatpush1.bf16.msra.mxu0 %v802_v28 }
  0x37   : > { %514 = vmatprep.subr.bf16.mxu0 %v803_v29 }
  0x3a   : > { %515 = vmatpush1.bf16.msra.mxu0 %v805_v30 }
  0x3b   : > { %516 = vmatprep.subr.bf16.mxu0 %v806_v31 }
  0x3e   : > { %517 = vmatpush1.bf16.msra.mxu0 %v808_v32 }
  0x41   : > { %535 = vmatmul.mubr.bf16.vlgmr.msra.gmra.mrb[0].mxu0 %v405_v33 }
 0x114   : > { %v536_v43 = vpop.f32.mrb[0].mxu0 }
 0x115   : > { %v564_v45 = vmul.f32 %v557_v40, %v536_v43  ;;  %v538_v46 = vpop.f32.mrb[1].mxu0 }
 0x116   : > { %v565_v47 = vmul.f32 %v561_v41, %v538_v46  ;;  %v540_v48 = vpop.f32.mrb[2].mxu0 }
 0x117   : > { %v578_v49 = vadd.f32 %v571_v42, %v564_v45  ;;  %v541_v50 = vpop.f32.mrb[3].mxu0 }
 0x118   : > { %v579_v51 = vadd.f32 %v575_v44, %v565_v47 }
 0x119   : > { %580 = vst [vmem:[%s394_s25] sm:$0xff] %v578_v49 }
 0x11a   : > { %581 = vst [vmem:[%s394_s25 + $0x8] sm:$0xff] %v579_v51 }
 0x11b PF: > { %s14_s19 = sadd.s32 1, %s847_s19   ;;  %s972_s15 = smov %s835_s16 }
 0x11c   : > { %p11_p10 = scmp.ge.s32.totalorder %s14_s19, 4   ;;  %s973_s16 = smov %s910_s23 }
 0x11d   : > { %s974_s17 = smov %s843_s18  ;;  %s975_s18 = smov %s977_s20 }
 0x11e   :  { %13 = sbr.rel (!%p11_p10) target bundleno = 3 (0x3), region = 126 }

// kernel: resnet_forward.60
= control target key start
LH: loop header
LB: loop body
LE: loop exit
PB: predicated region body
PF: predicated region fallthrough
CT: control target
= control target key end

     0   :  { %s329_s1 = inlined_call_operand.vmem [shape: bf16[128,128], index: 1, kind: input, shape index: {}]   ;;  %s330_s0 = inlined_call_operand.vmem [shape: bf16[32,128], index: 0, kind: input, shape index: {}]   ;;  %s331_s2 = inlined_call_operand.vmem [shape: f32[1,128], index: 2, kind: input, shape index: {}]   ;;  %s332_s3 = inlined_call_operand.vmem [shape: f32[1,128], index: 3, kind: input, shape index: {}]   ;;  %s333_s4 = inlined_call_operand.vmem [shape: f32[32,128], index: 4, kind: output, shape index: {}]  }
   0x1   :  { %v246_v0 = vld [vmem:[%s329_s1] sm:$0xff]   ;;  %v247_v1 = vld [vmem:[%s329_s1 + $0x8] sm:$0xff]   ;;  %v248_v2 = vld [vmem:[%s329_s1 + $0x10] sm:$0xff]  }
   0x2   :  { %226 = vmatprep.subr.bf16.mxu0 %v246_v0  ;;  %v249_v3 = vld [vmem:[%s329_s1 + $0x18] sm:$0xff]   ;;  %v254_v4 = vld [vmem:[%s330_s0] sm:$0xff]   ;;  %v251_v6 = vld [vmem:[%s329_s1 + $0x28] sm:$0xff]  }
   0x3   :  { %227 = vmatpush3.bf16.msra.mxu0 %v246_v0  ;;  %242 = vmatprep.mubr.bf16.mxu0 %v254_v4  ;;  %v250_v5 = vld [vmem:[%s329_s1 + $0x20] sm:$0xff]   ;;  %v252_v7 = vld [vmem:[%s329_s1 + $0x30] sm:$0xff]   ;;  %v253_v8 = vld [vmem:[%s329_s1 + $0x38] sm:$0xff]  }
   0x4   :  { %228 = vmatprep.subr.bf16.mxu0 %v247_v1  ;;  %v255_v9 = vld [vmem:[%s330_s0 + $0x8] sm:$0xff]   ;;  %v214_v10 = vld [vmem:[%s331_s2] ss:$0 sm:$0xff] }
   0x5   :  { %v215_v12 = vld [vmem:[%s332_s3] ss:$0 sm:$0xff] }
   0x7   :  { %229 = vmatpush3.bf16.msra.mxu0 %v247_v1 }
   0x8   :  { %230 = vmatprep.subr.bf16.mxu0 %v248_v2 }
   0xb   :  { %231 = vmatpush3.bf16.msra.mxu0 %v248_v2 }
   0xc   :  { %232 = vmatprep.subr.bf16.mxu0 %v249_v3 }
   0xf   :  { %233 = vmatpush3.bf16.msra.mxu0 %v249_v3 }
  0x10   :  { %234 = vmatprep.subr.bf16.mxu0 %v250_v5 }
  0x13   :  { %235 = vmatpush3.bf16.msra.mxu0 %v250_v5 }
  0x14   :  { %236 = vmatprep.subr.bf16.mxu0 %v251_v6 }
  0x17   :  { %237 = vmatpush3.bf16.msra.mxu0 %v251_v6 }
  0x18   :  { %238 = vmatprep.subr.bf16.mxu0 %v252_v7 }
  0x1b   :  { %239 = vmatpush3.bf16.msra.mxu0 %v252_v7 }
  0x1c   :  { %240 = vmatprep.subr.bf16.mxu0 %v253_v8 }
  0x1f   :  { %241 = vmatpush3.bf16.msra.mxu0 %v253_v8 }
  0x22   :  { %243 = vmatmul.mubr.bf16.vlgmr.msra.gmra.mrb[0].mxu0 %v255_v9 }
  0xf5   :  { %v244_v11 = vpop.f32.mrb[0].mxu0 }
  0xf6   :  { %v183_v13 = vmul.f32 %v244_v11, %v214_v10  ;;  %v144_v14 = vpop.f32.mrb[1].mxu0 }
  0xf7   :  { %v181_v15 = vmul.f32 %v214_v10, %v144_v14  ;;  %v245_v16 = vpop.f32.mrb[2].mxu0 }
  0xf8   :  { %v194_v17 = vadd.f32 %v215_v12, %v183_v13  ;;  %v184_v18 = vmul.f32 %v245_v16, %v214_v10  ;;  %v147_v19 = vpop.f32.mrb[3].mxu0 }
  0xf9   :  { %v192_v20 = vadd.f32 %v215_v12, %v181_v15  ;;  %v182_v21 = vmul.f32 %v214_v10, %v147_v19 }
  0xfa   :  { %198 = vst [vmem:[%s333_s4 + $0x10] sm:$0xff] %v194_v17  ;;  %v195_v22 = vadd.f32 %v215_v12, %v184_v18 }
  0xfb   :  { %196 = vst [vmem:[%s333_s4] sm:$0xff] %v192_v20  ;;  %v193_v23 = vadd.f32 %v215_v12, %v182_v21 }
  0xfc   :  { %199 = vst [vmem:[%s333_s4 + $0x18] sm:$0xff] %v195_v22 }
  0xfd   :  { %197 = vst [vmem:[%s333_s4 + $0x8] sm:$0xff] %v193_v23 }

// kernel: resnet_forward.59
= control target key start
LH: loop header
LB: loop body
LE: loop exit
PB: predicated region body
PF: predicated region fallthrough
CT: control target
= control target key end

     0   :  { %s657_s1 = inlined_call_operand.vmem [shape: bf16[512,128], index: 1, kind: input, shape index: {}]   ;;  %s658_s0 = inlined_call_operand.vmem [shape: bf16[8,512], index: 0, kind: input, shape index: {}]   ;;  %s659_s2 = inlined_call_operand.vmem [shape: f32[1,128], index: 2, kind: input, shape index: {}]   ;;  %s660_s3 = inlined_call_operand.vmem [shape: f32[1,128], index: 3, kind: input, shape index: {}]   ;;  %s661_s4 = inlined_call_operand.vmem [shape: f32[8,128], index: 4, kind: output, shape index: {}]  }
   0x1   :  { %v485_v0 = vld [vmem:[%s657_s1 + $0x40] sm:$0xff]   ;;  %v489_v4 = vld [vmem:[%s657_s1 + $0x48] sm:$0xff]   ;;  %v493_v8 = vld [vmem:[%s657_s1 + $0x50] sm:$0xff]  }
   0x2   :  { %v486_v1 = vld [vmem:[%s657_s1 + $0xc0] sm:$0xff]   ;;  %441 = vmatprep.subr.bf16.mxu0 %v485_v0  ;;  %v490_v5 = vld [vmem:[%s657_s1 + $0xc8] sm:$0xff]   ;;  %v494_v9 = vld [vmem:[%s657_s1 + $0xd0] sm:$0xff]  }
   0x3   :  { %v487_v2 = vld [vmem:[%s657_s1] sm:$0xff]   ;;  %463 = vmatprep.subr.bf16.mxu1 %v486_v1  ;;  %v491_v6 = vld [vmem:[%s657_s1 + $0x8] sm:$0xff]   ;;  %v495_v10 = vld [vmem:[%s657_s1 + $0x10] sm:$0xff]  }
   0x4   :  { %v488_v3 = vld [vmem:[%s657_s1 + $0x80] sm:$0xff]   ;;  %442 = vmatpush3.bf16.msra.mxu0 %v487_v2  ;;  %v492_v7 = vld [vmem:[%s657_s1 + $0x88] sm:$0xff]   ;;  %v496_v11 = vld [vmem:[%s657_s1 + $0x90] sm:$0xff]  }
   0x5   :  { %464 = vmatpush3.bf16.msra.mxu1 %v488_v3  ;;  %443 = vmatprep.subr.bf16.mxu0 %v489_v4  ;;  %v497_v12 = vld [vmem:[%s657_s1 + $0x58] sm:$0xff]   ;;  %v501_v16 = vld [vmem:[%s657_s1 + $0x60] sm:$0xff]   ;;  %v505_v20 = vld [vmem:[%s657_s1 + $0x68] sm:$0xff]  }
   0x6   :  { %465 = vmatprep.subr.bf16.mxu1 %v490_v5  ;;  %v498_v13 = vld [vmem:[%s657_s1 + $0xd8] sm:$0xff]   ;;  %v502_v17 = vld [vmem:[%s657_s1 + $0xe0] sm:$0xff]   ;;  %v506_v21 = vld [vmem:[%s657_s1 + $0xe8] sm:$0xff]  }
   0x7   :  { %v499_v14 = vld [vmem:[%s657_s1 + $0x18] sm:$0xff]   ;;  %v503_v18 = vld [vmem:[%s657_s1 + $0x20] sm:$0xff]   ;;  %v507_v22 = vld [vmem:[%s657_s1 + $0x28] sm:$0xff]  }
   0x8   :  { %444 = vmatpush3.bf16.msra.mxu0 %v491_v6  ;;  %v500_v15 = vld [vmem:[%s657_s1 + $0x98] sm:$0xff]   ;;  %v504_v19 = vld [vmem:[%s657_s1 + $0xa0] sm:$0xff]   ;;  %v508_v23 = vld [vmem:[%s657_s1 + $0xa8] sm:$0xff]  }
   0x9   :  { %466 = vmatpush3.bf16.msra.mxu1 %v492_v7  ;;  %445 = vmatprep.subr.bf16.mxu0 %v493_v8  ;;  %v509_v24 = vld [vmem:[%s657_s1 + $0x70] sm:$0xff]   ;;  %v513_v28 = vld [vmem:[%s657_s1 + $0x78] sm:$0xff]   ;;  %v24_v32 = vld [vmem:[%s658_s0] sm:$0xff] }
   0xa   :  { %467 = vmatprep.subr.bf16.mxu1 %v494_v9  ;;  %v510_v25 = vld [vmem:[%s657_s1 + $0xf0] sm:$0xff]   ;;  %v514_v29 = vld [vmem:[%s657_s1 + $0xf8] sm:$0xff]   ;;  %v25_v33 = vld [vmem:[%s658_s0 + $0x8] sm:$0xff]  ;;  %v403_v34 = vcombine.low %v24_v32, %v24_v32  ;;  %v404_v35 = vcombine.high %v24_v32, %v24_v32 }
   0xb   :  { %v511_v26 = vld [vmem:[%s657_s1 + $0x30] sm:$0xff]   ;;  %v515_v30 = vld [vmem:[%s657_s1 + $0x38] sm:$0xff]   ;;  %v405_v36 = vcombine.low %v25_v33, %v25_v33  ;;  %v406_v37 = vcombine.high %v25_v33, %v25_v33  ;;  %v439_v46 = vld [vmem:[%s659_s2] ss:$0 sm:$0xff] }
   0xc   :  { %446 = vmatpush3.bf16.msra.mxu0 %v495_v10  ;;  %v512_v27 = vld [vmem:[%s657_s1 + $0xb0] sm:$0xff]   ;;  %v516_v31 = vld [vmem:[%s657_s1 + $0xb8] sm:$0xff]   ;;  %328 = vmatprep.mubr.bf16.mxu0 %v404_v35  ;;  %v440_v50 = vld [vmem:[%s660_s3] ss:$0 sm:$0xff] }
   0xd   :  { %468 = vmatpush3.bf16.msra.mxu1 %v496_v11  ;;  %447 = vmatprep.subr.bf16.mxu0 %v497_v12 }
   0xe   :  { %469 = vmatprep.subr.bf16.mxu1 %v498_v13  ;;  %368 = vmatprep.mubr.bf16.mxu1 %v406_v37 }
  0x10   :  { %448 = vmatpush3.bf16.msra.mxu0 %v499_v14 }
  0x11   :  { %470 = vmatpush3.bf16.msra.mxu1 %v500_v15  ;;  %449 = vmatprep.subr.bf16.mxu0 %v501_v16 }
  0x12   :  { %471 = vmatprep.subr.bf16.mxu1 %v502_v17 }
  0x14   :  { %450 = vmatpush3.bf16.msra.mxu0 %v503_v18 }
  0x15   :  { %472 = vmatpush3.bf16.msra.mxu1 %v504_v19  ;;  %451 = vmatprep.subr.bf16.mxu0 %v505_v20 }
  0x16   :  { %473 = vmatprep.subr.bf16.mxu1 %v506_v21 }
  0x18   :  { %452 = vmatpush3.bf16.msra.mxu0 %v507_v22 }
  0x19   :  { %474 = vmatpush3.bf16.msra.mxu1 %v508_v23  ;;  %453 = vmatprep.subr.bf16.mxu0 %v509_v24 }
  0x1a   :  { %475 = vmatprep.subr.bf16.mxu1 %v510_v25 }
  0x1c   :  { %454 = vmatpush3.bf16.msra.mxu0 %v511_v26 }
  0x1d   :  { %476 = vmatpush3.bf16.msra.mxu1 %v512_v27  ;;  %455 = vmatprep.subr.bf16.mxu0 %v513_v28 }
  0x1e   :  { %477 = vmatprep.subr.bf16.mxu1 %v514_v29 }
  0x20   :  { %456 = vmatpush3.bf16.msra.mxu0 %v515_v30 }
  0x21   :  { %478 = vmatpush3.bf16.msra.mxu1 %v516_v31 }
  0x23   :  { %329 = vmatmul.mubr.bf16.vlgmr.msra.gmra.mrb[0].mxu0 %v403_v34 }
  0x24   :  { %369 = vmatmul.mubr.bf16.vlgmr.msra.gmra.mrb[0].mxu1 %v405_v36 }
  0xf6   :  { %v457_v38 = vpop.f32.mrb[0].mxu0 }
  0xf7   :  { %v479_v39 = vpop.f32.mrb[0].mxu1  ;;  %v458_v40 = vpop.f32.mrb[1].mxu0 }
  0xf8   :  { %v480_v41 = vpop.f32.mrb[1].mxu1  ;;  %v459_v42 = vadd.f32 %v458_v40, %v457_v38  ;;  %v460_v44 = vpop.f32.mrb[2].mxu0 }
  0xf9   :  { %v481_v43 = vadd.f32 %v480_v41, %v479_v39  ;;  %v482_v45 = vpop.f32.mrb[2].mxu1  ;;  %v461_v47 = vpop.f32.mrb[3].mxu0 }
  0xfa   :  { %v483_v48 = vpop.f32.mrb[3].mxu1 }
  0xfb   :  { %v371_v49 = vadd.f32 %v481_v43, %v459_v42 }
  0xfd   :  { %v389_v51 = vmul.f32 %v439_v46, %v371_v49 }
  0xff   :  { %v397_v52 = vadd.f32 %v440_v50, %v389_v51 }
 0x101   :  { %398 = vst [vmem:[%s661_s4] sm:$0xff] %v397_v52 }

// kernel: resnet_forward.61
= control target key start
LH: loop header
LB: loop body
LE: loop exit
PB: predicated region body
PF: predicated region fallthrough
CT: control target
= control target key end

     0   :  { %s928_s0 = inlined_call_operand.vmem [shape: bf16[224,128], index: 0, kind: input, shape index: {}]   ;;  %s929_s1 = inlined_call_operand.vmem [shape: bf16[128,128], index: 1, kind: input, shape index: {}]   ;;  %s930_s2 = inlined_call_operand.vmem [shape: f32[1,128], index: 2, kind: input, shape index: {}]   ;;  %s931_s3 = inlined_call_operand.vmem [shape: f32[1,128], index: 3, kind: input, shape index: {}]   ;;  %s932_s4 = inlined_call_operand.hbm [shape: f32[224,128], index: 4, kind: output, shape index: {}]  }
   0x1   :  { %v710_v0 = vld [vmem:[%s929_s1] sm:$0xff]   ;;  %v711_v1 = vld [vmem:[%s929_s1 + $0x8] sm:$0xff]   ;;  %v712_v2 = vld [vmem:[%s929_s1 + $0x10] sm:$0xff]  }
   0x2   :  { %647 = vmatprep.subr.bf16.mxu0 %v710_v0  ;;  %691 = vmatprep.subr.bf16.mxu1 %v710_v0  ;;  %v713_v3 = vld [vmem:[%s929_s1 + $0x18] sm:$0xff]   ;;  %v718_v4 = vld [vmem:[%s928_s0] sm:$0xff]   ;;  %v715_v7 = vld [vmem:[%s929_s1 + $0x28] sm:$0xff]  }
   0x3   :  { %648 = vmatpush3.bf16.msra.mxu0 %v710_v0  ;;  %699 = vmatpush3.bf16.msra.mxu1 %v710_v0  ;;  %v720_v5 = vld [vmem:[%s928_s0 + $0x40] sm:$0xff]   ;;  %v716_v8 = vld [vmem:[%s929_s1 + $0x30] sm:$0xff]  }
   0x4   :  { %649 = vmatprep.subr.bf16.mxu0 %v711_v1  ;;  %692 = vmatprep.subr.bf16.mxu1 %v711_v1  ;;  %v714_v6 = vld [vmem:[%s929_s1 + $0x20] sm:$0xff]  }
   0x5   :  { %663 = vmatprep.mubr.bf16.mxu0 %v718_v4  ;;  %679 = vmatprep.mubr.bf16.mxu1 %v720_v5 }
   0x7   :  { %650 = vmatpush3.bf16.msra.mxu0 %v711_v1  ;;  %700 = vmatpush3.bf16.msra.mxu1 %v711_v1 }
   0x8   :  { %651 = vmatprep.subr.bf16.mxu0 %v712_v2  ;;  %693 = vmatprep.subr.bf16.mxu1 %v712_v2 }
   0xb   :  { %652 = vmatpush3.bf16.msra.mxu0 %v712_v2  ;;  %701 = vmatpush3.bf16.msra.mxu1 %v712_v2 }
   0xc   :  { %653 = vmatprep.subr.bf16.mxu0 %v713_v3  ;;  %694 = vmatprep.subr.bf16.mxu1 %v713_v3 }
   0xf   :  { %654 = vmatpush3.bf16.msra.mxu0 %v713_v3  ;;  %702 = vmatpush3.bf16.msra.mxu1 %v713_v3 }
  0x10   :  { %655 = vmatprep.subr.bf16.mxu0 %v714_v6  ;;  %695 = vmatprep.subr.bf16.mxu1 %v714_v6 }
  0x13   :  { %656 = vmatpush3.bf16.msra.mxu0 %v714_v6  ;;  %703 = vmatpush3.bf16.msra.mxu1 %v714_v6 }
  0x14   :  { %657 = vmatprep.subr.bf16.mxu0 %v715_v7  ;;  %696 = vmatprep.subr.bf16.mxu1 %v715_v7 }
  0x15   :  { %9 = vsyncpa [#allocation4], 0  ;;  %v717_v9 = vld [vmem:[%s929_s1 + $0x38] sm:$0xff]   ;;  %v719_v10 = vld [vmem:[%s928_s0 + $0x8] sm:$0xff]  }
  0x16   :  { %v721_v11 = vld [vmem:[%s928_s0 + $0x48] sm:$0xff]   ;;  %v722_v12 = vld [vmem:[%s928_s0 + $0x10] sm:$0xff]   ;;  %v723_v14 = vld [vmem:[%s928_s0 + $0x18] sm:$0xff]  }
  0x17   :  { %658 = vmatpush3.bf16.msra.mxu0 %v715_v7  ;;  %704 = vmatpush3.bf16.msra.mxu1 %v715_v7  ;;  %v724_v13 = vld [vmem:[%s928_s0 + $0x50] sm:$0xff]   ;;  %v725_v15 = vld [vmem:[%s928_s0 + $0x58] sm:$0xff]   ;;  %v726_v16 = vld [vmem:[%s928_s0 + $0x20] sm:$0xff]  }
  0x18   :  { %659 = vmatprep.subr.bf16.mxu0 %v716_v8  ;;  %697 = vmatprep.subr.bf16.mxu1 %v716_v8  ;;  %v728_v17 = vld [vmem:[%s928_s0 + $0x60] sm:$0xff]   ;;  %v727_v18 = vld [vmem:[%s928_s0 + $0x28] sm:$0xff]   ;;  %v730_v20 = vld [vmem:[%s928_s0 + $0x30] sm:$0xff]  }
  0x19   :  { %v729_v19 = vld [vmem:[%s928_s0 + $0x68] sm:$0xff]   ;;  %v731_v21 = vld [vmem:[%s928_s0 + $0x38] sm:$0xff]   ;;  %v853_v22 = vld [vmem:[%s930_s2] ss:$0 sm:$0xff]  ;;  %s756_s0 = smov [#allocation3]  }
  0x1a   :  { %v858_v24 = vld [vmem:[%s931_s3] ss:$0 sm:$0xff]  ;;  %s590_s2 = sshll.u32 %s756_s0, 4  ;;  %s591_s2 = int_to_ptr.vmem [resolvable:$true] %s590_s2 }
  0x1b   :  { %660 = vmatpush3.bf16.msra.mxu0 %v716_v8  ;;  %705 = vmatpush3.bf16.msra.mxu1 %v716_v8  ;;  %s732_s3 = scalar_lea.vmem %s591_s2, 3584  ;;  %p737_p1 = scmp.lt.s32.totalorder %s591_s2, %s591_s2 }
  0x1c   :  { %661 = vmatprep.subr.bf16.mxu0 %v717_v9  ;;  %698 = vmatprep.subr.bf16.mxu1 %v717_v9  ;;  %p733_p0 = scmp.ne.s32.totalorder %s591_s2, %s732_s3  ;;  %p738_p2 = scmp.lt.s32.totalorder %s732_s3, %s732_s3 }
  0x1e   :  { %p739_p3 = por %p738_p2, %p737_p1 }
  0x1f   :  { %662 = vmatpush3.bf16.msra.mxu0 %v717_v9  ;;  %706 = vmatpush3.bf16.msra.mxu1 %v717_v9 }
  0x20   :  { %p740_p4 = pnand %p739_p3, %p733_p0 }
  0x22   :  { %664 = vmatmul.mubr.bf16.vlgmr.msra.gmra.mrb[0].mxu0 %v719_v10  ;;  %680 = vmatmul.mubr.bf16.vlgmr.msra.gmra.mrb[0].mxu1 %v721_v11 }
  0x23   :  { %667 = vmatprep.mubr.bf16.mxu0 %v722_v12  ;;  %683 = vmatprep.mubr.bf16.mxu1 %v724_v13 }
  0x2a   :  { %668 = vmatmul.mubr.bf16.gmra.mrb[4].mxu0 %v723_v14  ;;  %684 = vmatmul.mubr.bf16.gmra.mrb[4].mxu1 %v725_v15 }
  0x2b   :  { %671 = vmatprep.mubr.bf16.mxu0 %v726_v16  ;;  %687 = vmatprep.mubr.bf16.mxu1 %v728_v17 }
  0x32   :  { %672 = vmatmul.mubr.bf16.gmra.mrb[8].mxu0 %v727_v18  ;;  %688 = vmatmul.mubr.bf16.gmra.mrb[8].mxu1 %v729_v19 }
  0x33   :  { %675 = vmatprep.mubr.bf16.mxu0 %v730_v20 }
  0x3a   :  { %676 = vmatmul.mubr.bf16.gmra.mrb[12].mxu0 %v731_v21 }
  0xf5   :  { %v665_v23 = vpop.f32.mrb[0].mxu0  ;;  %v681_v25 = vpop.f32.mrb[0].mxu1 }
  0xf6   :  { %v496_v26 = vmul.f32 %v665_v23, %v853_v22  ;;  %v289_v27 = vpop.f32.mrb[1].mxu0  ;;  %v512_v28 = vmul.f32 %v681_v25, %v853_v22  ;;  %v353_v29 = vpop.f32.mrb[1].mxu1 }
  0xf7   :  { %v494_v30 = vmul.f32 %v853_v22, %v289_v27  ;;  %v666_v31 = vpop.f32.mrb[2].mxu0  ;;  %v510_v32 = vmul.f32 %v853_v22, %v353_v29  ;;  %v682_v33 = vpop.f32.mrb[2].mxu1 }
  0xf8   :  { %v531_v34 = vadd.f32 %v858_v24, %v496_v26  ;;  %v497_v35 = vmul.f32 %v666_v31, %v853_v22  ;;  %v292_v36 = vpop.f32.mrb[3].mxu0  ;;  %v547_v37 = vadd.f32 %v858_v24, %v512_v28  ;;  %v513_v38 = vmul.f32 %v682_v33, %v853_v22  ;;  %v356_v39 = vpop.f32.mrb[3].mxu1 }
  0xf9   :  { %v529_v40 = vadd.f32 %v858_v24, %v494_v30  ;;  %v495_v41 = vmul.f32 %v853_v22, %v292_v36  ;;  %v545_v42 = vadd.f32 %v858_v24, %v510_v32  ;;  %v511_v43 = vmul.f32 %v853_v22, %v356_v39 }
  0xfa   :  { %559 = vst [vmem:[#allocation3 + $0x10] sm:$0xff] %v531_v34  ;;  %v532_v44 = vadd.f32 %v858_v24, %v497_v35  ;;  %575 = vst [vmem:[#allocation3 + $0x90] sm:$0xff] %v547_v37  ;;  %v548_v45 = vadd.f32 %v858_v24, %v513_v38 }
  0xfb   :  { %557 = vst [vmem:[#allocation3] sm:$0xff] %v529_v40  ;;  %v530_v46 = vadd.f32 %v858_v24, %v495_v41  ;;  %573 = vst [vmem:[#allocation3 + $0x80] sm:$0xff] %v545_v42  ;;  %v546_v47 = vadd.f32 %v858_v24, %v511_v43 }
  0xfc   :  { %560 = vst [vmem:[#allocation3 + $0x18] sm:$0xff] %v532_v44  ;;  %576 = vst [vmem:[#allocation3 + $0x98] sm:$0xff] %v548_v45 }
  0xfd   :  { %558 = vst [vmem:[#allocation3 + $0x8] sm:$0xff] %v530_v46  ;;  %v669_v48 = vpop.f32.mrb[4].mxu0  ;;  %574 = vst [vmem:[#allocation3 + $0x88] sm:$0xff] %v546_v47  ;;  %v685_v49 = vpop.f32.mrb[4].mxu1 }
  0xfe   :  { %v500_v50 = vmul.f32 %v669_v48, %v853_v22  ;;  %v305_v51 = vpop.f32.mrb[5].mxu0  ;;  %v516_v52 = vmul.f32 %v685_v49, %v853_v22  ;;  %v369_v53 = vpop.f32.mrb[5].mxu1 }
  0xff   :  { %v498_v54 = vmul.f32 %v853_v22, %v305_v51  ;;  %v670_v55 = vpop.f32.mrb[6].mxu0  ;;  %v514_v56 = vmul.f32 %v853_v22, %v369_v53  ;;  %v686_v57 = vpop.f32.mrb[6].mxu1 }
 0x100   :  { %v535_v58 = vadd.f32 %v858_v24, %v500_v50  ;;  %v501_v59 = vmul.f32 %v670_v55, %v853_v22  ;;  %v308_v60 = vpop.f32.mrb[7].mxu0  ;;  %v551_v61 = vadd.f32 %v858_v24, %v516_v52  ;;  %v517_v62 = vmul.f32 %v686_v57, %v853_v22  ;;  %v372_v63 = vpop.f32.mrb[7].mxu1 }
 0x101   :  { %v533_v0 = vadd.f32 %v858_v24, %v498_v54  ;;  %v499_v1 = vmul.f32 %v853_v22, %v308_v60  ;;  %v549_v2 = vadd.f32 %v858_v24, %v514_v56  ;;  %v515_v3 = vmul.f32 %v853_v22, %v372_v63 }
 0x102   :  { %563 = vst [vmem:[#allocation3 + $0x30] sm:$0xff] %v535_v58  ;;  %v536_v4 = vadd.f32 %v858_v24, %v501_v59  ;;  %579 = vst [vmem:[#allocation3 + $0xb0] sm:$0xff] %v551_v61  ;;  %v552_v5 = vadd.f32 %v858_v24, %v517_v62 }
 0x103   :  { %561 = vst [vmem:[#allocation3 + $0x20] sm:$0xff] %v533_v0  ;;  %v534_v6 = vadd.f32 %v858_v24, %v499_v1  ;;  %577 = vst [vmem:[#allocation3 + $0xa0] sm:$0xff] %v549_v2  ;;  %v550_v7 = vadd.f32 %v858_v24, %v515_v3 }
 0x104   :  { %564 = vst [vmem:[#allocation3 + $0x38] sm:$0xff] %v536_v4  ;;  %580 = vst [vmem:[#allocation3 + $0xb8] sm:$0xff] %v552_v5 }
 0x105   :  { %562 = vst [vmem:[#allocation3 + $0x28] sm:$0xff] %v534_v6  ;;  %v673_v8 = vpop.f32.mrb[8].mxu0  ;;  %578 = vst [vmem:[#allocation3 + $0xa8] sm:$0xff] %v550_v7  ;;  %v689_v9 = vpop.f32.mrb[8].mxu1 }
 0x106   :  { %v504_v10 = vmul.f32 %v673_v8, %v853_v22  ;;  %v321_v11 = vpop.f32.mrb[9].mxu0  ;;  %v520_v12 = vmul.f32 %v689_v9, %v853_v22  ;;  %v385_v13 = vpop.f32.mrb[9].mxu1 }
 0x107   :  { %v502_v14 = vmul.f32 %v853_v22, %v321_v11  ;;  %v674_v15 = vpop.f32.mrb[10].mxu0  ;;  %v518_v16 = vmul.f32 %v853_v22, %v385_v13  ;;  %v690_v17 = vpop.f32.mrb[10].mxu1 }
 0x108   :  { %v539_v18 = vadd.f32 %v858_v24, %v504_v10  ;;  %v505_v19 = vmul.f32 %v674_v15, %v853_v22  ;;  %v324_v20 = vpop.f32.mrb[11].mxu0  ;;  %v555_v21 = vadd.f32 %v858_v24, %v520_v12  ;;  %v521_v23 = vmul.f32 %v690_v17, %v853_v22  ;;  %v388_v25 = vpop.f32.mrb[11].mxu1 }
 0x109   :  { %v537_v26 = vadd.f32 %v858_v24, %v502_v14  ;;  %v503_v27 = vmul.f32 %v853_v22, %v324_v20  ;;  %v553_v28 = vadd.f32 %v858_v24, %v518_v16  ;;  %v519_v29 = vmul.f32 %v853_v22, %v388_v25 }
 0x10a   :  { %567 = vst [vmem:[#allocation3 + $0x50] sm:$0xff] %v539_v18  ;;  %v540_v30 = vadd.f32 %v858_v24, %v505_v19  ;;  %583 = vst [vmem:[#allocation3 + $0xd0] sm:$0xff] %v555_v21  ;;  %v556_v31 = vadd.f32 %v858_v24, %v521_v23 }
 0x10b   :  { %565 = vst [vmem:[#allocation3 + $0x40] sm:$0xff] %v537_v26  ;;  %v538_v32 = vadd.f32 %v858_v24, %v503_v27  ;;  %581 = vst [vmem:[#allocation3 + $0xc0] sm:$0xff] %v553_v28  ;;  %v554_v33 = vadd.f32 %v858_v24, %v519_v29 }
 0x10c   :  { %568 = vst [vmem:[#allocation3 + $0x58] sm:$0xff] %v540_v30  ;;  %584 = vst [vmem:[#allocation3 + $0xd8] sm:$0xff] %v556_v31 }
 0x10d   :  { %566 = vst [vmem:[#allocation3 + $0x48] sm:$0xff] %v538_v32  ;;  %v677_v34 = vpop.f32.mrb[12].mxu0  ;;  %582 = vst [vmem:[#allocation3 + $0xc8] sm:$0xff] %v554_v33 }
 0x10e   :  { %v508_v35 = vmul.f32 %v677_v34, %v853_v22  ;;  %v337_v36 = vpop.f32.mrb[13].mxu0 }
 0x10f   :  { %v506_v37 = vmul.f32 %v853_v22, %v337_v36  ;;  %v678_v38 = vpop.f32.mrb[14].mxu0 }
 0x110   :  { %v543_v39 = vadd.f32 %v858_v24, %v508_v35  ;;  %v509_v40 = vmul.f32 %v678_v38, %v853_v22  ;;  %v340_v41 = vpop.f32.mrb[15].mxu0 }
 0x111   :  { %v541_v42 = vadd.f32 %v858_v24, %v506_v37  ;;  %v507_v43 = vmul.f32 %v853_v22, %v340_v41 }
 0x112   :  { %571 = vst [vmem:[#allocation3 + $0x70] sm:$0xff] %v543_v39  ;;  %v544_v44 = vadd.f32 %v858_v24, %v509_v40 }
 0x113   :  { %569 = vst [vmem:[#allocation3 + $0x60] sm:$0xff] %v541_v42  ;;  %v542_v45 = vadd.f32 %v858_v24, %v507_v43 }
 0x114   :  { %572 = vst [vmem:[#allocation3 + $0x78] sm:$0xff] %v544_v44 }
 0x115   :  { %570 = vst [vmem:[#allocation3 + $0x68] sm:$0xff] %v542_v45 }
 0x116   :  { %743 = shalt.err (!%p740_p4)
}
 0x117   :  { %s744_s12 = scalar_lea.hbm %s932_s4, 3584 }
 0x118   :  { %p745_p5 = scmp.ne.s32.totalorder %s932_s4, %s744_s12  ;;  %p748_p6 = scmp.lt.u32.totalorder %s744_s12, %s932_s4 }
 0x11a   :  { %p750_p7 = pnand %p748_p6, %p745_p5 }
 0x11c   :  { %753 = shalt.err (!%p750_p7)
}
 0x11d   :  { %s757_s16 = smov 128   ;;  %s758_s17 = smov 8  }
 0x11e   :  { %596 = dma.vmem_to_hbm [thread:$0]  %s591_s2, 3584, %s932_s4, [#allocation4], %s757_s16, %s757_s16, %s758_s17  }
 0x11f   :  { %754 = dma.done.wait [#allocation4], 3584  }
 0x120   :  { %755 = vsyncadd [#allocation4], 4294963712 }
 0x121   :  { %600 = vsyncpa [#allocation4], 1 }

</bundles_post_ra>
